<compile_context>
chip_gen: v7x
topology: tpu7x:2x2x1
jax: 0.10.0
libtpu: 0.0.40
codegen_flags: <defaults>
</compile_context>

<pallas_src>
import functools

import numpy as np

import jax
import jax.numpy as jnp
from jax.experimental import pallas as pl
from jax.experimental.pallas import tpu as pltpu

_CONV_STRIDES = (2, 1, 2, 1, 2)
_CONV_CHANNELS = ((1, 32), (32, 32), (32, 64), (64, 64), (64, 64))
_IMG = 28                      # Linear(2*16*32, z_dim) pins the input to 28x28
_S14, _S14P = 196, 200         # 14x14 grid (conv1/conv2 input), rows padded to 8-mult
_S7, _S7P = 49, 56             # 7x7 grid (conv3/conv4 input)
_S4 = 16                       # 4x4 grid (final feature map), already aligned
_PAD = 16                      # sublane zero-extension for shifted-tap slices


def _pick_tb(batch):
    for tb in (8, 4, 2):
        if batch % tb == 0:
            return tb
    return 1


# ----------------------------------------------------------------------------
# The fused kernel: conv0..conv4 (+ReLU) + Flatten + Linear for TB images.
# ----------------------------------------------------------------------------
def _encoder_kernel(cols0_ref, w0_ref, b0_ref,
                    m14_ref, w1_ref, b1_ref,
                    w2_ref, b2_ref, s2_ref,
                    m7_ref, w3_ref, b3_ref,
                    w4_ref, b4_ref, s4_ref,
                    u2_ref, mfc_ref, rsum_ref, bfc_ref,
                    out_ref, *, tb):
    f32, bf16 = jnp.float32, jnp.bfloat16

    def tap_patches(y, mask, width):
        # y: [N, C] f32 feature map, row r = b*S_pad + h*width + w.
        # Returns [N, 9*C] bf16 im2col patches (tap-major, channel-minor):
        # 9 shifted sublane slices of a zero-extended copy, then one lane-dense
        # 0/1 edge mask multiply (handles padding=1 and image boundaries).
        n, c = y.shape
        zpad = jnp.zeros((_PAD, c), f32)
        y_ext = jnp.concatenate([zpad, y, zpad], axis=0)
        pieces = []
        for t in range(9):
            dh, dw = t // 3 - 1, t % 3 - 1
            off = _PAD + dh * width + dw
            pieces.append(y_ext[off:off + n, :].astype(bf16))
        return jnp.concatenate(pieces, axis=1) * mask

    def subsample(p, s_ref, s_in_pad):
        # Stride-2 spatial subsample of the patch matrix (per image, one
        # tap-independent 0/1 matmul each; aligned static slices).
        pieces = []
        for b in range(tb):
            blk = p[b * s_in_pad:(b + 1) * s_in_pad, :]
            pieces.append(
                jnp.dot(s_ref[...], blk, preferred_element_type=f32).astype(bf16))
        return jnp.concatenate(pieces, axis=0)

    # ---- conv0 (1 -> 32, stride 2): wrapper-built im2col, one K=9 matmul ----
    y = jnp.dot(cols0_ref[0], w0_ref[...], preferred_element_type=f32)
    y = jnp.maximum(y + b0_ref[...], 0.0)                       # [tb*200, 32]

    # ---- conv1 (32 -> 32, stride 1 @ 14x14) ---------------------------------
    p = tap_patches(y, m14_ref[...], 14)                        # [tb*200, 288]
    y = jnp.maximum(jnp.dot(p, w1_ref[...], preferred_element_type=f32)
                    + b1_ref[...], 0.0)                         # [tb*200, 32]

    # ---- conv2 (32 -> 64, stride 2, 14 -> 7) --------------------------------
    p = tap_patches(y, m14_ref[...], 14)                        # [tb*200, 288]
    p = subsample(p, s2_ref, _S14P)                             # [tb*56, 288]
    y = jnp.maximum(jnp.dot(p, w2_ref[...], preferred_element_type=f32)
                    + b2_ref[...], 0.0)                         # [tb*56, 64]

    # ---- conv3 (64 -> 64, stride 1 @ 7x7) -----------------------------------
    p = tap_patches(y, m7_ref[...], 7)                          # [tb*56, 576]
    y = jnp.maximum(jnp.dot(p, w3_ref[...], preferred_element_type=f32)
                    + b3_ref[...], 0.0)                         # [tb*56, 64]

    # ---- conv4 (64 -> 64, stride 2, 7 -> 4) ---------------------------------
    p = tap_patches(y, m7_ref[...], 7)                          # [tb*56, 576]
    p = subsample(p, s4_ref, _S7P)                              # [tb*16, 576]
    y = jnp.maximum(jnp.dot(p, w4_ref[...], preferred_element_type=f32)
                    + b4_ref[...], 0.0)                         # [tb*16, 64]

    # ---- Flatten (NCHW fold) + Linear: one K=1024 matmul --------------------
    yb = y.astype(bf16)
    x = jnp.concatenate([yb] * _S4, axis=1) * mfc_ref[...]      # [tb*16, 1024]
    zr = jnp.dot(x, u2_ref[...], preferred_element_type=f32)    # [tb*16, z_pad]
    z = jnp.dot(rsum_ref[...], zr, preferred_element_type=f32)  # [tb, z_pad]
    out_ref[0] = z + bfc_ref[...]


# ----------------------------------------------------------------------------
# One-time parameter preparation (all weight relayouts, bf16 casts).
# ----------------------------------------------------------------------------
def _subsample_matrix(hw_in, s_in_pad, hw_out, s_out_pad):
    m = np.zeros((s_out_pad, s_in_pad), np.float32)
    for ho in range(hw_out):
        for wo in range(hw_out):
            m[ho * hw_out + wo, (2 * ho) * hw_in + 2 * wo] = 1.0
    return m


def prepare_params(params):
    """Fold tap stacking, flatten permutation, stride-2 subsample matrices and
    z_dim padding once; store matmul operands as bf16, biases as f32."""
    bf = jnp.bfloat16
    p = {}

    w0 = np.asarray(params["conv0_w"], np.float32)              # [32, 1, 3, 3]
    p["w0"] = jnp.asarray(w0[:, 0].reshape(32, 9).T.copy()).astype(bf)
    p["b0"] = jnp.asarray(np.asarray(params["conv0_b"], np.float32).reshape(1, -1))

    for i in range(1, 5):
        w = np.asarray(params[f"conv{i}_w"], np.float32)        # [co, ci, 3, 3]
        co, ci = w.shape[0], w.shape[1]
        taps = np.transpose(w.reshape(co, ci, 9), (2, 1, 0)).reshape(9 * ci, co)
        p[f"w{i}"] = jnp.asarray(np.ascontiguousarray(taps)).astype(bf)
        p[f"b{i}"] = jnp.asarray(
            np.asarray(params[f"conv{i}_b"], np.float32).reshape(1, -1))

    p["s2"] = jnp.asarray(_subsample_matrix(14, _S14P, 7, _S7P)).astype(bf)
    p["s4"] = jnp.asarray(_subsample_matrix(7, _S7P, 4, _S4)).astype(bf)

    # FC: fold the NCHW flatten into the weight; pad z_dim to a lane multiple.
    wfc = np.asarray(params["fc_w"], np.float32)                # [z_dim, 1024]
    z_dim = wfc.shape[0]
    z_pad = ((z_dim + 127) // 128) * 128
    u = np.transpose(wfc.reshape(z_dim, 64, _S4), (2, 1, 0)).reshape(64 * _S4, z_dim)
    u_pad = np.zeros((64 * _S4, z_pad), np.float32)
    u_pad[:, :z_dim] = u
    p["u2"] = jnp.asarray(u_pad).astype(bf)
    bfc = np.zeros((1, z_pad), np.float32)
    bfc[0, :z_dim] = np.asarray(params["fc_b"], np.float32)
    p["b_fc"] = jnp.asarray(bfc)
    return p


# ----------------------------------------------------------------------------
# Wrapper-built (TB-dependent) constants.
# ----------------------------------------------------------------------------
def _tap_mask_wide(hw, s_pad, tb, c):
    """Lane-dense [tb*s_pad, 9*c] 0/1 mask for the 9 shifted-tap patches."""
    base = np.zeros((s_pad, 9 * c), np.float32)
    for t in range(9):
        dh, dw = t // 3 - 1, t % 3 - 1
        for h in range(hw):
            if not 0 <= h + dh < hw:
                continue
            for w in range(hw):
                if 0 <= w + dw < hw:
                    base[h * hw + w, t * c:(t + 1) * c] = 1.0
    return np.tile(base, (tb, 1))


def _fc_mask(tb):
    m = np.zeros((tb * _S4, 64 * _S4), np.float32)
    for r in range(tb * _S4):
        s = r % _S4
        m[r, s * 64:(s + 1) * 64] = 1.0
    return m


def _rsum_matrix(tb):
    m = np.zeros((tb, tb * _S4), np.float32)
    for b in range(tb):
        m[b, b * _S4:(b + 1) * _S4] = 1.0
    return m


def _im2col_first(x_nchw, tb):
    """x: [B,1,28,28] -> conv0 im2col [B//tb, tb*200, 9] bf16 (row-padded)."""
    b = x_nchw.shape[0]
    xp = jnp.pad(x_nchw[:, 0].astype(jnp.float32), ((0, 0), (1, 1), (1, 1)))
    taps = []
    for kh in range(3):
        for kw in range(3):
            taps.append(xp[:, kh:kh + 28:2, kw:kw + 28:2])      # [B, 14, 14]
    cols = jnp.stack(taps, axis=-1).reshape(b, _S14, 9)
    cols = jnp.pad(cols, ((0, 0), (0, _S14P - _S14), (0, 0)))
    return cols.reshape(b // tb, tb * _S14P, 9).astype(jnp.bfloat16)


def _const_map(ndim):
    zeros = (0,) * ndim
    return lambda g: zeros


_CONST_ORDER = ("w0", "b0", "m14", "w1", "b1", "w2", "b2", "s2",
                "m7", "w3", "b3", "w4", "b4", "s4", "u2", "mfc", "rsum", "b_fc")


@functools.partial(jax.jit, static_argnames=("z_dim",))
def conv_encoder_forward(prepped, x_nchw, *, z_dim):
    """x: [B, 1, 28, 28] float32 -> z: [B, z_dim] float32."""
    batch = x_nchw.shape[0]
    tb = _pick_tb(batch)
    g = batch // tb
    z_pad = prepped["b_fc"].shape[-1]

    cols0 = _im2col_first(x_nchw, tb)                           # [g, tb*200, 9]

    consts = dict(prepped)
    consts["m14"] = jnp.asarray(_tap_mask_wide(14, _S14P, tb, 32)).astype(jnp.bfloat16)
    consts["m7"] = jnp.asarray(_tap_mask_wide(7, _S7P, tb, 64)).astype(jnp.bfloat16)
    consts["mfc"] = jnp.asarray(_fc_mask(tb)).astype(jnp.bfloat16)
    consts["rsum"] = jnp.asarray(_rsum_matrix(tb))
    const_vals = [consts[k] for k in _CONST_ORDER]

    in_specs = [pl.BlockSpec((1, tb * _S14P, 9), lambda i: (i, 0, 0))]
    for v in const_vals:
        in_specs.append(pl.BlockSpec(tuple(v.shape), _const_map(v.ndim)))

    # Advisory cost estimate (MXU flops, HBM bytes) for XLA scheduling.
    flops_blk = (2 * tb * _S14P * 9 * 32
                 + 2 * tb * _S14P * 288 * 32
                 + tb * 2 * _S7P * _S14P * 288 + 2 * tb * _S7P * 288 * 64
                 + 2 * tb * _S7P * 576 * 64
                 + tb * 2 * _S4 * _S7P * 576 + 2 * tb * _S4 * 576 * 64
                 + 2 * tb * _S4 * 1024 * z_pad + 2 * tb * tb * _S4 * z_pad)
    bytes_accessed = int(cols0.size * cols0.dtype.itemsize
                         + sum(int(v.size) * v.dtype.itemsize for v in const_vals)
                         + g * tb * z_pad * 4)

    out = pl.pallas_call(
        functools.partial(_encoder_kernel, tb=tb),
        out_shape=jax.ShapeDtypeStruct((g, tb, z_pad), jnp.float32),
        grid=(g,),
        in_specs=in_specs,
        out_specs=pl.BlockSpec((1, tb, z_pad), lambda i: (i, 0, 0)),
        compiler_params=pltpu.CompilerParams(
            dimension_semantics=("parallel",),
            vmem_limit_bytes=32 * 1024 * 1024),
        cost_estimate=pl.CostEstimate(flops=int(g * flops_blk), transcendentals=0,
                                      bytes_accessed=bytes_accessed),
    )(cols0, *const_vals)
    return out.reshape(batch, z_pad)[:, :z_dim]


# ----------------------------------------------------------------------------
# Deterministic PyTorch-style parameter init.
# ----------------------------------------------------------------------------
def init_params(key, z_dim):
    params = {}
    for i, (c_in, c_out) in enumerate(_CONV_CHANNELS):
        key, kw_, kb_ = jax.random.split(key, 3)
        bound = 1.0 / np.sqrt(c_in * 9)
        params[f"conv{i}_w"] = jax.random.uniform(
            kw_, (c_out, c_in, 3, 3), jnp.float32, -bound, bound)
        params[f"conv{i}_b"] = jax.random.uniform(
            kb_, (c_out,), jnp.float32, -bound, bound)
    key, kw_, kb_ = jax.random.split(key, 3)
    fan_in = 2 * 16 * 32  # 1024 = 64 * 4 * 4
    bound = 1.0 / np.sqrt(fan_in)
    params["fc_w"] = jax.random.uniform(kw_, (z_dim, fan_in), jnp.float32, -bound, bound)
    params["fc_b"] = jax.random.uniform(kb_, (z_dim,), jnp.float32, -bound, bound)
    return params


# ----------------------------------------------------------------------------
# Pure-JAX reference (lax.conv) for a correctness sanity check.
# ----------------------------------------------------------------------------
@jax.jit
def reference_forward(params, x_nchw):
    x = x_nchw
    for i, stride in enumerate(_CONV_STRIDES):
        w, b = params[f"conv{i}_w"], params[f"conv{i}_b"]
        x = jax.lax.conv_general_dilated(
            x, w, (stride, stride), [(1, 1), (1, 1)],
            dimension_numbers=("NCHW", "OIHW", "NCHW"),
            precision=jax.lax.Precision.HIGHEST)
        x = jax.nn.relu(x + b[None, :, None, None])
    feat = x.reshape(x.shape[0], -1)   # torch.nn.Flatten on NCHW
    return jnp.dot(feat, params["fc_w"].T,
                   precision=jax.lax.Precision.HIGHEST) + params["fc_b"]


if __name__ == "__main__":
    z_dim = 20
    key = jax.random.PRNGKey(0)
    key_p, key_x = jax.random.split(key)
    params = init_params(key_p, z_dim)
    prepped = prepare_params(params)

    # The Linear(2*16*32, z_dim) pins spatial size to 28x28; batch = 2.
    x = jax.random.normal(key_x, (2, 1, 28, 28), jnp.float32)

    z = jax.block_until_ready(conv_encoder_forward(prepped, x, z_dim=z_dim))
    assert z.shape == (2, z_dim), z.shape
    assert bool(jnp.all(jnp.isfinite(z)))

    z_ref = jax.block_until_ready(reference_forward(params, x))
    # bf16 MXU operands vs f32 HIGHEST reference -> slightly looser tolerance.
    np.testing.assert_allclose(np.asarray(z), np.asarray(z_ref), rtol=3e-2, atol=3e-2)

    print("KERNEL_OK")
</pallas_src>

<mosaic_0001>
module attributes {stable_mosaic.version = 11 : i64} {
  func.func @_encoder_kernel(%arg0: i32, %arg1: memref<1x400x9xbf16, #tpu.memory_space<vmem>>, %arg2: memref<9x32xbf16, #tpu.memory_space<vmem>>, %arg3: memref<1x32xf32, #tpu.memory_space<vmem>>, %arg4: memref<400x288xbf16, #tpu.memory_space<vmem>>, %arg5: memref<288x32xbf16, #tpu.memory_space<vmem>>, %arg6: memref<1x32xf32, #tpu.memory_space<vmem>>, %arg7: memref<288x64xbf16, #tpu.memory_space<vmem>>, %arg8: memref<1x64xf32, #tpu.memory_space<vmem>>, %arg9: memref<56x200xbf16, #tpu.memory_space<vmem>>, %arg10: memref<112x576xbf16, #tpu.memory_space<vmem>>, %arg11: memref<576x64xbf16, #tpu.memory_space<vmem>>, %arg12: memref<1x64xf32, #tpu.memory_space<vmem>>, %arg13: memref<576x64xbf16, #tpu.memory_space<vmem>>, %arg14: memref<1x64xf32, #tpu.memory_space<vmem>>, %arg15: memref<16x56xbf16, #tpu.memory_space<vmem>>, %arg16: memref<1024x128xbf16, #tpu.memory_space<vmem>>, %arg17: memref<32x1024xbf16, #tpu.memory_space<vmem>>, %arg18: memref<2x32xf32, #tpu.memory_space<vmem>>, %arg19: memref<1x128xf32, #tpu.memory_space<vmem>>, %arg20: memref<1x2x128xf32, #tpu.memory_space<vmem>>) attributes {dimension_semantics = [#tpu.dimension_semantics<parallel>], iteration_bounds = array<i64: 1>, scalar_prefetch = 0 : i64, scratch_operands = 0 : i64, tpu.core_type = #tpu.core_type<tc>, window_params = [{transform_indices = @transform_0, window_bounds = array<i64: 1, 400, 9>}, {pipeline_mode = #tpu.pipeline_mode<synchronous>, transform_indices = @transform_1, window_bounds = array<i64: 9, 32>}, {pipeline_mode = #tpu.pipeline_mode<synchronous>, transform_indices = @transform_2, window_bounds = array<i64: 1, 32>}, {pipeline_mode = #tpu.pipeline_mode<synchronous>, transform_indices = @transform_3, window_bounds = array<i64: 400, 288>}, {pipeline_mode = #tpu.pipeline_mode<synchronous>, transform_indices = @transform_4, window_bounds = array<i64: 288, 32>}, {pipeline_mode = #tpu.pipeline_mode<synchronous>, transform_indices = @transform_5, window_bounds = array<i64: 1, 32>}, {pipeline_mode = #tpu.pipeline_mode<synchronous>, transform_indices = @transform_6, window_bounds = array<i64: 288, 64>}, {pipeline_mode = #tpu.pipeline_mode<synchronous>, transform_indices = @transform_7, window_bounds = array<i64: 1, 64>}, {pipeline_mode = #tpu.pipeline_mode<synchronous>, transform_indices = @transform_8, window_bounds = array<i64: 56, 200>}, {pipeline_mode = #tpu.pipeline_mode<synchronous>, transform_indices = @transform_9, window_bounds = array<i64: 112, 576>}, {pipeline_mode = #tpu.pipeline_mode<synchronous>, transform_indices = @transform_10, window_bounds = array<i64: 576, 64>}, {pipeline_mode = #tpu.pipeline_mode<synchronous>, transform_indices = @transform_11, window_bounds = array<i64: 1, 64>}, {pipeline_mode = #tpu.pipeline_mode<synchronous>, transform_indices = @transform_12, window_bounds = array<i64: 576, 64>}, {pipeline_mode = #tpu.pipeline_mode<synchronous>, transform_indices = @transform_13, window_bounds = array<i64: 1, 64>}, {pipeline_mode = #tpu.pipeline_mode<synchronous>, transform_indices = @transform_14, window_bounds = array<i64: 16, 56>}, {pipeline_mode = #tpu.pipeline_mode<synchronous>, transform_indices = @transform_15, window_bounds = array<i64: 1024, 128>}, {pipeline_mode = #tpu.pipeline_mode<synchronous>, transform_indices = @transform_16, window_bounds = array<i64: 32, 1024>}, {pipeline_mode = #tpu.pipeline_mode<synchronous>, transform_indices = @transform_17, window_bounds = array<i64: 2, 32>}, {pipeline_mode = #tpu.pipeline_mode<synchronous>, transform_indices = @transform_18, window_bounds = array<i64: 1, 128>}, {transform_indices = @transform_19, window_bounds = array<i64: 1, 2, 128>}]} {
    %c0 = arith.constant 0 : index
    %c0_0 = arith.constant 0 : index
    %c0_1 = arith.constant 0 : index
    %0 = vector.load %arg1[%c0, %c0_0, %c0_1] : memref<1x400x9xbf16, #tpu.memory_space<vmem>>, vector<1x400x9xbf16>
    %1 = vector.shape_cast %0 : vector<1x400x9xbf16> to vector<400x9xbf16>
    %c0_2 = arith.constant 0 : index
    %c0_3 = arith.constant 0 : index
    %2 = vector.load %arg2[%c0_2, %c0_3] : memref<9x32xbf16, #tpu.memory_space<vmem>>, vector<9x32xbf16>
    %cst = arith.constant dense<0.000000e+00> : vector<400x32xf32>
    %3 = tpu.matmul %1, %2, %cst {dimension_numbers = #tpu.dot_dimension_numbers<[1], [0], [0], [1], [0, 0, 1, 1], [], []>} : vector<400x9xbf16>, vector<9x32xbf16>, vector<400x32xf32> -> vector<400x32xf32>
    %c0_4 = arith.constant 0 : index
    %c0_5 = arith.constant 0 : index
    %4 = vector.load %arg3[%c0_4, %c0_5] : memref<1x32xf32, #tpu.memory_space<vmem>>, vector<1x32xf32>
    %5 = vector.broadcast %4 : vector<1x32xf32> to vector<400x32xf32>
    %6 = arith.addf %3, %5 : vector<400x32xf32>
    %cst_6 = arith.constant 0.000000e+00 : f32
    %7 = vector.broadcast %cst_6 : f32 to vector<400x32xf32>
    %8 = arith.maximumf %6, %7 : vector<400x32xf32>
    %c0_7 = arith.constant 0 : index
    %c0_8 = arith.constant 0 : index
    %9 = vector.load %arg4[%c0_7, %c0_8] : memref<400x288xbf16, #tpu.memory_space<vmem>>, vector<400x288xbf16>
    %cst_9 = arith.constant 0.000000e+00 : f32
    %10 = vector.broadcast %cst_9 : f32 to vector<16x32xf32>
    %11 = tpu.concatenate %10, %8, %10 in 0 : vector<16x32xf32>, vector<400x32xf32>, vector<16x32xf32> -> vector<432x32xf32>
    %12 = vector.extract_strided_slice %11 {offsets = [1, 0], sizes = [400, 32], strides = [1, 1]} : vector<432x32xf32> to vector<400x32xf32>
    %13 = arith.truncf %12 : vector<400x32xf32> to vector<400x32xbf16>
    %14 = vector.extract_strided_slice %11 {offsets = [2, 0], sizes = [400, 32], strides = [1, 1]} : vector<432x32xf32> to vector<400x32xf32>
    %15 = arith.truncf %14 : vector<400x32xf32> to vector<400x32xbf16>
    %16 = vector.extract_strided_slice %11 {offsets = [3, 0], sizes = [400, 32], strides = [1, 1]} : vector<432x32xf32> to vector<400x32xf32>
    %17 = arith.truncf %16 : vector<400x32xf32> to vector<400x32xbf16>
    %18 = vector.extract_strided_slice %11 {offsets = [15, 0], sizes = [400, 32], strides = [1, 1]} : vector<432x32xf32> to vector<400x32xf32>
    %19 = arith.truncf %18 : vector<400x32xf32> to vector<400x32xbf16>
    %20 = vector.extract_strided_slice %11 {offsets = [16, 0], sizes = [400, 32], strides = [1, 1]} : vector<432x32xf32> to vector<400x32xf32>
    %21 = arith.truncf %20 : vector<400x32xf32> to vector<400x32xbf16>
    %22 = vector.extract_strided_slice %11 {offsets = [17, 0], sizes = [400, 32], strides = [1, 1]} : vector<432x32xf32> to vector<400x32xf32>
    %23 = arith.truncf %22 : vector<400x32xf32> to vector<400x32xbf16>
    %24 = vector.extract_strided_slice %11 {offsets = [29, 0], sizes = [400, 32], strides = [1, 1]} : vector<432x32xf32> to vector<400x32xf32>
    %25 = arith.truncf %24 : vector<400x32xf32> to vector<400x32xbf16>
    %26 = vector.extract_strided_slice %11 {offsets = [30, 0], sizes = [400, 32], strides = [1, 1]} : vector<432x32xf32> to vector<400x32xf32>
    %27 = arith.truncf %26 : vector<400x32xf32> to vector<400x32xbf16>
    %28 = vector.extract_strided_slice %11 {offsets = [31, 0], sizes = [400, 32], strides = [1, 1]} : vector<432x32xf32> to vector<400x32xf32>
    %29 = arith.truncf %28 : vector<400x32xf32> to vector<400x32xbf16>
    %30 = tpu.concatenate %13, %15, %17, %19, %21, %23, %25, %27, %29 in 1 : vector<400x32xbf16>, vector<400x32xbf16>, vector<400x32xbf16>, vector<400x32xbf16>, vector<400x32xbf16>, vector<400x32xbf16>, vector<400x32xbf16>, vector<400x32xbf16>, vector<400x32xbf16> -> vector<400x288xbf16>
    %31 = arith.mulf %30, %9 : vector<400x288xbf16>
    %c0_10 = arith.constant 0 : index
    %c0_11 = arith.constant 0 : index
    %32 = vector.load %arg5[%c0_10, %c0_11] : memref<288x32xbf16, #tpu.memory_space<vmem>>, vector<288x32xbf16>
    %cst_12 = arith.constant dense<0.000000e+00> : vector<400x32xf32>
    %33 = tpu.matmul %31, %32, %cst_12 {dimension_numbers = #tpu.dot_dimension_numbers<[1], [0], [0], [1], [0, 0, 1, 1], [], []>} : vector<400x288xbf16>, vector<288x32xbf16>, vector<400x32xf32> -> vector<400x32xf32>
    %c0_13 = arith.constant 0 : index
    %c0_14 = arith.constant 0 : index
    %34 = vector.load %arg6[%c0_13, %c0_14] : memref<1x32xf32, #tpu.memory_space<vmem>>, vector<1x32xf32>
    %35 = vector.broadcast %34 : vector<1x32xf32> to vector<400x32xf32>
    %36 = arith.addf %33, %35 : vector<400x32xf32>
    %cst_15 = arith.constant 0.000000e+00 : f32
    %37 = vector.broadcast %cst_15 : f32 to vector<400x32xf32>
    %38 = arith.maximumf %36, %37 : vector<400x32xf32>
    %c0_16 = arith.constant 0 : index
    %c0_17 = arith.constant 0 : index
    %39 = vector.load %arg4[%c0_16, %c0_17] : memref<400x288xbf16, #tpu.memory_space<vmem>>, vector<400x288xbf16>
    %cst_18 = arith.constant 0.000000e+00 : f32
    %40 = vector.broadcast %cst_18 : f32 to vector<16x32xf32>
    %41 = tpu.concatenate %40, %38, %40 in 0 : vector<16x32xf32>, vector<400x32xf32>, vector<16x32xf32> -> vector<432x32xf32>
    %42 = vector.extract_strided_slice %41 {offsets = [1, 0], sizes = [400, 32], strides = [1, 1]} : vector<432x32xf32> to vector<400x32xf32>
    %43 = arith.truncf %42 : vector<400x32xf32> to vector<400x32xbf16>
    %44 = vector.extract_strided_slice %41 {offsets = [2, 0], sizes = [400, 32], strides = [1, 1]} : vector<432x32xf32> to vector<400x32xf32>
    %45 = arith.truncf %44 : vector<400x32xf32> to vector<400x32xbf16>
    %46 = vector.extract_strided_slice %41 {offsets = [3, 0], sizes = [400, 32], strides = [1, 1]} : vector<432x32xf32> to vector<400x32xf32>
    %47 = arith.truncf %46 : vector<400x32xf32> to vector<400x32xbf16>
    %48 = vector.extract_strided_slice %41 {offsets = [15, 0], sizes = [400, 32], strides = [1, 1]} : vector<432x32xf32> to vector<400x32xf32>
    %49 = arith.truncf %48 : vector<400x32xf32> to vector<400x32xbf16>
    %50 = vector.extract_strided_slice %41 {offsets = [16, 0], sizes = [400, 32], strides = [1, 1]} : vector<432x32xf32> to vector<400x32xf32>
    %51 = arith.truncf %50 : vector<400x32xf32> to vector<400x32xbf16>
    %52 = vector.extract_strided_slice %41 {offsets = [17, 0], sizes = [400, 32], strides = [1, 1]} : vector<432x32xf32> to vector<400x32xf32>
    %53 = arith.truncf %52 : vector<400x32xf32> to vector<400x32xbf16>
    %54 = vector.extract_strided_slice %41 {offsets = [29, 0], sizes = [400, 32], strides = [1, 1]} : vector<432x32xf32> to vector<400x32xf32>
    %55 = arith.truncf %54 : vector<400x32xf32> to vector<400x32xbf16>
    %56 = vector.extract_strided_slice %41 {offsets = [30, 0], sizes = [400, 32], strides = [1, 1]} : vector<432x32xf32> to vector<400x32xf32>
    %57 = arith.truncf %56 : vector<400x32xf32> to vector<400x32xbf16>
    %58 = vector.extract_strided_slice %41 {offsets = [31, 0], sizes = [400, 32], strides = [1, 1]} : vector<432x32xf32> to vector<400x32xf32>
    %59 = arith.truncf %58 : vector<400x32xf32> to vector<400x32xbf16>
    %60 = tpu.concatenate %43, %45, %47, %49, %51, %53, %55, %57, %59 in 1 : vector<400x32xbf16>, vector<400x32xbf16>, vector<400x32xbf16>, vector<400x32xbf16>, vector<400x32xbf16>, vector<400x32xbf16>, vector<400x32xbf16>, vector<400x32xbf16>, vector<400x32xbf16> -> vector<400x288xbf16>
    %61 = arith.mulf %60, %39 : vector<400x288xbf16>
    %62 = vector.extract_strided_slice %61 {offsets = [0, 0], sizes = [200, 288], strides = [1, 1]} : vector<400x288xbf16> to vector<200x288xbf16>
    %c0_19 = arith.constant 0 : index
    %c0_20 = arith.constant 0 : index
    %63 = vector.load %arg9[%c0_19, %c0_20] : memref<56x200xbf16, #tpu.memory_space<vmem>>, vector<56x200xbf16>
    %cst_21 = arith.constant dense<0.000000e+00> : vector<56x288xf32>
    %64 = tpu.matmul %63, %62, %cst_21 {dimension_numbers = #tpu.dot_dimension_numbers<[1], [0], [0], [1], [0, 0, 1, 1], [], []>} : vector<56x200xbf16>, vector<200x288xbf16>, vector<56x288xf32> -> vector<56x288xf32>
    %65 = arith.truncf %64 : vector<56x288xf32> to vector<56x288xbf16>
    %66 = vector.extract_strided_slice %61 {offsets = [200, 0], sizes = [200, 288], strides = [1, 1]} : vector<400x288xbf16> to vector<200x288xbf16>
    %c0_22 = arith.constant 0 : index
    %c0_23 = arith.constant 0 : index
    %67 = vector.load %arg9[%c0_22, %c0_23] : memref<56x200xbf16, #tpu.memory_space<vmem>>, vector<56x200xbf16>
    %cst_24 = arith.constant dense<0.000000e+00> : vector<56x288xf32>
    %68 = tpu.matmul %67, %66, %cst_24 {dimension_numbers = #tpu.dot_dimension_numbers<[1], [0], [0], [1], [0, 0, 1, 1], [], []>} : vector<56x200xbf16>, vector<200x288xbf16>, vector<56x288xf32> -> vector<56x288xf32>
    %69 = arith.truncf %68 : vector<56x288xf32> to vector<56x288xbf16>
    %70 = tpu.concatenate %65, %69 in 0 : vector<56x288xbf16>, vector<56x288xbf16> -> vector<112x288xbf16>
    %c0_25 = arith.constant 0 : index
    %c0_26 = arith.constant 0 : index
    %71 = vector.load %arg7[%c0_25, %c0_26] : memref<288x64xbf16, #tpu.memory_space<vmem>>, vector<288x64xbf16>
    %cst_27 = arith.constant dense<0.000000e+00> : vector<112x64xf32>
    %72 = tpu.matmul %70, %71, %cst_27 {dimension_numbers = #tpu.dot_dimension_numbers<[1], [0], [0], [1], [0, 0, 1, 1], [], []>} : vector<112x288xbf16>, vector<288x64xbf16>, vector<112x64xf32> -> vector<112x64xf32>
    %c0_28 = arith.constant 0 : index
    %c0_29 = arith.constant 0 : index
    %73 = vector.load %arg8[%c0_28, %c0_29] : memref<1x64xf32, #tpu.memory_space<vmem>>, vector<1x64xf32>
    %74 = vector.broadcast %73 : vector<1x64xf32> to vector<112x64xf32>
    %75 = arith.addf %72, %74 : vector<112x64xf32>
    %cst_30 = arith.constant 0.000000e+00 : f32
    %76 = vector.broadcast %cst_30 : f32 to vector<112x64xf32>
    %77 = arith.maximumf %75, %76 : vector<112x64xf32>
    %c0_31 = arith.constant 0 : index
    %c0_32 = arith.constant 0 : index
    %78 = vector.load %arg10[%c0_31, %c0_32] : memref<112x576xbf16, #tpu.memory_space<vmem>>, vector<112x576xbf16>
    %cst_33 = arith.constant 0.000000e+00 : f32
    %79 = vector.broadcast %cst_33 : f32 to vector<16x64xf32>
    %80 = tpu.concatenate %79, %77, %79 in 0 : vector<16x64xf32>, vector<112x64xf32>, vector<16x64xf32> -> vector<144x64xf32>
    %81 = vector.extract_strided_slice %80 {offsets = [8, 0], sizes = [112, 64], strides = [1, 1]} : vector<144x64xf32> to vector<112x64xf32>
    %82 = arith.truncf %81 : vector<112x64xf32> to vector<112x64xbf16>
    %83 = vector.extract_strided_slice %80 {offsets = [9, 0], sizes = [112, 64], strides = [1, 1]} : vector<144x64xf32> to vector<112x64xf32>
    %84 = arith.truncf %83 : vector<112x64xf32> to vector<112x64xbf16>
    %85 = vector.extract_strided_slice %80 {offsets = [10, 0], sizes = [112, 64], strides = [1, 1]} : vector<144x64xf32> to vector<112x64xf32>
    %86 = arith.truncf %85 : vector<112x64xf32> to vector<112x64xbf16>
    %87 = vector.extract_strided_slice %80 {offsets = [15, 0], sizes = [112, 64], strides = [1, 1]} : vector<144x64xf32> to vector<112x64xf32>
    %88 = arith.truncf %87 : vector<112x64xf32> to vector<112x64xbf16>
    %89 = vector.extract_strided_slice %80 {offsets = [16, 0], sizes = [112, 64], strides = [1, 1]} : vector<144x64xf32> to vector<112x64xf32>
    %90 = arith.truncf %89 : vector<112x64xf32> to vector<112x64xbf16>
    %91 = vector.extract_strided_slice %80 {offsets = [17, 0], sizes = [112, 64], strides = [1, 1]} : vector<144x64xf32> to vector<112x64xf32>
    %92 = arith.truncf %91 : vector<112x64xf32> to vector<112x64xbf16>
    %93 = vector.extract_strided_slice %80 {offsets = [22, 0], sizes = [112, 64], strides = [1, 1]} : vector<144x64xf32> to vector<112x64xf32>
    %94 = arith.truncf %93 : vector<112x64xf32> to vector<112x64xbf16>
    %95 = vector.extract_strided_slice %80 {offsets = [23, 0], sizes = [112, 64], strides = [1, 1]} : vector<144x64xf32> to vector<112x64xf32>
    %96 = arith.truncf %95 : vector<112x64xf32> to vector<112x64xbf16>
    %97 = vector.extract_strided_slice %80 {offsets = [24, 0], sizes = [112, 64], strides = [1, 1]} : vector<144x64xf32> to vector<112x64xf32>
    %98 = arith.truncf %97 : vector<112x64xf32> to vector<112x64xbf16>
    %99 = tpu.concatenate %82, %84, %86, %88, %90, %92, %94, %96, %98 in 1 : vector<112x64xbf16>, vector<112x64xbf16>, vector<112x64xbf16>, vector<112x64xbf16>, vector<112x64xbf16>, vector<112x64xbf16>, vector<112x64xbf16>, vector<112x64xbf16>, vector<112x64xbf16> -> vector<112x576xbf16>
    %100 = arith.mulf %99, %78 : vector<112x576xbf16>
    %c0_34 = arith.constant 0 : index
    %c0_35 = arith.constant 0 : index
    %101 = vector.load %arg11[%c0_34, %c0_35] : memref<576x64xbf16, #tpu.memory_space<vmem>>, vector<576x64xbf16>
    %cst_36 = arith.constant dense<0.000000e+00> : vector<112x64xf32>
    %102 = tpu.matmul %100, %101, %cst_36 {dimension_numbers = #tpu.dot_dimension_numbers<[1], [0], [0], [1], [0, 0, 1, 1], [], []>} : vector<112x576xbf16>, vector<576x64xbf16>, vector<112x64xf32> -> vector<112x64xf32>
    %c0_37 = arith.constant 0 : index
    %c0_38 = arith.constant 0 : index
    %103 = vector.load %arg12[%c0_37, %c0_38] : memref<1x64xf32, #tpu.memory_space<vmem>>, vector<1x64xf32>
    %104 = vector.broadcast %103 : vector<1x64xf32> to vector<112x64xf32>
    %105 = arith.addf %102, %104 : vector<112x64xf32>
    %cst_39 = arith.constant 0.000000e+00 : f32
    %106 = vector.broadcast %cst_39 : f32 to vector<112x64xf32>
    %107 = arith.maximumf %105, %106 : vector<112x64xf32>
    %c0_40 = arith.constant 0 : index
    %c0_41 = arith.constant 0 : index
    %108 = vector.load %arg10[%c0_40, %c0_41] : memref<112x576xbf16, #tpu.memory_space<vmem>>, vector<112x576xbf16>
    %cst_42 = arith.constant 0.000000e+00 : f32
    %109 = vector.broadcast %cst_42 : f32 to vector<16x64xf32>
    %110 = tpu.concatenate %109, %107, %109 in 0 : vector<16x64xf32>, vector<112x64xf32>, vector<16x64xf32> -> vector<144x64xf32>
    %111 = vector.extract_strided_slice %110 {offsets = [8, 0], sizes = [112, 64], strides = [1, 1]} : vector<144x64xf32> to vector<112x64xf32>
    %112 = arith.truncf %111 : vector<112x64xf32> to vector<112x64xbf16>
    %113 = vector.extract_strided_slice %110 {offsets = [9, 0], sizes = [112, 64], strides = [1, 1]} : vector<144x64xf32> to vector<112x64xf32>
    %114 = arith.truncf %113 : vector<112x64xf32> to vector<112x64xbf16>
    %115 = vector.extract_strided_slice %110 {offsets = [10, 0], sizes = [112, 64], strides = [1, 1]} : vector<144x64xf32> to vector<112x64xf32>
    %116 = arith.truncf %115 : vector<112x64xf32> to vector<112x64xbf16>
    %117 = vector.extract_strided_slice %110 {offsets = [15, 0], sizes = [112, 64], strides = [1, 1]} : vector<144x64xf32> to vector<112x64xf32>
    %118 = arith.truncf %117 : vector<112x64xf32> to vector<112x64xbf16>
    %119 = vector.extract_strided_slice %110 {offsets = [16, 0], sizes = [112, 64], strides = [1, 1]} : vector<144x64xf32> to vector<112x64xf32>
    %120 = arith.truncf %119 : vector<112x64xf32> to vector<112x64xbf16>
    %121 = vector.extract_strided_slice %110 {offsets = [17, 0], sizes = [112, 64], strides = [1, 1]} : vector<144x64xf32> to vector<112x64xf32>
    %122 = arith.truncf %121 : vector<112x64xf32> to vector<112x64xbf16>
    %123 = vector.extract_strided_slice %110 {offsets = [22, 0], sizes = [112, 64], strides = [1, 1]} : vector<144x64xf32> to vector<112x64xf32>
    %124 = arith.truncf %123 : vector<112x64xf32> to vector<112x64xbf16>
    %125 = vector.extract_strided_slice %110 {offsets = [23, 0], sizes = [112, 64], strides = [1, 1]} : vector<144x64xf32> to vector<112x64xf32>
    %126 = arith.truncf %125 : vector<112x64xf32> to vector<112x64xbf16>
    %127 = vector.extract_strided_slice %110 {offsets = [24, 0], sizes = [112, 64], strides = [1, 1]} : vector<144x64xf32> to vector<112x64xf32>
    %128 = arith.truncf %127 : vector<112x64xf32> to vector<112x64xbf16>
    %129 = tpu.concatenate %112, %114, %116, %118, %120, %122, %124, %126, %128 in 1 : vector<112x64xbf16>, vector<112x64xbf16>, vector<112x64xbf16>, vector<112x64xbf16>, vector<112x64xbf16>, vector<112x64xbf16>, vector<112x64xbf16>, vector<112x64xbf16>, vector<112x64xbf16> -> vector<112x576xbf16>
    %130 = arith.mulf %129, %108 : vector<112x576xbf16>
    %131 = vector.extract_strided_slice %130 {offsets = [0, 0], sizes = [56, 576], strides = [1, 1]} : vector<112x576xbf16> to vector<56x576xbf16>
    %c0_43 = arith.constant 0 : index
    %c0_44 = arith.constant 0 : index
    %132 = vector.load %arg15[%c0_43, %c0_44] : memref<16x56xbf16, #tpu.memory_space<vmem>>, vector<16x56xbf16>
    %cst_45 = arith.constant dense<0.000000e+00> : vector<16x576xf32>
    %133 = tpu.matmul %132, %131, %cst_45 {dimension_numbers = #tpu.dot_dimension_numbers<[1], [0], [0], [1], [0, 0, 1, 1], [], []>} : vector<16x56xbf16>, vector<56x576xbf16>, vector<16x576xf32> -> vector<16x576xf32>
    %134 = arith.truncf %133 : vector<16x576xf32> to vector<16x576xbf16>
    %135 = vector.extract_strided_slice %130 {offsets = [56, 0], sizes = [56, 576], strides = [1, 1]} : vector<112x576xbf16> to vector<56x576xbf16>
    %c0_46 = arith.constant 0 : index
    %c0_47 = arith.constant 0 : index
    %136 = vector.load %arg15[%c0_46, %c0_47] : memref<16x56xbf16, #tpu.memory_space<vmem>>, vector<16x56xbf16>
    %cst_48 = arith.constant dense<0.000000e+00> : vector<16x576xf32>
    %137 = tpu.matmul %136, %135, %cst_48 {dimension_numbers = #tpu.dot_dimension_numbers<[1], [0], [0], [1], [0, 0, 1, 1], [], []>} : vector<16x56xbf16>, vector<56x576xbf16>, vector<16x576xf32> -> vector<16x576xf32>
    %138 = arith.truncf %137 : vector<16x576xf32> to vector<16x576xbf16>
    %139 = tpu.concatenate %134, %138 in 0 : vector<16x576xbf16>, vector<16x576xbf16> -> vector<32x576xbf16>
    %c0_49 = arith.constant 0 : index
    %c0_50 = arith.constant 0 : index
    %140 = vector.load %arg13[%c0_49, %c0_50] : memref<576x64xbf16, #tpu.memory_space<vmem>>, vector<576x64xbf16>
    %cst_51 = arith.constant dense<0.000000e+00> : vector<32x64xf32>
    %141 = tpu.matmul %139, %140, %cst_51 {dimension_numbers = #tpu.dot_dimension_numbers<[1], [0], [0], [1], [0, 0, 1, 1], [], []>} : vector<32x576xbf16>, vector<576x64xbf16>, vector<32x64xf32> -> vector<32x64xf32>
    %c0_52 = arith.constant 0 : index
    %c0_53 = arith.constant 0 : index
    %142 = vector.load %arg14[%c0_52, %c0_53] : memref<1x64xf32, #tpu.memory_space<vmem>>, vector<1x64xf32>
    %143 = vector.broadcast %142 : vector<1x64xf32> to vector<32x64xf32>
    %144 = arith.addf %141, %143 : vector<32x64xf32>
    %cst_54 = arith.constant 0.000000e+00 : f32
    %145 = vector.broadcast %cst_54 : f32 to vector<32x64xf32>
    %146 = arith.maximumf %144, %145 : vector<32x64xf32>
    %147 = arith.truncf %146 : vector<32x64xf32> to vector<32x64xbf16>
    %148 = tpu.concatenate %147, %147, %147, %147, %147, %147, %147, %147, %147, %147, %147, %147, %147, %147, %147, %147 in 1 : vector<32x64xbf16>, vector<32x64xbf16>, vector<32x64xbf16>, vector<32x64xbf16>, vector<32x64xbf16>, vector<32x64xbf16>, vector<32x64xbf16>, vector<32x64xbf16>, vector<32x64xbf16>, vector<32x64xbf16>, vector<32x64xbf16>, vector<32x64xbf16>, vector<32x64xbf16>, vector<32x64xbf16>, vector<32x64xbf16>, vector<32x64xbf16> -> vector<32x1024xbf16>
    %c0_55 = arith.constant 0 : index
    %c0_56 = arith.constant 0 : index
    %149 = vector.load %arg17[%c0_55, %c0_56] : memref<32x1024xbf16, #tpu.memory_space<vmem>>, vector<32x1024xbf16>
    %150 = arith.mulf %148, %149 : vector<32x1024xbf16>
    %c0_57 = arith.constant 0 : index
    %c0_58 = arith.constant 0 : index
    %151 = vector.load %arg16[%c0_57, %c0_58] : memref<1024x128xbf16, #tpu.memory_space<vmem>>, vector<1024x128xbf16>
    %cst_59 = arith.constant dense<0.000000e+00> : vector<32x128xf32>
    %152 = tpu.matmul %150, %151, %cst_59 {dimension_numbers = #tpu.dot_dimension_numbers<[1], [0], [0], [1], [0, 0, 1, 1], [], []>} : vector<32x1024xbf16>, vector<1024x128xbf16>, vector<32x128xf32> -> vector<32x128xf32>
    %c0_60 = arith.constant 0 : index
    %c0_61 = arith.constant 0 : index
    %153 = vector.load %arg18[%c0_60, %c0_61] : memref<2x32xf32, #tpu.memory_space<vmem>>, vector<2x32xf32>
    %cst_62 = arith.constant dense<0.000000e+00> : vector<2x128xf32>
    %154 = tpu.matmul %153, %152, %cst_62 {dimension_numbers = #tpu.dot_dimension_numbers<[1], [0], [0], [1], [0, 0, 1, 1], [], []>} : vector<2x32xf32>, vector<32x128xf32>, vector<2x128xf32> -> vector<2x128xf32>
    %c0_63 = arith.constant 0 : index
    %c0_64 = arith.constant 0 : index
    %155 = vector.load %arg19[%c0_63, %c0_64] : memref<1x128xf32, #tpu.memory_space<vmem>>, vector<1x128xf32>
    %156 = vector.broadcast %155 : vector<1x128xf32> to vector<2x128xf32>
    %157 = arith.addf %154, %156 : vector<2x128xf32>
    %c0_65 = arith.constant 0 : index
    %c0_66 = arith.constant 0 : index
    %c0_67 = arith.constant 0 : index
    %158 = vector.load %arg20[%c0_65, %c0_66, %c0_67] : memref<1x2x128xf32, #tpu.memory_space<vmem>>, vector<1x2x128xf32>
    %159 = vector.shape_cast %158 : vector<1x2x128xf32> to vector<2x128xf32>
    %160 = vector.shape_cast %157 : vector<2x128xf32> to vector<1x2x128xf32>
    tpu.vector_store %arg20[%c0_65, %c0_66, %c0_67], %160 {strides = array<i32>} : memref<1x2x128xf32, #tpu.memory_space<vmem>>, vector<1x2x128xf32>,
    return
  }
  func.func @transform_0(%arg0: i32) -> (i32, i32, i32) {
    %c0_i32 = arith.constant 0 : i32
    %c0_i32_0 = arith.constant 0 : i32
    %c0_i32_1 = arith.constant 0 : i32
    return %arg0, %c0_i32, %c0_i32_0 : i32, i32, i32
  }
  func.func @transform_1(%arg0: i32) -> (i32, i32) {
    %c0_i32 = arith.constant 0 : i32
    %c0_i32_0 = arith.constant 0 : i32
    %c0_i32_1 = arith.constant 0 : i32
    return %c0_i32, %c0_i32_0 : i32, i32
  }
  func.func @transform_2(%arg0: i32) -> (i32, i32) {
    %c0_i32 = arith.constant 0 : i32
    %c0_i32_0 = arith.constant 0 : i32
    %c0_i32_1 = arith.constant 0 : i32
    return %c0_i32, %c0_i32_0 : i32, i32
  }
  func.func @transform_3(%arg0: i32) -> (i32, i32) {
    %c0_i32 = arith.constant 0 : i32
    %c0_i32_0 = arith.constant 0 : i32
    %c0_i32_1 = arith.constant 0 : i32
    return %c0_i32, %c0_i32_0 : i32, i32
  }
  func.func @transform_4(%arg0: i32) -> (i32, i32) {
    %c0_i32 = arith.constant 0 : i32
    %c0_i32_0 = arith.constant 0 : i32
    %c0_i32_1 = arith.constant 0 : i32
    return %c0_i32, %c0_i32_0 : i32, i32
  }
  func.func @transform_5(%arg0: i32) -> (i32, i32) {
    %c0_i32 = arith.constant 0 : i32
    %c0_i32_0 = arith.constant 0 : i32
    %c0_i32_1 = arith.constant 0 : i32
    return %c0_i32, %c0_i32_0 : i32, i32
  }
  func.func @transform_6(%arg0: i32) -> (i32, i32) {
    %c0_i32 = arith.constant 0 : i32
    %c0_i32_0 = arith.constant 0 : i32
    %c0_i32_1 = arith.constant 0 : i32
    return %c0_i32, %c0_i32_0 : i32, i32
  }
  func.func @transform_7(%arg0: i32) -> (i32, i32) {
    %c0_i32 = arith.constant 0 : i32
    %c0_i32_0 = arith.constant 0 : i32
    %c0_i32_1 = arith.constant 0 : i32
    return %c0_i32, %c0_i32_0 : i32, i32
  }
  func.func @transform_8(%arg0: i32) -> (i32, i32) {
    %c0_i32 = arith.constant 0 : i32
    %c0_i32_0 = arith.constant 0 : i32
    %c0_i32_1 = arith.constant 0 : i32
    return %c0_i32, %c0_i32_0 : i32, i32
  }
  func.func @transform_9(%arg0: i32) -> (i32, i32) {
    %c0_i32 = arith.constant 0 : i32
    %c0_i32_0 = arith.constant 0 : i32
    %c0_i32_1 = arith.constant 0 : i32
    return %c0_i32, %c0_i32_0 : i32, i32
  }
  func.func @transform_10(%arg0: i32) -> (i32, i32) {
    %c0_i32 = arith.constant 0 : i32
    %c0_i32_0 = arith.constant 0 : i32
    %c0_i32_1 = arith.constant 0 : i32
    return %c0_i32, %c0_i32_0 : i32, i32
  }
  func.func @transform_11(%arg0: i32) -> (i32, i32) {
    %c0_i32 = arith.constant 0 : i32
    %c0_i32_0 = arith.constant 0 : i32
    %c0_i32_1 = arith.constant 0 : i32
    return %c0_i32, %c0_i32_0 : i32, i32
  }
  func.func @transform_12(%arg0: i32) -> (i32, i32) {
    %c0_i32 = arith.constant 0 : i32
    %c0_i32_0 = arith.constant 0 : i32
    %c0_i32_1 = arith.constant 0 : i32
    return %c0_i32, %c0_i32_0 : i32, i32
  }
  func.func @transform_13(%arg0: i32) -> (i32, i32) {
    %c0_i32 = arith.constant 0 : i32
    %c0_i32_0 = arith.constant 0 : i32
    %c0_i32_1 = arith.constant 0 : i32
    return %c0_i32, %c0_i32_0 : i32, i32
  }
  func.func @transform_14(%arg0: i32) -> (i32, i32) {
    %c0_i32 = arith.constant 0 : i32
    %c0_i32_0 = arith.constant 0 : i32
    %c0_i32_1 = arith.constant 0 : i32
    return %c0_i32, %c0_i32_0 : i32, i32
  }
  func.func @transform_15(%arg0: i32) -> (i32, i32) {
    %c0_i32 = arith.constant 0 : i32
    %c0_i32_0 = arith.constant 0 : i32
    %c0_i32_1 = arith.constant 0 : i32
    return %c0_i32, %c0_i32_0 : i32, i32
  }
  func.func @transform_16(%arg0: i32) -> (i32, i32) {
    %c0_i32 = arith.constant 0 : i32
    %c0_i32_0 = arith.constant 0 : i32
    %c0_i32_1 = arith.constant 0 : i32
    return %c0_i32, %c0_i32_0 : i32, i32
  }
  func.func @transform_17(%arg0: i32) -> (i32, i32) {
    %c0_i32 = arith.constant 0 : i32
    %c0_i32_0 = arith.constant 0 : i32
    %c0_i32_1 = arith.constant 0 : i32
    return %c0_i32, %c0_i32_0 : i32, i32
  }
  func.func @transform_18(%arg0: i32) -> (i32, i32) {
    %c0_i32 = arith.constant 0 : i32
    %c0_i32_0 = arith.constant 0 : i32
    %c0_i32_1 = arith.constant 0 : i32
    return %c0_i32, %c0_i32_0 : i32, i32
  }
  func.func @transform_19(%arg0: i32) -> (i32, i32, i32) {
    %c0_i32 = arith.constant 0 : i32
    %c0_i32_0 = arith.constant 0 : i32
    %c0_i32_1 = arith.constant 0 : i32
    return %arg0, %c0_i32, %c0_i32_0 : i32, i32, i32
  }
}

</mosaic_0001>

<bundles_post_ra>
// kernel: conv_encoder_forward.1
= control target key start
LH: loop header
LB: loop body
LE: loop exit
PB: predicated region body
PF: predicated region fallthrough
CT: control target
= control target key end

     0   :  { %s20691_s0 = inlined_call_operand.vmem [shape: bf16[1,400,9], index: 0, kind: input, shape index: {}]   ;;  %s20692_s1 = inlined_call_operand.vmem [shape: bf16[9,32], index: 1, kind: input, shape index: {}]   ;;  %s20693_s2 = inlined_call_operand.vmem [shape: f32[1,32], index: 2, kind: input, shape index: {}]   ;;  %s20694_s3 = inlined_call_operand.vmem [shape: bf16[400,288], index: 3, kind: input, shape index: {}]   ;;  %s20695_s4 = inlined_call_operand.vmem [shape: bf16[288,32], index: 4, kind: input, shape index: {}]   ;;  %s20696_s5 = inlined_call_operand.vmem [shape: f32[1,32], index: 5, kind: input, shape index: {}]   ;;  %s20697_s6 = inlined_call_operand.vmem [shape: bf16[288,64], index: 6, kind: input, shape index: {}]   ;;  %s20698_s7 = inlined_call_operand.vmem [shape: f32[1,64], index: 7, kind: input, shape index: {}]   ;;  %s20699_s8 = inlined_call_operand.vmem [shape: bf16[56,200], index: 8, kind: input, shape index: {}]   ;;  %s20700_s9 = inlined_call_operand.vmem [shape: bf16[112,576], index: 9, kind: input, shape index: {}]   ;;  %s20701_s10 = inlined_call_operand.vmem [shape: bf16[576,64], index: 10, kind: input, shape index: {}]   ;;  %s20702_s11 = inlined_call_operand.vmem [shape: f32[1,64], index: 11, kind: input, shape index: {}]   ;;  %s20703_s12 = inlined_call_operand.vmem [shape: bf16[576,64], index: 12, kind: input, shape index: {}]   ;;  %s20704_s13 = inlined_call_operand.vmem [shape: f32[1,64], index: 13, kind: input, shape index: {}]   ;;  %s20705_s14 = inlined_call_operand.vmem [shape: bf16[16,56], index: 14, kind: input, shape index: {}]   ;;  %s20706_s15 = inlined_call_operand.vmem [shape: bf16[1024,128], index: 15, kind: input, shape index: {}]   ;;  %s20707_s16 = inlined_call_operand.vmem [shape: bf16[32,1024], index: 16, kind: input, shape index: {}]   ;;  %s20708_s17 = inlined_call_operand.vmem [shape: f32[2,32], index: 17, kind: input, shape index: {}]   ;;  %s20709_s18 = inlined_call_operand.vmem [shape: f32[1,128], index: 18, kind: input, shape index: {}]   ;;  %s20710_s19 = inlined_call_operand.hbm [shape: f32[1,2,128], index: 19, kind: output, shape index: {}]  }
   0x1   :  { %21012 = sst [smem:[#allocation124_spill]] %s20691_s0 }
   0x2   :  { %21013 = sst [smem:[#allocation125_spill]] %s20692_s1 }
   0x3   :  { %21014 = sst [smem:[#allocation126_spill]] %s20693_s2 }
   0x4   :  { %21015 = sst [smem:[#allocation127_spill]] %s20694_s3 }
   0x5   :  { %vm329_vm0 = vcmask 1043456   ;;  %v20718_v0 = vmov 0.0   ;;  %s21016_s20 = sld [smem:[#allocation125_spill]]  ;;  %vm330_vm1 = vcmask 1044480   ;;  %v12994_v2 = vmov 65535   ;;  %s21017_s22 = sld [smem:[#allocation124_spill]] }
   0x6   :  { %12086 = vmatprep.subr.bf16.mxu0 %v20718_v0  ;;  %v331_v3 = vsel %vm329_vm0, 4294967295, %v12994_v2  ;;  %vm12995_vm2 = vmmov 0   ;;  %vm253_vm3 = vcmask 72704   ;;  %v20714_v19 = vmov 0   ;;  %v12604_v31 = vld [vmem:[%s20695_s4] sm:$0xff]   ;;  %v12605_v33 = vld [vmem:[%s20695_s4 + $0x8] sm:$0xff]  }
   0x7   :  { %12088 = vmatprep.mubr.msk.bf16.mxu0 %vm12995_vm2, %v20718_v0  ;;  %v332_v4 = vsel %vm330_vm1, %v331_v3, 0  ;;  %4200 = vmatprep.subr.bf16.mxu1 %v20714_v19  ;;  %v12607_v34 = vld [vmem:[%s20695_s4 + $0x10] sm:$0xff]  }
   0x8   :  { %4201 = vmatpush1.bf16.msra.mxu1 %v12604_v31 }
   0x9   :  { %4202 = vmatprep.subr.bf16.mxu1 %v20714_v19 }
   0xb   :  { %v12572_v1 = vld [vmem:[%s21016_s20] sm:$0x1f]   ;;  %v12574_v7 = vld [vmem:[%s21017_s22 + $0x8] sm:$0xff]   ;;  %v12575_v8 = vld [vmem:[%s21017_s22 + $0x10] sm:$0xff]  }
   0xc   :  { %v334_v5 = vand.u32 %v12572_v1, %v332_v4  ;;  %v12573_v6 = vld [vmem:[%s21017_s22] sm:$0xff]   ;;  %v12576_v9 = vld [vmem:[%s21017_s22 + $0x18] sm:$0xff]   ;;  %v12578_v11 = vld [vmem:[%s21017_s22 + $0x28] sm:$0xff]   ;;  %4203 = vmatpush1.bf16.msra.mxu1 %v12605_v33 }
   0xd   :  { %v12577_v10 = vld [vmem:[%s21017_s22 + $0x20] sm:$0xff]   ;;  %v12579_v12 = vld [vmem:[%s21017_s22 + $0x30] sm:$0xff]   ;;  %v12580_v13 = vld [vmem:[%s21017_s22 + $0x38] sm:$0xff]   ;;  %4204 = vmatprep.subr.bf16.mxu1 %v20714_v19 }
   0xe   :  { %12087 = vmatpush3.bf16.msra.mxu0 %v334_v5  ;;  %v12581_v14 = vld [vmem:[%s21017_s22 + $0x40] sm:$0xff]   ;;  %v12582_v15 = vld [vmem:[%s21017_s22 + $0x48] sm:$0xff]   ;;  %v12583_v16 = vld [vmem:[%s21017_s22 + $0x50] sm:$0xff]  }
   0xf   :  { %v12584_v17 = vld [vmem:[%s21017_s22 + $0x58] sm:$0xff]   ;;  %v12585_v18 = vld [vmem:[%s21017_s22 + $0x60] sm:$0xff]   ;;  %v12586_v20 = vld [vmem:[%s21017_s22 + $0x68] sm:$0xff]  }
  0x10   :  { %v12587_v21 = vld [vmem:[%s21017_s22 + $0x70] sm:$0xff]   ;;  %v12588_v22 = vld [vmem:[%s21017_s22 + $0x78] sm:$0xff]   ;;  %v12589_v23 = vld [vmem:[%s21017_s22 + $0x80] sm:$0xff]   ;;  %4205 = vmatpush1.bf16.msra.mxu1 %v12607_v34 }
  0x11   :  { %12089 = vmatmul.mubr.msk.bf16.vlgmr.msra.gmra.mrb[0].mxu0 %vm253_vm3, %v12573_v6  ;;  %v12590_v24 = vld [vmem:[%s21017_s22 + $0x88] sm:$0xff]   ;;  %v12591_v25 = vld [vmem:[%s21017_s22 + $0x90] sm:$0xff]   ;;  %v12592_v26 = vld [vmem:[%s21017_s22 + $0x98] sm:$0xff]   ;;  %4206 = vmatprep.subr.bf16.mxu1 %v20714_v19 }
  0x12   :  { %12092 = vmatprep.mubr.msk.bf16.mxu0 %vm12995_vm2, %v20718_v0  ;;  %v12593_v27 = vld [vmem:[%s21017_s22 + $0xa0] sm:$0xff]   ;;  %v12594_v28 = vld [vmem:[%s21017_s22 + $0xa8] sm:$0xff]   ;;  %v12595_v29 = vld [vmem:[%s21017_s22 + $0xb0] sm:$0xff]  }
  0x13   :  { %v12596_v30 = vld [vmem:[%s21017_s22 + $0xb8] sm:$0xff]   ;;  %v12597_v32 = vld [vmem:[%s21017_s22 + $0xc0] sm:$0xff]  }
  0x19   :  { %12093 = vmatmul.mubr.msk.bf16.gmra.mrb[4].mxu0 %vm253_vm3, %v12574_v7 }
  0x1a   :  { %12096 = vmatprep.mubr.msk.bf16.mxu0 %vm12995_vm2, %v20718_v0 }
  0x21   :  { %12097 = vmatmul.mubr.msk.bf16.gmra.mrb[8].mxu0 %vm253_vm3, %v12575_v8 }
  0x22   :  { %12100 = vmatprep.mubr.msk.bf16.mxu0 %vm12995_vm2, %v20718_v0 }
  0x29   :  { %12101 = vmatmul.mubr.msk.bf16.gmra.mrb[12].mxu0 %vm253_vm3, %v12576_v9 }
  0x2a   :  { %12104 = vmatprep.mubr.msk.bf16.mxu0 %vm12995_vm2, %v20718_v0 }
  0x31   :  { %12105 = vmatmul.mubr.msk.bf16.gmra.mrb[16].mxu0 %vm253_vm3, %v12577_v10 }
  0x32   :  { %12108 = vmatprep.mubr.msk.bf16.mxu0 %vm12995_vm2, %v20718_v0 }
  0x39   :  { %12109 = vmatmul.mubr.msk.bf16.gmra.mrb[20].mxu0 %vm253_vm3, %v12578_v11 }
  0x3a   :  { %12112 = vmatprep.mubr.msk.bf16.mxu0 %vm12995_vm2, %v20718_v0 }
  0x41   :  { %12113 = vmatmul.mubr.msk.bf16.gmra.mrb[24].mxu0 %vm253_vm3, %v12579_v12 }
  0x42   :  { %12116 = vmatprep.mubr.msk.bf16.mxu0 %vm12995_vm2, %v20718_v0 }
  0x49   :  { %12117 = vmatmul.mubr.msk.bf16.gmra.mrb[28].mxu0 %vm253_vm3, %v12580_v13 }
  0x4a   :  { %12120 = vmatprep.mubr.msk.bf16.mxu0 %vm12995_vm2, %v20718_v0 }
  0x51   :  { %12121 = vmatmul.mubr.msk.bf16.gmra.mrb[32].mxu0 %vm253_vm3, %v12581_v14 }
  0x52   :  { %12124 = vmatprep.mubr.msk.bf16.mxu0 %vm12995_vm2, %v20718_v0 }
  0x59   :  { %12125 = vmatmul.mubr.msk.bf16.gmra.mrb[36].mxu0 %vm253_vm3, %v12582_v15 }
  0x5a   :  { %12128 = vmatprep.mubr.msk.bf16.mxu0 %vm12995_vm2, %v20718_v0 }
  0x61   :  { %12129 = vmatmul.mubr.msk.bf16.gmra.mrb[40].mxu0 %vm253_vm3, %v12583_v16 }
  0x62   :  { %12132 = vmatprep.mubr.msk.bf16.mxu0 %vm12995_vm2, %v20718_v0 }
  0x69   :  { %12133 = vmatmul.mubr.msk.bf16.gmra.mrb[44].mxu0 %vm253_vm3, %v12584_v17 }
  0x6a   :  { %12136 = vmatprep.mubr.msk.bf16.mxu0 %vm12995_vm2, %v20718_v0 }
  0x71   :  { %12137 = vmatmul.mubr.msk.bf16.gmra.mrb[48].mxu0 %vm253_vm3, %v12585_v18 }
  0x72   :  { %12140 = vmatprep.mubr.msk.bf16.mxu0 %vm12995_vm2, %v20718_v0 }
  0x79   :  { %12141 = vmatmul.mubr.msk.bf16.gmra.mrb[52].mxu0 %vm253_vm3, %v12586_v20 }
  0x7a   :  { %12144 = vmatprep.mubr.msk.bf16.mxu0 %vm12995_vm2, %v20718_v0 }
  0x81   :  { %12145 = vmatmul.mubr.msk.bf16.gmra.mrb[56].mxu0 %vm253_vm3, %v12587_v21 }
  0x82   :  { %12148 = vmatprep.mubr.msk.bf16.mxu0 %vm12995_vm2, %v20718_v0 }
  0x89   :  { %12149 = vmatmul.mubr.msk.bf16.gmra.mrb[60].mxu0 %vm253_vm3, %v12588_v22 }
  0x8a   :  { %12152 = vmatprep.mubr.msk.bf16.mxu0 %vm12995_vm2, %v20718_v0 }
  0x91   :  { %12153 = vmatmul.mubr.msk.bf16.gmra.mrb[64].mxu0 %vm253_vm3, %v12589_v23 }
  0x92   :  { %12156 = vmatprep.mubr.msk.bf16.mxu0 %vm12995_vm2, %v20718_v0 }
  0x99   :  { %12157 = vmatmul.mubr.msk.bf16.gmra.mrb[68].mxu0 %vm253_vm3, %v12590_v24 }
  0x9a   :  { %12160 = vmatprep.mubr.msk.bf16.mxu0 %vm12995_vm2, %v20718_v0 }
  0xa1   :  { %12161 = vmatmul.mubr.msk.bf16.gmra.mrb[72].mxu0 %vm253_vm3, %v12591_v25 }
  0xa2   :  { %12164 = vmatprep.mubr.msk.bf16.mxu0 %vm12995_vm2, %v20718_v0 }
  0xa9   :  { %12165 = vmatmul.mubr.msk.bf16.gmra.mrb[76].mxu0 %vm253_vm3, %v12592_v26 }
  0xaa   :  { %12168 = vmatprep.mubr.msk.bf16.mxu0 %vm12995_vm2, %v20718_v0 }
  0xb1   :  { %12169 = vmatmul.mubr.msk.bf16.gmra.mrb[80].mxu0 %vm253_vm3, %v12593_v27 }
  0xb2   :  { %12172 = vmatprep.mubr.msk.bf16.mxu0 %vm12995_vm2, %v20718_v0 }
  0xb9   :  { %12173 = vmatmul.mubr.msk.bf16.gmra.mrb[84].mxu0 %vm253_vm3, %v12594_v28 }
  0xba   :  { %12176 = vmatprep.mubr.msk.bf16.mxu0 %vm12995_vm2, %v20718_v0 }
  0xc1   :  { %12177 = vmatmul.mubr.msk.bf16.gmra.mrb[88].mxu0 %vm253_vm3, %v12595_v29 }
  0xc2   :  { %12180 = vmatprep.mubr.msk.bf16.mxu0 %vm12995_vm2, %v20718_v0 }
  0xc9   :  { %12181 = vmatmul.mubr.msk.bf16.gmra.mrb[92].mxu0 %vm253_vm3, %v12596_v30 }
  0xca   :  { %12184 = vmatprep.mubr.msk.bf16.mxu0 %vm12995_vm2, %v20718_v0 }
  0xd1   :  { %12185 = vmatmul.mubr.msk.bf16.gmra.mrb[96].mxu0 %vm253_vm3, %v12597_v32 }
  0xd2   :  { %24 = vsyncpa [#allocation3], 0  ;;  %v12608_v35 = vld [vmem:[%s20695_s4 + $0x18] sm:$0xff]   ;;  %v12609_v36 = vld [vmem:[%s20695_s4 + $0x20] sm:$0xff]   ;;  %s21018_s28 = sld [smem:[#allocation126_spill]]  ;;  %v20716_v50 = vmov 0.0|0.0  }
  0xd3   :  { %4207 = vmatpush1.bf16.msra.mxu1 %v12608_v35  ;;  %v12611_v37 = vld [vmem:[%s20695_s4 + $0x28] sm:$0xff]   ;;  %v12612_v38 = vld [vmem:[%s20695_s4 + $0x30] sm:$0xff]   ;;  %v12613_v43 = vld [vmem:[%s20695_s4 + $0x38] sm:$0xff]   ;;  %v13301_v51 = vrot.slane %v20716_v50, 1  ;;  %vm1058_vm4 = vcmask 1046528   ;;  %v13307_v54 = vrot.slane %v20714_v19, 1 }
  0xd4   :  { %4208 = vmatprep.subr.bf16.mxu1 %v20714_v19  ;;  %v12617_v52 = vld [vmem:[%s20695_s4 + $0x40] sm:$0xff]   ;;  %s12998_s22 = smov 32   ;;  %vm773_vm5 = vsmask.f32 7424  ;;  %v12618_v62 = vld [vmem:[%s20695_s4 + $0x48] sm:$0xff]   ;;  %s12999_s2 = smov 64  }
  0xd5   :  { %21020 = vst [vmem:[#allocation6_spill] sm:$0xff] %v13301_v51  ;;  %21021 = vst [vmem:[#allocation7_spill] sm:$0xff] %v13307_v54  ;;  %v12619_v9 = vld [vmem:[%s20695_s4 + $0x50] sm:$0xff]   ;;  %s13000_s25 = smov 96   ;;  %vm1292_vm6 = vsmask.f32 256 }
  0xd6   :  { %v12623_v35 = vld [vmem:[%s20695_s4 + $0x58] sm:$0xff]   ;;  %vm1426_vm7 = vcmask 1045504   ;;  %vm1530_vm8 = vsmask.f32 5376  ;;  %s21031_s26 = sld [smem:[#allocation127_spill]]  ;;  %vm1841_vm9 = vcmask 261120  }
  0xd7   :  { %4209 = vmatpush1.bf16.msra.mxu1 %v12609_v36  ;;  %vm1894_vm10 = vcmask 523264   ;;  %vm1947_vm11 = vcmask 785408   ;;  %vm6659_vm12 = vcmask 588800   ;;  %vm6828_vm13 = vsmask.f32 3328  ;;  %s13001_s27 = smov [#allocation2]  }
  0xd8   :  { %4210 = vmatprep.subr.bf16.mxu1 %v20714_v19  ;;  %v13289_v39 = vld [vmem:[%s21018_s28] ss:$0 sm:$0xff]  ;;  %vm7935_vm14 = vsmask.f32 4352  ;;  %vm9464_vm15 = vcmask 457728  }
  0xdb   :  { %4211 = vmatpush1.bf16.msra.mxu1 %v12611_v37 }
  0xdc   :  { %4212 = vmatprep.subr.bf16.mxu1 %v20714_v19 }
  0xdf   :  { %4213 = vmatpush1.bf16.msra.mxu1 %v12612_v38 }
  0xe0   :  { %4214 = vmatprep.subr.bf16.mxu1 %v20714_v19 }
  0xe3   :  { %4215 = vmatpush1.bf16.msra.mxu1 %v12613_v43  ;;  %v12624_v43 = vld [vmem:[%s20695_s4 + $0x60] sm:$0xff]  }
  0xe4   :  { %v370_v40 = vpop.f32.mrb[0].mxu0  ;;  %4216 = vmatprep.subr.bf16.mxu1 %v20714_v19 }
  0xe5   :  { %v371_v41 = vadd.f32 %v13289_v39, %v370_v40  ;;  %v12090_v42 = vpop.f32.mrb[1].mxu0 }
  0xe6   :  { %v373_v44 = vpop.f32.mrb[2].mxu0 }
  0xe7   :  { %v374_v45 = vadd.f32 %v13289_v39, %v373_v44  ;;  %v12091_v46 = vpop.f32.mrb[3].mxu0  ;;  %v569_v47 = vmax.f32 %v371_v41, 0.0  ;;  %4217 = vmatpush1.bf16.msra.mxu1 %v12617_v52 }
  0xe8   :  { %4218 = vmatprep.subr.bf16.mxu1 %v20714_v19 }
  0xe9   :  { %v570_v48 = vmax.f32 %v374_v45, 0.0  ;;  %v745_v60 = vpack.c.bf16 %v569_v47, %v20718_v0 }
  0xeb   :  { %v13298_v49 = vpack.c.bf16 %v570_v48, %v569_v47  ;;  %4219 = vmatpush1.bf16.msra.mxu1 %v12618_v62  ;;  %v1189_v12 = vrot.slane %v745_v60, 3 }
  0xec   :  { %v378_v53 = vpop.f32.mrb[4].mxu0  ;;  %4220 = vmatprep.subr.bf16.mxu1 %v20714_v19 }
  0xed   :  { %21019 = vst [vmem:[#allocation5_spill] sm:$0xff] %v13298_v49  ;;  %v379_v55 = vadd.f32 %v13289_v39, %v378_v53  ;;  %1373 = vrot.lane.b32.xlu0 %v13298_v49, %s12998_s22  ;;  %v12094_v56 = vpop.f32.mrb[5].mxu0  ;;  %v1060_v57 = vrot.slane %v13298_v49, 1  ;;  %v782_v58 = vshll.u32 %v13298_v49, 16  ;;  %v786_v59 = vshrl.u32 %v13298_v49, 16 }
  0xee   :  { %v381_v61 = vpop.f32.mrb[6].mxu0 }
  0xef   :  { %v571_v63 = vmax.f32 %v379_v55, 0.0  ;;  %v382_v1 = vadd.f32 %v13289_v39, %v381_v61  ;;  %v12095_v2 = vpop.f32.mrb[7].mxu0  ;;  %v1061_v3 = vsel %vm1058_vm4, %v13301_v51, %v1060_v57  ;;  %v784_v4 = vrot.slane %v782_v58, 1  ;;  %4221 = vmatpush1.bf16.msra.mxu1 %v12619_v9 }
  0xf0   :  { %1110 = vrot.lane.b32.xlu1 %v1061_v3, %s12999_s2  ;;  %v1293_v5 = vrot.slane %v786_v59, 7  ;;  %4222 = vmatprep.subr.bf16.mxu1 %v20714_v19 }
  0xf1   :  { %v746_v6 = vpack.c.bf16 %v571_v63, %v570_v48  ;;  %v572_v7 = vmax.f32 %v382_v1, 0.0  ;;  %v785_v8 = vsel %vm773_vm5, %v13307_v54, %v784_v4  ;;  %v788_v26 = vor.u32 %v786_v59, %v784_v4 }
  0xf2   :  { %980 = vrot.lane.b32.xlu0 %v785_v8, %s12998_s22  ;;  %v13330_v10 = vor.u32 %v1293_v5, %v782_v58 }
  0xf3   :  { %v13333_v11 = vpack.c.bf16 %v572_v7, %v571_v63  ;;  %v1190_v13 = vrot.slane %v746_v6, 3  ;;  %v1532_v28 = vshrl.u32 %v746_v6, 16  ;;  %v1535_v29 = vshll.u32 %v746_v6, 16  ;;  %4223 = vmatpush1.bf16.msra.mxu1 %v12623_v35 }
  0xf4   :  { %21022 = vst [vmem:[#allocation8_spill] sm:$0xff] %v13330_v10  ;;  %v386_v14 = vpop.f32.mrb[8].mxu0  ;;  %v1427_v36 = vrot.slane %v746_v6, 2  ;;  %4224 = vmatprep.subr.bf16.mxu1 %v20714_v19 }
  0xf5   :  { %21023 = vst [vmem:[#allocation9_spill] sm:$0xff] %v13333_v11  ;;  %v387_v15 = vadd.f32 %v13289_v39, %v386_v14  ;;  %v12098_v16 = vpop.f32.mrb[9].mxu0  ;;  %v1191_v17 = vsel %vm330_vm1, %v1189_v12, %v1190_v13  ;;  %v1062_v18 = vrot.slane %v13333_v11, 1  ;;  %v790_v20 = vshll.u32 %v13333_v11, 16 }
  0xf6   :  { %1240 = vrot.lane.b32.xlu1 %v1191_v17, %s13000_s25  ;;  %1375 = vrot.lane.b32.xlu0 %v13333_v11, %s12998_s22  ;;  %v389_v21 = vpop.f32.mrb[10].mxu0  ;;  %v794_v22 = vshrl.u32 %v13333_v11, 16  ;;  %v1534_v45 = vrot.slane %v1532_v28, 2  ;;  %v1537_v46 = vrot.slane %v1535_v29, 3  ;;  %v12629_v16 = vld [vmem:[%s20695_s4 + $0x70] sm:$0xff]  }
  0xf7   :  { %v573_v23 = vmax.f32 %v387_v15, 0.0  ;;  %v390_v24 = vadd.f32 %v13289_v39, %v389_v21  ;;  %v12099_v25 = vpop.f32.mrb[11].mxu0  ;;  %v13344_v27 = vrot.slane %v790_v20, 1  ;;  %v1063_v33 = vsel %vm1058_vm4, %v1060_v57, %v1062_v18  ;;  %4225 = vmatpush1.bf16.msra.mxu1 %v12624_v43 }
  0xf8   :  { %v13349_v30 = vrot.slane %v794_v22, 7  ;;  %v1538_v2 = vor.u32 %v1537_v46, %v1534_v45  ;;  %4226 = vmatprep.subr.bf16.mxu1 %v20714_v19 }
  0xf9   :  { %v13351_v31 = vpack.c.bf16 %v573_v23, %v572_v7  ;;  %v574_v32 = vmax.f32 %v390_v24, 0.0  ;;  %v793_v34 = vsel %vm773_vm5, %v788_v26, %v13344_v27  ;;  %v12626_v7 = vld [vmem:[%s20695_s4 + $0x68] sm:$0xff]  }
  0xfa   :  { %1112 = vrot.lane.b32.xlu1 %v1063_v33, %s12999_s2  ;;  %982 = vrot.lane.b32.xlu0 %v793_v34, %s12998_s22  ;;  %v1296_v37 = vor.u32 %v13349_v30, %v790_v20 }
  0xfb   :  { %v13364_v38 = vpack.c.bf16 %v574_v32, %v573_v23  ;;  %v1428_v40 = vrot.slane %v13351_v31, 2  ;;  %v1192_v41 = vrot.slane %v13351_v31, 3  ;;  %v1540_v42 = vshrl.u32 %v13351_v31, 16  ;;  %4227 = vmatpush1.bf16.msra.mxu1 %v12626_v7 }
  0xfc   :  { %v394_v44 = vpop.f32.mrb[12].mxu0  ;;  %v1543_v47 = vshll.u32 %v13351_v31, 16  ;;  %v13374_v48 = vsel %vm1292_vm6, %v1293_v5, %v1296_v37  ;;  %4228 = vmatprep.subr.bf16.mxu1 %v20714_v19 }
  0xfd   :  { %21024 = vst [vmem:[#allocation10_spill] sm:$0xff] %v13364_v38  ;;  %21025 = vst [vmem:[#allocation11_spill] sm:$0xff] %v13374_v48  ;;  %v395_v52 = vadd.f32 %v13289_v39, %v394_v44  ;;  %v12102_v53 = vpop.f32.mrb[13].mxu0  ;;  %v1429_v55 = vsel %vm1426_vm7, %v1427_v36, %v1428_v40  ;;  %v13380_v56 = vsel %vm330_vm1, %v1190_v13, %v1192_v41  ;;  %v1542_v58 = vrot.slane %v1540_v42, 2 }
  0xfe   :  { %1478 = vrot.lane.b32.xlu1 %v1429_v55, %s12999_s2  ;;  %1377 = vrot.lane.b32.xlu0 %v13364_v38, %s12998_s22  ;;  %v397_v57 = vpop.f32.mrb[14].mxu0  ;;  %v1545_v59 = vrot.slane %v1543_v47, 3  ;;  %v802_v63 = vshrl.u32 %v13364_v38, 16  ;;  %v1064_v1 = vrot.slane %v13364_v38, 1  ;;  %v798_v9 = vshll.u32 %v13364_v38, 16  ;;  %v12632_v47 = vld [vmem:[%s20695_s4 + $0x78] sm:$0xff]  }
  0xff   :  { %v575_v60 = vmax.f32 %v395_v52, 0.0  ;;  %v398_v61 = vadd.f32 %v13289_v39, %v397_v57  ;;  %v12103_v62 = vpop.f32.mrb[15].mxu0  ;;  %4229 = vmatpush1.bf16.msra.mxu1 %v12629_v16 }
 0x100   :  { %v1546_v3 = vor.u32 %v1545_v59, %v1542_v58  ;;  %v1298_v6 = vrot.slane %v802_v63, 7  ;;  %v1065_v20 = vsel %vm1058_vm4, %v1062_v18, %v1064_v1  ;;  %4230 = vmatprep.subr.bf16.mxu1 %v20714_v19  ;;  %v800_v45 = vrot.slane %v798_v9, 1 }
 0x101   :  { %v13389_v4 = vpack.c.bf16 %v575_v60, %v574_v32  ;;  %v576_v5 = vmax.f32 %v398_v61, 0.0 }
 0x102   :  { %1242 = vrot.lane.b32.xlu1 %v13380_v56, %s13000_s25  ;;  %v1547_v8 = vsel %vm1530_vm8, %v1538_v2, %v1546_v3  ;;  %v1299_v23 = vor.u32 %v1298_v6, %v798_v9 }
 0x103   :  { %v13400_v12 = vpack.c.bf16 %v576_v5, %v575_v60  ;;  %v1430_v13 = vrot.slane %v13389_v4, 2  ;;  %v1549_v14 = vshrl.u32 %v13389_v4, 16  ;;  %v1552_v15 = vshll.u32 %v13389_v4, 16  ;;  %4231 = vmatpush1.bf16.msra.mxu1 %v12632_v47 }
 0x104   :  { %v402_v17 = vpop.f32.mrb[16].mxu0  ;;  %v1194_v21 = vrot.slane %v13389_v4, 3  ;;  %v13432_v42 = vsel %vm1292_vm6, %v13349_v30, %v1299_v23  ;;  %v796_v30 = vor.u32 %v794_v22, %v13344_v27  ;;  %12188 = vmatprep.subr.bf16.mxu1 %v20718_v0 }
 0x105   :  { %21026 = vst [vmem:[#allocation12_spill] sm:$0xff] %v13400_v12  ;;  %v403_v24 = vadd.f32 %v13289_v39, %v402_v17  ;;  %1379 = vrot.lane.b32.xlu0 %v13400_v12, %s12998_s22  ;;  %v12106_v25 = vpop.f32.mrb[17].mxu0  ;;  %v1431_v26 = vsel %vm1426_vm7, %v1428_v40, %v1430_v13  ;;  %v1551_v28 = vrot.slane %v1549_v14, 2  ;;  %v1554_v29 = vrot.slane %v1552_v15, 3  ;;  %21027 = vst [vmem:[#allocation13_spill] sm:$0xff] %v13432_v42 }
 0x106   :  { %1114 = vrot.lane.b32.xlu1 %v1065_v20, %s12999_s2  ;;  %v405_v31 = vpop.f32.mrb[18].mxu0  ;;  %v13421_v18 = vsel %vm330_vm1, %v1192_v41, %v1194_v21  ;;  %v810_v32 = vshrl.u32 %v13400_v12, 16  ;;  %v806_v37 = vshll.u32 %v13400_v12, 16  ;;  %v801_v2 = vsel %vm773_vm5, %v796_v30, %v800_v45 }
 0x107   :  { %v577_v33 = vmax.f32 %v403_v24, 0.0  ;;  %v406_v34 = vadd.f32 %v13289_v39, %v405_v31  ;;  %v12107_v35 = vpop.f32.mrb[19].mxu0  ;;  %v1555_v36 = vor.u32 %v1554_v29, %v1551_v28  ;;  %v1066_v9 = vrot.slane %v13400_v12, 1 }
 0x108   :  { %v13428_v40 = vrot.slane %v810_v32, 7 }
 0x109   :  { %v749_v41 = vpack.c.bf16 %v577_v33, %v576_v5  ;;  %v578_v43 = vmax.f32 %v406_v34, 0.0  ;;  %1480 = vrot.lane.b32.xlu0 %v1431_v26, %s12999_s2  ;;  %v1556_v44 = vsel %vm1530_vm8, %v1546_v3, %v1555_v36  ;;  %v1067_v24 = vsel %vm1058_vm4, %v1064_v1, %v1066_v9 }
 0x10a   :  { %1759 = vrot.lane.b32.xlu1 %v1547_v8, %s13000_s25  ;;  %v1302_v46 = vor.u32 %v13428_v40, %v806_v37 }
 0x10b   :  { %v13442_v52 = vpack.c.bf16 %v578_v43, %v577_v33  ;;  %v1432_v53 = vrot.slane %v749_v41, 2  ;;  %v1558_v55 = vshrl.u32 %v749_v41, 16  ;;  %v1561_v58 = vshll.u32 %v749_v41, 16 }
 0x10c   :  { %v410_v57 = vpop.f32.mrb[20].mxu0  ;;  %v1196_v59 = vrot.slane %v749_v41, 3  ;;  %v13448_v60 = vsel %vm1292_vm6, %v1298_v6, %v1302_v46  ;;  %v808_v33 = vrot.slane %v806_v37, 1  ;;  %v804_v46 = vor.u32 %v802_v63, %v800_v45 }
 0x10d   :  { %21028 = vst [vmem:[#allocation14_spill] sm:$0xff] %v13442_v52  ;;  %21029 = vst [vmem:[#allocation15_spill] sm:$0xff] %v13448_v60  ;;  %v411_v61 = vadd.f32 %v13289_v39, %v410_v57  ;;  %1761 = vrot.lane.b32.xlu0 %v1556_v44, %s13000_s25  ;;  %v12110_v62 = vpop.f32.mrb[21].mxu0  ;;  %v1433_v3 = vsel %vm1426_vm7, %v1430_v13, %v1432_v53  ;;  %v1560_v4 = vrot.slane %v1558_v55, 2  ;;  %v1563_v27 = vrot.slane %v1561_v58, 3 }
 0x10e   :  { %984 = vrot.lane.b32.xlu1 %v801_v2, %s12998_s22  ;;  %v413_v22 = vpop.f32.mrb[22].mxu0  ;;  %v13457_v5 = vsel %vm330_vm1, %v1194_v21, %v1196_v59  ;;  %v818_v28 = vshrl.u32 %v13442_v52, 16  ;;  %v809_v57 = vsel %vm773_vm5, %v804_v46, %v808_v33  ;;  %v13495_v58 = vld [vmem:[%s21031_s26 + $0x20] ss:$12 sps:$4 sm:$0xff]   ;;  %v814_v45 = vshll.u32 %v13442_v52, 16 }
 0x10f   :  { %v579_v6 = vmax.f32 %v411_v61, 0.0  ;;  %v414_v7 = vadd.f32 %v13289_v39, %v413_v22  ;;  %v12111_v8 = vpop.f32.mrb[23].mxu0  ;;  %v1564_v14 = vor.u32 %v1563_v27, %v1560_v4 }
 0x110   :  { %v13486_v37 = vrot.slane %v818_v28, 7  ;;  %v1068_v8 = vrot.slane %v13442_v52, 1 }
 0x111   :  { %v750_v15 = vpack.c.bf16 %v579_v6, %v578_v43  ;;  %v580_v16 = vmax.f32 %v414_v7, 0.0  ;;  %1381 = vrot.lane.b32.xlu0 %v13442_v52, %s12998_s22  ;;  %v1565_v13 = vsel %vm1530_vm8, %v1555_v36, %v1564_v14 }
 0x112   :  { %1244 = vrot.lane.b32.xlu1 %v13421_v18, %s13000_s25  ;;  %v1305_v27 = vor.u32 %v13486_v37, %v814_v45 }
 0x113   :  { %v13466_v17 = vpack.c.bf16 %v580_v16, %v579_v6  ;;  %v1434_v20 = vrot.slane %v750_v15, 2  ;;  %v1567_v21 = vshrl.u32 %v750_v15, 16  ;;  %v1570_v25 = vshll.u32 %v750_v15, 16 }
 0x114   :  { %v418_v23 = vpop.f32.mrb[24].mxu0  ;;  %v1198_v26 = vrot.slane %v750_v15, 3 }
 0x115   :  { %21030 = vst [vmem:[#allocation16_spill] sm:$0xff] %v13466_v17  ;;  %v419_v29 = vadd.f32 %v13289_v39, %v418_v23  ;;  %1482 = vrot.lane.b32.xlu0 %v1433_v3, %s12999_s2  ;;  %v12114_v31 = vpop.f32.mrb[25].mxu0  ;;  %v1435_v34 = vsel %vm1426_vm7, %v1432_v53, %v1434_v20  ;;  %v1569_v35 = vrot.slane %v1567_v21, 2  ;;  %v1572_v41 = vrot.slane %v1570_v25, 3  ;;  %v13507_v3 = vld [vmem:[%s21031_s26 + $0x38] ss:$12 sps:$4 sm:$0xff]  }
 0x116   :  { %1116 = vrot.lane.b32.xlu1 %v1067_v24, %s12999_s2  ;;  %v421_v36 = vpop.f32.mrb[26].mxu0  ;;  %v13479_v43 = vsel %vm330_vm1, %v1196_v59, %v1198_v26  ;;  %v2621_v31 = vshrl.u32 %v13507_v3, 16 }
 0x117   :  { %v581_v1 = vmax.f32 %v419_v29, 0.0  ;;  %v422_v44 = vadd.f32 %v13289_v39, %v421_v36  ;;  %v12115_v47 = vpop.f32.mrb[27].mxu0  ;;  %v1573_v30 = vor.u32 %v1572_v41, %v1569_v35 }
 0x118   :  { %v2600_v47 = vshll.u32 %v13495_v58, 16 }
 0x119   :  { %v13488_v53 = vpack.c.bf16 %v581_v1, %v580_v16  ;;  %v582_v55 = vmax.f32 %v422_v44, 0.0  ;;  %1763 = vrot.lane.b32.xlu0 %v1565_v13, %s13000_s25  ;;  %v1574_v63 = vsel %vm1530_vm8, %v1564_v14, %v1573_v30  ;;  %v13522_v16 = vld [vmem:[%s21031_s26 + $0x8] ss:$12 sps:$4 sm:$0xff]   ;;  %v2597_v13 = vshrl.u32 %v13495_v58, 16 }
 0x11a   :  { %986 = vrot.lane.b32.xlu1 %v809_v57, %s12998_s22  ;;  %v2574_v44 = vshrl.u32 %v13522_v16, 16  ;;  %v13561_v58 = vrot.slane %v2621_v31, 7 }
 0x11b   :  { %v13500_v59 = vpack.c.bf16 %v582_v55, %v581_v1  ;;  %v1436_v61 = vrot.slane %v13488_v53, 2  ;;  %v1576_v62 = vshrl.u32 %v13488_v53, 16  ;;  %v1579_v4 = vshll.u32 %v13488_v53, 16 }
 0x11c   :  { %v426_v2 = vpop.f32.mrb[28].mxu0  ;;  %v1200_v22 = vrot.slane %v13488_v53, 3  ;;  %v1069_v1 = vsel %vm1058_vm4, %v1066_v9, %v1068_v8  ;;  %v13543_v46 = vrot.slane %v2597_v13, 7  ;;  %v812_v9 = vor.u32 %v810_v32, %v808_v33 }
 0x11d   :  { %21032 = vst [vmem:[#allocation17_spill] sm:$0xff] %v13500_v59  ;;  %v427_v6 = vadd.f32 %v13289_v39, %v426_v2  ;;  %1383 = vrot.lane.b32.xlu0 %v13466_v17, %s12998_s22  ;;  %v12118_v7 = vpop.f32.mrb[29].mxu0  ;;  %v13517_v14 = vsel %vm1426_vm7, %v1434_v20, %v1436_v61  ;;  %v1578_v15 = vrot.slane %v1576_v62, 2  ;;  %v1581_v23 = vrot.slane %v1579_v4, 3  ;;  %v13566_v2 = vld [vmem:[%s21031_s26 + $0x68] ss:$12 sps:$4 sm:$0xff]  }
 0x11e   :  { %1246 = vrot.lane.b32.xlu1 %v13457_v5, %s13000_s25  ;;  %v429_v21 = vpop.f32.mrb[30].mxu0  ;;  %v13528_v24 = vsel %vm330_vm1, %v1198_v26, %v1200_v22  ;;  %v13540_v26 = vrot.slane %v814_v45, 1  ;;  %v2576_v31 = vrot.slane %v2574_v44, 7 }
 0x11f   :  { %v583_v25 = vmax.f32 %v427_v6, 0.0  ;;  %v430_v20 = vadd.f32 %v13289_v39, %v429_v21  ;;  %v12119_v29 = vpop.f32.mrb[31].mxu0  ;;  %v1582_v35 = vor.u32 %v1581_v23, %v1578_v15  ;;  %v13572_v6 = vsel %vm1292_vm6, %v13428_v40, %v1305_v27 }
 0x120   :  { %21034 = vst [vmem:[#allocation19_spill] sm:$0xff] %v13572_v6  ;;  %v817_v33 = vsel %vm773_vm5, %v812_v9, %v13540_v26  ;;  %v2624_v21 = vshll.u32 %v13507_v3, 16  ;;  %v2577_v3 = vshll.u32 %v13522_v16, 16  ;;  %v13608_v16 = vld [vmem:[%s21031_s26 + $0x80] ss:$12 sps:$4 sm:$0xff]  }
 0x121   :  { %v13532_v36 = vpack.c.bf16 %v583_v25, %v582_v55  ;;  %v584_v41 = vmax.f32 %v430_v20, 0.0  ;;  %1484 = vrot.lane.b32.xlu0 %v1435_v34, %s12999_s2  ;;  %v13550_v34 = vld [vmem:[%s21031_s26 + $0x50] ss:$12 sps:$4 sm:$0xff]   ;;  %v13553_v53 = vsel %vm1530_vm8, %v1573_v30, %v1582_v35  ;;  %v2696_v54 = vshll.u32 %v13608_v16, 16 }
 0x122   :  { %1118 = vrot.lane.b32.xlu1 %v1069_v1, %s12999_s2  ;;  %v2645_v23 = vshrl.u32 %v13550_v34, 16 }
 0x123   :  { %v13555_v55 = vpack.c.bf16 %v584_v41, %v583_v25  ;;  %v1438_v57 = vrot.slane %v13532_v36, 2  ;;  %v1585_v45 = vshrl.u32 %v13532_v36, 16  ;;  %v1588_v30 = vshll.u32 %v13532_v36, 16 }
 0x124   :  { %v434_v62 = vpop.f32.mrb[32].mxu0  ;;  %v1202_v4 = vrot.slane %v13532_v36, 3  ;;  %v2669_v36 = vshrl.u32 %v13566_v2, 16  ;;  %v13598_v44 = vrot.slane %v2645_v23, 7 }
 0x125   :  { %21033 = vst [vmem:[#allocation18_spill] sm:$0xff] %v13555_v55  ;;  %v435_v32 = vadd.f32 %v13289_v39, %v434_v62  ;;  %1765 = vrot.lane.b32.xlu0 %v1574_v63, %s13000_s25  ;;  %v12122_v7 = vpop.f32.mrb[33].mxu0  ;;  %v13579_v15 = vsel %vm1426_vm7, %v1436_v61, %v1438_v57  ;;  %v1587_v13 = vrot.slane %v1585_v45, 2  ;;  %v1590_v27 = vrot.slane %v1588_v30, 3 }
 0x126   :  { %988 = vrot.lane.b32.xlu1 %v817_v33, %s12998_s22  ;;  %v437_v40 = vpop.f32.mrb[34].mxu0  ;;  %v13585_v25 = vsel %vm330_vm1, %v1200_v22, %v1202_v4  ;;  %v20721_v61 = vrot.slane %v13466_v17, 1  ;;  %v20720_v22 = vshll.u32 %v13466_v17, 16  ;;  %v2602_v62 = vor.u32 %v2600_v47, %v13543_v46 }
 0x127   :  { %21035 = vst [vmem:[#allocation20_spill] sm:$0xff] %v13585_v25  ;;  %v585_v63 = vmax.f32 %v435_v32, 0.0  ;;  %v438_v20 = vadd.f32 %v13289_v39, %v437_v40  ;;  %v12123_v29 = vpop.f32.mrb[35].mxu0  ;;  %v1591_v1 = vor.u32 %v1590_v27, %v1587_v13  ;;  %v2626_v30 = vor.u32 %v2624_v21, %v13561_v58 }
 0x128   :  { %v13620_v21 = vrot.slane %v2669_v36, 7  ;;  %v2672_v36 = vshll.u32 %v13566_v2, 16  ;;  %v13652_v2 = vld [vmem:[%s21031_s26 + $0xb0] ss:$12 sps:$4 sm:$0xff]  }
 0x129   :  { %v13591_v9 = vpack.c.bf16 %v585_v63, %v584_v41  ;;  %1385 = vrot.lane.b32.xlu0 %v13500_v59, %s12998_s22  ;;  %v586_v45 = vmax.f32 %v438_v20, 0.0  ;;  %v13603_v32 = vsel %vm1530_vm8, %v1582_v35, %v1591_v1  ;;  %v2648_v41 = vshll.u32 %v13550_v34, 16 }
 0x12a   :  { %1248 = vrot.lane.b32.xlu1 %v13479_v43, %s13000_s25  ;;  %v1071_v35 = vsel %vm1058_vm4, %v1068_v8, %v20721_v61 }
 0x12b   :  { %v13611_v33 = vpack.c.bf16 %v586_v45, %v585_v63  ;;  %v1440_v47 = vrot.slane %v13591_v9, 2  ;;  %v1594_v7 = vshrl.u32 %v13591_v9, 16  ;;  %v1597_v23 = vshll.u32 %v13591_v9, 16 }
 0x12c   :  { %v442_v13 = vpop.f32.mrb[36].mxu0  ;;  %v1204_v40 = vrot.slane %v13591_v9, 3  ;;  %v13629_v63 = vrot.slane %v20720_v22, 1  ;;  %v2693_v9 = vshrl.u32 %v13608_v16, 16 }
 0x12d   :  { %21036 = vst [vmem:[#allocation21_spill] sm:$0xff] %v13611_v33  ;;  %v443_v34 = vadd.f32 %v13289_v39, %v442_v13  ;;  %1486 = vrot.lane.b32.xlu0 %v13517_v14, %s12999_s2  ;;  %v12126_v27 = vpop.f32.mrb[37].mxu0  ;;  %v13632_v20 = vsel %vm1426_vm7, %v1438_v57, %v1440_v47  ;;  %v1596_v8 = vrot.slane %v1594_v7, 2  ;;  %v1599_v13 = vrot.slane %v1597_v23, 3  ;;  %v13643_v14 = vld [vmem:[%s21031_s26 + $0x98] ss:$12 sps:$4 sm:$0xff]  }
 0x12e   :  { %1120 = vrot.lane.b32.xlu1 %v1071_v35, %s12999_s2  ;;  %v445_v29 = vpop.f32.mrb[38].mxu0  ;;  %v13638_v19 = vsel %vm330_vm1, %v1202_v4, %v1204_v40  ;;  %v820_v57 = vor.u32 %v818_v28, %v13540_v26  ;;  %v13654_v4 = vor.u32 %v2577_v3, %v2576_v31  ;;  %v13657_v23 = vsel %vm1292_vm6, %v2576_v31, %v2602_v62 }
 0x12f   :  { %21037 = vst [vmem:[#allocation22_spill] sm:$0xff] %v13638_v19  ;;  %v587_v27 = vmax.f32 %v443_v34, 0.0  ;;  %v446_v7 = vadd.f32 %v13289_v39, %v445_v29  ;;  %v12127_v35 = vpop.f32.mrb[39].mxu0  ;;  %21039 = vst [vmem:[#allocation24_spill] sm:$0xff] %v13657_v23  ;;  %v13661_v34 = vsel %vm1292_vm6, %v13543_v46, %v2626_v30  ;;  %v1600_v50 = vor.u32 %v1599_v13, %v1596_v8 }
 0x130   :  { %21038 = vst [vmem:[#allocation23_spill] sm:$0xff] %v13654_v4  ;;  %21040 = vst [vmem:[#allocation25_spill] sm:$0xff] %v13661_v34  ;;  %v13664_v28 = vor.u32 %v2648_v41, %v13598_v44  ;;  %v825_v3 = vsel %vm773_vm5, %v820_v57, %v13629_v63  ;;  %v13674_v31 = vor.u32 %v2672_v36, %v13620_v21  ;;  %v13676_v46 = vrot.slane %v2693_v9, 7 }
 0x131   :  { %v13666_v26 = vpack.c.bf16 %v587_v27, %v586_v45  ;;  %1767 = vrot.lane.b32.xlu0 %v13553_v53, %s13000_s25  ;;  %v588_v29 = vmax.f32 %v446_v7, 0.0  ;;  %v13679_v62 = vsel %vm1530_vm8, %v1591_v1, %v1600_v50  ;;  %v2717_v45 = vshrl.u32 %v13643_v14, 16  ;;  %v13685_v53 = vld [vmem:[%s21031_s26 + $0xc8] ss:$12 sps:$4 sm:$0xff]   ;;  %v13695_v1 = vld [vmem:[%s21031_s26 + $0xe0] ss:$12 sps:$4 sm:$0xff]  }
 0x132   :  { %990 = vrot.lane.b32.xlu1 %v825_v3, %s12998_s22  ;;  %v2741_v36 = vshrl.u32 %v13652_v2, 16  ;;  %v826_v57 = vshrl.u32 %v13466_v17, 16  ;;  %v2789_v16 = vshrl.u32 %v13695_v1, 16 }
 0x133   :  { %v13687_v30 = vpack.c.bf16 %v588_v29, %v587_v27  ;;  %v1442_v41 = vrot.slane %v13666_v26, 2  ;;  %v1603_v8 = vshrl.u32 %v13666_v26, 16  ;;  %v1606_v7 = vshll.u32 %v13666_v26, 16 }
 0x134   :  { %v450_v9 = vpop.f32.mrb[40].mxu0  ;;  %v1206_v27 = vrot.slane %v13666_v26, 3  ;;  %v13716_v6 = vrot.slane %v2717_v45, 7  ;;  %v13721_v60 = vrot.slane %v2741_v36, 7  ;;  %v12627_v36 = vld [vmem:[%s21031_s26 + $0xf8] ss:$12 sps:$4 sm:$0xff]  }
 0x135   :  { %21041 = vst [vmem:[#allocation26_spill] sm:$0xff] %v13687_v30  ;;  %v451_v35 = vadd.f32 %v13289_v39, %v450_v9  ;;  %1387 = vrot.lane.b32.xlu0 %v13555_v55, %s12998_s22  ;;  %v12130_v3 = vpop.f32.mrb[41].mxu0  ;;  %v13706_v22 = vsel %vm1426_vm7, %v1440_v47, %v1442_v41  ;;  %v1605_v61 = vrot.slane %v1603_v8, 2  ;;  %v1608_v51 = vrot.slane %v1606_v7, 3 }
 0x136   :  { %1250 = vrot.lane.b32.xlu1 %v13528_v24, %s13000_s25  ;;  %v453_v13 = vpop.f32.mrb[42].mxu0  ;;  %v13712_v26 = vsel %vm330_vm1, %v1204_v40, %v1206_v27  ;;  %v2765_v9 = vshrl.u32 %v13685_v53, 16  ;;  %v2720_v47 = vshll.u32 %v13643_v14, 16  ;;  %v13719_v8 = vrot.slane %v826_v57, 7 }
 0x137   :  { %21042 = vst [vmem:[#allocation27_spill] sm:$0xff] %v13712_v26  ;;  %v589_v52 = vmax.f32 %v451_v35, 0.0  ;;  %v454_v3 = vadd.f32 %v13289_v39, %v453_v13  ;;  %v12131_v0 = vpop.f32.mrb[43].mxu0  ;;  %v1609_v12 = vor.u32 %v1608_v51, %v1605_v61  ;;  %v21043_v40 = vrot.slane %v13500_v59, 1 }
 0x138   :  { %v21044_v0 = vrot.slane %v13466_v17, 1  ;;  %v21045_v14 = vshll.u32 %v13500_v59, 16  ;;  %v2744_v61 = vshll.u32 %v13652_v2, 16 }
 0x139   :  { %v13724_v7 = vpack.c.bf16 %v589_v52, %v588_v29  ;;  %1488 = vrot.lane.b32.xlu0 %v13579_v15, %s12999_s2  ;;  %v590_v13 = vmax.f32 %v454_v3, 0.0  ;;  %v13737_v51 = vsel %vm1530_vm8, %v1600_v50, %v1609_v12  ;;  %v13740_v29 = vrot.slane %v2765_v9, 7 }
 0x13a   :  { %v1073_v45 = vsel %vm1058_vm4, %v21044_v0, %v21043_v40  ;;  %v832_v35 = vrot.slane %v21045_v14, 1  ;;  %v2768_v15 = vshll.u32 %v13685_v53, 16  ;;  %v828_v3 = vor.u32 %v826_v57, %v13629_v63 }
 0x13b   :  { %1122 = vrot.lane.b32.xlu1 %v1073_v45, %s12999_s2  ;;  %v13746_v40 = vpack.c.bf16 %v590_v13, %v589_v52  ;;  %v1444_v0 = vrot.slane %v13724_v7, 2  ;;  %v1612_v45 = vshrl.u32 %v13724_v7, 16  ;;  %v1615_v14 = vshll.u32 %v13724_v7, 16 }
 0x13c   :  { %v458_v50 = vpop.f32.mrb[44].mxu0  ;;  %v1208_v2 = vrot.slane %v13724_v7, 3  ;;  %v13753_v9 = vrot.slane %v2789_v16, 7  ;;  %v21047_v53 = vshll.u32 %v13466_v17, 16  ;;  %v833_v63 = vsel %vm773_vm5, %v828_v3, %v832_v35 }
 0x13d   :  { %21046 = vst [vmem:[#allocation28_spill] sm:$0xff] %v13746_v40  ;;  %v459_v52 = vadd.f32 %v13289_v39, %v458_v50  ;;  %1769 = vrot.lane.b32.xlu0 %v13603_v32, %s13000_s25  ;;  %v12134_v57 = vpop.f32.mrb[45].mxu0  ;;  %v13763_v42 = vsel %vm1426_vm7, %v1442_v41, %v1444_v0  ;;  %v1614_v11 = vrot.slane %v1612_v45, 2  ;;  %v1617_v7 = vrot.slane %v1615_v14, 3 }
 0x13e   :  { %v1308_v38 = vor.u32 %v13719_v8, %v21047_v53  ;;  %v461_v16 = vpop.f32.mrb[46].mxu0  ;;  %v13767_v17 = vsel %vm330_vm1, %v1206_v27, %v1208_v2  ;;  %v2792_v53 = vshll.u32 %v13695_v1, 16  ;;  %v2813_v50 = vshrl.u32 %v12627_v36, 16 }
 0x13f   :  { %992 = vrot.lane.b32.xlu1 %v833_v63, %s12998_s22  ;;  %21048 = vst [vmem:[#allocation29_spill] sm:$0xff] %v13767_v17  ;;  %v591_v48 = vmax.f32 %v459_v52, 0.0  ;;  %v2698_v32 = vor.u32 %v2696_v54, %v13676_v46  ;;  %v462_v3 = vadd.f32 %v13289_v39, %v461_v16  ;;  %v12135_v57 = vpop.f32.mrb[47].mxu0  ;;  %v2722_v41 = vor.u32 %v2720_v47, %v13716_v6 }
 0x140   :  { %v20734_v45 = vrot.slane %v13555_v55, 1  ;;  %v2746_v63 = vor.u32 %v2744_v61, %v13721_v60  ;;  %v1618_v10 = vor.u32 %v1617_v7, %v1614_v11  ;;  %v2770_v14 = vor.u32 %v2768_v15, %v13740_v29  ;;  %v13793_v15 = vld [vmem:[%s21031_s26 + $0x110] ss:$12 sps:$4 sm:$0xff]  }
 0x141   :  { %v13776_v27 = vpack.c.bf16 %v591_v48, %v590_v13  ;;  %1389 = vrot.lane.b32.xlu0 %v13611_v33, %s12998_s22  ;;  %v592_v1 = vmax.f32 %v462_v3, 0.0  ;;  %v20730_v54 = vshrl.u32 %v13500_v59, 16  ;;  %v2794_v11 = vor.u32 %v2792_v53, %v13753_v9 }
 0x142   :  { %v13785_v47 = vsel %vm1530_vm8, %v1609_v12, %v1618_v10  ;;  %v13788_v61 = vrot.slane %v2813_v50, 7  ;;  %v2816_v13 = vshll.u32 %v12627_v36, 16  ;;  %v21049_v53 = vrot.slane %v13500_v59, 1 }
 0x143   :  { %1252 = vrot.lane.b32.xlu1 %v13585_v25, %s13000_s25  ;;  %v13795_v16 = vpack.c.bf16 %v592_v1, %v591_v48  ;;  %v836_v7 = vor.u32 %v20730_v54, %v832_v35  ;;  %v1446_v3 = vrot.slane %v13776_v27, 2  ;;  %v1621_v12 = vshrl.u32 %v13776_v27, 16 }
 0x144   :  { %v466_v57 = vpop.f32.mrb[48].mxu0  ;;  %v1075_v36 = vsel %vm1058_vm4, %v21049_v53, %v20734_v45  ;;  %v1624_v50 = vshll.u32 %v13776_v27, 16  ;;  %v1210_v52 = vrot.slane %v13776_v27, 3  ;;  %v13810_v48 = vsel %vm1292_vm6, %v13486_v37, %v1308_v38 }
 0x145   :  { %21050 = vst [vmem:[#allocation30_spill] sm:$0xff] %v13810_v48  ;;  %v467_v35 = vadd.f32 %v13289_v39, %v466_v57  ;;  %1490 = vrot.lane.b32.xlu0 %v13632_v20, %s12999_s2  ;;  %v21051_v54 = vshll.u32 %v13555_v55, 16  ;;  %v12138_v25 = vpop.f32.mrb[49].mxu0  ;;  %v13818_v17 = vsel %vm1426_vm7, %v1444_v0, %v1446_v3  ;;  %v1623_v53 = vrot.slane %v1621_v12, 2 }
 0x146   :  { %v469_v27 = vpop.f32.mrb[50].mxu0  ;;  %v1626_v45 = vrot.slane %v1624_v50, 3  ;;  %v13822_v38 = vsel %vm330_vm1, %v1208_v2, %v1210_v52  ;;  %v2818_v37 = vor.u32 %v2816_v13, %v13788_v61  ;;  %v2837_v57 = vshrl.u32 %v13793_v15, 16  ;;  %v13840_v2 = vld [vmem:[%s21031_s26 + $0x18] ss:$12 sps:$4 sm:$0xff]  }
 0x147   :  { %v840_v49 = vrot.slane %v21051_v54, 1  ;;  %1124 = vrot.lane.b32.xlu1 %v1075_v36, %s12999_s2  ;;  %21052 = vst [vmem:[#allocation31_spill] sm:$0xff] %v13822_v38  ;;  %v13829_v20 = vsel %vm1292_vm6, %v13561_v58, %v13664_v28  ;;  %v13834_v25 = vsel %vm1292_vm6, %v13598_v44, %v13674_v31  ;;  %v593_v0 = vmax.f32 %v467_v35, 0.0  ;;  %v12139_v12 = vpop.f32.mrb[51].mxu0 }
 0x148   :  { %21053 = vst [vmem:[#allocation32_spill] sm:$0xff] %v13829_v20  ;;  %21054 = vst [vmem:[#allocation33_spill] sm:$0xff] %v13834_v25  ;;  %v470_v54 = vadd.f32 %v13289_v39, %v469_v27  ;;  %v13844_v13 = vsel %vm1292_vm6, %v13620_v21, %v2698_v32  ;;  %v13848_v58 = vsel %vm1292_vm6, %v13676_v46, %v2722_v41  ;;  %v2840_v12 = vshll.u32 %v13793_v15, 16 }
 0x149   :  { %21055 = vst [vmem:[#allocation34_spill] sm:$0xff] %v13844_v13  ;;  %21056 = vst [vmem:[#allocation35_spill] sm:$0xff] %v13848_v58  ;;  %v13852_v44 = vsel %vm1292_vm6, %v13716_v6, %v2746_v63  ;;  %v1627_v28 = vor.u32 %v1626_v45, %v1623_v53  ;;  %v13854_v31 = vpack.c.bf16 %v593_v0, %v592_v1  ;;  %1771 = vrot.lane.b32.xlu0 %v13679_v62, %s13000_s25 }
 0x14a   :  { %21057 = vst [vmem:[#allocation36_spill] sm:$0xff] %v13852_v44  ;;  %v841_v36 = vsel %vm773_vm5, %v836_v7, %v840_v49  ;;  %v594_v50 = vmax.f32 %v470_v54, 0.0  ;;  %v13861_v21 = vsel %vm1292_vm6, %v13721_v60, %v2770_v14  ;;  %v13869_v6 = vsel %vm1292_vm6, %v13740_v29, %v2794_v11  ;;  %v13882_v60 = vld [vmem:[%s21031_s26] ss:$12 sps:$4 sm:$0xff]  }
 0x14b   :  { %21058 = vst [vmem:[#allocation37_spill] sm:$0xff] %v13861_v21  ;;  %994 = vrot.lane.b32.xlu1 %v841_v36, %s12998_s22  ;;  %v13865_v46 = vsel %vm1530_vm8, %v1618_v10, %v1627_v28  ;;  %21059 = vst [vmem:[#allocation38_spill] sm:$0xff] %v13869_v6  ;;  %v13873_v32 = vsel %vm1292_vm6, %v13753_v9, %v2818_v37  ;;  %v13875_v62 = vrot.slane %v2837_v57, 7  ;;  %v2581_v10 = vshrl.u32 %v13840_v2, 16 }
 0x14c   :  { %21060 = vst [vmem:[#allocation39_spill] sm:$0xff] %v13873_v32  ;;  %v13877_v41 = vpack.c.bf16 %v594_v50, %v593_v0  ;;  %v1448_v45 = vrot.slane %v13854_v31, 2  ;;  %v1630_v29 = vshrl.u32 %v13854_v31, 16  ;;  %v13889_v63 = vmul.bf16 %v13654_v4, %v13380_v56  ;;  %v474_v9 = vpop.f32.mrb[52].mxu0 }
 0x14d   :  { %21061 = vst [vmem:[#allocation40_spill] sm:$0xff] %v13875_v62  ;;  %v1633_v1 = vshll.u32 %v13854_v31, 16  ;;  %v1212_v11 = vrot.slane %v13854_v31, 3  ;;  %1391 = vrot.lane.b32.xlu0 %v13687_v30, %s12998_s22  ;;  %v475_v7 = vadd.f32 %v13289_v39, %v474_v9  ;;  %v12142_v53 = vpop.f32.mrb[53].mxu0  ;;  %v20735_v37 = vshrl.u32 %v13555_v55, 16 }
 0x14e   :  { %v13899_v27 = vsel %vm1426_vm7, %v1446_v3, %v1448_v45  ;;  %v1632_v56 = vrot.slane %v1630_v29, 2  ;;  %v477_v57 = vpop.f32.mrb[54].mxu0  ;;  %v2560_v3 = vshrl.u32 %v13882_v60, 16  ;;  %v2584_v29 = vshll.u32 %v13840_v2, 16 }
 0x14f   :  { %1254 = vrot.lane.b32.xlu1 %v13638_v19, %s13000_s25  ;;  %v1635_v0 = vrot.slane %v1633_v1, 3  ;;  %v13905_v54 = vsel %vm330_vm1, %v1210_v52, %v1212_v11  ;;  %v595_v31 = vmax.f32 %v475_v7, 0.0  ;;  %v478_v36 = vadd.f32 %v13289_v39, %v477_v57  ;;  %v12143_v9 = vpop.f32.mrb[55].mxu0 }
 0x150   :  { %21062 = vst [vmem:[#allocation41_spill] sm:$0xff] %v13905_v54  ;;  %v3382_v53 = vshll.u32 %v13889_v63, 16  ;;  %v844_v35 = vor.u32 %v20735_v37, %v840_v49  ;;  %v13914_v14 = vrot.slane %v2581_v10, 7  ;;  %v21063_v39 = vrot.slane %v13611_v33, 1 }
 0x151   :  { %v1636_v1 = vor.u32 %v1635_v0, %v1632_v56  ;;  %v13916_v52 = vpack.c.bf16 %v595_v31, %v594_v50  ;;  %1492 = vrot.lane.b32.xlu0 %v13706_v22, %s12999_s2  ;;  %v21064_v15 = vrot.slane %v13555_v55, 1  ;;  %v21065_v2 = vshll.u32 %v13611_v33, 16 }
 0x152   :  { %v596_v9 = vmax.f32 %v478_v36, 0.0  ;;  %v13929_v49 = vmul.bf16 %v13657_v23, %v13421_v18  ;;  %v2563_v50 = vshll.u32 %v13882_v60, 16  ;;  %v2842_v10 = vor.u32 %v2840_v12, %v13875_v62  ;;  %v13945_v60 = vld [vmem:[%s21031_s26 + $0x4] ss:$12 sps:$4 sm:$0xff]  }
 0x153   :  { %v1077_v7 = vsel %vm1058_vm4, %v21064_v15, %v21063_v39  ;;  %v848_v57 = vrot.slane %v21065_v2, 1  ;;  %v13934_v22 = vsel %vm1530_vm8, %v1627_v28, %v1636_v1  ;;  %v2562_v0 = vrot.slane %v2560_v3, 7  ;;  %v13955_v3 = vld [vmem:[%s21018_s28] ss:$0 sm:$0xff] }
 0x154   :  { %1126 = vrot.lane.b32.xlu1 %v1077_v7, %s12999_s2  ;;  %v13937_v56 = vpack.c.bf16 %v596_v9, %v595_v31  ;;  %v1450_v39 = vrot.slane %v13916_v52, 2  ;;  %v1639_v36 = vshrl.u32 %v13916_v52, 16  ;;  %v3384_v15 = vrot.slane %v3382_v53, 1  ;;  %v482_v2 = vpop.f32.mrb[56].mxu0 }
 0x155   :  { %v2586_v18 = vor.u32 %v2584_v29, %v13914_v14  ;;  %v1642_v28 = vshll.u32 %v13916_v52, 16  ;;  %v1214_v12 = vrot.slane %v13916_v52, 3  ;;  %1773 = vrot.lane.b32.xlu0 %v13737_v51, %s13000_s25  ;;  %v849_v31 = vsel %vm773_vm5, %v844_v35, %v848_v57  ;;  %v12146_v53 = vpop.f32.mrb[57].mxu0 }
 0x156   :  { %v483_v29 = vadd.f32 %v13955_v3, %v482_v2  ;;  %v13959_v7 = vsel %vm1426_vm7, %v1448_v45, %v1450_v39  ;;  %v1641_v37 = vrot.slane %v1639_v36, 2  ;;  %v3387_v23 = vshll.u32 %v13929_v49, 16  ;;  %v485_v52 = vpop.f32.mrb[58].mxu0 }
 0x157   :  { %v1644_v51 = vrot.slane %v1642_v28, 3  ;;  %v13964_v35 = vsel %vm330_vm1, %v1212_v11, %v1214_v12  ;;  %v13968_v4 = vsel %vm1292_vm6, %v13788_v61, %v2842_v10  ;;  %v3380_v2 = vshrl.u32 %v13889_v63, 16  ;;  %v12147_v62 = vpop.f32.mrb[59].mxu0 }
 0x158   :  { %996 = vrot.lane.b32.xlu1 %v849_v31, %s12998_s22  ;;  %21066 = vst [vmem:[#allocation42_spill] sm:$0xff] %v13964_v35  ;;  %21067 = vst [vmem:[#allocation43_spill] sm:$0xff] %v13968_v4  ;;  %v597_v53 = vmax.f32 %v483_v29, 0.0  ;;  %v486_v45 = vadd.f32 %v13955_v3, %v485_v52  ;;  %v13972_v36 = vor.u32 %v2563_v50, %v2562_v0  ;;  %v20741_v32 = vrot.slane %v13687_v30, 1 }
 0x159   :  { %v13976_v31 = vsel %vm1292_vm6, %v2562_v0, %v2586_v18  ;;  %v2567_v11 = vshrl.u32 %v13945_v60, 16  ;;  %v1645_v28 = vor.u32 %v1644_v51, %v1641_v37  ;;  %v13979_v6 = vor.u32 %v3384_v15, %v3380_v2  ;;  %1393 = vrot.lane.b32.xlu0 %v13746_v40, %s12998_s22  ;;  %v14016_v2 = vld [vmem:[%s21031_s26 + $0x1c] ss:$12 sps:$4 sm:$0xff]  }
 0x15a   :  { %21068 = vst [vmem:[#allocation44_spill] sm:$0xff] %v13972_v36  ;;  %21069 = vst [vmem:[#allocation45_spill] sm:$0xff] %v13976_v31  ;;  %v13983_v61 = vpack.c.bf16 %v597_v53, %v596_v9  ;;  %v20746_v63 = vshll.u32 %v13687_v30, 16  ;;  %v598_v62 = vmax.f32 %v486_v45, 0.0  ;;  %v13986_v50 = vrot.slane %v3387_v23, 1 }
 0x15b   :  { %21070 = vst [vmem:[#allocation46_spill] sm:$0xff] %v13979_v6  ;;  %v13990_v10 = vmul.bf16 %v13661_v34, %v13457_v5  ;;  %v20742_v37 = vshrl.u32 %v13611_v33, 16  ;;  %v13996_v0 = vsel %vm1530_vm8, %v1636_v1, %v1645_v28  ;;  %v21072_v9 = vshrl.u32 %v13500_v59, 16 }
 0x15c   :  { %21071 = vst [vmem:[#allocation47_spill] sm:$0xff] %v13986_v50  ;;  %1256 = vrot.lane.b32.xlu1 %v13712_v26, %s13000_s25  ;;  %v14002_v18 = vpack.c.bf16 %v598_v62, %v597_v53  ;;  %v1452_v23 = vrot.slane %v13983_v61, 2  ;;  %v1648_v29 = vshrl.u32 %v13983_v61, 16  ;;  %v21073_v5 = vrot.slane %v13611_v33, 1  ;;  %v490_v51 = vpop.f32.mrb[60].mxu0 }
 0x15d   :  { %v14000_v15 = vrot.slane %v21072_v9, 7  ;;  %v852_v1 = vor.u32 %v20742_v37, %v848_v57  ;;  %v1651_v53 = vshll.u32 %v13983_v61, 16  ;;  %1494 = vrot.lane.b32.xlu0 %v13763_v42, %s12999_s2  ;;  %v856_v9 = vrot.slane %v20746_v63, 1 }
 0x15e   :  { %v1079_v52 = vsel %vm1058_vm4, %v21073_v5, %v20741_v32  ;;  %v491_v5 = vadd.f32 %v13955_v3, %v490_v51  ;;  %v12150_v32 = vpop.f32.mrb[61].mxu0  ;;  %v14026_v57 = vsel %vm1426_vm7, %v1450_v39, %v1452_v23  ;;  %v1650_v37 = vrot.slane %v1648_v29, 2 }
 0x15f   :  { %v3407_v34 = vshrl.u32 %v13929_v49, 16  ;;  %v493_v6 = vpop.f32.mrb[62].mxu0  ;;  %v14030_v4 = vrot.slane %v2567_v11, 7  ;;  %v1653_v45 = vrot.slane %v1651_v53, 3  ;;  %v21074_v42 = vrot.slane %v13983_v61, 3  ;;  %v14041_v39 = vpop.permute.xlu0 %1373 }
 0x160   :  { %1128 = vrot.lane.b32.xlu1 %v1079_v52, %s12999_s2  ;;  %v14039_v32 = vmul.bf16 %v13829_v20, %v13479_v43  ;;  %v599_v29 = vmax.f32 %v491_v5, 0.0  ;;  %v494_v49 = vadd.f32 %v13955_v3, %v493_v6  ;;  %v12151_v51 = vpop.f32.mrb[63].mxu0  ;;  %v21076_v52 = vshll.u32 %v13500_v59, 16 }
 0x161   :  { %v14035_v21 = vsel %vm330_vm1, %v1214_v12, %v21074_v42  ;;  %v3411_v53 = vshll.u32 %v13990_v10, 16  ;;  %v2589_v12 = vshrl.u32 %v14016_v2, 16  ;;  %v1654_v42 = vor.u32 %v1653_v45, %v1650_v37  ;;  %1775 = vrot.lane.b32.xlu0 %v13785_v47, %s13000_s25 }
 0x162   :  { %21075 = vst [vmem:[#allocation48_spill] sm:$0xff] %v14035_v21  ;;  %v1311_v11 = vor.u32 %v14000_v15, %v21076_v52  ;;  %v14051_v43 = vor.u32 %v3407_v34, %v13986_v50  ;;  %v857_v6 = vsel %vm773_vm5, %v852_v1, %v856_v9  ;;  %v14056_v5 = vpack.c.bf16 %v599_v29, %v598_v62  ;;  %v14072_v62 = vpop.permute.xlu1 %1110 }
 0x163   :  { %v600_v51 = vmax.f32 %v494_v49, 0.0  ;;  %v14061_v20 = vmul.bf16 %v13834_v25, %v13528_v24  ;;  %v14065_v37 = vsel %vm1530_vm8, %v1645_v28, %v1654_v42  ;;  %v3435_v47 = vshll.u32 %v14039_v32, 16  ;;  %v14079_v24 = vld [vmem:[%s21031_s26 + $0x30] ss:$12 sps:$4 sm:$0xff]  }
 0x164   :  { %21077 = vst [vmem:[#allocation49_spill] sm:$0xff] %v14051_v43  ;;  %998 = vrot.lane.b32.xlu1 %v857_v6, %s12998_s22  ;;  %v14069_v34 = vsel %vm1292_vm6, %v13719_v8, %v1311_v11  ;;  %v1657_v28 = vshrl.u32 %v14056_v5, 16  ;;  %v14083_v49 = vrot.slane %v3411_v53, 1  ;;  %v14085_v6 = vpop.permute.xlu0 %980  ;;  %v498_v8 = vpop.f32.mrb[64].mxu0  ;;  %v14087_v11 = vrot.slane %v2589_v12, 7 }
 0x165   :  { %21078 = vst [vmem:[#allocation50_spill] sm:$0xff] %v14069_v34  ;;  %v14074_v1 = vpack.c.bf16 %v600_v51, %v599_v29  ;;  %v2592_v52 = vshll.u32 %v14016_v2, 16  ;;  %v1660_v29 = vshll.u32 %v14056_v5, 16  ;;  %1395 = vrot.lane.b32.xlu0 %v13795_v16, %s12998_s22  ;;  %v499_v25 = vadd.f32 %v13955_v3, %v498_v8  ;;  %v12154_v53 = vpop.f32.mrb[65].mxu0  ;;  %v21082_v2 = vld [vmem:[#allocation29_spill] sm:$0xff] }
 0x166   :  { %21080 = vst [vmem:[#allocation52_spill] sm:$0xff] %v14083_v49  ;;  %v21081_v43 = vrot.slane %v14056_v5, 2  ;;  %v3459_v12 = vshll.u32 %v14061_v20, 16  ;;  %v20754_v44 = vshrl.u32 %v13687_v30, 16  ;;  %v501_v26 = vpop.f32.mrb[66].mxu0  ;;  %v1659_v59 = vrot.slane %v1657_v28, 2 }
 0x167   :  { %21079 = vst [vmem:[#allocation51_spill] sm:$0xff] %v14074_v1  ;;  %v1662_v63 = vrot.slane %v1660_v29, 3  ;;  %v14105_v34 = vrot.slane %v3435_v47, 1  ;;  %v601_v45 = vmax.f32 %v499_v25, 0.0  ;;  %v14108_v8 = vadd.f32 %v13955_v3, %v501_v26  ;;  %v12155_v53 = vpop.f32.mrb[67].mxu0 }
 0x168   :  { %v14099_v50 = vsel %vm1426_vm7, %v1452_v23, %v21081_v43  ;;  %1258 = vrot.lane.b32.xlu1 %v21082_v2, %s13000_s25  ;;  %v2605_v23 = vshrl.u32 %v14079_v24, 16  ;;  %v14111_v43 = vpop.permute.xlu1 %1240  ;;  %v14113_v48 = vpop.permute.xlu0 %1375  ;;  %v860_v2 = vor.u32 %v20754_v44, %v856_v9  ;;  %v2594_v58 = vor.u32 %v2592_v52, %v14087_v11  ;;  %v14121_v47 = vld [vmem:[%s21031_s26 + $0x34] ss:$12 sps:$4 sm:$0xff]  }
 0x169   :  { %21083 = vst [vmem:[#allocation53_spill] sm:$0xff] %v14105_v34  ;;  %v14123_v25 = vor.u32 %v1662_v63, %v1659_v59  ;;  %v20756_v26 = vrot.slane %v14056_v5, 3  ;;  %1496 = vrot.lane.b32.xlu0 %v13818_v17, %s12999_s2  ;;  %v21084_v28 = vrot.slane %v13746_v40, 1  ;;  %v21085_v29 = vrot.slane %v13687_v30, 1 }
 0x16a   :  { %v21086_v52 = vshll.u32 %v13746_v40, 16  ;;  %v14135_v44 = vpack.c.bf16 %v601_v45, %v600_v51  ;;  %v602_v19 = vmax.f32 %v14108_v8, 0.0  ;;  %v3455_v59 = vshrl.u32 %v14039_v32, 16 }
 0x16b   :  { %v1081_v9 = vsel %vm1058_vm4, %v21085_v29, %v21084_v28  ;;  %v14139_v63 = vrot.slane %v3459_v12, 1  ;;  %v14144_v17 = vsel %vm1530_vm8, %v1654_v42, %v14123_v25  ;;  %v21089_v28 = vrot.slane %v13983_v61, 3 }
 0x16c   :  { %v864_v53 = vrot.slane %v21086_v52, 1  ;;  %1130 = vrot.lane.b32.xlu1 %v1081_v9, %s12999_s2  ;;  %21088 = vst [vmem:[#allocation55_spill] sm:$0xff] %v14144_v17  ;;  %v21091_v8 = vshrl.u32 %v13555_v55, 16  ;;  %v14157_v32 = vpack.c.bf16 %v602_v19, %v601_v45  ;;  %v14159_v12 = vrot.slane %v2605_v23, 7  ;;  %v14163_v52 = vpop.permute.xlu1 %1112 }
 0x16d   :  { %21087 = vst [vmem:[#allocation54_spill] sm:$0xff] %v14139_v63  ;;  %v14151_v51 = vsel %vm330_vm1, %v21089_v28, %v20756_v26  ;;  %v2608_v9 = vshll.u32 %v14079_v24, 16  ;;  %v3479_v42 = vshrl.u32 %v14061_v20, 16  ;;  %v21093_v61 = vshll.u32 %v13945_v60, 16  ;;  %v983_v20 = vpop.permute.xlu0 %982  ;;  %1777 = vrot.lane.b32.xlu0 %v13865_v46, %s13000_s25 }
 0x16e   :  { %21090 = vst [vmem:[#allocation56_spill] sm:$0xff] %v14151_v51  ;;  %v14155_v29 = vrot.slane %v21091_v8, 7  ;;  %21092 = vst [vmem:[#allocation57_spill] sm:$0xff] %v14157_v32  ;;  %v2613_v8 = vshrl.u32 %v14121_v47, 16  ;;  %v20760_v26 = vrot.slane %v14135_v44, 2  ;;  %v21095_v45 = vshrl.u32 %v13990_v10, 16 }
 0x16f   :  { %v14168_v28 = vor.u32 %v21093_v61, %v14030_v4  ;;  %v14178_v24 = vor.u32 %v3455_v59, %v14105_v34  ;;  %v865_v60 = vsel %vm773_vm5, %v860_v2, %v864_v53  ;;  %v14185_v61 = vsel %vm1292_vm6, %v14030_v4, %v2594_v58  ;;  %v506_v51 = vpop.f32.mrb[68].mxu0  ;;  %v14190_v10 = vld [vmem:[%s21031_s26 + $0x48] ss:$12 sps:$4 sm:$0xff]  }
 0x170   :  { %v14175_v23 = vor.u32 %v21095_v45, %v14083_v49  ;;  %21098 = vst [vmem:[#allocation61_spill] sm:$0xff] %v14185_v61  ;;  %v14193_v45 = vor.u32 %v3479_v42, %v14139_v63  ;;  %1000 = vrot.lane.b32.xlu1 %v865_v60, %s12998_s22  ;;  %v507_v46 = vadd.f32 %v13955_v3, %v506_v51  ;;  %v12158_v2 = vpop.f32.mrb[69].mxu0  ;;  %v21100_v4 = vrot.slane %v14056_v5, 2 }
 0x171   :  { %21094 = vst [vmem:[#allocation58_spill] sm:$0xff] %v14168_v28  ;;  %21097 = vst [vmem:[#allocation60_spill] sm:$0xff] %v14178_v24  ;;  %v21102_v24 = vld [vmem:[#allocation20_spill] sm:$0xff]  ;;  %v20764_v42 = vshrl.u32 %v13746_v40, 16  ;;  %v2610_v60 = vor.u32 %v2608_v9, %v14159_v12  ;;  %v21104_v59 = vshll.u32 %v13555_v55, 16  ;;  %v14214_v2 = vpop.permute.xlu1 %1478  ;;  %1397 = vrot.lane.b32.xlu0 %v13877_v41, %s12998_s22  ;;  %v1082_v9 = vrot.slane %v13795_v16, 1 }
 0x172   :  { %21096 = vst [vmem:[#allocation59_spill] sm:$0xff] %v14175_v23  ;;  %21099 = vst [vmem:[#allocation62_spill] sm:$0xff] %v14193_v45  ;;  %v14203_v58 = vsel %vm1426_vm7, %v21100_v4, %v20760_v26  ;;  %v14207_v23 = vmul.bf16 %v13844_v13, %v21102_v24  ;;  %v509_v45 = vpop.f32.mrb[70].mxu0  ;;  %v603_v63 = vmax.f32 %v507_v46, 0.0  ;;  %v14217_v4 = vrot.slane %v2613_v8, 7 }
 0x173   :  { %21101 = vst [vmem:[#allocation63_spill] sm:$0xff] %v14203_v58  ;;  %v1314_v51 = vor.u32 %v14155_v29, %v21104_v59  ;;  %v510_v34 = vadd.f32 %v13955_v3, %v509_v45  ;;  %v2616_v26 = vshll.u32 %v14121_v47, 16  ;;  %v21105_v24 = vshrl.u32 %v13611_v33, 16  ;;  %v12159_v49 = vpop.f32.mrb[71].mxu0 }
 0x174   :  { %21103 = vst [vmem:[#allocation20_spill] sm:$0xff] %v14207_v23  ;;  %v868_v59 = vor.u32 %v20764_v42, %v864_v53  ;;  %v2629_v46 = vshrl.u32 %v14190_v10, 16  ;;  %1260 = vrot.lane.b32.xlu1 %v13822_v38, %s13000_s25  ;;  %v21106_v47 = vshll.u32 %v13795_v16, 16  ;;  %v14234_v45 = vpack.c.bf16 %v603_v63, %v602_v19  ;;  %v14242_v53 = vpop.permute.xlu0 %1377 }
 0x175   :  { %v14222_v13 = vrot.slane %v21105_v24, 7  ;;  %v604_v24 = vmax.f32 %v510_v34, 0.0  ;;  %v14238_v55 = vsel %vm1292_vm6, %v14000_v15, %v1314_v51  ;;  %v1843_v58 = vsel %vm1841_vm9, 0.0|0.0, %v14085_v6  ;;  %v1243_v19 = vpop.permute.xlu1 %1242  ;;  %v514_v6 = vpop.f32.mrb[72].mxu0  ;;  %1498 = vrot.lane.b32.xlu0 %v13899_v27, %s12999_s2 }
 0x176   :  { %v872_v8 = vrot.slane %v21106_v47, 1  ;;  %21107 = vst [vmem:[#allocation64_spill] sm:$0xff] %v14238_v55  ;;  %v14246_v49 = vsel %vm1292_vm6, %v13914_v14, %v2610_v60  ;;  %v1666_v42 = vshrl.u32 %v14135_v44, 16  ;;  %v1669_v47 = vshll.u32 %v14135_v44, 16  ;;  %v21110_v55 = vld [vmem:[#allocation5_spill] sm:$0xff]  ;;  %v12162_v34 = vpop.f32.mrb[73].mxu0 }
 0x177   :  { %21108 = vst [vmem:[#allocation65_spill] sm:$0xff] %v14246_v49  ;;  %v14252_v15 = vpack.c.bf16 %v604_v24, %v603_v63  ;;  %v2618_v51 = vor.u32 %v2616_v26, %v14217_v4  ;;  %v1845_v32 = vsel %vm1841_vm9, %v21110_v55, %v983_v20  ;;  %v21111_v14 = vrot.slane %v13746_v40, 1  ;;  %v517_v55 = vpop.f32.mrb[74].mxu0 }
 0x178   :  { %v515_v23 = vadd.f32 %v13955_v3, %v514_v6  ;;  %v1668_v17 = vrot.slane %v1666_v42, 2  ;;  %v1896_v63 = vsel %vm1894_vm10, %v1843_v58, %v14072_v62  ;;  %v873_v26 = vsel %vm773_vm5, %v868_v59, %v872_v8  ;;  %v12163_v6 = vpop.f32.mrb[75].mxu0 }
 0x179   :  { %21109 = vst [vmem:[#allocation66_spill] sm:$0xff] %v14252_v15  ;;  %v1083_v60 = vsel %vm1058_vm4, %v21111_v14, %v1082_v9  ;;  %v14267_v38 = vrot.slane %v2629_v46, 7  ;;  %v1671_v20 = vrot.slane %v1669_v47, 3  ;;  %v1949_v27 = vsel %vm1947_vm11, %v1896_v63, %v14111_v43  ;;  %v14271_v15 = vpop.permute.xlu0 %1379  ;;  %v14277_v58 = vpop.permute.xlu1 %1114  ;;  %1779 = vrot.lane.b32.xlu0 %v13934_v22, %s13000_s25 }
 0x17a   :  { %1132 = vrot.lane.b32.xlu1 %v1083_v60, %s12999_s2  ;;  %v605_v14 = vmax.f32 %v515_v23, 0.0  ;;  %v2632_v34 = vshll.u32 %v14190_v10, 16  ;;  %v518_v42 = vadd.f32 %v13955_v3, %v517_v55  ;;  %v1898_v62 = vsel %vm1894_vm10, %v1845_v32, %v14163_v52 }
 0x17b   :  { %v20770_v59 = vrot.slane %v13877_v41, 1  ;;  %v21112_v46 = vshrl.u32 %v13795_v16, 16  ;;  %v21113_v43 = vshll.u32 %v13877_v41, 16  ;;  %v1952_v23 = vsel %vm1947_vm11, %v1898_v62, %v1243_v19 }
 0x17c   :  { %v14287_v10 = vpack.c.bf16 %v605_v14, %v604_v24  ;;  %v606_v63 = vmax.f32 %v518_v42, 0.0  ;;  %v14289_v55 = vor.u32 %v1671_v20, %v1668_v17  ;;  %v14292_v32 = vmul.bf16 %v13972_v36, %v1949_v27  ;;  %v21116_v24 = vld [vmem:[#allocation8_spill] sm:$0xff] }
 0x17d   :  { %v876_v47 = vor.u32 %v21112_v46, %v872_v8  ;;  %v880_v60 = vrot.slane %v21113_v43, 1  ;;  %v21114_v52 = vshrl.u32 %v13687_v30, 16  ;;  %v14301_v8 = vsel %vm1292_vm6, %v14087_v11, %v2618_v51  ;;  %v1481_v19 = vpop.permute.xlu0 %1480  ;;  %v1760_v42 = vpop.permute.xlu1 %1759  ;;  %1399 = vrot.lane.b32.xlu0 %v13937_v56, %s12998_s22 }
 0x17e   :  { %1002 = vrot.lane.b32.xlu1 %v873_v26, %s12998_s22  ;;  %21115 = vst [vmem:[#allocation5_spill] sm:$0xff] %v14301_v8  ;;  %v20769_v22 = vrot.slane %v14135_v44, 3  ;;  %v2028_v17 = vsel %vm1841_vm9, %v21116_v24, %v14041_v39  ;;  %v14308_v20 = vor.u32 %v2632_v34, %v14267_v38  ;;  %v14310_v27 = vpack.c.bf16 %v606_v63, %v605_v14  ;;  %v522_v34 = vpop.f32.mrb[76].mxu0 }
 0x17f   :  { %v14296_v6 = vrot.slane %v21114_v52, 7  ;;  %v14315_v26 = vsel %vm1530_vm8, %v14123_v25, %v14289_v55  ;;  %v2105_v11 = vsel %vm1894_vm10, %v2028_v17, %v14214_v2  ;;  %v14320_v51 = vmul.bf16 %v13976_v31, %v1952_v23  ;;  %v21119_v52 = vld [vmem:[#allocation11_spill] sm:$0xff] }
 0x180   :  { %v1085_v39 = vsel %vm1058_vm4, %v1082_v9, %v20770_v59  ;;  %v21117_v14 = vrot.slane %v14056_v5, 3  ;;  %v2157_v25 = vsel %vm1947_vm11, %v2105_v11, %v1760_v42  ;;  %v881_v2 = vsel %vm773_vm5, %v876_v47, %v880_v60  ;;  %v12166_v9 = vpop.f32.mrb[77].mxu0 }
 0x181   :  { %v523_v43 = vadd.f32 %v13955_v3, %v522_v34  ;;  %v3358_v23 = vshll.u32 %v14292_v32, 16  ;;  %v2031_v5 = vsel %vm1841_vm9, %v21119_v52, %v14113_v48  ;;  %v3235_v24 = vmul.bf16 %v14168_v28, %v2157_v25  ;;  %v525_v17 = vpop.f32.mrb[78].mxu0  ;;  %v1762_v42 = vpop.permute.xlu0 %1761  ;;  %1500 = vrot.lane.b32.xlu0 %v13959_v7, %s12999_s2 }
 0x182   :  { %v14330_v62 = vsel %vm330_vm1, %v21117_v14, %v20769_v22  ;;  %1262 = vrot.lane.b32.xlu1 %v13905_v54, %s13000_s25  ;;  %v20773_v11 = vrot.slane %v14234_v45, 2  ;;  %v2107_v47 = vsel %vm1894_vm10, %v2031_v5, %v1481_v19  ;;  %v14351_v14 = vld [vmem:[%s21031_s26 + $0x4c] ss:$12 sps:$4 sm:$0xff]   ;;  %v526_v48 = vadd.f32 %v13955_v3, %v525_v17  ;;  %v12167_v25 = vpop.f32.mrb[79].mxu0  ;;  %v985_v46 = vpop.permute.xlu1 %984 }
 0x183   :  { %21118 = vst [vmem:[#allocation8_spill] sm:$0xff] %v14330_v62  ;;  %v607_v9 = vmax.f32 %v523_v43, 0.0  ;;  %v3363_v52 = vshll.u32 %v14320_v51, 16  ;;  %v3370_v22 = vshll.u32 %v3235_v24, 16  ;;  %v2160_v59 = vsel %vm1947_vm11, %v2107_v47, %v1762_v42  ;;  %v21121_v43 = vld [vmem:[#allocation9_spill] sm:$0xff] }
 0x184   :  { %v21120_v19 = vrot.slane %v14135_v44, 2  ;;  %v14364_v34 = vmul.bf16 %v14185_v61, %v2160_v59  ;;  %v1847_v17 = vsel %vm1841_vm9, %v21121_v43, %v985_v46  ;;  %v608_v47 = vmax.f32 %v526_v48, 0.0  ;;  %v14378_v59 = vld [vmem:[%s21031_s26 + $0x60] ss:$12 sps:$4 sm:$0xff]  }
 0x185   :  { %v14370_v25 = vpack.c.bf16 %v607_v9, %v606_v63  ;;  %v3360_v42 = vrot.slane %v3358_v23, 1  ;;  %v3368_v28 = vshrl.u32 %v3235_v24, 16  ;;  %v3372_v31 = vrot.slane %v3370_v22, 1  ;;  %v14380_v46 = vpop.permute.xlu0 %1381  ;;  %1781 = vrot.lane.b32.xlu0 %v13996_v0, %s13000_s25 }
 0x186   :  { %v14361_v5 = vsel %vm1426_vm7, %v21120_v19, %v20773_v11  ;;  %1134 = vrot.lane.b32.xlu1 %v1085_v39, %s12999_s2  ;;  %v21122_v19 = vshrl.u32 %v13877_v41, 16  ;;  %v3375_v7 = vshll.u32 %v14364_v34, 16  ;;  %v2637_v23 = vshrl.u32 %v14351_v14, 16  ;;  %v1245_v48 = vpop.permute.xlu1 %1244 }
 0x187   :  { %v14385_v24 = vpack.c.bf16 %v608_v47, %v607_v9  ;;  %v3356_v22 = vshrl.u32 %v14292_v32, 16  ;;  %v14388_v39 = vrot.slane %v3363_v52, 1  ;;  %v3373_v43 = vor.u32 %v3372_v31, %v3368_v28 }
 0x188   :  { %v884_v11 = vor.u32 %v21122_v19, %v880_v60  ;;  %v1900_v60 = vsel %vm1894_vm10, %v1847_v17, %v14277_v58  ;;  %v530_v19 = vpop.f32.mrb[80].mxu0  ;;  %v14395_v63 = vrot.slane %v3375_v7, 1  ;;  %v21124_v9 = vshll.u32 %v13937_v56, 16 }
 0x189   :  { %21123 = vst [vmem:[#allocation11_spill] sm:$0xff] %v14385_v24  ;;  %v1955_v61 = vsel %vm1947_vm11, %v1900_v60, %v1245_v48  ;;  %v531_v32 = vadd.f32 %v13955_v3, %v530_v19  ;;  %v12170_v52 = vpop.f32.mrb[81].mxu0  ;;  %v3361_v58 = vor.u32 %v3360_v42, %v3356_v22  ;;  %v14406_v31 = vsel %vm1292_vm6, %v14159_v12, %v14308_v20  ;;  %v12671_v60 = vld [vmem:[%s20695_s4 + $0x80] sm:$0xff]   ;;  %v1483_v48 = vpop.permute.xlu0 %1482 }
 0x18a   :  { %v14399_v36 = vrot.slane %v21124_v9, 1  ;;  %1004 = vrot.lane.b32.xlu1 %v881_v2, %s12998_s22  ;;  %21125 = vst [vmem:[#allocation9_spill] sm:$0xff] %v14406_v31  ;;  %v2653_v28 = vshrl.u32 %v14378_v59, 16  ;;  %v533_v0 = vpop.f32.mrb[82].mxu0  ;;  %v21126_v17 = vshll.u32 %v13611_v33, 16  ;;  %v3378_v2 = vsel %vm773_vm5, %v3373_v43, %v14395_v63  ;;  %v1117_v9 = vpop.permute.xlu1 %1116  ;;  %1401 = vrot.lane.b32.xlu0 %v14002_v18, %s12998_s22 }
 0x18b   :  { %v14417_v42 = vrot.slane %v2637_v23, 7  ;;  %v2640_v12 = vshll.u32 %v14351_v14, 16  ;;  %v609_v20 = vmax.f32 %v531_v32, 0.0  ;;  %v12171_v22 = vpop.f32.mrb[83].mxu0  ;;  %v14421_v19 = vmul.bf16 %v14246_v49, %v1955_v61  ;;  %4232 = vmatprep.mubr.bf16.mxu1 %v3378_v2  ;;  %v21130_v2 = vld [vmem:[#allocation13_spill] sm:$0xff] }
 0x18c   :  { %v1317_v7 = vor.u32 %v14222_v13, %v21126_v17  ;;  %v3366_v52 = vsel %vm773_vm5, %v3361_v58, %v14388_v39  ;;  %v21127_v17 = vrot.slane %v13937_v56, 1  ;;  %v21128_v54 = vrot.slane %v13877_v41, 1  ;;  %v538_v49 = vpop.f32.mrb[84].mxu0 }
 0x18d   :  { %v534_v23 = vadd.f32 %v13955_v3, %v533_v0  ;;  %4233 = vmatmul.mubr.bf16.vlgmr.msra.gmra.mrb[0].mxu1 %v3366_v52  ;;  %v889_v61 = vsel %vm773_vm5, %v884_v11, %v14399_v36  ;;  %v2656_v14 = vshll.u32 %v14378_v59, 16  ;;  %v14436_v32 = vpack.c.bf16 %v609_v20, %v608_v47  ;;  %v1764_v59 = vpop.permute.xlu0 %1763 }
 0x18e   :  { %v1087_v43 = vsel %vm1058_vm4, %v21128_v54, %v21127_v17  ;;  %v14440_v58 = vsel %vm1292_vm6, %v14155_v29, %v1317_v7  ;;  %v2034_v54 = vsel %vm1841_vm9, %v21130_v2, %v14242_v53  ;;  %1264 = vrot.lane.b32.xlu1 %v13964_v35, %s13000_s25  ;;  %v14447_v0 = vrot.slane %v2653_v28, 7  ;;  %12189 = vmatpush3.bf16.msra.mxu1 %v12671_v60  ;;  %v987_v2 = vpop.permute.xlu1 %986 }
 0x18f   :  { %21129 = vst [vmem:[#allocation67_spill] sm:$0xff] %v14440_v58  ;;  %v610_v22 = vmax.f32 %v534_v23, 0.0  ;;  %v1675_v11 = vshrl.u32 %v14234_v45, 16  ;;  %v2109_v47 = vsel %vm1894_vm10, %v2034_v54, %v1483_v48  ;;  %v2642_v52 = vor.u32 %v2640_v12, %v14417_v42  ;;  %v21133_v12 = vld [vmem:[#allocation10_spill] sm:$0xff]  ;;  %1502 = vrot.lane.b32.xlu0 %v14026_v57, %s12999_s2  ;;  %v14480_v57 = vld [vmem:[%s21031_s26 + $0x78] ss:$12 sps:$4 sm:$0xff]  }
 0x190   :  { %v1678_v7 = vshll.u32 %v14234_v45, 16  ;;  %v21131_v17 = vmov 0.0   ;;  %v3395_v53 = vshll.u32 %v14421_v19, 16  ;;  %v2163_v28 = vsel %vm1947_vm11, %v2109_v47, %v1764_v59  ;;  %v14471_v47 = vld [vmem:[%s21031_s26 + $0x64] ss:$12 sps:$4 sm:$0xff]   ;;  %v12174_v59 = vpop.f32.mrb[85].mxu0 }
 0x191   :  { %12190 = vmatprep.subr.bf16.mxu1 %v21131_v17  ;;  %v14457_v23 = vpack.c.bf16 %v610_v22, %v609_v20  ;;  %v14461_v48 = vmul.bf16 %v14301_v8, %v2163_v28  ;;  %v1849_v54 = vsel %vm1841_vm9, %v21133_v12, %v987_v2  ;;  %v539_v20 = vadd.f32 %v13955_v3, %v538_v49  ;;  %v541_v29 = vpop.f32.mrb[86].mxu0  ;;  %v14485_v59 = vpop.permute.xlu0 %1383 }
 0x192   :  { %1136 = vrot.lane.b32.xlu1 %v1087_v43, %s12999_s2  ;;  %v2658_v28 = vor.u32 %v2656_v14, %v14447_v0  ;;  %v1677_v2 = vrot.slane %v1675_v11, 2  ;;  %v1680_v12 = vrot.slane %v1678_v7, 3  ;;  %v3391_v8 = vshrl.u32 %v14320_v51, 16  ;;  %v12175_v14 = vpop.f32.mrb[87].mxu0  ;;  %v1247_v33 = vpop.permute.xlu1 %1246 }
 0x193   :  { %21132 = vst [vmem:[#allocation13_spill] sm:$0xff] %v14457_v23  ;;  %v3399_v35 = vshrl.u32 %v14364_v34, 16  ;;  %v3403_v49 = vshll.u32 %v14461_v48, 16  ;;  %v611_v43 = vmax.f32 %v539_v20, 0.0  ;;  %v14487_v17 = vrot.slane %v3395_v53, 1  ;;  %1783 = vrot.lane.b32.xlu0 %v14065_v37, %s13000_s25 }
 0x194   :  { %v1902_v60 = vsel %vm1894_vm10, %v1849_v54, %v1117_v9  ;;  %v14490_v23 = vor.u32 %v1680_v12, %v1677_v2  ;;  %v21134_v11 = vrot.slane %v14234_v45, 3  ;;  %v21135_v7 = vrot.slane %v14135_v44, 3  ;;  %v546_v14 = vpop.f32.mrb[88].mxu0 }
 0x195   :  { %v14499_v34 = vrot.slane %v3403_v49, 1  ;;  %v1958_v58 = vsel %vm1947_vm11, %v1902_v60, %v1247_v33  ;;  %v3401_v53 = vor.u32 %v3399_v35, %v14395_v63  ;;  %v14505_v9 = vpack.c.bf16 %v611_v43, %v610_v22  ;;  %v1485_v33 = vpop.permute.xlu0 %1484 }
 0x196   :  { %v14497_v51 = vsel %vm330_vm1, %v21135_v7, %v21134_v11  ;;  %1006 = vrot.lane.b32.xlu1 %v889_v61, %s12998_s22  ;;  %v3393_v54 = vor.u32 %v3391_v8, %v14388_v39  ;;  %v2661_v44 = vshrl.u32 %v14471_v47, 16  ;;  %v2677_v20 = vshrl.u32 %v14480_v57, 16 }
 0x197   :  { %21136 = vst [vmem:[#allocation10_spill] sm:$0xff] %v14497_v51  ;;  %v14514_v2 = vsel %vm1530_vm8, %v14289_v55, %v14490_v23  ;;  %v3406_v37 = vsel %vm773_vm5, %v3401_v53, %v14499_v34  ;;  %v14520_v35 = vsel %vm1292_vm6, %v14217_v4, %v2642_v52  ;;  %v21138_v63 = vrot.slane %v14002_v18, 1  ;;  %v1119_v55 = vpop.permute.xlu1 %1118  ;;  %1403 = vrot.lane.b32.xlu0 %v14074_v1, %s12998_s22  ;;  %v12178_v53 = vpop.f32.mrb[89].mxu0 }
 0x198   :  { %21137 = vst [vmem:[#allocation68_spill] sm:$0xff] %v14520_v35  ;;  %v21139_v8 = vrot.slane %v13937_v56, 1  ;;  %v542_v61 = vadd.f32 %v13955_v3, %v541_v29  ;;  %v14529_v22 = vmul.bf16 %v14406_v31, %v1958_v58  ;;  %4240 = vmatprep.mubr.bf16.mxu1 %v3406_v37  ;;  %v3398_v60 = vsel %vm773_vm5, %v3393_v54, %v14487_v17 }
 0x199   :  { %v21140_v4 = vshrl.u32 %v13937_v56, 16  ;;  %v21141_v12 = vshll.u32 %v14002_v18, 16  ;;  %4241 = vmatmul.mubr.bf16.gmra.mrb[4].mxu1 %v3398_v60  ;;  %v14542_v58 = vsel %vm1292_vm6, %v14267_v38, %v2658_v28  ;;  %v2664_v29 = vshll.u32 %v14471_v47, 16  ;;  %v14558_v28 = vpop.f32.mrb[90].mxu0 }
 0x19a   :  { %v1089_v39 = vsel %vm1058_vm4, %v21139_v8, %v21138_v63  ;;  %21142 = vst [vmem:[#allocation69_spill] sm:$0xff] %v14542_v58  ;;  %v612_v11 = vmax.f32 %v542_v61, 0.0  ;;  %v14546_v7 = vadd.f32 %v13955_v3, %v546_v14  ;;  %1266 = vrot.lane.b32.xlu1 %v14035_v21, %s13000_s25  ;;  %v14553_v37 = vrot.slane %v2661_v44, 7  ;;  %v1766_v8 = vpop.permute.xlu0 %1765 }
 0x19b   :  { %v892_v52 = vor.u32 %v21140_v4, %v14399_v36  ;;  %v896_v49 = vrot.slane %v21141_v12, 1  ;;  %v21143_v36 = vld [vmem:[#allocation15_spill] sm:$0xff]  ;;  %v14555_v63 = vrot.slane %v2677_v20, 7  ;;  %v20783_v38 = vrot.slane %v14287_v10, 2  ;;  %v12179_v20 = vpop.f32.mrb[91].mxu0  ;;  %v989_v14 = vpop.permute.xlu1 %988  ;;  %1504 = vrot.lane.b32.xlu0 %v14099_v50, %s12999_s2 }
 0x19c   :  { %v2037_v54 = vsel %vm1841_vm9, %v21143_v36, %v14271_v15  ;;  %v2680_v61 = vshll.u32 %v14480_v57, 16  ;;  %v14565_v15 = vld [vmem:[%s21031_s26 + $0x7c] ss:$12 sps:$4 sm:$0xff]   ;;  %v14567_v60 = vpack.c.bf16 %v612_v11, %v611_v43  ;;  %v20782_v44 = vmax.f32 %v14546_v7, 0.0 }
 0x19d   :  { %v2111_v47 = vsel %vm1894_vm10, %v2037_v54, %v1485_v33  ;;  %v3419_v4 = vshll.u32 %v14529_v22, 16  ;;  %v897_v33 = vsel %vm773_vm5, %v892_v52, %v896_v49  ;;  %v21144_v53 = vshll.u32 %v13687_v30, 16  ;;  %v21145_v54 = vld [vmem:[#allocation12_spill] sm:$0xff] }
 0x19e   :  { %v2166_v12 = vsel %vm1947_vm11, %v2111_v47, %v1766_v8  ;;  %v1851_v43 = vsel %vm1841_vm9, %v21145_v54, %v989_v14  ;;  %v14586_v47 = vpack.c.bf16 %v20782_v44, %v612_v11  ;;  %1138 = vrot.lane.b32.xlu1 %v1089_v39, %s12999_s2  ;;  %v2666_v52 = vor.u32 %v2664_v29, %v14553_v37  ;;  %v14601_v54 = vpop.permute.xlu0 %1385 }
 0x19f   :  { %v1320_v57 = vor.u32 %v14296_v6, %v21144_v53  ;;  %v14577_v36 = vmul.bf16 %v14520_v35, %v2166_v12  ;;  %v21147_v14 = vrot.slane %v14234_v45, 2  ;;  %v3423_v53 = vshrl.u32 %v14461_v48, 16  ;;  %v1249_v8 = vpop.permute.xlu1 %1248  ;;  %v14613_v48 = vpop.f32.mrb[92].mxu0 }
 0x1a0   :  { %21146 = vst [vmem:[#allocation15_spill] sm:$0xff] %v14586_v47  ;;  %v2682_v39 = vor.u32 %v2680_v61, %v14555_v63  ;;  %v2685_v29 = vshrl.u32 %v14565_v15, 16  ;;  %v3415_v44 = vshrl.u32 %v14421_v19, 16  ;;  %v14606_v20 = vrot.slane %v3419_v4, 1  ;;  %v21149_v61 = vld [vmem:[#allocation55_spill] sm:$0xff]  ;;  %v12182_v31 = vpop.f32.mrb[93].mxu0 }
 0x1a1   :  { %v14597_v50 = vsel %vm1426_vm7, %v21147_v14, %v20783_v38  ;;  %v3427_v11 = vshll.u32 %v14577_v36, 16  ;;  %v1904_v12 = vsel %vm1894_vm10, %v1851_v43, %v1119_v55  ;;  %v14611_v14 = vsel %vm1292_vm6, %v14222_v13, %v1320_v57  ;;  %1785 = vrot.lane.b32.xlu0 %v21149_v61, %s13000_s25  ;;  %v21152_v31 = vld [vmem:[#allocation20_spill] sm:$0xff] }
 0x1a2   :  { %21148 = vst [vmem:[#allocation12_spill] sm:$0xff] %v14611_v14  ;;  %v1961_v35 = vsel %vm1947_vm11, %v1904_v12, %v1249_v8  ;;  %v3425_v19 = vor.u32 %v3423_v53, %v14499_v34  ;;  %v1684_v4 = vshrl.u32 %v14287_v10, 16  ;;  %1008 = vrot.lane.b32.xlu1 %v897_v33, %s12998_s22  ;;  %v3417_v55 = vor.u32 %v3415_v44, %v14487_v17  ;;  %v14633_v8 = vld [vmem:[%s21031_s26 + $0x90] ss:$12 sps:$4 sm:$0xff]   ;;  %v14636_v12 = vpop.f32.mrb[94].mxu0 }
 0x1a3   :  { %v14615_v38 = vrot.slane %v3427_v11, 1  ;;  %v21150_v13 = vshrl.u32 %v14002_v18, 16  ;;  %v21151_v43 = vshll.u32 %v14074_v1, 16  ;;  %v1687_v34 = vshll.u32 %v14287_v10, 16  ;;  %v1121_v21 = vpop.permute.xlu1 %1120  ;;  %v14734_v47 = vld [vmem:[%s21031_s26 + $0x94] ss:$12 sps:$4 sm:$0xff]  }
 0x1a4   :  { %v21153_v17 = vshrl.u32 %v13746_v40, 16  ;;  %v1686_v61 = vrot.slane %v1684_v4, 2  ;;  %v3422_v30 = vsel %vm773_vm5, %v3417_v55, %v14606_v20  ;;  %v14650_v14 = vrot.slane %v2685_v29, 7  ;;  %v21158_v55 = vld [vmem:[#allocation19_spill] sm:$0xff] }
 0x1a5   :  { %v900_v57 = vor.u32 %v21150_v13, %v896_v49  ;;  %v14628_v11 = vrot.slane %v21151_v43, 1  ;;  %v1487_v49 = vpop.permute.xlu0 %1486  ;;  %v3430_v53 = vsel %vm773_vm5, %v3425_v19, %v14615_v38  ;;  %v12183_v13 = vpop.f32.mrb[95].mxu0  ;;  %v14646_v43 = vmul.bf16 %v14542_v58, %v1961_v35 }
 0x1a6   :  { %v14641_v44 = vrot.slane %v21153_v17, 7  ;;  %4248 = vmatprep.mubr.bf16.mxu1 %v3430_v53  ;;  %v2688_v33 = vshll.u32 %v14565_v15, 16  ;;  %v21154_v17 = vld [vmem:[#allocation57_spill] sm:$0xff]  ;;  %v14657_v19 = vsel %vm1292_vm6, %v14417_v42, %v2666_v52  ;;  %v21156_v35 = vrot.slane %v14074_v1, 1  ;;  %v21159_v15 = vld [vmem:[#allocation56_spill] sm:$0xff] }
 0x1a7   :  { %4249 = vmatmul.mubr.bf16.gmra.mrb[8].mxu1 %v3422_v30  ;;  %1405 = vrot.lane.b32.xlu0 %v21154_v17, %s12998_s22  ;;  %21155 = vst [vmem:[#allocation55_spill] sm:$0xff] %v14657_v19  ;;  %v21157_v4 = vrot.slane %v14002_v18, 1  ;;  %v1689_v13 = vrot.slane %v1687_v34, 3  ;;  %v20789_v29 = vrot.slane %v14287_v10, 3  ;;  %v2040_v30 = vsel %vm1841_vm9, %v21158_v55, %v14380_v46 }
 0x1a8   :  { %1268 = vrot.lane.b32.xlu1 %v21159_v15, %s13000_s25  ;;  %v14672_v42 = vsel %vm1292_vm6, %v14447_v0, %v2682_v39  ;;  %v905_v52 = vsel %vm773_vm5, %v900_v57, %v14628_v11  ;;  %v2701_v58 = vshrl.u32 %v14633_v8, 16  ;;  %v2113_v34 = vsel %vm1894_vm10, %v2040_v30, %v1487_v49  ;;  %v991_v15 = vpop.permute.xlu1 %990 }
 0x1a9   :  { %v1091_v53 = vsel %vm1058_vm4, %v21157_v4, %v21156_v35  ;;  %21160 = vst [vmem:[#allocation20_spill] sm:$0xff] %v14672_v42  ;;  %v1768_v35 = vpop.permute.xlu0 %1767  ;;  %v14678_v4 = vor.u32 %v1689_v13, %v1686_v61  ;;  %v21161_v46 = vrot.slane %v14234_v45, 3  ;;  %v550_v0 = vadd.f32 %v13955_v3, %v14558_v28  ;;  %v14693_v13 = vpop.f32.mrb[96].mxu0  ;;  %v21162_v45 = vld [vmem:[#allocation14_spill] sm:$0xff] }
 0x1aa   :  { %v3443_v39 = vshll.u32 %v14646_v43, 16  ;;  %v2169_v57 = vsel %vm1947_vm11, %v2113_v34, %v1768_v35  ;;  %v2690_v49 = vor.u32 %v2688_v33, %v14650_v14  ;;  %v12186_v33 = vpop.f32.mrb[97].mxu0  ;;  %v14708_v35 = vrot.slane %v2701_v58, 7 }
 0x1ab   :  { %v14685_v55 = vsel %vm330_vm1, %v21161_v46, %v20789_v29  ;;  %v14696_v30 = vmul.bf16 %v14657_v19, %v2169_v57  ;;  %v1853_v46 = vsel %vm1841_vm9, %v21162_v45, %v991_v15  ;;  %v21163_v29 = vld [vmem:[#allocation63_spill] sm:$0xff]  ;;  %v14705_v28 = vsel %vm1530_vm8, %v14490_v23, %v14678_v4  ;;  %v14713_v45 = vpop.f32.mrb[98].mxu0 }
 0x1ac   :  { %1506 = vrot.lane.b32.xlu0 %v21163_v29, %s12999_s2  ;;  %v614_v34 = vmax.f32 %v550_v0, 0.0  ;;  %1140 = vrot.lane.b32.xlu1 %v1091_v53, %s12999_s2  ;;  %v2704_v57 = vshll.u32 %v14633_v8, 16  ;;  %v3447_v29 = vshrl.u32 %v14577_v36, 16  ;;  %v21164_v0 = vmax.f32 %v14546_v7, 0.0  ;;  %v12187_v8 = vpop.f32.mrb[99].mxu0  ;;  %v1251_v36 = vpop.permute.xlu1 %1250 }
 0x1ad   :  { %v3451_v19 = vshll.u32 %v14696_v30, 16  ;;  %v14717_v23 = vpop.permute.xlu0 %1387  ;;  %v14725_v58 = vadd.f32 %v13955_v3, %v14613_v48  ;;  %v3439_v53 = vshrl.u32 %v14529_v22, 16  ;;  %v14728_v15 = vrot.slane %v3443_v39, 1 }
 0x1ae   :  { %v14721_v33 = vpack.c.bf16 %v614_v34, %v21164_v0  ;;  %v1906_v61 = vsel %vm1894_vm10, %v1853_v46, %v1121_v21  ;;  %v20793_v7 = vrot.slane %v14370_v25, 2  ;;  %v3449_v3 = vor.u32 %v3447_v29, %v14615_v38  ;;  %v21168_v46 = vld [vmem:[#allocation35_spill] sm:$0xff] }
 0x1af   :  { %v3453_v0 = vrot.slane %v3451_v19, 1  ;;  %v20795_v22 = vmax.f32 %v14725_v58, 0.0  ;;  %v3441_v48 = vor.u32 %v3439_v53, %v14606_v20  ;;  %v2706_v39 = vor.u32 %v2704_v57, %v14708_v35  ;;  %v14749_v19 = vld [vmem:[%s21031_s26 + $0xa8] ss:$12 sps:$4 sm:$0xff]  }
 0x1b0   :  { %21165 = vst [vmem:[#allocation57_spill] sm:$0xff] %v14721_v33  ;;  %v1964_v33 = vsel %vm1947_vm11, %v1906_v61, %v1251_v36  ;;  %1787 = vrot.lane.b32.xlu0 %v14315_v26, %s13000_s25  ;;  %1010 = vrot.lane.b32.xlu1 %v905_v52, %s12998_s22  ;;  %v21166_v26 = vrot.slane %v14287_v10, 2  ;;  %v21167_v61 = vld [vmem:[#allocation22_spill] sm:$0xff]  ;;  %v21169_v57 = vshrl.u32 %v14074_v1, 16  ;;  %v21170_v53 = vshll.u32 %v21154_v17, 16 }
 0x1b1   :  { %v14760_v29 = vmul.bf16 %v21168_v46, %v21167_v61  ;;  %v1489_v52 = vpop.permute.xlu0 %1488  ;;  %v3454_v20 = vsel %vm773_vm5, %v3449_v3, %v3453_v0  ;;  %v14771_v21 = vmul.bf16 %v14672_v42, %v1964_v33  ;;  %v3446_v61 = vsel %vm773_vm5, %v3441_v48, %v14728_v15 }
 0x1b2   :  { %v14756_v38 = vsel %vm1426_vm7, %v21166_v26, %v20793_v7  ;;  %v908_v8 = vor.u32 %v21169_v57, %v14628_v11  ;;  %v14768_v36 = vrot.slane %v21170_v53, 1  ;;  %4256 = vmatprep.mubr.bf16.mxu1 %v3454_v20  ;;  %v1123_v26 = vpop.permute.xlu1 %1122  ;;  %v14777_v7 = vsel %vm1292_vm6, %v14553_v37, %v2690_v49  ;;  %v21174_v53 = vld [vmem:[#allocation66_spill] sm:$0xff] }
 0x1b3   :  { %21171 = vst [vmem:[#allocation19_spill] sm:$0xff] %v14777_v7  ;;  %v2709_v3 = vshrl.u32 %v14734_v47, 16  ;;  %v21172_v11 = vshll.u32 %v21152_v31, 16  ;;  %4257 = vmatmul.mubr.bf16.gmra.mrb[12].mxu1 %v3446_v61  ;;  %v21175_v33 = vrot.slane %v21154_v17, 1  ;;  %v21176_v20 = vrot.slane %v14074_v1, 1 }
 0x1b4   :  { %1407 = vrot.lane.b32.xlu0 %v21174_v53, %s12998_s22  ;;  %v14793_v37 = vpack.c.bf16 %v20795_v22, %v614_v34  ;;  %v21178_v49 = vshll.u32 %v13746_v40, 16  ;;  %1270 = vrot.lane.b32.xlu1 %v14330_v62, %s13000_s25  ;;  %v14805_v42 = vsel %vm1292_vm6, %v14555_v63, %v2706_v39  ;;  %v1693_v34 = vshrl.u32 %v14370_v25, 16 }
 0x1b5   :  { %v14782_v57 = vrot.slane %v21172_v11, 1  ;;  %v1093_v48 = vsel %vm1058_vm4, %v21176_v20, %v21175_v33  ;;  %v21179_v11 = vld [vmem:[#allocation30_spill] sm:$0xff]  ;;  %21180 = vst [vmem:[#allocation22_spill] sm:$0xff] %v14805_v42  ;;  %v2725_v33 = vshrl.u32 %v14749_v19, 16  ;;  %v1770_v22 = vpop.permute.xlu0 %1769  ;;  %v3467_v62 = vshll.u32 %v14771_v21, 16 }
 0x1b6   :  { %21177 = vst [vmem:[#allocation63_spill] sm:$0xff] %v14793_v37  ;;  %v1323_v46 = vor.u32 %v14641_v44, %v21178_v49  ;;  %v2043_v61 = vsel %vm1841_vm9, %v21179_v11, %v14485_v59  ;;  %v913_v49 = vsel %vm773_vm5, %v908_v8, %v14768_v36  ;;  %v1696_v11 = vshll.u32 %v14370_v25, 16  ;;  %v993_v39 = vpop.permute.xlu1 %992 }
 0x1b7   :  { %21173 = vst [vmem:[#allocation14_spill] sm:$0xff] %v14782_v57  ;;  %v2115_v20 = vsel %vm1894_vm10, %v2043_v61, %v1489_v52  ;;  %v14819_v1 = vrot.slane %v2709_v3, 7  ;;  %v2712_v40 = vshll.u32 %v14734_v47, 16  ;;  %v21181_v61 = vld [vmem:[#allocation16_spill] sm:$0xff]  ;;  %v3471_v37 = vshrl.u32 %v14696_v30, 16 }
 0x1b8   :  { %v14814_v59 = vsel %vm1292_vm6, %v14296_v6, %v1323_v46  ;;  %v2172_v63 = vsel %vm1947_vm11, %v2115_v20, %v1770_v22  ;;  %v1855_v8 = vsel %vm1841_vm9, %v21181_v61, %v993_v39  ;;  %1508 = vrot.lane.b32.xlu0 %v14361_v5, %s12999_s2  ;;  %v1695_v6 = vrot.slane %v1693_v34, 2  ;;  %1142 = vrot.lane.b32.xlu1 %v1093_v48, %s12999_s2 }
 0x1b9   :  { %v14823_v52 = vmul.bf16 %v14777_v7, %v2172_v63  ;;  %v1698_v46 = vrot.slane %v1696_v11, 3  ;;  %v14832_v3 = vrot.slane %v2725_v33, 7  ;;  %v2728_v47 = vshll.u32 %v14749_v19, 16  ;;  %v14836_v63 = vpop.permute.xlu0 %1389 }
 0x1ba   :  { %v20801_v39 = vshll.u32 %v21174_v53, 16  ;;  %v20803_v5 = vrot.slane %v14370_v25, 3  ;;  %v3463_v30 = vshrl.u32 %v14646_v43, 16  ;;  %v14843_v34 = vrot.slane %v3467_v62, 1  ;;  %v1253_v33 = vpop.permute.xlu1 %1252 }
 0x1bb   :  { %v3475_v20 = vshll.u32 %v14823_v52, 16  ;;  %v14839_v61 = vor.u32 %v1698_v46, %v1695_v6  ;;  %v1908_v48 = vsel %vm1894_vm10, %v1855_v8, %v1123_v26  ;;  %v3473_v11 = vor.u32 %v3471_v37, %v3453_v0 }
 0x1bc   :  { %v1967_v19 = vsel %vm1947_vm11, %v1908_v48, %v1253_v33  ;;  %1789 = vrot.lane.b32.xlu0 %v14514_v2, %s13000_s25  ;;  %v21182_v62 = vrot.slane %v14287_v10, 3  ;;  %1012 = vrot.lane.b32.xlu1 %v913_v49, %s12998_s22  ;;  %v3465_v0 = vor.u32 %v3463_v30, %v14728_v15  ;;  %v2714_v26 = vor.u32 %v2712_v40, %v14819_v1  ;;  %v14875_v10 = vld [vmem:[%s21018_s28] ss:$0 sm:$0xff] }
 0x1bd   :  { %v14846_v22 = vrot.slane %v3475_v20, 1  ;;  %v14854_v6 = vsel %vm1530_vm8, %v14678_v4, %v14839_v61  ;;  %v20802_v2 = vshrl.u32 %v21154_v17, 16  ;;  %v14870_v4 = vld [vmem:[%s21031_s26 + $0xac] ss:$12 sps:$4 sm:$0xff]   ;;  %v558_v37 = vadd.f32 %v14875_v10, %v14636_v12  ;;  %v1491_v46 = vpop.permute.xlu0 %1490 }
 0x1be   :  { %v14861_v43 = vsel %vm330_vm1, %v21182_v62, %v20803_v5  ;;  %v3507_v49 = vshll.u32 %v14760_v29, 16  ;;  %v21184_v40 = vshrl.u32 %v13795_v16, 16  ;;  %v14890_v30 = vld [vmem:[%s21031_s26 + $0xc0] ss:$12 sps:$4 sm:$0xff]   ;;  %v14893_v48 = vmul.bf16 %v14805_v42, %v1967_v19  ;;  %v1125_v12 = vpop.permute.xlu1 %1124 }
 0x1bf   :  { %21183 = vst [vmem:[#allocation66_spill] sm:$0xff] %v14861_v43  ;;  %v3478_v20 = vsel %vm773_vm5, %v3473_v11, %v14846_v22  ;;  %v3470_v33 = vsel %vm773_vm5, %v3465_v0, %v14843_v34  ;;  %v2730_v62 = vor.u32 %v2728_v47, %v14832_v3  ;;  %v14905_v11 = vrot.slane %v20801_v39, 1  ;;  %v21185_v47 = vld [vmem:[#allocation50_spill] sm:$0xff] }
 0x1c0   :  { %v14883_v8 = vrot.slane %v21184_v40, 7  ;;  %4264 = vmatprep.mubr.bf16.mxu1 %v3478_v20  ;;  %v916_v40 = vor.u32 %v20802_v2, %v14768_v36  ;;  %1409 = vrot.lane.b32.xlu0 %v14310_v27, %s12998_s22  ;;  %v616_v19 = vmax.f32 %v558_v37, 0.0  ;;  %v563_v20 = vadd.f32 %v14875_v10, %v14693_v13 }
 0x1c1   :  { %4265 = vmatmul.mubr.bf16.gmra.mrb[16].mxu1 %v3470_v33  ;;  %v2046_v15 = vsel %vm1841_vm9, %v21185_v47, %v14601_v54  ;;  %1272 = vrot.lane.b32.xlu1 %v14497_v51, %s13000_s25  ;;  %v14917_v36 = vsel %vm1292_vm6, %v14650_v14, %v2714_v26  ;;  %v21187_v33 = vrot.slane %v21174_v53, 1  ;;  %v21188_v37 = vrot.slane %v21154_v17, 1  ;;  %v1772_v5 = vpop.permute.xlu0 %1771 }
 0x1c2   :  { %21186 = vst [vmem:[#allocation30_spill] sm:$0xff] %v14917_v36  ;;  %v2733_v13 = vshrl.u32 %v14870_v4, 16  ;;  %v2117_v2 = vsel %vm1894_vm10, %v2046_v15, %v1491_v46  ;;  %v2749_v54 = vshrl.u32 %v14890_v30, 16  ;;  %v21189_v47 = vmax.f32 %v14725_v58, 0.0  ;;  %v995_v7 = vpop.permute.xlu1 %994 }
 0x1c3   :  { %v1095_v39 = vsel %vm1058_vm4, %v21188_v37, %v21187_v33  ;;  %v14931_v42 = vmax.f32 %v563_v20, 0.0  ;;  %v3491_v14 = vshll.u32 %v14893_v48, 16  ;;  %v2175_v26 = vsel %vm1947_vm11, %v2117_v2, %v1772_v5  ;;  %v21194_v20 = vld [vmem:[#allocation17_spill] sm:$0xff] }
 0x1c4   :  { %v14929_v0 = vpack.c.bf16 %v616_v19, %v21189_v47  ;;  %v21191_v33 = vrot.slane %v14436_v32, 2  ;;  %v21192_v37 = vrot.slane %v14370_v25, 2  ;;  %v21193_v46 = vshll.u32 %v13795_v16, 16  ;;  %1510 = vrot.lane.b32.xlu0 %v14597_v50, %s12999_s2 }
 0x1c5   :  { %v14946_v47 = vmul.bf16 %v14917_v36, %v2175_v26  ;;  %v1857_v51 = vsel %vm1841_vm9, %v21194_v20, %v995_v7  ;;  %v14954_v5 = vsel %vm1292_vm6, %v14708_v35, %v2730_v62  ;;  %v921_v2 = vsel %vm773_vm5, %v916_v40, %v14905_v11  ;;  %1144 = vrot.lane.b32.xlu1 %v1095_v39, %s12999_s2  ;;  %v14968_v35 = vpop.permute.xlu0 %1391 }
 0x1c6   :  { %21190 = vst [vmem:[#allocation16_spill] sm:$0xff] %v14929_v0  ;;  %v14940_v15 = vsel %vm1426_vm7, %v21192_v37, %v21191_v33  ;;  %v1326_v58 = vor.u32 %v14883_v8, %v21193_v46  ;;  %21195 = vst [vmem:[#allocation50_spill] sm:$0xff] %v14954_v5  ;;  %v3495_v33 = vshrl.u32 %v14823_v52, 16  ;;  %v14960_v37 = vrot.slane %v2733_v13, 7  ;;  %v1255_v13 = vpop.permute.xlu1 %1254 }
 0x1c7   :  { %v2736_v26 = vshll.u32 %v14870_v4, 16  ;;  %v14964_v7 = vpack.c.bf16 %v14931_v42, %v616_v19  ;;  %v3487_v50 = vshrl.u32 %v14771_v21, 16  ;;  %v3499_v46 = vshll.u32 %v14946_v47, 16 }
 0x1c8   :  { %v14970_v62 = vrot.slane %v2749_v54, 7  ;;  %v2752_v40 = vshll.u32 %v14890_v30, 16  ;;  %v14973_v52 = vrot.slane %v3491_v14, 1  ;;  %v1910_v39 = vsel %vm1894_vm10, %v1857_v51, %v1125_v12  ;;  %1791 = vrot.lane.b32.xlu0 %v14705_v28, %s13000_s25  ;;  %v14989_v30 = vld [vmem:[%s21031_s26 + $0xc4] ss:$12 sps:$4 sm:$0xff]   ;;  %v21198_v14 = vld [vmem:[#allocation36_spill] sm:$0xff] }
 0x1c9   :  { %v3497_v4 = vor.u32 %v3495_v33, %v14846_v22  ;;  %v14979_v19 = vsel %vm1292_vm6, %v14641_v44, %v1326_v58  ;;  %v14981_v21 = vrot.slane %v3499_v46, 1  ;;  %v1970_v20 = vsel %vm1947_vm11, %v1910_v39, %v1255_v13  ;;  %1014 = vrot.lane.b32.xlu1 %v921_v2, %s12998_s22  ;;  %v1493_v28 = vpop.permute.xlu0 %1492 }
 0x1ca   :  { %v1702_v51 = vshrl.u32 %v14436_v32, 16  ;;  %v1705_v22 = vshll.u32 %v14436_v32, 16  ;;  %v14993_v12 = vrot.slane %v3507_v49, 1  ;;  %v3489_v44 = vor.u32 %v3487_v50, %v14843_v34  ;;  %v1127_v49 = vpop.permute.xlu1 %1126  ;;  %v21197_v50 = vld [vmem:[#allocation27_spill] sm:$0xff] }
 0x1cb   :  { %v2738_v54 = vor.u32 %v2736_v26, %v14960_v37  ;;  %v3502_v58 = vsel %vm773_vm5, %v3497_v4, %v14981_v21  ;;  %v15003_v13 = vmul.bf16 %v14954_v5, %v1970_v20  ;;  %v2754_v2 = vor.u32 %v2752_v40, %v14970_v62 }
 0x1cc   :  { %21196 = vst [vmem:[#allocation17_spill] sm:$0xff] %v14993_v12  ;;  %v1704_v46 = vrot.slane %v1702_v51, 2  ;;  %v1707_v39 = vrot.slane %v1705_v22, 3  ;;  %4272 = vmatprep.mubr.bf16.mxu1 %v3502_v58  ;;  %v3494_v34 = vsel %vm773_vm5, %v3489_v44, %v14973_v52  ;;  %v20808_v26 = vshrl.u32 %v21174_v53, 16  ;;  %1411 = vrot.lane.b32.xlu0 %v14385_v24, %s12998_s22  ;;  %v21199_v22 = vld [vmem:[#allocation64_spill] sm:$0xff] }
 0x1cd   :  { %v15011_v36 = vmul.bf16 %v21198_v14, %v21197_v50  ;;  %4273 = vmatmul.mubr.bf16.gmra.mrb[20].mxu1 %v3494_v34  ;;  %v2757_v4 = vshrl.u32 %v14989_v30, 16  ;;  %v20810_v51 = vrot.slane %v14436_v32, 3  ;;  %v2049_v40 = vsel %vm1841_vm9, %v21199_v22, %v14717_v23  ;;  %1274 = vrot.lane.b32.xlu1 %v14685_v55, %s13000_s25  ;;  %v12659_v34 = vld [vmem:[%s21031_s26 + $0xd8] ss:$12 sps:$4 sm:$0xff]   ;;  %v15173_v14 = vld [vmem:[%s21031_s26 + $0xf0] ss:$12 sps:$4 sm:$0xff]  }
 0x1ce   :  { %v15016_v20 = vor.u32 %v1707_v39, %v1704_v46  ;;  %v15026_v44 = vsel %vm1292_vm6, %v14819_v1, %v2738_v54  ;;  %v924_v58 = vor.u32 %v20808_v26, %v14905_v11  ;;  %v21201_v46 = vshll.u32 %v14310_v27, 16  ;;  %v1774_v1 = vpop.permute.xlu0 %1773  ;;  %v997_v33 = vpop.permute.xlu1 %996 }
 0x1cf   :  { %21200 = vst [vmem:[#allocation27_spill] sm:$0xff] %v15026_v44  ;;  %v21202_v23 = vshrl.u32 %v13877_v41, 16  ;;  %v2119_v22 = vsel %vm1894_vm10, %v2049_v40, %v1493_v28  ;;  %v21203_v11 = vrot.slane %v14370_v25, 3  ;;  %v3515_v26 = vshll.u32 %v15003_v13, 16 }
 0x1d0   :  { %v15033_v39 = vrot.slane %v21201_v46, 1  ;;  %v15046_v54 = vsel %vm1530_vm8, %v14839_v61, %v15016_v20  ;;  %v21205_v28 = vrot.slane %v14310_v27, 1  ;;  %v21206_v40 = vrot.slane %v21174_v53, 1  ;;  %1512 = vrot.lane.b32.xlu0 %v14756_v38, %s12999_s2 }
 0x1d1   :  { %v15040_v50 = vrot.slane %v21202_v23, 7  ;;  %v15053_v46 = vsel %vm330_vm1, %v21203_v11, %v20810_v51  ;;  %v2178_v23 = vsel %vm1947_vm11, %v2119_v22, %v1774_v1  ;;  %v15064_v61 = vsel %vm1292_vm6, %v14832_v3, %v2754_v2  ;;  %v21208_v11 = vld [vmem:[#allocation18_spill] sm:$0xff] }
 0x1d2   :  { %21204 = vst [vmem:[#allocation64_spill] sm:$0xff] %v15053_v46  ;;  %v1097_v5 = vsel %vm1058_vm4, %v21206_v40, %v21205_v28  ;;  %21207 = vst [vmem:[#allocation70_spill] sm:$0xff] %v15064_v61  ;;  %v15067_v25 = vmul.bf16 %v15026_v44, %v2178_v23  ;;  %v1859_v51 = vsel %vm1841_vm9, %v21208_v11, %v997_v33  ;;  %v15073_v22 = vrot.slane %v2757_v4, 7  ;;  %v15085_v4 = vpop.permute.xlu0 %1393  ;;  %v1257_v11 = vpop.permute.xlu1 %1256 }
 0x1d3   :  { %v2760_v1 = vshll.u32 %v14989_v30, 16  ;;  %1146 = vrot.lane.b32.xlu1 %v1097_v5, %s12999_s2  ;;  %v929_v28 = vsel %vm773_vm5, %v924_v58, %v15033_v39  ;;  %v2773_v3 = vshrl.u32 %v12659_v34, 16  ;;  %v566_v2 = vadd.f32 %v14875_v10, %v14713_v45 }
 0x1d4   :  { %v20812_v23 = vrot.slane %v14505_v9, 2  ;;  %v3511_v33 = vshrl.u32 %v14893_v48, 16  ;;  %v3519_v40 = vshrl.u32 %v14946_v47, 16  ;;  %v3523_v38 = vshll.u32 %v15067_v25, 16  ;;  %1793 = vrot.lane.b32.xlu0 %v14854_v6, %s13000_s25 }
 0x1d5   :  { %v15088_v5 = vrot.slane %v3515_v26, 1  ;;  %v1912_v58 = vsel %vm1894_vm10, %v1859_v51, %v1127_v49  ;;  %v15091_v44 = vmax.f32 %v566_v2, 0.0  ;;  %v21209_v45 = vrot.slane %v14436_v32, 2 }
 0x1d6   :  { %v15100_v48 = vrot.slane %v3523_v38, 1  ;;  %v1973_v47 = vsel %vm1947_vm11, %v1912_v58, %v1257_v11  ;;  %v3521_v26 = vor.u32 %v3519_v40, %v14981_v21  ;;  %v2762_v49 = vor.u32 %v2760_v1, %v15073_v22  ;;  %v15114_v38 = vld [vmem:[%s21031_s26 + $0xdc] ss:$12 sps:$4 sm:$0xff]  }
 0x1d7   :  { %v15098_v10 = vsel %vm1426_vm7, %v21209_v45, %v20812_v23  ;;  %1016 = vrot.lane.b32.xlu1 %v929_v28, %s12998_s22  ;;  %v3513_v51 = vor.u32 %v3511_v33, %v14973_v52  ;;  %v15109_v2 = vrot.slane %v2773_v3, 7  ;;  %v2776_v30 = vshll.u32 %v12659_v34, 16  ;;  %v1495_v28 = vpop.permute.xlu0 %1494  ;;  %v21214_v45 = vld [vmem:[#allocation29_spill] sm:$0xff]  ;;  %v21216_v23 = vld [vmem:[#allocation67_spill] sm:$0xff] }
 0x1d8   :  { %v15118_v58 = vpack.c.bf16 %v15091_v44, %v14931_v42  ;;  %v21210_v6 = vshrl.u32 %v21152_v31, 16  ;;  %v21212_v52 = vshrl.u32 %v14760_v29, 16  ;;  %v3531_v34 = vshll.u32 %v15011_v36, 16  ;;  %v1129_v31 = vpop.permute.xlu1 %1128  ;;  %v21217_v33 = vld [vmem:[#allocation13_spill] sm:$0xff] }
 0x1d9   :  { %v3526_v3 = vsel %vm773_vm5, %v3521_v26, %v15100_v48  ;;  %v15135_v40 = vmul.bf16 %v15064_v61, %v1973_v47  ;;  %v3518_v11 = vsel %vm773_vm5, %v3513_v51, %v15088_v5  ;;  %v2052_v26 = vsel %vm1841_vm9, %v21216_v23, %v14836_v63  ;;  %1413 = vrot.lane.b32.xlu0 %v21217_v33, %s12998_s22 }
 0x1da   :  { %v15123_v21 = vor.u32 %v21210_v6, %v14782_v57  ;;  %v15128_v1 = vor.u32 %v21212_v52, %v14993_v12  ;;  %4280 = vmatprep.mubr.bf16.mxu1 %v3526_v3  ;;  %v21215_v6 = vld [vmem:[#allocation37_spill] sm:$0xff]  ;;  %v15151_v47 = vsel %vm1292_vm6, %v14960_v37, %v2762_v49  ;;  %v21219_v3 = vrot.slane %v14385_v24, 1 }
 0x1db   :  { %v15142_v52 = vmul.bf16 %v21215_v6, %v21214_v45  ;;  %4281 = vmatmul.mubr.bf16.gmra.mrb[24].mxu1 %v3518_v11  ;;  %21218 = vst [vmem:[#allocation29_spill] sm:$0xff] %v15151_v47  ;;  %1276 = vrot.lane.b32.xlu1 %v14861_v43, %s13000_s25  ;;  %v21220_v45 = vrot.slane %v14310_v27, 1  ;;  %v2778_v63 = vor.u32 %v2776_v30, %v15109_v2  ;;  %v2781_v23 = vshrl.u32 %v15114_v38, 16  ;;  %v1776_v51 = vpop.permute.xlu0 %1775 }
 0x1dc   :  { %21211 = vst [vmem:[#allocation18_spill] sm:$0xff] %v15123_v21  ;;  %21213 = vst [vmem:[#allocation71_spill] sm:$0xff] %v15128_v1  ;;  %v21221_v11 = vshll.u32 %v13877_v41, 16  ;;  %v2121_v49 = vsel %vm1894_vm10, %v2052_v26, %v1495_v28  ;;  %v21222_v61 = vshrl.u32 %v14310_v27, 16  ;;  %v1711_v30 = vshrl.u32 %v14505_v9, 16  ;;  %v999_v43 = vpop.permute.xlu1 %998  ;;  %v21224_v1 = vld [vmem:[#allocation21_spill] sm:$0xff] }
 0x1dd   :  { %v1099_v29 = vsel %vm1058_vm4, %v21220_v45, %v21219_v3  ;;  %v1714_v3 = vshll.u32 %v14505_v9, 16  ;;  %v3539_v45 = vshll.u32 %v15135_v40, 16  ;;  %v21223_v28 = vshll.u32 %v14385_v24, 16  ;;  %1514 = vrot.lane.b32.xlu0 %v14940_v15, %s12999_s2 }
 0x1de   :  { %v1329_v37 = vor.u32 %v15040_v50, %v21221_v11  ;;  %v932_v6 = vor.u32 %v21222_v61, %v15033_v39  ;;  %v2181_v11 = vsel %vm1947_vm11, %v2121_v49, %v1776_v51  ;;  %v1861_v21 = vsel %vm1841_vm9, %v21224_v1, %v999_v43 }
 0x1df   :  { %v936_v26 = vrot.slane %v21223_v28, 1  ;;  %v15186_v61 = vmul.bf16 %v15151_v47, %v2181_v11  ;;  %v1713_v12 = vrot.slane %v1711_v30, 2  ;;  %v1716_v57 = vrot.slane %v1714_v3, 3  ;;  %1148 = vrot.lane.b32.xlu1 %v1099_v29, %s12999_s2  ;;  %v15203_v1 = vpop.permute.xlu0 %1395 }
 0x1e0   :  { %v15183_v39 = vsel %vm1292_vm6, %v14883_v8, %v1329_v37  ;;  %v3535_v51 = vshrl.u32 %v15003_v13, 16  ;;  %v15196_v49 = vsel %vm1292_vm6, %v14970_v62, %v2778_v63  ;;  %v15198_v8 = vrot.slane %v2781_v23, 7  ;;  %v1259_v62 = vpop.permute.xlu1 %1258 }
 0x1e1   :  { %21225 = vst [vmem:[#allocation67_spill] sm:$0xff] %v15196_v49  ;;  %v2784_v37 = vshll.u32 %v15114_v38, 16  ;;  %v3543_v11 = vshrl.u32 %v15067_v25, 16  ;;  %v3547_v43 = vshll.u32 %v15186_v61, 16  ;;  %v2797_v15 = vshrl.u32 %v15173_v14, 16  ;;  %1795 = vrot.lane.b32.xlu0 %v15046_v54, %s13000_s25 }
 0x1e2   :  { %v15206_v30 = vor.u32 %v1716_v57, %v1713_v12  ;;  %v15208_v13 = vrot.slane %v3539_v45, 1  ;;  %v1914_v29 = vsel %vm1894_vm10, %v1861_v21, %v1129_v31  ;;  %v937_v63 = vsel %vm773_vm5, %v932_v6, %v936_v26 }
 0x1e3   :  { %v20817_v23 = vrot.slane %v14505_v9, 3  ;;  %v15213_v38 = vrot.slane %v3547_v43, 1  ;;  %v1976_v25 = vsel %vm1947_vm11, %v1914_v29, %v1259_v62  ;;  %v3545_v3 = vor.u32 %v3543_v11, %v15100_v48  ;;  %1018 = vrot.lane.b32.xlu1 %v937_v63, %s12998_s22  ;;  %v1497_v28 = vpop.permute.xlu0 %1496 }
 0x1e4   :  { %v15222_v57 = vsel %vm1530_vm8, %v15016_v20, %v15206_v30  ;;  %v21226_v12 = vshrl.u32 %v13937_v56, 16  ;;  %v3537_v31 = vor.u32 %v3535_v51, %v15088_v5  ;;  %v2786_v6 = vor.u32 %v2784_v37, %v15198_v8  ;;  %v15241_v20 = vld [vmem:[%s21031_s26 + $0xf4] ss:$12 sps:$4 sm:$0xff]   ;;  %v1131_v43 = vpop.permute.xlu1 %1130 }
 0x1e5   :  { %v21227_v54 = vrot.slane %v14436_v32, 3  ;;  %v15243_v45 = vrot.slane %v3531_v34, 1  ;;  %v3550_v5 = vsel %vm773_vm5, %v3545_v3, %v15213_v38  ;;  %v15247_v51 = vrot.slane %v2797_v15, 7  ;;  %1415 = vrot.lane.b32.xlu0 %v14567_v60, %s12998_s22 }
 0x1e6   :  { %v15226_v21 = vrot.slane %v21226_v12, 7  ;;  %v2800_v37 = vshll.u32 %v15173_v14, 16  ;;  %v15252_v11 = vmul.bf16 %v15196_v49, %v1976_v25  ;;  %4288 = vmatprep.mubr.bf16.mxu1 %v3550_v5  ;;  %v3542_v29 = vsel %vm773_vm5, %v3537_v31, %v15208_v13  ;;  %v21230_v25 = vld [vmem:[#allocation15_spill] sm:$0xff]  ;;  %v21231_v12 = vld [vmem:[#allocation12_spill] sm:$0xff] }
 0x1e7   :  { %v15236_v48 = vsel %vm330_vm1, %v21227_v54, %v20817_v23  ;;  %v20821_v34 = vshll.u32 %v21217_v33, 16  ;;  %v21229_v62 = vshrl.u32 %v14002_v18, 16  ;;  %4289 = vmatmul.mubr.bf16.gmra.mrb[28].mxu1 %v3542_v29  ;;  %v20818_v15 = vshrl.u32 %v14385_v24, 16  ;;  %1278 = vrot.lane.b32.xlu1 %v15053_v46, %s13000_s25  ;;  %v1778_v23 = vpop.permute.xlu0 %1777 }
 0x1e8   :  { %21228 = vst [vmem:[#allocation21_spill] sm:$0xff] %v15236_v48  ;;  %v20819_v3 = vrot.slane %v21230_v25, 2  ;;  %v2055_v31 = vsel %vm1841_vm9, %v21231_v12, %v14968_v35  ;;  %v15273_v54 = vsel %vm1292_vm6, %v15073_v22, %v2786_v6  ;;  %v2805_v5 = vshrl.u32 %v15241_v20, 16  ;;  %v15293_v6 = vld [vmem:[%s21031_s26 + $0x108] ss:$12 sps:$4 sm:$0xff]  }
 0x1e9   :  { %v15259_v63 = vrot.slane %v21229_v62, 7  ;;  %21232 = vst [vmem:[#allocation15_spill] sm:$0xff] %v15273_v54  ;;  %v21233_v29 = vshll.u32 %v13937_v56, 16  ;;  %v2123_v32 = vsel %vm1894_vm10, %v2055_v31, %v1497_v28  ;;  %v2802_v14 = vor.u32 %v2800_v37, %v15247_v51  ;;  %v1001_v37 = vpop.permute.xlu1 %1000  ;;  %1516 = vrot.lane.b32.xlu0 %v15098_v10, %s12999_s2  ;;  %v12700_v10 = vld [vmem:[%s20695_s4 + $0x88] sm:$0xff]  }
 0x1ea   :  { %v940_v35 = vor.u32 %v20818_v15, %v936_v26  ;;  %v21234_v12 = vrot.slane %v14505_v9, 2  ;;  %v3563_v28 = vshll.u32 %v15252_v11, 16  ;;  %v2184_v31 = vsel %vm1947_vm11, %v2123_v32, %v1778_v23  ;;  %12191 = vmatpush3.bf16.msra.mxu1 %v12700_v10 }
 0x1eb   :  { %v1332_v62 = vor.u32 %v15226_v21, %v21233_v29  ;;  %v15299_v26 = vrot.slane %v20821_v34, 1  ;;  %v15307_v15 = vmul.bf16 %v15273_v54, %v2184_v31  ;;  %v21236_v23 = vrot.slane %v21217_v33, 1 }
 0x1ec   :  { %v15288_v22 = vsel %vm1426_vm7, %v21234_v12, %v20819_v3  ;;  %v3559_v12 = vshrl.u32 %v15135_v40, 16  ;;  %v21235_v3 = vld [vmem:[#allocation26_spill] sm:$0xff]  ;;  %v21237_v32 = vrot.slane %v14385_v24, 1  ;;  %v15320_v40 = vrot.slane %v2805_v5, 7 }
 0x1ed   :  { %v15303_v29 = vsel %vm1292_vm6, %v15040_v50, %v1332_v62  ;;  %v1863_v49 = vsel %vm1841_vm9, %v21235_v3, %v1001_v37  ;;  %v3567_v50 = vshrl.u32 %v15186_v61, 16  ;;  %v2808_v62 = vshll.u32 %v15241_v20, 16  ;;  %v15328_v37 = vpop.permute.xlu0 %1397  ;;  %1797 = vrot.lane.b32.xlu0 %v15222_v57, %s13000_s25 }
 0x1ee   :  { %v1101_v34 = vsel %vm1058_vm4, %v21237_v32, %v21236_v23  ;;  %v1720_v31 = vshrl.u32 %v21230_v25, 16  ;;  %v3571_v3 = vshll.u32 %v15307_v15, 16  ;;  %v15332_v23 = vsel %vm1292_vm6, %v15109_v2, %v2802_v14  ;;  %v1261_v32 = vpop.permute.xlu1 %1260 }
 0x1ef   :  { %1150 = vrot.lane.b32.xlu1 %v1101_v34, %s12999_s2  ;;  %21238 = vst [vmem:[#allocation12_spill] sm:$0xff] %v15332_v23  ;;  %v2821_v61 = vshrl.u32 %v15293_v6, 16  ;;  %v1723_v34 = vshll.u32 %v21230_v25, 16  ;;  %v15336_v5 = vrot.slane %v3563_v28, 1  ;;  %v1916_v20 = vsel %vm1894_vm10, %v1863_v49, %v1131_v43 }
 0x1f0   :  { %v945_v54 = vsel %vm773_vm5, %v940_v35, %v15299_v26  ;;  %v1722_v47 = vrot.slane %v1720_v31, 2  ;;  %v15341_v46 = vrot.slane %v3571_v3, 1  ;;  %v1979_v24 = vsel %vm1947_vm11, %v1916_v20, %v1261_v32  ;;  %v15355_v31 = vld [vmem:[%s21031_s26 + $0x10c] ss:$12 sps:$4 sm:$0xff]   ;;  %v21241_v32 = vld [vmem:[#allocation57_spill] sm:$0xff] }
 0x1f1   :  { %v3569_v2 = vor.u32 %v3567_v50, %v15213_v38  ;;  %v1725_v14 = vrot.slane %v1723_v34, 3  ;;  %v3561_v49 = vor.u32 %v3559_v12, %v15208_v13  ;;  %v2810_v43 = vor.u32 %v2808_v62, %v15320_v40  ;;  %v1499_v10 = vpop.permute.xlu0 %1498  ;;  %v21239_v12 = vld [vmem:[#allocation31_spill] sm:$0xff]  ;;  %v21240_v50 = vld [vmem:[#allocation38_spill] sm:$0xff]  ;;  %1417 = vrot.lane.b32.xlu0 %v21241_v32, %s12998_s22 }
 0x1f2   :  { %v20828_v35 = vrot.slane %v14567_v60, 1  ;;  %v2824_v28 = vshll.u32 %v15293_v6, 16  ;;  %v15359_v57 = vrot.slane %v2821_v61, 7  ;;  %v20827_v13 = vrot.slane %v21230_v25, 3  ;;  %v1133_v3 = vpop.permute.xlu1 %1132 }
 0x1f3   :  { %1020 = vrot.lane.b32.xlu1 %v945_v54, %s12998_s22  ;;  %v3574_v38 = vsel %vm773_vm5, %v3569_v2, %v15341_v46  ;;  %v15361_v54 = vor.u32 %v1725_v14, %v1722_v47  ;;  %v15366_v62 = vmul.bf16 %v21240_v50, %v21239_v12  ;;  %v15369_v6 = vmul.bf16 %v15332_v23, %v1979_v24  ;;  %v21248_v50 = vld [vmem:[#allocation28_spill] sm:$0xff] }
 0x1f4   :  { %4296 = vmatprep.mubr.bf16.mxu1 %v3574_v38  ;;  %v3566_v34 = vsel %vm773_vm5, %v3561_v49, %v15336_v5  ;;  %v2058_v47 = vsel %vm1841_vm9, %v14814_v59, %v15085_v4  ;;  %v21242_v2 = vrot.slane %v14505_v9, 3  ;;  %v15394_v59 = vsel %vm1292_vm6, %v15198_v8, %v2810_v43  ;;  %v15406_v38 = vld [vmem:[%s21031_s26 + $0x120] ss:$12 sps:$4 sm:$0xff]   ;;  %v21245_v43 = vld [vmem:[#allocation63_spill] sm:$0xff] }
 0x1f5   :  { %4297 = vmatmul.mubr.bf16.gmra.mrb[32].mxu1 %v3566_v34  ;;  %v1727_v24 = vsel %vm1530_vm8, %v15206_v30, %v15361_v54  ;;  %21243 = vst [vmem:[#allocation26_spill] sm:$0xff] %v15394_v59  ;;  %v21244_v4 = vrot.slane %v21217_v33, 1  ;;  %v20830_v49 = vshrl.u32 %v21217_v33, 16  ;;  %v2829_v9 = vshrl.u32 %v15355_v31, 16  ;;  %v1780_v34 = vpop.permute.xlu0 %1779  ;;  %1518 = vrot.lane.b32.xlu0 %v15288_v22, %s12999_s2 }
 0x1f6   :  { %v15388_v14 = vsel %vm330_vm1, %v21242_v2, %v20827_v13  ;;  %v2125_v12 = vsel %vm1894_vm10, %v2058_v47, %v1499_v10  ;;  %v2826_v8 = vor.u32 %v2824_v28, %v15359_v57  ;;  %v21246_v61 = vshll.u32 %v14002_v18, 16  ;;  %v1003_v20 = vpop.permute.xlu1 %1002 }
 0x1f7   :  { %1280 = vrot.lane.b32.xlu1 %v15236_v48, %s13000_s25  ;;  %v1103_v30 = vsel %vm1058_vm4, %v21244_v4, %v20828_v35  ;;  %v3587_v13 = vshll.u32 %v15369_v6, 16  ;;  %v2187_v35 = vsel %vm1947_vm11, %v2125_v12, %v1780_v34  ;;  %v948_v23 = vor.u32 %v20830_v49, %v15299_v26 }
 0x1f8   :  { %v1335_v4 = vor.u32 %v15259_v63, %v21246_v61  ;;  %v21247_v10 = vshll.u32 %v14567_v60, 16  ;;  %v3591_v28 = vshrl.u32 %v15307_v15, 16  ;;  %v15425_v2 = vmul.bf16 %v15394_v59, %v2187_v35 }
 0x1f9   :  { %v1865_v61 = vsel %vm1841_vm9, %v21248_v50, %v1003_v20  ;;  %v21249_v12 = vrot.slane %v21245_v43, 2  ;;  %v21250_v34 = vrot.slane %v21230_v25, 2  ;;  %v2832_v15 = vshll.u32 %v15355_v31, 16  ;;  %1799 = vrot.lane.b32.xlu0 %v1727_v24, %s13000_s25 }
 0x1fa   :  { %v15421_v47 = vrot.slane %v21247_v10, 1  ;;  %v15439_v10 = vrot.slane %v2829_v9, 7  ;;  %v15444_v35 = vsel %vm1292_vm6, %v15226_v21, %v1335_v4  ;;  %v2845_v50 = vshrl.u32 %v15406_v38, 16  ;;  %v1263_v21 = vpop.permute.xlu1 %1262 }
 0x1fb   :  { %v15436_v26 = vsel %vm1426_vm7, %v21250_v34, %v21249_v12  ;;  %1152 = vrot.lane.b32.xlu1 %v1103_v30, %s12999_s2  ;;  %v3579_v22 = vshll.u32 %v15366_v62, 16  ;;  %v3583_v20 = vshrl.u32 %v15252_v11, 16  ;;  %v3595_v49 = vshll.u32 %v15425_v2, 16  ;;  %v15450_v12 = vpop.permute.xlu0 %1399  ;;  %v15465_v11 = vld [vmem:[%s21031_s26 + $0x128] ss:$12 sps:$4 sm:$0xff]  }
 0x1fc   :  { %v15454_v30 = vsel %vm1292_vm6, %v15247_v51, %v2826_v8  ;;  %v15456_v9 = vrot.slane %v3587_v13, 1  ;;  %v1918_v31 = vsel %vm1894_vm10, %v1865_v61, %v1133_v3  ;;  %v953_v4 = vsel %vm773_vm5, %v948_v23, %v15421_v47 }
 0x1fd   :  { %21251 = vst [vmem:[#allocation31_spill] sm:$0xff] %v15454_v30  ;;  %v3593_v34 = vor.u32 %v3591_v28, %v15341_v46  ;;  %v15467_v59 = vrot.slane %v3595_v49, 1  ;;  %v1982_v51 = vsel %vm1947_vm11, %v1918_v31, %v1263_v21  ;;  %v1729_v13 = vshrl.u32 %v21245_v43, 16  ;;  %1419 = vrot.lane.b32.xlu0 %v14929_v0, %s12998_s22 }
 0x1fe   :  { %v1732_v3 = vshll.u32 %v21245_v43, 16  ;;  %v3585_v23 = vor.u32 %v3583_v20, %v15336_v5  ;;  %v2834_v46 = vor.u32 %v2832_v15, %v15439_v10  ;;  %v20837_v8 = vrot.slane %v21241_v32, 1 }
 0x1ff   :  { %1022 = vrot.lane.b32.xlu1 %v953_v4, %s12998_s22  ;;  %v15477_v28 = vrot.slane %v2845_v50, 7  ;;  %v1501_v49 = vpop.permute.xlu0 %1500  ;;  %v3598_v61 = vsel %vm773_vm5, %v3593_v34, %v15467_v59  ;;  %v2848_v24 = vshll.u32 %v15406_v38, 16  ;;  %v1731_v31 = vrot.slane %v1729_v13, 2  ;;  %v1135_v50 = vpop.permute.xlu1 %1134  ;;  %v12675_v38 = vld [vmem:[%s21031_s26 + $0x124] ss:$12 sps:$4 sm:$0xff]  }
 0x200   :  { %v1734_v21 = vrot.slane %v1732_v3, 3  ;;  %v21252_v48 = vshll.u32 %v15142_v52, 16  ;;  %v3599_v5 = vshrl.u32 %v15366_v62, 16  ;;  %v15488_v15 = vmul.bf16 %v15454_v30, %v1982_v51  ;;  %4304 = vmatprep.mubr.bf16.mxu1 %v3598_v61 }
 0x201   :  { %v3590_v20 = vsel %vm773_vm5, %v3585_v23, %v15456_v9  ;;  %v15495_v4 = vrot.slane %v3579_v22, 1  ;;  %v2861_v34 = vshrl.u32 %v15465_v11, 16  ;;  %v20836_v62 = vshll.u32 %v21241_v32, 16  ;;  %1520 = vrot.lane.b32.xlu0 %v15436_v26, %s12999_s2 }
 0x202   :  { %v15484_v33 = vrot.slane %v21252_v48, 1  ;;  %4305 = vmatmul.mubr.bf16.gmra.mrb[36].mxu1 %v3590_v20  ;;  %v15500_v48 = vor.u32 %v1734_v21, %v1731_v31  ;;  %v2061_v51 = vsel %vm1841_vm9, %v14979_v19, %v15203_v1  ;;  %v15510_v22 = vsel %vm1292_vm6, %v15320_v40, %v2834_v46 }
 0x203   :  { %1282 = vrot.lane.b32.xlu1 %v15388_v14, %s13000_s25  ;;  %21253 = vst [vmem:[#allocation63_spill] sm:$0xff] %v15510_v22  ;;  %v21254_v13 = vrot.slane %v14567_v60, 1  ;;  %v20834_v23 = vrot.slane %v21245_v43, 3  ;;  %v2127_v61 = vsel %vm1894_vm10, %v2061_v51, %v1501_v49  ;;  %v1782_v31 = vpop.permute.xlu0 %1781  ;;  %v2850_v19 = vor.u32 %v2848_v24, %v15477_v28  ;;  %v1005_v20 = vpop.permute.xlu1 %1004 }
 0x204   :  { %v1736_v1 = vsel %vm1530_vm8, %v15361_v54, %v15500_v48  ;;  %v20835_v40 = vshrl.u32 %v14567_v60, 16  ;;  %v3611_v46 = vshll.u32 %v15488_v15, 16  ;;  %v2190_v21 = vsel %vm1947_vm11, %v2127_v61, %v1782_v31 }
 0x205   :  { %v1105_v3 = vsel %vm1058_vm4, %v21254_v13, %v20837_v8  ;;  %v21255_v13 = vrot.slane %v21230_v25, 3  ;;  %v2853_v51 = vshrl.u32 %v12675_v38, 16  ;;  %v15534_v24 = vmul.bf16 %v15510_v22, %v2190_v21  ;;  %1801 = vrot.lane.b32.xlu0 %v1736_v1, %s13000_s25 }
 0x206   :  { %v1867_v54 = vsel %vm1841_vm9, %v13795_v16, %v1005_v20  ;;  %v956_v61 = vor.u32 %v20835_v40, %v15421_v47  ;;  %v15545_v25 = vrot.slane %v20836_v62, 1  ;;  %v15547_v31 = vrot.slane %v2861_v34, 7  ;;  %v12676_v34 = vld [vmem:[%s21031_s26 + $0x138] ss:$12 sps:$4 sm:$0xff]  }
 0x207   :  { %v15531_v49 = vsel %vm330_vm1, %v21255_v13, %v20834_v23  ;;  %1154 = vrot.lane.b32.xlu1 %v1105_v3, %s12999_s2  ;;  %v15550_v21 = vrot.slane %v2853_v51, 7  ;;  %v2856_v13 = vshll.u32 %v12675_v38, 16  ;;  %v20839_v16 = vrot.slane %v14964_v7, 2  ;;  %v15557_v40 = vpop.permute.xlu0 %1401 }
 0x208   :  { %21256 = vst [vmem:[#allocation28_spill] sm:$0xff] %v15531_v49  ;;  %v2864_v20 = vshll.u32 %v15465_v11, 16  ;;  %v3607_v26 = vshrl.u32 %v15369_v6, 16  ;;  %v3615_v23 = vshrl.u32 %v15425_v2, 16  ;;  %v3619_v47 = vshll.u32 %v15534_v24, 16  ;;  %v1265_v11 = vpop.permute.xlu1 %1264 }
 0x209   :  { %v15562_v3 = vrot.slane %v3611_v46, 1  ;;  %v1920_v38 = vsel %vm1894_vm10, %v1867_v54, %v1135_v50  ;;  %v15567_v51 = vsel %vm1292_vm6, %v15359_v57, %v2850_v19  ;;  %v21258_v6 = vrot.slane %v21245_v43, 2  ;;  %1421 = vrot.lane.b32.xlu0 %v15118_v58, %s12998_s22 }
 0x20a   :  { %21257 = vst [vmem:[#allocation72_spill] sm:$0xff] %v15567_v51  ;;  %v3621_v62 = vrot.slane %v3619_v47, 1  ;;  %v1985_v8 = vsel %vm1947_vm11, %v1920_v38, %v1265_v11  ;;  %v961_v46 = vsel %vm773_vm5, %v956_v61, %v15545_v25  ;;  %v3617_v50 = vor.u32 %v3615_v23, %v15467_v59 }
 0x20b   :  { %v1473_v2 = vsel %vm1426_vm7, %v21258_v6, %v20839_v16  ;;  %v21259_v57 = vshrl.u32 %v15011_v36, 16  ;;  %v21260_v54 = vshrl.u32 %v15142_v52, 16  ;;  %1024 = vrot.lane.b32.xlu1 %v961_v46, %s12998_s22  ;;  %v3609_v47 = vor.u32 %v3607_v26, %v15456_v9  ;;  %v1503_v36 = vpop.permute.xlu0 %1502  ;;  %v21263_v26 = vld [vmem:[#allocation41_spill] sm:$0xff]  ;;  %v21264_v46 = vld [vmem:[#allocation39_spill] sm:$0xff] }
 0x20c   :  { %v2858_v1 = vor.u32 %v2856_v13, %v15550_v21  ;;  %v15593_v61 = vor.u32 %v3599_v5, %v15495_v4  ;;  %v15596_v59 = vmul.bf16 %v15567_v51, %v1985_v8  ;;  %v3622_v23 = vsel %vm773_vm5, %v3617_v50, %v3621_v62  ;;  %v1137_v6 = vpop.permute.xlu1 %1136 }
 0x20d   :  { %v15582_v19 = vor.u32 %v21259_v57, %v15243_v45  ;;  %v15587_v22 = vor.u32 %v21260_v54, %v15484_v33  ;;  %v2869_v38 = vshrl.u32 %v12676_v34, 16  ;;  %v21261_v52 = vmov 0.0   ;;  %4312 = vmatprep.mubr.bf16.mxu1 %v3622_v23  ;;  %1522 = vrot.lane.b32.xlu0 %v1473_v2, %s12999_s2 }
 0x20e   :  { %v15601_v11 = vpack.c.bf16 %v21261_v52, %v15091_v44  ;;  %v3614_v9 = vsel %vm773_vm5, %v3609_v47, %v15562_v3  ;;  %v20840_v13 = vrot.slane %v14929_v0, 1  ;;  %v2872_v5 = vshll.u32 %v12676_v34, 16 }
 0x20f   :  { %v15608_v8 = vmul.bf16 %v21264_v46, %v21263_v26  ;;  %v15611_v57 = vor.u32 %v2864_v20, %v15547_v31  ;;  %v2064_v50 = vsel %vm1841_vm9, %v15183_v39, %v15328_v37  ;;  %4313 = vmatmul.mubr.bf16.gmra.mrb[40].mxu1 %v3614_v9  ;;  %v15618_v54 = vrot.slane %v2869_v38, 7  ;;  %1284 = vrot.lane.b32.xlu1 %v15531_v49, %s13000_s25  ;;  %v1784_v9 = vpop.permute.xlu0 %1783 }
 0x210   :  { %21262 = vst [vmem:[#allocation73_spill] sm:$0xff] %v15601_v11  ;;  %v3639_v47 = vshrl.u32 %v15534_v24, 16  ;;  %v15625_v34 = vsel %vm1292_vm6, %v15439_v10, %v2858_v1  ;;  %v3635_v39 = vshll.u32 %v15596_v59, 16  ;;  %v2129_v37 = vsel %vm1894_vm10, %v2064_v50, %v1503_v36  ;;  %v1007_v16 = vpop.permute.xlu1 %1006  ;;  %v12679_v36 = vld [vmem:[%s21031_s26 + $0x13c] ss:$12 sps:$4 sm:$0xff]  }
 0x211   :  { %21265 = vst [vmem:[#allocation41_spill] sm:$0xff] %v15625_v34  ;;  %v20843_v38 = vshrl.u32 %v21241_v32, 16  ;;  %v1738_v24 = vshrl.u32 %v14964_v7, 16  ;;  %v2193_v26 = vsel %vm1947_vm11, %v2129_v37, %v1784_v9  ;;  %v21266_v10 = vrot.slane %v21241_v32, 1 }
 0x212   :  { %v2874_v20 = vor.u32 %v2872_v5, %v15618_v54  ;;  %v1741_v23 = vshll.u32 %v14964_v7, 16  ;;  %v15645_v50 = vmul.bf16 %v15625_v34, %v2193_v26  ;;  %v1869_v37 = vsel %vm1841_vm9, %v13877_v41, %v1007_v16 }
 0x213   :  { %v1107_v1 = vsel %vm1058_vm4, %v21266_v10, %v20840_v13  ;;  %v964_v9 = vor.u32 %v20843_v38, %v15545_v25  ;;  %v21267_v5 = vshll.u32 %v14929_v0, 16  ;;  %v15657_v13 = vpack.c.bf16 %v14931_v42, %v14931_v42  ;;  %v15664_v2 = vpop.permute.xlu0 %1403 }
 0x214   :  { %v3631_v51 = vshrl.u32 %v15488_v15, 16  ;;  %1156 = vrot.lane.b32.xlu1 %v1107_v1, %s12999_s2  ;;  %v1740_v26 = vrot.slane %v1738_v24, 2  ;;  %v1743_v34 = vrot.slane %v1741_v23, 3  ;;  %v15661_v41 = vrot.slane %v3635_v39, 1  ;;  %v1267_v23 = vpop.permute.xlu1 %1266 }
 0x215   :  { %v968_v10 = vrot.slane %v21267_v5, 1  ;;  %21268 = vst [vmem:[#allocation74_spill] sm:$0xff] %v15657_v13  ;;  %v3643_v16 = vshll.u32 %v15645_v50, 16  ;;  %v21269_v25 = vrot.slane %v15601_v11, 2  ;;  %v21270_v5 = vrot.slane %v14964_v7, 2 }
 0x216   :  { %v3641_v42 = vor.u32 %v3639_v47, %v3621_v62  ;;  %v1922_v30 = vsel %vm1894_vm10, %v1869_v37, %v1137_v6  ;;  %v15674_v15 = vsel %vm1292_vm6, %v15477_v28, %v2874_v20  ;;  %v15676_v39 = vor.u32 %v1743_v34, %v1740_v26  ;;  %v15689_v28 = vld [vmem:[%s21031_s26 + $0x140] ss:$12 sps:$4 sm:$0xff]  }
 0x217   :  { %v1475_v38 = vsel %vm1426_vm7, %v21270_v5, %v21269_v25  ;;  %21271 = vst [vmem:[#allocation75_spill] sm:$0xff] %v15674_v15  ;;  %v2877_v24 = vshrl.u32 %v12679_v36, 16  ;;  %v15678_v1 = vrot.slane %v3643_v16, 1  ;;  %v1988_v46 = vsel %vm1947_vm11, %v1922_v30, %v1267_v23 }
 0x218   :  { %1524 = vrot.lane.b32.xlu0 %v1475_v38, %s12999_s2  ;;  %v969_v52 = vsel %vm773_vm5, %v964_v9, %v968_v10  ;;  %v15684_v62 = vrot.slane %v14964_v7, 3  ;;  %v3633_v6 = vor.u32 %v3631_v51, %v15562_v3  ;;  %v1745_v30 = vsel %vm1530_vm8, %v15500_v48, %v15676_v39  ;;  %v1505_v38 = vpop.permute.xlu0 %1504  ;;  %v12680_v3 = vld [vmem:[%s21031_s26 + $0x150] ss:$12 sps:$4 sm:$0xff]   ;;  %v1139_v48 = vpop.permute.xlu1 %1138 }
 0x219   :  { %1026 = vrot.lane.b32.xlu1 %v969_v52, %s12998_s22  ;;  %v15696_v47 = vrot.slane %v2877_v24, 7  ;;  %v2880_v34 = vshll.u32 %v12679_v36, 16  ;;  %v3646_v37 = vsel %vm773_vm5, %v3641_v42, %v15678_v1  ;;  %v20845_v9 = vshrl.u32 %v14929_v0, 16  ;;  %v21277_v24 = vld [vmem:[#allocation40_spill] sm:$0xff] }
 0x21a   :  { %21272 = vst [vmem:[#allocation76_spill] sm:$0xff] %v15684_v62  ;;  %v15707_v51 = vmul.bf16 %v15674_v15, %v1988_v46  ;;  %4320 = vmatprep.mubr.bf16.mxu1 %v3646_v37  ;;  %v3638_v52 = vsel %vm773_vm5, %v3633_v6, %v15661_v41  ;;  %v21273_v26 = vmov 0.0|0.0   ;;  %v2067_v25 = vsel %vm1841_vm9, %v15303_v29, %v15450_v12 }
 0x21b   :  { %v2882_v36 = vor.u32 %v2880_v34, %v15696_v47  ;;  %v15713_v16 = vrot.slane %v21273_v26, 2  ;;  %4321 = vmatmul.mubr.bf16.gmra.mrb[44].mxu1 %v3638_v52  ;;  %v21275_v46 = vrot.slane %v21245_v43, 3  ;;  %v972_v42 = vor.u32 %v20845_v9, %v968_v10 }
 0x21c   :  { %1803 = vrot.lane.b32.xlu0 %v1745_v30, %s13000_s25  ;;  %v974_v23 = vshll.u32 %v15657_v13, 16  ;;  %v15731_v6 = vsel %vm1292_vm6, %v21277_v24, %v15611_v57  ;;  %v2885_v29 = vshrl.u32 %v15689_v28, 16  ;;  %v2131_v12 = vsel %vm1894_vm10, %v2067_v25, %v1505_v38  ;;  %v1786_v30 = vpop.permute.xlu0 %1785  ;;  %v1009_v38 = vpop.permute.xlu1 %1008 }
 0x21d   :  { %21274 = vst [vmem:[#allocation77_spill] sm:$0xff] %v15713_v16  ;;  %v15723_v5 = vsel %vm330_vm1, %v21275_v46, %v15684_v62  ;;  %21278 = vst [vmem:[#allocation40_spill] sm:$0xff] %v15731_v6  ;;  %v15739_v43 = vsel %vm1292_vm6, %v15550_v21, %v2882_v36  ;;  %v2893_v34 = vshrl.u32 %v12680_v3, 16  ;;  %v2896_v37 = vshll.u32 %v12680_v3, 16 }
 0x21e   :  { %21276 = vst [vmem:[#allocation78_spill] sm:$0xff] %v15723_v5  ;;  %1286 = vrot.lane.b32.xlu1 %v15723_v5, %s13000_s25  ;;  %21279 = vst [vmem:[#allocation79_spill] sm:$0xff] %v15739_v43  ;;  %v976_v10 = vrot.slane %v974_v23, 1  ;;  %v1747_v52 = vshrl.u32 %v15601_v11, 16  ;;  %v2888_v57 = vshll.u32 %v15689_v28, 16  ;;  %v3659_v46 = vshll.u32 %v15707_v51, 16 }
 0x21f   :  { %v2196_v24 = vsel %vm1947_vm11, %v2131_v12, %v1786_v30  ;;  %v21280_v25 = vrot.slane %v15601_v11, 2  ;;  %v1871_v3 = vsel %vm1841_vm9, %v13937_v56, %v1009_v38  ;;  %v15756_v36 = vrot.slane %v2893_v34, 7 }
 0x220   :  { %v15750_v21 = vmul.bf16 %v15739_v43, %v2196_v24  ;;  %v977_v28 = vsel %vm773_vm5, %v972_v42, %v976_v10  ;;  %v15758_v23 = vrot.slane %v2885_v29, 7  ;;  %v770_v12 = vpack.c.bf16 %v15091_v44, %v15091_v44  ;;  %v15766_v56 = vpop.permute.xlu0 %1405  ;;  %v12682_v29 = vld [vmem:[%s21031_s26 + $0x154] ss:$12 sps:$4 sm:$0xff]  }
 0x221   :  { %v1477_v9 = vsel %vm1426_vm7, %v21280_v25, %v15713_v16  ;;  %v3655_v30 = vshrl.u32 %v15596_v59, 16  ;;  %v3663_v25 = vshrl.u32 %v15645_v50, 16  ;;  %v1749_v42 = vrot.slane %v1747_v52, 2  ;;  %v1269_v50 = vpop.permute.xlu1 %1268 }
 0x222   :  { %1526 = vrot.lane.b32.xlu0 %v1477_v9, %s12999_s2  ;;  %1028 = vrot.lane.b32.xlu1 %v977_v28, %s12998_s22  ;;  %v3667_v24 = vshll.u32 %v15750_v21, 16  ;;  %v2898_v9 = vor.u32 %v2896_v37, %v15756_v36  ;;  %v1750_v10 = vshll.u32 %v15601_v11, 16  ;;  %v15773_v44 = vrot.slane %v3659_v46, 1 }
 0x223   :  { %v1924_v59 = vsel %vm1894_vm10, %v1871_v3, %v1139_v48  ;;  %v20846_v34 = vrot.slane %v15657_v13, 1  ;;  %v3665_v38 = vor.u32 %v3663_v25, %v15678_v1  ;;  %v2890_v20 = vor.u32 %v2888_v57, %v15758_v23 }
 0x224   :  { %v15778_v28 = vrot.slane %v3667_v24, 1  ;;  %v15782_v37 = vsel %vm1292_vm6, %v15618_v54, %v2898_v9  ;;  %v1991_v52 = vsel %vm1947_vm11, %v1924_v59, %v1269_v50  ;;  %v1752_v7 = vrot.slane %v1750_v10, 3  ;;  %v12683_v54 = vld [vmem:[%s21031_s26 + $0x168] ss:$12 sps:$4 sm:$0xff]   ;;  %v1507_v24 = vpop.permute.xlu0 %1506 }
 0x225   :  { %21281 = vst [vmem:[#allocation80_spill] sm:$0xff] %v15782_v37  ;;  %v15786_v46 = vrot.slane %v770_v12, 3  ;;  %v21282_v48 = vrot.slane %v14929_v0, 1  ;;  %v3657_v1 = vor.u32 %v3655_v30, %v15661_v41  ;;  %v2901_v12 = vshrl.u32 %v12682_v29, 16  ;;  %v21283_v10 = vld [vmem:[#allocation42_spill] sm:$0xff]  ;;  %v21284_v59 = vld [vmem:[#allocation43_spill] sm:$0xff] }
 0x226   :  { %v1753_v25 = vor.u32 %v1752_v7, %v1749_v42  ;;  %v3670_v57 = vsel %vm773_vm5, %v3665_v38, %v15778_v28  ;;  %v2904_v9 = vshll.u32 %v12682_v29, 16  ;;  %v15802_v50 = vmul.bf16 %v21284_v59, %v21283_v10  ;;  %v1141_v7 = vpop.permute.xlu1 %1140  ;;  %v12685_v29 = vld [vmem:[%s21031_s26 + $0x16c] ss:$12 sps:$4 sm:$0xff]  }
 0x227   :  { %v1109_v3 = vsel %vm1058_vm4, %v21282_v48, %v20846_v34  ;;  %v21285_v48 = vld [vmem:[#allocation48_spill] sm:$0xff]  ;;  %v15809_v30 = vmul.bf16 %v15782_v37, %v1991_v52  ;;  %4328 = vmatprep.mubr.bf16.mxu1 %v3670_v57  ;;  %v3662_v42 = vsel %vm773_vm5, %v3657_v1, %v15773_v44  ;;  %v21286_v10 = vmov 0   ;;  %v21289_v37 = vld [vmem:[#allocation51_spill] sm:$0xff] }
 0x228   :  { %1158 = vrot.lane.b32.xlu1 %v1109_v3, %s12999_s2  ;;  %v15806_v41 = vmul.bf16 %v15731_v6, %v21285_v48  ;;  %v1754_v38 = vsel %vm1530_vm8, %v15676_v39, %v1753_v25  ;;  %4329 = vmatmul.mubr.bf16.gmra.mrb[48].mxu1 %v3662_v42  ;;  %v15818_v3 = vrot.slane %v2901_v12, 7  ;;  %v15821_v48 = vrot.slane %v21286_v10, 2  ;;  %v15829_v1 = vld [vmem:[%s21031_s26 + $0x158] ss:$12 sps:$4 sm:$0xff]  }
 0x229   :  { %v15824_v52 = vrot.slane %v21286_v10, 3  ;;  %v2070_v57 = vsel %vm1841_vm9, %v15444_v35, %v15557_v40  ;;  %1805 = vrot.lane.b32.xlu0 %v1754_v38, %s13000_s25  ;;  %v1239_v39 = vsel %vm330_vm1, %v15684_v62, %v15786_v46  ;;  %v2917_v12 = vshrl.u32 %v12683_v54, 16  ;;  %v1788_v40 = vpop.permute.xlu0 %1787 }
 0x22a   :  { %v2920_v42 = vshll.u32 %v12683_v54, 16  ;;  %v15840_v34 = vsel %vm1292_vm6, %v15547_v31, %v2890_v20  ;;  %v21290_v15 = vshrl.u32 %v21289_v37, 16  ;;  %v2133_v10 = vsel %vm1894_vm10, %v2070_v57, %v1507_v24  ;;  %v1011_v54 = vpop.permute.xlu1 %1010 }
 0x22b   :  { %21287 = vst [vmem:[#allocation42_spill] sm:$0xff] %v15824_v52  ;;  %21288 = vst [vmem:[#allocation48_spill] sm:$0xff] %v15840_v34  ;;  %v2906_v35 = vor.u32 %v2904_v9, %v15818_v3  ;;  %v3683_v38 = vshll.u32 %v15809_v30, 16  ;;  %v2199_v43 = vsel %vm1947_vm11, %v2133_v10, %v1788_v40  ;;  %v15851_v59 = vrot.slane %v2917_v12, 7  ;;  %v15867_v10 = vld [vmem:[%s21031_s26 + $0x180] ss:$12 sps:$4 sm:$0xff]  }
 0x22c   :  { %v15844_v6 = vrot.slane %v21290_v15, 7  ;;  %1288 = vrot.lane.b32.xlu1 %v1239_v39, %s13000_s25  ;;  %v2925_v31 = vshrl.u32 %v12685_v29, 16  ;;  %v1873_v15 = vsel %vm1841_vm9, %v14002_v18, %v1011_v54  ;;  %v15861_v24 = vor.u32 %v15824_v52, %v15821_v48 }
 0x22d   :  { %v15855_v20 = vsel %vm1292_vm6, %v15696_v47, %v2906_v35  ;;  %v978_v9 = vshrl.u32 %v15657_v13, 16  ;;  %v2909_v57 = vshrl.u32 %v15829_v1, 16  ;;  %v2912_v39 = vshll.u32 %v15829_v1, 16  ;;  %1423 = vrot.lane.b32.xlu0 %v21273_v26, %s12998_s22  ;;  %v15882_v54 = vpop.permute.xlu0 %1407 }
 0x22e   :  { %21291 = vst [vmem:[#allocation51_spill] sm:$0xff] %v15855_v20  ;;  %21292 = vst [vmem:[#allocation81_spill] sm:$0xff] %v15861_v24  ;;  %v15874_v18 = vmul.bf16 %v15855_v20, %v2199_v43  ;;  %v2922_v47 = vor.u32 %v2920_v42, %v15851_v59  ;;  %v21293_v12 = vshll.u32 %v21289_v37, 16  ;;  %v3679_v40 = vshrl.u32 %v15707_v51, 16  ;;  %v1271_v20 = vpop.permute.xlu1 %1270 }
 0x22f   :  { %v15884_v52 = vrot.slane %v2925_v31, 7  ;;  %v2928_v1 = vshll.u32 %v12685_v29, 16  ;;  %v3687_v26 = vshrl.u32 %v15750_v21, 16  ;;  %v15887_v62 = vrot.slane %v3683_v38, 1 }
 0x230   :  { %v1338_v35 = vor.u32 %v15844_v6, %v21293_v12  ;;  %1030 = vrot.lane.b32.xlu1 %v978_v9, %s12998_s22  ;;  %v3691_v43 = vshll.u32 %v15874_v18, 16  ;;  %v1926_v42 = vsel %vm1894_vm10, %v1873_v15, %v1141_v7  ;;  %v1758_v12 = vsel %vm1530_vm8, %v1753_v25, %v15861_v24  ;;  %v15907_v25 = vld [vmem:[%s21031_s26 + $0x184] ss:$12 sps:$4 sm:$0xff]  }
 0x231   :  { %v15895_v51 = vsel %vm1292_vm6, %v15756_v36, %v2922_v47  ;;  %v1994_v31 = vsel %vm1947_vm11, %v1926_v42, %v1271_v20  ;;  %v2941_v29 = vshrl.u32 %v15867_v10, 16  ;;  %v15899_v9 = vrot.slane %v2909_v57, 7  ;;  %1807 = vrot.lane.b32.xlu0 %v1758_v12, %s13000_s25  ;;  %v15918_v47 = vld [vmem:[%s21031_s26 + $0x170] ss:$12 sps:$4 sm:$0xff]  }
 0x232   :  { %21294 = vst [vmem:[#allocation82_spill] sm:$0xff] %v15895_v51  ;;  %v3693_v21 = vrot.slane %v3691_v43, 1  ;;  %v3689_v38 = vor.u32 %v3687_v26, %v15778_v28  ;;  %v2930_v7 = vor.u32 %v2928_v1, %v15884_v52  ;;  %v21295_v36 = vshll.u32 %v15608_v8, 16  ;;  %v1509_v28 = vpop.permute.xlu0 %1508  ;;  %v21297_v42 = vld [vmem:[#allocation56_spill] sm:$0xff]  ;;  %v1143_v24 = vpop.permute.xlu1 %1142 }
 0x233   :  { %v3627_v20 = vshll.u32 %v15802_v50, 16  ;;  %v3647_v57 = vshrl.u32 %v15802_v50, 16  ;;  %v21296_v26 = vrot.slane %v15657_v13, 1  ;;  %v3681_v1 = vor.u32 %v3679_v40, %v15773_v44 }
 0x234   :  { %v15911_v15 = vrot.slane %v21295_v36, 1  ;;  %v3651_v43 = vshll.u32 %v15806_v41, 16  ;;  %v15927_v12 = vmul.bf16 %v15840_v34, %v21297_v42  ;;  %v15930_v50 = vmul.bf16 %v15895_v51, %v1994_v31 }
 0x235   :  { %1160 = vrot.lane.b32.xlu1 %v21296_v26, %s12999_s2  ;;  %v3694_v36 = vsel %vm773_vm5, %v3689_v38, %v3693_v21  ;;  %v1339_v11 = vsel %vm1292_vm6, %v15259_v63, %v1338_v35  ;;  %v3686_v26 = vsel %vm773_vm5, %v3681_v1, %v15887_v62  ;;  %v15937_v44 = vrot.slane %v2941_v29, 7  ;;  %1528 = vrot.lane.b32.xlu0 %v15713_v16, %s12999_s2 }
 0x236   :  { %4336 = vmatprep.mubr.bf16.mxu1 %v3694_v36  ;;  %v2944_v40 = vshll.u32 %v15867_v10, 16  ;;  %v2914_v42 = vor.u32 %v2912_v39, %v15899_v9  ;;  %v2073_v31 = vsel %vm1841_vm9, %v1339_v11, %v15664_v2  ;;  %v15947_v63 = vsel %vm1292_vm6, %v15818_v3, %v2930_v7  ;;  %v1790_v2 = vpop.permute.xlu0 %1789  ;;  %v1013_v36 = vpop.permute.xlu1 %1012 }
 0x237   :  { %4337 = vmatmul.mubr.bf16.gmra.mrb[52].mxu1 %v3686_v26  ;;  %21298 = vst [vmem:[#allocation56_spill] sm:$0xff] %v15947_v63  ;;  %v2949_v35 = vshrl.u32 %v15907_v25, 16  ;;  %v15950_v38 = vrot.slane %v3627_v20, 1  ;;  %v2933_v29 = vshrl.u32 %v15918_v47, 16  ;;  %v21299_v10 = vshrl.u32 %v21154_v17, 16 }
 0x238   :  { %v2135_v11 = vsel %vm1894_vm10, %v2073_v31, %v1509_v28  ;;  %v15960_v1 = vrot.slane %v3651_v43, 1  ;;  %v3671_v3 = vshrl.u32 %v15806_v41, 16  ;;  %v3707_v7 = vshll.u32 %v15930_v50, 16  ;;  %v12689_v43 = vld [vmem:[%s21031_s26 + $0x198] ss:$12 sps:$4 sm:$0xff]  }
 0x239   :  { %v15955_v39 = vrot.slane %v21299_v10, 7  ;;  %1290 = vrot.lane.b32.xlu1 %v15786_v46, %s13000_s25  ;;  %v2202_v20 = vsel %vm1947_vm11, %v2135_v11, %v1790_v2  ;;  %v3675_v26 = vshll.u32 %v15927_v12, 16  ;;  %v1875_v28 = vsel %vm1841_vm9, %v21289_v37, %v1013_v36  ;;  %1809 = vrot.lane.b32.xlu0 %v15821_v48, %s13000_s25 }
 0x23a   :  { %v15967_v10 = vmul.bf16 %v15947_v63, %v2202_v20  ;;  %v2946_v46 = vor.u32 %v2944_v40, %v15937_v44  ;;  %v15977_v41 = vsel %vm1292_vm6, %v15758_v23, %v2914_v42  ;;  %v3711_v31 = vshrl.u32 %v15874_v18, 16  ;;  %v15992_v42 = vpop.permute.xlu0 %1409 }
 0x23b   :  { %21300 = vst [vmem:[#allocation83_spill] sm:$0xff] %v15977_v41  ;;  %v15982_v11 = vrot.slane %v2949_v35, 7  ;;  %v2952_v2 = vshll.u32 %v15907_v25, 16  ;;  %v15985_v37 = vrot.slane %v2933_v29, 7  ;;  %v2936_v40 = vshll.u32 %v15918_v47, 16  ;;  %v1273_v35 = vpop.permute.xlu1 %1272 }
 0x23c   :  { %v21301_v20 = vshll.u32 %v21154_v17, 16  ;;  %v3715_v23 = vshll.u32 %v15967_v10, 16  ;;  %v3703_v18 = vshrl.u32 %v15809_v30, 16  ;;  %v15995_v63 = vrot.slane %v3707_v7, 1  ;;  %v16001_v47 = vld [vmem:[%s21031_s26 + $0x188] ss:$12 sps:$4 sm:$0xff]  }
 0x23d   :  { %v1928_v48 = vsel %vm1894_vm10, %v1875_v28, %v1143_v24  ;;  %v3713_v25 = vor.u32 %v3711_v31, %v3693_v21  ;;  %v2965_v34 = vshrl.u32 %v12689_v43, 16  ;;  %v21303_v30 = vshrl.u32 %v15608_v8, 16  ;;  %v12691_v31 = vld [vmem:[%s21031_s26 + $0x19c] ss:$12 sps:$4 sm:$0xff]  }
 0x23e   :  { %v1341_v36 = vor.u32 %v15955_v39, %v21301_v20  ;;  %v3717_v29 = vrot.slane %v3715_v23, 1  ;;  %v16005_v20 = vsel %vm1292_vm6, %v15851_v59, %v2946_v46  ;;  %v1997_v51 = vsel %vm1947_vm11, %v1928_v48, %v1273_v35  ;;  %v21304_v23 = vld [vmem:[#allocation8_spill] sm:$0xff]  ;;  %v1511_v48 = vpop.permute.xlu0 %1510 }
 0x23f   :  { %21302 = vst [vmem:[#allocation84_spill] sm:$0xff] %v16005_v20  ;;  %v16011_v7 = vor.u32 %v21303_v30, %v15911_v15  ;;  %v3695_v24 = vshrl.u32 %v15927_v12, 16  ;;  %v3705_v21 = vor.u32 %v3703_v18, %v15887_v62  ;;  %v2954_v28 = vor.u32 %v2952_v2, %v15982_v11 }
 0x240   :  { %v16020_v59 = vor.u32 %v3647_v57, %v15950_v38  ;;  %v16023_v46 = vor.u32 %v3671_v3, %v15960_v1  ;;  %v16027_v8 = vmul.bf16 %v15977_v41, %v21304_v23  ;;  %v3718_v12 = vsel %vm773_vm5, %v3713_v25, %v3717_v29  ;;  %v1145_v57 = vpop.permute.xlu1 %1144 }
 0x241   :  { %v16030_v62 = vrot.slane %v3675_v26, 1  ;;  %v2938_v2 = vor.u32 %v2936_v40, %v15985_v37  ;;  %v16034_v18 = vmul.bf16 %v16005_v20, %v1997_v51  ;;  %4344 = vmatprep.mubr.bf16.mxu1 %v3718_v12  ;;  %v3710_v3 = vsel %vm773_vm5, %v3705_v21, %v15995_v63 }
 0x242   :  { %v2957_v35 = vshrl.u32 %v16001_v47, 16  ;;  %v1342_v30 = vsel %vm1292_vm6, %v15844_v6, %v1341_v36  ;;  %4345 = vmatmul.mubr.bf16.gmra.mrb[56].mxu1 %v3710_v3  ;;  %v16041_v23 = vrot.slane %v2965_v34, 7  ;;  %v2968_v26 = vshll.u32 %v12689_v43, 16  ;;  %v1792_v43 = vpop.permute.xlu0 %1791 }
 0x243   :  { %v16044_v25 = vor.u32 %v3695_v24, %v16030_v62  ;;  %v2076_v51 = vsel %vm1841_vm9, %v1342_v30, %v15766_v56  ;;  %v16050_v40 = vsel %vm1292_vm6, %v15884_v52, %v2954_v28  ;;  %v2973_v21 = vshrl.u32 %v12691_v31, 16 }
 0x244   :  { %21305 = vst [vmem:[#allocation8_spill] sm:$0xff] %v16050_v40  ;;  %v3699_v12 = vshll.u32 %v16027_v8, 16  ;;  %v21306_v20 = vshrl.u32 %v21174_v53, 16  ;;  %v2137_v34 = vsel %vm1894_vm10, %v2076_v51, %v1511_v48  ;;  %v21307_v36 = vshrl.u32 %v21241_v32, 16  ;;  %v1015_v30 = vpop.permute.xlu1 %1014 }
 0x245   :  { %v16062_v56 = vsel %vm1292_vm6, %v15899_v9, %v2938_v2  ;;  %v2960_v52 = vshll.u32 %v16001_v47, 16  ;;  %v3731_v28 = vshll.u32 %v16034_v18, 16  ;;  %v2205_v3 = vsel %vm1947_vm11, %v2137_v34, %v1792_v43 }
 0x246   :  { %v16055_v6 = vrot.slane %v21306_v20, 7  ;;  %v1358_v24 = vrot.slane %v21307_v36, 7  ;;  %21308 = vst [vmem:[#allocation85_spill] sm:$0xff] %v16062_v56  ;;  %v12692_v20 = vld [vmem:[%s21031_s26 + $0x1b0] ss:$12 sps:$4 sm:$0xff]   ;;  %v16070_v48 = vrot.slane %v2957_v35, 7  ;;  %v16073_v51 = vmul.bf16 %v16050_v40, %v2205_v3 }
 0x247   :  { %v1877_v9 = vsel %vm1841_vm9, %v21154_v17, %v1015_v30  ;;  %v2970_v2 = vor.u32 %v2968_v26, %v16041_v23  ;;  %v16078_v47 = vrot.slane %v2973_v21, 7  ;;  %v2976_v36 = vshll.u32 %v12691_v31, 16  ;;  %v16092_v21 = vpop.permute.xlu0 %1411 }
 0x248   :  { %v21309_v34 = vshrl.u32 %v14567_v60, 16  ;;  %v21310_v41 = vshll.u32 %v21241_v32, 16  ;;  %v21311_v35 = vshll.u32 %v21174_v53, 16  ;;  %v3727_v40 = vshrl.u32 %v15930_v50, 16 }
 0x249   :  { %v3735_v17 = vshrl.u32 %v15967_v10, 16  ;;  %v3739_v26 = vshll.u32 %v16073_v51, 16  ;;  %v16094_v31 = vrot.slane %v3731_v28, 1  ;;  %v1930_v30 = vsel %vm1894_vm10, %v1877_v9, %v1145_v57  ;;  %v12694_v28 = vld [vmem:[%s21031_s26 + $0x1b4] ss:$12 sps:$4 sm:$0xff]  }
 0x24a   :  { %v16082_v43 = vrot.slane %v21309_v34, 7  ;;  %v1359_v16 = vor.u32 %v1358_v24, %v21310_v41  ;;  %v1344_v3 = vor.u32 %v16055_v6, %v21311_v35  ;;  %v1275_v34 = vpop.permute.xlu1 %1274  ;;  %v2989_v13 = vshrl.u32 %v12692_v20, 16 }
 0x24b   :  { %v16101_v5 = vrot.slane %v3739_v26, 1  ;;  %v16105_v50 = vsel %vm1292_vm6, %v15937_v44, %v2970_v2  ;;  %v2000_v10 = vsel %vm1947_vm11, %v1930_v30, %v1275_v34  ;;  %v3737_v35 = vor.u32 %v3735_v17, %v3717_v29  ;;  %v1513_v29 = vpop.permute.xlu0 %1512  ;;  %v21314_v34 = vld [vmem:[#allocation10_spill] sm:$0xff] }
 0x24c   :  { %v16099_v41 = vsel %vm1292_vm6, %v16082_v43, %v1359_v16  ;;  %21312 = vst [vmem:[#allocation86_spill] sm:$0xff] %v16105_v50  ;;  %v1365_v57 = vshrl.u32 %v15118_v58, 16  ;;  %v3729_v9 = vor.u32 %v3727_v40, %v15995_v63  ;;  %v2978_v16 = vor.u32 %v2976_v36, %v16078_v47 }
 0x24d   :  { %v21313_v26 = vshrl.u32 %v14929_v0, 16  ;;  %v16116_v32 = vrot.slane %v3699_v12, 1  ;;  %v3719_v44 = vshrl.u32 %v16027_v8, 16  ;;  %v1368_v2 = vshll.u32 %v15118_v58, 16 }
 0x24e   :  { %v3742_v17 = vsel %vm773_vm5, %v3737_v35, %v16101_v5  ;;  %v16123_v30 = vmul.bf16 %v16105_v50, %v2000_v10  ;;  %v1147_v63 = vpop.permute.xlu1 %1146  ;;  %v3734_v40 = vsel %vm773_vm5, %v3729_v9, %v16094_v31  ;;  %v16127_v36 = vrot.slane %v2989_v13, 7 }
 0x24f   :  { %v1361_v49 = vrot.slane %v21313_v26, 7  ;;  %4352 = vmatprep.mubr.bf16.mxu1 %v3742_v17  ;;  %v2992_v12 = vshll.u32 %v12692_v20, 16  ;;  %v16131_v8 = vmul.bf16 %v16062_v56, %v21314_v34  ;;  %v1345_v58 = vsel %vm1292_vm6, %v15955_v39, %v1344_v3  ;;  %v12695_v20 = vld [vmem:[%s21031_s26 + $0x1c8] ss:$12 sps:$4 sm:$0xff]  }
 0x250   :  { %4353 = vmatmul.mubr.bf16.gmra.mrb[60].mxu1 %v3734_v40  ;;  %v2997_v35 = vshrl.u32 %v12694_v28, 16  ;;  %v21315_v10 = vshll.u32 %v14929_v0, 16  ;;  %v2962_v17 = vor.u32 %v2960_v52, %v16070_v48  ;;  %v2079_v9 = vsel %vm1841_vm9, %v1345_v58, %v15882_v54  ;;  %v12657_v52 = vld [vmem:[%s21031_s26 + $0x1a0] ss:$12 sps:$4 sm:$0xff]  }
 0x251   :  { %v16142_v13 = vsel %vm1292_vm6, %v15982_v11, %v2978_v16  ;;  %v16147_v34 = vrot.slane %v1365_v57, 7  ;;  %v16150_v39 = vor.u32 %v3719_v44, %v16116_v32  ;;  %v21318_v3 = vshrl.u32 %v14310_v27, 16  ;;  %v1794_v16 = vpop.permute.xlu0 %1793 }
 0x252   :  { %v1362_v26 = vor.u32 %v1361_v49, %v21315_v10  ;;  %21316 = vst [vmem:[#allocation10_spill] sm:$0xff] %v16142_v13  ;;  %v2139_v11 = vsel %vm1894_vm10, %v2079_v9, %v1513_v29  ;;  %v3755_v57 = vshll.u32 %v16123_v30, 16  ;;  %v1017_v44 = vpop.permute.xlu1 %1016  ;;  %v2994_v10 = vor.u32 %v2992_v12, %v16127_v36 }
 0x253   :  { %21317 = vst [vmem:[#allocation87_spill] sm:$0xff] %v16147_v34  ;;  %v16157_v54 = vrot.slane %v21318_v3, 7  ;;  %v2208_v58 = vsel %vm1947_vm11, %v2139_v11, %v1794_v16  ;;  %v1370_v50 = vor.u32 %v1368_v2, %v16147_v34  ;;  %v1879_v3 = vsel %vm1841_vm9, %v21174_v53, %v1017_v44  ;;  %v12697_v2 = vld [vmem:[%s21031_s26 + $0x1cc] ss:$12 sps:$4 sm:$0xff]  }
 0x254   :  { %v16161_v40 = vsel %vm1292_vm6, %v1358_v24, %v1362_v26  ;;  %v16168_v56 = vmul.bf16 %v16142_v13, %v2208_v58  ;;  %v16172_v29 = vrot.slane %v2997_v35, 7  ;;  %v3000_v9 = vshll.u32 %v12694_v28, 16 }
 0x255   :  { %21319 = vst [vmem:[#allocation88_spill] sm:$0xff] %v16161_v40  ;;  %v3723_v24 = vshll.u32 %v16131_v8, 16  ;;  %v16177_v26 = vsel %vm1292_vm6, %v15985_v37, %v2962_v17  ;;  %v3013_v11 = vshrl.u32 %v12695_v20, 16  ;;  %v16183_v12 = vsel %vm1292_vm6, %v1361_v49, %v1370_v50  ;;  %v16190_v44 = vpop.permute.xlu0 %1413 }
 0x256   :  { %21320 = vst [vmem:[#allocation89_spill] sm:$0xff] %v16177_v26  ;;  %21321 = vst [vmem:[#allocation90_spill] sm:$0xff] %v16183_v12  ;;  %v2981_v16 = vshrl.u32 %v12657_v52, 16  ;;  %v21322_v53 = vshll.u32 %v14310_v27, 16  ;;  %v3759_v28 = vshrl.u32 %v16073_v51, 16  ;;  %v3763_v58 = vshll.u32 %v16168_v56, 16  ;;  %v1277_v50 = vpop.permute.xlu1 %1276 }
 0x257   :  { %v3751_v37 = vshrl.u32 %v16034_v18, 16  ;;  %v16193_v17 = vrot.slane %v3755_v57, 1  ;;  %v1932_v13 = vsel %vm1894_vm10, %v1879_v3, %v1147_v63  ;;  %v16198_v49 = vsel %vm1292_vm6, %v16041_v23, %v2994_v10 }
 0x258   :  { %v1347_v35 = vor.u32 %v16157_v54, %v21322_v53  ;;  %21323 = vst [vmem:[#allocation91_spill] sm:$0xff] %v16198_v49  ;;  %v3765_v34 = vrot.slane %v3763_v58, 1  ;;  %v2003_v53 = vsel %vm1947_vm11, %v1932_v13, %v1277_v50  ;;  %v3761_v51 = vor.u32 %v3759_v28, %v16101_v5 }
 0x259   :  { %v3002_v12 = vor.u32 %v3000_v9, %v16172_v29  ;;  %v3753_v0 = vor.u32 %v3751_v37, %v16094_v31  ;;  %v16204_v40 = vrot.slane %v3013_v11, 7  ;;  %v3016_v18 = vshll.u32 %v12695_v20, 16  ;;  %v1515_v3 = vpop.permute.xlu0 %1514  ;;  %v21324_v9 = vld [vmem:[#allocation11_spill] sm:$0xff] }
 0x25a   :  { %v3021_v57 = vshrl.u32 %v12697_v2, 16  ;;  %v16208_v63 = vmul.bf16 %v16177_v26, %v14685_v55  ;;  %v16210_v23 = vrot.slane %v2981_v16, 7  ;;  %v2984_v10 = vshll.u32 %v12657_v52, 16  ;;  %v1149_v11 = vpop.permute.xlu1 %1148  ;;  %v16227_v52 = vld [vmem:[%s21031_s26 + $0x1e0] ss:$12 sps:$4 sm:$0xff]  }
 0x25b   :  { %v3766_v13 = vsel %vm773_vm5, %v3761_v51, %v3765_v34  ;;  %v1348_v5 = vsel %vm1292_vm6, %v16055_v6, %v1347_v35  ;;  %v21325_v28 = vshrl.u32 %v21324_v9, 16  ;;  %v16220_v20 = vmul.bf16 %v16198_v49, %v2003_v53  ;;  %v21327_v53 = vld [vmem:[#allocation47_spill] sm:$0xff]  ;;  %v21328_v51 = vld [vmem:[#allocation46_spill] sm:$0xff]  ;;  %v21337_v26 = vld [vmem:[#allocation60_spill] sm:$0xff] }
 0x25c   :  { %4360 = vmatprep.mubr.bf16.mxu1 %v3766_v13  ;;  %v3758_v55 = vsel %vm773_vm5, %v3753_v0, %v16193_v17  ;;  %v16229_v16 = vrot.slane %v3723_v24, 1  ;;  %v2082_v35 = vsel %vm1841_vm9, %v1348_v5, %v15992_v42  ;;  %v3024_v58 = vshll.u32 %v12697_v2, 16  ;;  %v21329_v5 = vld [vmem:[#allocation52_spill] sm:$0xff] }
 0x25d   :  { %v16217_v31 = vrot.slane %v21325_v28, 7  ;;  %4361 = vmatmul.mubr.bf16.gmra.mrb[64].mxu1 %v3758_v55  ;;  %v16236_v37 = vsel %vm1292_vm6, %v16078_v47, %v3002_v12  ;;  %v3018_v0 = vor.u32 %v3016_v18, %v16204_v40  ;;  %v16239_v50 = vrot.slane %v3021_v57, 7  ;;  %v1796_v2 = vpop.permute.xlu0 %1795  ;;  %v21330_v55 = vld [vmem:[#allocation49_spill] sm:$0xff] }
 0x25e   :  { %21326 = vst [vmem:[#allocation11_spill] sm:$0xff] %v16236_v37  ;;  %v16244_v24 = vsel %vm773_vm5, %v21328_v51, %v21327_v53  ;;  %v3747_v13 = vshll.u32 %v16208_v63, 16  ;;  %v2986_v28 = vor.u32 %v2984_v10, %v16210_v23  ;;  %v2141_v42 = vsel %vm1894_vm10, %v2082_v35, %v1515_v3  ;;  %v1019_v51 = vpop.permute.xlu1 %1018 }
 0x25f   :  { %v16252_v47 = vsel %vm773_vm5, %v21330_v55, %v21329_v5  ;;  %v21331_v12 = vshll.u32 %v21324_v9, 16  ;;  %v3779_v57 = vshll.u32 %v16220_v20, 16  ;;  %v2211_v53 = vsel %vm1947_vm11, %v2141_v42, %v1796_v2  ;;  %v21332_v5 = vld [vmem:[#allocation53_spill] sm:$0xff]  ;;  %v21333_v55 = vld [vmem:[#allocation59_spill] sm:$0xff]  ;;  %v21336_v2 = vld [vmem:[#allocation54_spill] sm:$0xff] }
 0x260   :  { %v3037_v6 = vshrl.u32 %v16227_v52, 16  ;;  %v3783_v10 = vshrl.u32 %v16168_v56, 16  ;;  %v16262_v3 = vmul.bf16 %v16236_v37, %v2211_v53  ;;  %v1881_v35 = vsel %vm1841_vm9, %v14310_v27, %v1019_v51  ;;  %v21339_v53 = vld [vmem:[#allocation14_spill] sm:$0xff]  ;;  %v12661_v51 = vld [vmem:[%s21031_s26 + $0x1b8] ss:$12 sps:$4 sm:$0xff]  }
 0x261   :  { %v1350_v18 = vor.u32 %v16217_v31, %v21331_v12  ;;  %v16269_v49 = vsel %vm773_vm5, %v21333_v55, %v21332_v5  ;;  %v16273_v12 = vsel %vm1292_vm6, %v16127_v36, %v3018_v0  ;;  %v3026_v42 = vor.u32 %v3024_v58, %v16239_v50  ;;  %v21340_v37 = vld [vmem:[#allocation62_spill] sm:$0xff]  ;;  %v16291_v0 = vpop.permute.xlu0 %1415  ;;  %v21342_v55 = vld [vmem:[#allocation17_spill] sm:$0xff] }
 0x262   :  { %21334 = vst [vmem:[#allocation47_spill] sm:$0xff] %v16269_v49  ;;  %21335 = vst [vmem:[#allocation46_spill] sm:$0xff] %v16273_v12  ;;  %v16279_v56 = vsel %vm773_vm5, %v21337_v26, %v21336_v2  ;;  %v16284_v27 = vsel %vm773_vm5, %v21340_v37, %v21339_v53  ;;  %v3775_v5 = vshrl.u32 %v16123_v30, 16  ;;  %v3787_v36 = vshll.u32 %v16262_v3, 16  ;;  %v21343_v49 = vld [vmem:[#allocation18_spill] sm:$0xff]  ;;  %v1279_v53 = vpop.permute.xlu1 %1278 }
 0x263   :  { %21338 = vst [vmem:[#allocation52_spill] sm:$0xff] %v16279_v56  ;;  %21341 = vst [vmem:[#allocation49_spill] sm:$0xff] %v16284_v27  ;;  %v3785_v58 = vor.u32 %v3783_v10, %v3765_v34  ;;  %v16296_v26 = vsel %vm773_vm5, %v21343_v49, %v21342_v55  ;;  %v16298_v2 = vrot.slane %v3779_v57, 1  ;;  %v1934_v37 = vsel %vm1894_vm10, %v1881_v35, %v1149_v11  ;;  %v21344_v27 = vld [vmem:[#allocation71_spill] sm:$0xff] }
 0x264   :  { %v16304_v56 = vsel %vm773_vm5, %v21344_v27, %v15243_v45  ;;  %v16309_v30 = vsel %vm773_vm5, %v15582_v19, %v15484_v33  ;;  %v3789_v34 = vrot.slane %v3787_v36, 1  ;;  %v2006_v10 = vsel %vm1947_vm11, %v1934_v37, %v1279_v53  ;;  %v12701_v33 = vld [vmem:[%s21031_s26 + $0x1e4] ss:$12 sps:$4 sm:$0xff]  }
 0x265   :  { %v16315_v49 = vsel %vm773_vm5, %v15587_v22, %v15495_v4  ;;  %v16320_v11 = vsel %vm773_vm5, %v15593_v61, %v15911_v15  ;;  %v3777_v45 = vor.u32 %v3775_v5, %v16193_v17  ;;  %v16329_v19 = vsel %vm773_vm5, %v16011_v7, %v15950_v38  ;;  %v1517_v15 = vpop.permute.xlu0 %1516  ;;  %v12702_v53 = vld [vmem:[%s21031_s26 + $0x1f8] ss:$12 sps:$4 sm:$0xff]  }
 0x266   :  { %v16334_v4 = vsel %vm773_vm5, %v16020_v59, %v15960_v1  ;;  %v16339_v22 = vsel %vm773_vm5, %v16023_v46, %v16030_v62  ;;  %v3005_v61 = vshrl.u32 %v12661_v51, 16  ;;  %v3790_v17 = vsel %vm773_vm5, %v3785_v58, %v3789_v34  ;;  %v1151_v7 = vpop.permute.xlu1 %1150 }
 0x267   :  { %v16345_v57 = vsel %vm773_vm5, %v16044_v25, %v16116_v32  ;;  %v16350_v38 = vsel %vm773_vm5, %v16150_v39, %v16229_v16  ;;  %v16353_v1 = vmul.bf16 %v16273_v12, %v2006_v10  ;;  %4368 = vmatprep.mubr.bf16.mxu1 %v3790_v17  ;;  %v3782_v59 = vsel %vm773_vm5, %v3777_v45, %v16298_v2  ;;  %v21350_v10 = vld [vmem:[#allocation66_spill] sm:$0xff] }
 0x268   :  { %v16357_v46 = vrot.slane %v3037_v6, 7  ;;  %v3040_v62 = vshll.u32 %v16227_v52, 16  ;;  %v16360_v35 = vrot.slane %v3747_v13, 1  ;;  %v1351_v32 = vsel %vm1292_vm6, %v16157_v54, %v1350_v18  ;;  %4369 = vmatmul.mubr.bf16.gmra.mrb[68].mxu1 %v3782_v59  ;;  %v21347_v13 = vld [vmem:[#allocation13_spill] sm:$0xff] }
 0x269   :  { %v16366_v25 = vsel %vm1292_vm6, %v16070_v48, %v2986_v28  ;;  %v2085_v39 = vsel %vm1841_vm9, %v1351_v32, %v16092_v21  ;;  %v16372_v27 = vsel %vm1292_vm6, %v16172_v29, %v3026_v42  ;;  %v3045_v6 = vshrl.u32 %v12701_v33, 16  ;;  %v1798_v18 = vpop.permute.xlu0 %1797 }
 0x26a   :  { %21345 = vst [vmem:[#allocation53_spill] sm:$0xff] %v16366_v25  ;;  %21346 = vst [vmem:[#allocation59_spill] sm:$0xff] %v16372_v27  ;;  %v16374_v5 = vrot.slane %v3005_v61, 7  ;;  %v3008_v52 = vshll.u32 %v12661_v51, 16  ;;  %v21348_v36 = vshrl.u32 %v21347_v13, 16  ;;  %v2143_v54 = vsel %vm1894_vm10, %v2085_v39, %v1517_v15  ;;  %v1021_v21 = vpop.permute.xlu1 %1020 }
 0x26b   :  { %v3803_v48 = vshll.u32 %v16353_v1, 16  ;;  %v2214_v28 = vsel %vm1947_vm11, %v2143_v54, %v1798_v18  ;;  %v3042_v55 = vor.u32 %v3040_v62, %v16357_v46  ;;  %v21349_v29 = vshrl.u32 %v16131_v8, 16 }
 0x26c   :  { %v16378_v58 = vrot.slane %v21348_v36, 7  ;;  %v16388_v51 = vmul.bf16 %v16372_v27, %v2214_v28  ;;  %v1883_v37 = vsel %vm1841_vm9, %v21324_v9, %v1021_v21  ;;  %v16397_v45 = vmul.bf16 %v16366_v25, %v21350_v10  ;;  %v12665_v9 = vld [vmem:[%s21031_s26 + $0x1d0] ss:$12 sps:$4 sm:$0xff]  }
 0x26d   :  { %v3745_v42 = vor.u32 %v21349_v29, %v16229_v16  ;;  %v16399_v61 = vrot.slane %v3045_v6, 7  ;;  %v3048_v15 = vshll.u32 %v12701_v33, 16  ;;  %v3010_v16 = vor.u32 %v3008_v52, %v16374_v5  ;;  %v16414_v39 = vpop.permute.xlu0 %1417 }
 0x26e   :  { %v21351_v17 = vshll.u32 %v21347_v13, 16  ;;  %v3807_v62 = vshrl.u32 %v16262_v3, 16  ;;  %v3811_v32 = vshll.u32 %v16388_v51, 16  ;;  %v3799_v33 = vshrl.u32 %v16220_v20, 16  ;;  %v1281_v54 = vpop.permute.xlu1 %1280  ;;  %v12704_v20 = vld [vmem:[%s21031_s26 + $0x1fc] ss:$12 sps:$4 sm:$0xff]  }
 0x26f   :  { %v16403_v8 = vsel %vm773_vm5, %v3745_v42, %v16360_v35  ;;  %v3805_v6 = vrot.slane %v3803_v48, 1  ;;  %v1936_v36 = vsel %vm1894_vm10, %v1883_v37, %v1151_v7  ;;  %v16420_v52 = vsel %vm1292_vm6, %v16204_v40, %v3042_v55 }
 0x270   :  { %v1353_v59 = vor.u32 %v16378_v58, %v21351_v17  ;;  %21352 = vst [vmem:[#allocation54_spill] sm:$0xff] %v16420_v52  ;;  %v3813_v18 = vrot.slane %v3811_v32, 1  ;;  %v2009_v28 = vsel %vm1947_vm11, %v1936_v36, %v1281_v54  ;;  %v3809_v21 = vor.u32 %v3807_v62, %v3789_v34  ;;  %v21355_v36 = vld [vmem:[#allocation64_spill] sm:$0xff] }
 0x271   :  { %v3061_v29 = vshrl.u32 %v12702_v53, 16  ;;  %v3771_v3 = vshll.u32 %v16397_v45, 16  ;;  %v3801_v42 = vor.u32 %v3799_v33, %v16298_v2  ;;  %v3050_v10 = vor.u32 %v3048_v15, %v16399_v61  ;;  %v1519_v48 = vpop.permute.xlu0 %1518 }
 0x272   :  { %v3029_v7 = vshrl.u32 %v12665_v9, 16  ;;  %v3814_v40 = vsel %vm773_vm5, %v3809_v21, %v3813_v18  ;;  %v3767_v55 = vshrl.u32 %v16208_v63, 16  ;;  %v16433_v34 = vsel %vm1292_vm6, %v16210_v23, %v3010_v16  ;;  %v1153_v2 = vpop.permute.xlu1 %1152 }
 0x273   :  { %21353 = vst [vmem:[#allocation60_spill] sm:$0xff] %v16433_v34  ;;  %v16436_v37 = vmul.bf16 %v16420_v52, %v2009_v28  ;;  %4376 = vmatprep.mubr.bf16.mxu1 %v3814_v40  ;;  %v3806_v15 = vsel %vm773_vm5, %v3801_v42, %v3805_v6  ;;  %v1354_v17 = vsel %vm1292_vm6, %v16217_v31, %v1353_v59  ;;  %v16441_v62 = vrot.slane %v3061_v29, 7 }
 0x274   :  { %4377 = vmatmul.mubr.bf16.gmra.mrb[72].mxu1 %v3806_v15  ;;  %v3064_v32 = vshll.u32 %v12702_v53, 16  ;;  %v3773_v33 = vrot.slane %v3771_v3, 1  ;;  %v2088_v63 = vsel %vm1841_vm9, %v1354_v17, %v16190_v44  ;;  %v16447_v23 = vsel %vm1292_vm6, %v16239_v50, %v3050_v10 }
 0x275   :  { %21354 = vst [vmem:[#allocation14_spill] sm:$0xff] %v16447_v23  ;;  %v3069_v16 = vshrl.u32 %v12704_v20, 16  ;;  %v16451_v54 = vmul.bf16 %v16433_v34, %v21355_v36  ;;  %v16453_v28 = vrot.slane %v3029_v7, 7  ;;  %v3032_v31 = vshll.u32 %v12665_v9, 16  ;;  %v1800_v21 = vpop.permute.xlu0 %1799  ;;  %v12669_v9 = vld [vmem:[%s21031_s26 + $0x1e8] ss:$12 sps:$4 sm:$0xff]  }
 0x276   :  { %v2145_v59 = vsel %vm1894_vm10, %v2088_v63, %v1519_v48  ;;  %v3827_v53 = vshll.u32 %v16436_v37, 16  ;;  %v1023_v44 = vpop.permute.xlu1 %1022  ;;  %v3769_v3 = vor.u32 %v3767_v55, %v16360_v35  ;;  %v3066_v10 = vor.u32 %v3064_v32, %v16441_v62 }
 0x277   :  { %v2217_v29 = vsel %vm1947_vm11, %v2145_v59, %v1800_v21  ;;  %v1885_v42 = vsel %vm1841_vm9, %v21347_v13, %v1023_v44  ;;  %v16468_v7 = vrot.slane %v3069_v16, 7  ;;  %v3072_v48 = vshll.u32 %v12704_v20, 16  ;;  %v12705_v44 = vld [vmem:[%s21031_s26 + $0x210] ss:$12 sps:$4 sm:$0xff]  }
 0x278   :  { %v16460_v50 = vmul.bf16 %v16447_v23, %v2217_v29  ;;  %v16471_v40 = vsel %vm773_vm5, %v3769_v3, %v3773_v33  ;;  %v3795_v35 = vshll.u32 %v16451_v54, 16  ;;  %v3034_v55 = vor.u32 %v3032_v31, %v16453_v28 }
 0x279   :  { %v3831_v15 = vshrl.u32 %v16388_v51, 16  ;;  %v16477_v17 = vpop.permute.xlu0 %1419  ;;  %v21356_v32 = vshll.u32 %v14567_v60, 16  ;;  %v3823_v16 = vshrl.u32 %v16353_v1, 16  ;;  %v3829_v20 = vrot.slane %v3827_v53, 1 }
 0x27a   :  { %v3835_v13 = vshll.u32 %v16460_v50, 16  ;;  %v1938_v36 = vsel %vm1894_vm10, %v1885_v42, %v1153_v2  ;;  %v1283_v59 = vpop.permute.xlu1 %1282  ;;  %v16486_v31 = vsel %vm1292_vm6, %v16357_v46, %v3066_v10  ;;  %v3053_v3 = vshrl.u32 %v12669_v9, 16 }
 0x27b   :  { %v1356_v63 = vor.u32 %v16082_v43, %v21356_v32  ;;  %21357 = vst [vmem:[#allocation62_spill] sm:$0xff] %v16486_v31  ;;  %v2012_v51 = vsel %vm1947_vm11, %v1938_v36, %v1283_v59  ;;  %v3833_v29 = vor.u32 %v3831_v15, %v3813_v18  ;;  %v3825_v43 = vor.u32 %v3823_v16, %v3805_v6 }
 0x27c   :  { %v3837_v21 = vrot.slane %v3835_v13, 1  ;;  %v3074_v1 = vor.u32 %v3072_v48, %v16468_v7  ;;  %v3791_v42 = vshrl.u32 %v16397_v45, 16  ;;  %v16496_v13 = vmul.bf16 %v16486_v31, %v2012_v51 }
 0x27d   :  { %v1521_v53 = vpop.permute.xlu0 %1520  ;;  %v3830_v18 = vsel %vm773_vm5, %v3825_v43, %v3829_v20  ;;  %v3797_v10 = vrot.slane %v3795_v35, 1  ;;  %v16501_v15 = vsel %vm1292_vm6, %v16374_v5, %v3034_v55  ;;  %v1357_v6 = vsel %vm1292_vm6, %v16378_v58, %v1356_v63  ;;  %v12707_v5 = vld [vmem:[%s21031_s26 + $0x214] ss:$12 sps:$4 sm:$0xff]  }
 0x27e   :  { %v3838_v2 = vsel %vm773_vm5, %v3833_v29, %v3837_v21  ;;  %v1155_v46 = vpop.permute.xlu1 %1154  ;;  %21358 = vst [vmem:[#allocation17_spill] sm:$0xff] %v16501_v15  ;;  %v3085_v48 = vshrl.u32 %v12705_v44, 16  ;;  %v16505_v32 = vrot.slane %v3053_v3, 7  ;;  %v3056_v45 = vshll.u32 %v12669_v9, 16  ;;  %v21360_v58 = vld [vmem:[#allocation21_spill] sm:$0xff] }
 0x27f   :  { %4384 = vmatprep.mubr.bf16.mxu1 %v3838_v2  ;;  %v2091_v16 = vsel %vm1841_vm9, %v1357_v6, %v16291_v0  ;;  %v16511_v36 = vsel %vm1292_vm6, %v16399_v61, %v3074_v1  ;;  %v16519_v63 = vmul.bf16 %v16501_v15, %v21360_v58  ;;  %v3851_v9 = vshll.u32 %v16496_v13, 16 }
 0x280   :  { %4385 = vmatmul.mubr.bf16.gmra.mrb[76].mxu1 %v3830_v18  ;;  %21359 = vst [vmem:[#allocation18_spill] sm:$0xff] %v16511_v36  ;;  %v2147_v35 = vsel %vm1894_vm10, %v2091_v16, %v1521_v53  ;;  %v3793_v51 = vor.u32 %v3791_v42, %v3773_v33  ;;  %v16526_v29 = vrot.slane %v3085_v48, 7  ;;  %v3088_v3 = vshll.u32 %v12705_v44, 16  ;;  %v12674_v42 = vld [vmem:[%s21031_s26 + $0x200] ss:$12 sps:$4 sm:$0xff]  }
 0x281   :  { %v1802_v55 = vpop.permute.xlu0 %1801  ;;  %v3058_v43 = vor.u32 %v3056_v45, %v16505_v32  ;;  %v3093_v1 = vshrl.u32 %v12707_v5, 16  ;;  %v3855_v2 = vshrl.u32 %v16460_v50, 16  ;;  %v3819_v33 = vshll.u32 %v16519_v63, 16 }
 0x282   :  { %v2220_v59 = vsel %vm1947_vm11, %v2147_v35, %v1802_v55  ;;  %v1025_v0 = vpop.permute.xlu1 %1024  ;;  %v16530_v53 = vsel %vm773_vm5, %v3793_v51, %v3797_v10  ;;  %v3847_v44 = vshrl.u32 %v16436_v37, 16  ;;  %v16541_v48 = vrot.slane %v3851_v9, 1  ;;  %v12708_v37 = vld [vmem:[%s21031_s26 + $0x228] ss:$12 sps:$4 sm:$0xff]  }
 0x283   :  { %v16524_v61 = vmul.bf16 %v16511_v36, %v2220_v59  ;;  %v1887_v50 = vsel %vm1841_vm9, %v14567_v60, %v1025_v0  ;;  %v3090_v35 = vor.u32 %v3088_v3, %v16526_v29  ;;  %v3857_v55 = vor.u32 %v3855_v2, %v3837_v21 }
 0x284   :  { %v16550_v58 = vsel %vm1292_vm6, %v16453_v28, %v3058_v43  ;;  %v3849_v59 = vor.u32 %v3847_v44, %v3829_v20  ;;  %v16552_v51 = vrot.slane %v3093_v1, 7  ;;  %v3096_v36 = vshll.u32 %v12707_v5, 16  ;;  %v12710_v44 = vld [vmem:[%s21031_s26 + $0x22c] ss:$12 sps:$4 sm:$0xff]  }
 0x285   :  { %v3859_v18 = vshll.u32 %v16524_v61, 16  ;;  %v16534_v6 = vpop.permute.xlu0 %1421  ;;  %21361 = vst [vmem:[#allocation71_spill] sm:$0xff] %v16550_v58  ;;  %v3815_v60 = vshrl.u32 %v16451_v54, 16  ;;  %v3077_v0 = vshrl.u32 %v12674_v42, 16  ;;  %v1940_v21 = vsel %vm1894_vm10, %v1887_v50, %v1155_v46 }
 0x286   :  { %v1285_v45 = vpop.permute.xlu1 %1284  ;;  %v3854_v20 = vsel %vm773_vm5, %v3849_v59, %v16541_v48  ;;  %v16565_v5 = vmul.bf16 %v16550_v58, %v15388_v14  ;;  %v16569_v3 = vsel %vm1292_vm6, %v16441_v62, %v3090_v35  ;;  %v3821_v54 = vrot.slane %v3819_v33, 1 }
 0x287   :  { %v16543_v16 = vrot.slane %v3859_v18, 1  ;;  %21362 = vst [vmem:[#allocation13_spill] sm:$0xff] %v16569_v3  ;;  %v2015_v43 = vsel %vm1947_vm11, %v1940_v21, %v1285_v45  ;;  %v3098_v1 = vor.u32 %v3096_v36, %v16552_v51  ;;  %v3109_v46 = vshrl.u32 %v12708_v37, 16 }
 0x288   :  { %v16578_v50 = vrot.slane %v3077_v0, 7  ;;  %v3080_v14 = vshll.u32 %v12674_v42, 16  ;;  %v3817_v35 = vor.u32 %v3815_v60, %v3797_v10  ;;  %v3843_v45 = vshll.u32 %v16565_v5, 16  ;;  %v12711_v42 = vld [vmem:[%s21031_s26 + $0x240] ss:$12 sps:$4 sm:$0xff]  }
 0x289   :  { %v1523_v9 = vpop.permute.xlu0 %1522  ;;  %v3862_v18 = vsel %vm773_vm5, %v3857_v55, %v16543_v16  ;;  %v16581_v55 = vmul.bf16 %v16569_v3, %v2015_v43  ;;  %v3112_v33 = vshll.u32 %v12708_v37, 16  ;;  %v2094_v36 = vsel %vm1841_vm9, %v16099_v41, %v16414_v39  ;;  %v12678_v41 = vld [vmem:[%s21031_s26 + $0x218] ss:$12 sps:$4 sm:$0xff]  }
 0x28a   :  { %4392 = vmatprep.mubr.bf16.mxu1 %v3862_v18  ;;  %v1157_v28 = vpop.permute.xlu1 %1156  ;;  %v16589_v59 = vsel %vm1292_vm6, %v16468_v7, %v3098_v1  ;;  %v16591_v18 = vrot.slane %v3109_v46, 7  ;;  %v16597_v0 = vsel %vm773_vm5, %v3817_v35, %v3821_v54  ;;  %v2149_v10 = vsel %vm1894_vm10, %v2094_v36, %v1523_v9  ;;  %v21364_v9 = vld [vmem:[#allocation57_spill] sm:$0xff] }
 0x28b   :  { %4393 = vmatmul.mubr.bf16.gmra.mrb[80].mxu1 %v3854_v20  ;;  %21363 = vst [vmem:[#allocation66_spill] sm:$0xff] %v16589_v59  ;;  %v3117_v60 = vshrl.u32 %v12710_v44, 16  ;;  %v3082_v21 = vor.u32 %v3080_v14, %v16578_v50  ;;  %v3875_v39 = vshll.u32 %v16581_v55, 16  ;;  %v3839_v43 = vshrl.u32 %v16519_v63, 16  ;;  %v12713_v63 = vld [vmem:[%s21031_s26 + $0x244] ss:$12 sps:$4 sm:$0xff]  }
 0x28c   :  { %v16610_v46 = vrot.slane %v3843_v45, 1  ;;  %v3114_v14 = vor.u32 %v3112_v33, %v16591_v18  ;;  %v3133_v36 = vshrl.u32 %v12711_v42, 16  ;;  %v3879_v3 = vshrl.u32 %v16524_v61, 16 }
 0x28d   :  { %v16573_v2 = vpop.permute.xlu0 %1524  ;;  %v3119_v23 = vrot.slane %v3117_v60, 7  ;;  %v16622_v45 = vsel %vm1292_vm6, %v16505_v32, %v3082_v21  ;;  %v3136_v60 = vshll.u32 %v12711_v42, 16 }
 0x28e   :  { %v1027_v62 = vpop.permute.xlu1 %1026  ;;  %21365 = vst [vmem:[#allocation64_spill] sm:$0xff] %v16622_v45  ;;  %v16633_v21 = vrot.slane %v3133_v36, 7 }
 0x28f   :  { %v1889_v35 = vsel %vm1841_vm9, %v21364_v9, %v1027_v62  ;;  %v3871_v62 = vshrl.u32 %v16496_v13, 16 }
 0x290   :  { %v1942_v61 = vsel %vm1894_vm10, %v1889_v35, %v1157_v28  ;;  %21367 = vst [vmem:[#allocation57_spill] sm:$0xff] %v16633_v21  ;;  %v3104_v35 = vshll.u32 %v12678_v41, 16 }
 0x291   :  { %v1804_v37 = vpop.permute.xlu0 %1803  ;;  %v3873_v32 = vor.u32 %v3871_v62, %v16541_v48 }
 0x292   :  { %v2223_v7 = vsel %vm1947_vm11, %v2149_v10, %v1804_v37  ;;  %v1287_v20 = vpop.permute.xlu1 %1286  ;;  %v3120_v10 = vshll.u32 %v12710_v44, 16  ;;  %v3101_v37 = vshrl.u32 %v12678_v41, 16  ;;  %v16629_v44 = vsel %vm1292_vm6, %v16526_v29, %v3114_v14 }
 0x293   :  { %v16608_v1 = vmul.bf16 %v16589_v59, %v2223_v7  ;;  %v3877_v7 = vrot.slane %v3875_v39, 1  ;;  %v3881_v59 = vor.u32 %v3879_v3, %v16543_v16  ;;  %21366 = vst [vmem:[#allocation21_spill] sm:$0xff] %v16629_v44  ;;  %v2018_v52 = vsel %vm1947_vm11, %v1942_v61, %v1287_v20  ;;  %v21368_v3 = vld [vmem:[#allocation28_spill] sm:$0xff] }
 0x294   :  { %v3122_v13 = vor.u32 %v3120_v10, %v3119_v23  ;;  %v3841_v16 = vor.u32 %v3839_v43, %v3821_v54  ;;  %v16639_v42 = vmul.bf16 %v16622_v45, %v21368_v3  ;;  %v16642_v29 = vmul.bf16 %v16629_v44, %v2018_v52  ;;  %v21369_v54 = vld [vmem:[#allocation88_spill] sm:$0xff] }
 0x295   :  { %v3883_v31 = vshll.u32 %v16608_v1, 16  ;;  %v1527_v27 = vpop.permute.xlu0 %1526  ;;  %v3878_v28 = vsel %vm773_vm5, %v3873_v32, %v3877_v7  ;;  %v16644_v48 = vrot.slane %v3101_v37, 7  ;;  %v3138_v14 = vor.u32 %v3136_v60, %v16633_v21  ;;  %v21372_v37 = vld [vmem:[#allocation16_spill] sm:$0xff] }
 0x296   :  { %v1029_v33 = vpop.permute.xlu1 %1028  ;;  %v2097_v43 = vsel %vm1841_vm9, %v21369_v54, %v16477_v17  ;;  %v16656_v36 = vsel %vm1292_vm6, %v16552_v51, %v3122_v13  ;;  %v3144_v10 = vshll.u32 %v12713_v63, 16  ;;  %v3899_v60 = vshll.u32 %v16642_v29, 16 }
 0x297   :  { %v3885_v9 = vrot.slane %v3883_v31, 1  ;;  %v3141_v31 = vshrl.u32 %v12713_v63, 16  ;;  %21370 = vst [vmem:[#allocation28_spill] sm:$0xff] %v16656_v36  ;;  %v2151_v41 = vsel %vm1894_vm10, %v2097_v43, %v16573_v2  ;;  %v1891_v62 = vsel %vm1841_vm9, %v21372_v37, %v1029_v33 }
 0x298   :  { %v3867_v51 = vshll.u32 %v16639_v42, 16  ;;  %v16671_v63 = vsel %vm1292_vm6, %v16591_v18, %v3138_v14  ;;  %v3106_v33 = vor.u32 %v3104_v35, %v16644_v48  ;;  %v3895_v54 = vshrl.u32 %v16581_v55, 16 }
 0x299   :  { %v3886_v39 = vsel %vm773_vm5, %v3881_v59, %v3885_v9  ;;  %v16649_v59 = vsel %vm773_vm5, %v3841_v16, %v16610_v46  ;;  %v16658_v52 = vrot.slane %v3141_v31, 7  ;;  %21373 = vst [vmem:[#allocation16_spill] sm:$0xff] %v16671_v63  ;;  %v3903_v16 = vshrl.u32 %v16608_v1, 16 }
 0x29a   :  { %4400 = vmatprep.mubr.bf16.mxu1 %v3886_v39  ;;  %v1159_v20 = vpop.permute.xlu1 %1158  ;;  %v3901_v43 = vrot.slane %v3899_v60, 1  ;;  %v3869_v14 = vrot.slane %v3867_v51, 1  ;;  %v16684_v35 = vsel %vm1292_vm6, %v16578_v50, %v3106_v33 }
 0x29b   :  { %4401 = vmatmul.mubr.bf16.gmra.mrb[84].mxu1 %v3878_v28  ;;  %21371 = vst [vmem:[#allocation88_spill] sm:$0xff] %v16658_v52  ;;  %v1806_v61 = vpop.permute.xlu0 %1805  ;;  %v1944_v17 = vsel %vm1894_vm10, %v1891_v62, %v1159_v20  ;;  %v3146_v31 = vor.u32 %v3144_v10, %v16658_v52  ;;  %v3863_v28 = vshrl.u32 %v16565_v5, 16  ;;  %v3905_v62 = vor.u32 %v3903_v16, %v3885_v9  ;;  %v21376_v5 = vld [vmem:[#allocation90_spill] sm:$0xff] }
 0x29c   :  { %v2226_v32 = vsel %vm1947_vm11, %v2151_v41, %v1806_v61  ;;  %21375 = vst [vmem:[#allocation93_spill] sm:$0xff] %v16684_v35  ;;  %v2100_v1 = vsel %vm1841_vm9, %v21376_v5, %v16534_v6  ;;  %v3897_v61 = vor.u32 %v3895_v54, %v3877_v7  ;;  %v3919_v16 = vshrl.u32 %v16642_v29, 16 }
 0x29d   :  { %v3304_v13 = vmul.bf16 %v16656_v36, %v2226_v32  ;;  %v16690_v10 = vsel %vm1292_vm6, %v3119_v23, %v3146_v31  ;;  %v2153_v55 = vsel %vm1894_vm10, %v2100_v1, %v1527_v27 }
 0x29e   :  { %v1289_v39 = vpop.permute.xlu1 %1288  ;;  %21377 = vst [vmem:[#allocation90_spill] sm:$0xff] %v16690_v10  ;;  %v3902_v50 = vsel %vm773_vm5, %v3897_v61, %v3901_v43 }
 0x29f   :  { %v2021_v2 = vsel %vm1947_vm11, %v1944_v17, %v1289_v39  ;;  %v3907_v3 = vshll.u32 %v3304_v13, 16  ;;  %v16678_v20 = vpop.permute.xlu0 %1423  ;;  %v3865_v17 = vor.u32 %v3863_v28, %v16610_v46  ;;  %v3927_v7 = vshrl.u32 %v3304_v13, 16  ;;  %v21379_v46 = vld [vmem:[#allocation74_spill] sm:$0xff]  ;;  %v21381_v13 = vld [vmem:[#allocation87_spill] sm:$0xff] }
 0x2a0   :  { %21374 = vst [vmem:[#allocation92_spill] sm:$0xff] %v16678_v20  ;;  %v3306_v41 = vmul.bf16 %v16671_v63, %v2021_v2  ;;  %v21378_v2 = vld [vmem:[#allocation78_spill] sm:$0xff] }
 0x2a1   :  { %v3909_v37 = vrot.slane %v3907_v3, 1  ;;  %v16699_v6 = vmul.bf16 %v16684_v35, %v21378_v2  ;;  %v16703_v27 = vsel %vm773_vm5, %v3865_v17, %v3869_v14  ;;  %v3887_v17 = vshrl.u32 %v16639_v42, 16 }
 0x2a2   :  { %v1031_v18 = vpop.permute.xlu1 %1030  ;;  %v3923_v9 = vshll.u32 %v3306_v41, 16  ;;  %v3943_v42 = vshrl.u32 %v3306_v41, 16  ;;  %v21384_v41 = vld [vmem:[#allocation47_spill] sm:$0xff] }
 0x2a3   :  { %v1808_v60 = vpop.permute.xlu0 %1807  ;;  %v3910_v32 = vsel %vm773_vm5, %v3905_v62, %v3909_v37  ;;  %v1893_v31 = vsel %vm1841_vm9, %v21379_v46, %v1031_v18  ;;  %v3891_v5 = vshll.u32 %v16699_v6, 16  ;;  %v3929_v61 = vor.u32 %v3927_v7, %v3909_v37 }
 0x2a4   :  { %v2229_v39 = vsel %vm1947_vm11, %v2153_v55, %v1808_v60  ;;  %4408 = vmatprep.mubr.bf16.mxu1 %v3910_v32  ;;  %v3925_v3 = vrot.slane %v3923_v9, 1  ;;  %v2103_v60 = vsel %vm1841_vm9, %v21381_v13, %v16678_v20  ;;  %v3921_v32 = vor.u32 %v3919_v16, %v3901_v43 }
 0x2a5   :  { %v3307_v23 = vmul.bf16 %v16690_v10, %v2229_v39  ;;  %4409 = vmatmul.mubr.bf16.gmra.mrb[88].mxu1 %v3902_v50  ;;  %v16726_v2 = vrot.slane %v3891_v5, 1  ;;  %v21383_v13 = vmov 0.0  }
 0x2a6   :  { %v3945_v16 = vor.u32 %v3943_v42, %v3925_v3 }
 0x2a7   :  { %v1161_v51 = vpop.permute.xlu1 %1160  ;;  %v3931_v33 = vshll.u32 %v3307_v23, 16  ;;  %v16707_v28 = vpop.permute.xlu0 %1528 }
 0x2a8   :  { %21380 = vst [vmem:[#allocation78_spill] sm:$0xff] %v16707_v28  ;;  %v1946_v54 = vsel %vm1894_vm10, %v1893_v31, %v1161_v51  ;;  %v2155_v29 = vsel %vm1894_vm10, %v2103_v60, %v16707_v28  ;;  %v3926_v51 = vsel %vm773_vm5, %v3921_v32, %v3925_v3  ;;  %v3889_v31 = vor.u32 %v3887_v17, %v3869_v14  ;;  %v21385_v14 = vld [vmem:[#allocation52_spill] sm:$0xff] }
 0x2a9   :  { %v3933_v1 = vrot.slane %v3931_v33, 1  ;;  %v3951_v33 = vshrl.u32 %v3307_v23, 16 }
 0x2ab   :  { %v1291_v62 = vpop.permute.xlu1 %1290  ;;  %v16720_v9 = vpop.permute.xlu0 %1809  ;;  %v3934_v39 = vsel %vm773_vm5, %v3929_v61, %v3933_v1  ;;  %v16731_v61 = vsel %vm773_vm5, %v3889_v31, %v16726_v2  ;;  %v16867_v31 = vld [vmem:[%s20696_s5] ss:$0 sm:$0xff] }
 0x2ac   :  { %v2024_v55 = vsel %vm1947_vm11, %v1946_v54, %v1291_v62  ;;  %21382 = vst [vmem:[#allocation74_spill] sm:$0xff] %v16720_v9  ;;  %v2232_v37 = vsel %vm1947_vm11, %v2155_v29, %v16720_v9  ;;  %4416 = vmatprep.mubr.bf16.mxu1 %v3934_v39  ;;  %v3953_v62 = vor.u32 %v3951_v33, %v3933_v1 }
 0x2ad   :  { %v3309_v18 = vmul.bf16 %v16633_v21, %v2024_v55  ;;  %v3310_v43 = vmul.bf16 %v16658_v52, %v2232_v37  ;;  %4417 = vmatmul.mubr.bf16.gmra.mrb[92].mxu1 %v3926_v51 }
 0x2af   :  { %v3947_v50 = vshll.u32 %v3309_v18, 16  ;;  %v3955_v46 = vshll.u32 %v3310_v43, 16 }
 0x2b1   :  { %v3949_v7 = vrot.slane %v3947_v50, 1  ;;  %v3957_v54 = vrot.slane %v3955_v46, 1 }
 0x2b3   :  { %v3950_v55 = vsel %vm773_vm5, %v3945_v16, %v3949_v7  ;;  %v3958_v5 = vsel %vm773_vm5, %v3953_v62, %v3957_v54 }
 0x2b4   :  { %4424 = vmatprep.mubr.bf16.mxu1 %v3958_v5 }
 0x2b5   :  { %4425 = vmatmul.mubr.bf16.gmra.mrb[96].mxu1 %v3950_v55 }
 0x2b6   :  { %12192 = vmatprep.mubr.msk.bf16.mxu1 %vm12995_vm2, %v21383_v13 }
 0x2bd   :  { %12193 = vmatmul.mubr.msk.bf16.vlgmr.msra.gmra.mrb[0].mxu1 %vm1841_vm9, %v16244_v24  ;;  %v21386_v24 = vld [vmem:[#allocation49_spill] sm:$0xff] }
 0x2be   :  { %12196 = vmatprep.mubr.msk.bf16.mxu1 %vm12995_vm2, %v21383_v13 }
 0x2c5   :  { %12197 = vmatmul.mubr.msk.bf16.gmra.mrb[4].mxu1 %vm1841_vm9, %v16252_v47  ;;  %v12714_v47 = vld [vmem:[%s21031_s26 + $0x230] ss:$12 sps:$4 sm:$0xff]  }
 0x2c6   :  { %12200 = vmatprep.mubr.msk.bf16.mxu1 %vm12995_vm2, %v21383_v13 }
 0x2cd   :  { %12201 = vmatmul.mubr.msk.bf16.gmra.mrb[8].mxu1 %vm1841_vm9, %v21384_v41 }
 0x2ce   :  { %12204 = vmatprep.mubr.msk.bf16.mxu1 %vm12995_vm2, %v21383_v13 }
 0x2d5   :  { %12205 = vmatmul.mubr.msk.bf16.gmra.mrb[12].mxu1 %vm1841_vm9, %v21385_v14 }
 0x2d6   :  { %12208 = vmatprep.mubr.msk.bf16.mxu1 %vm12995_vm2, %v21383_v13 }
 0x2dd   :  { %12209 = vmatmul.mubr.msk.bf16.gmra.mrb[16].mxu1 %vm1841_vm9, %v21386_v24 }
 0x2de   :  { %12212 = vmatprep.mubr.msk.bf16.mxu1 %vm12995_vm2, %v21383_v13 }
 0x2e5   :  { %12213 = vmatmul.mubr.msk.bf16.gmra.mrb[20].mxu1 %vm1841_vm9, %v16296_v26 }
 0x2e6   :  { %12216 = vmatprep.mubr.msk.bf16.mxu1 %vm12995_vm2, %v21383_v13 }
 0x2ed   :  { %12217 = vmatmul.mubr.msk.bf16.gmra.mrb[24].mxu1 %vm1841_vm9, %v16304_v56  ;;  %v3125_v56 = vshrl.u32 %v12714_v47, 16 }
 0x2ee   :  { %12220 = vmatprep.mubr.msk.bf16.mxu1 %vm12995_vm2, %v21383_v13 }
 0x2ef   :  { %v3127_v26 = vrot.slane %v3125_v56, 7 }
 0x2f5   :  { %12221 = vmatmul.mubr.msk.bf16.gmra.mrb[28].mxu1 %vm1841_vm9, %v16309_v30  ;;  %v3128_v30 = vshll.u32 %v12714_v47, 16 }
 0x2f6   :  { %12224 = vmatprep.mubr.msk.bf16.mxu1 %vm12995_vm2, %v21383_v13 }
 0x2fd   :  { %12225 = vmatmul.mubr.msk.bf16.gmra.mrb[32].mxu1 %vm1841_vm9, %v16315_v49  ;;  %v12715_v49 = vld [vmem:[%s21031_s26 + $0x248] ss:$12 sps:$4 sm:$0xff]  }
 0x2fe   :  { %12228 = vmatprep.mubr.msk.bf16.mxu1 %vm12995_vm2, %v21383_v13 }
 0x305   :  { %12229 = vmatmul.mubr.msk.bf16.gmra.mrb[36].mxu1 %vm1841_vm9, %v16320_v11  ;;  %v21387_v11 = vld [vmem:[#allocation73_spill] sm:$0xff] }
 0x306   :  { %12232 = vmatprep.mubr.msk.bf16.mxu1 %vm12995_vm2, %v21383_v13 }
 0x30d   :  { %12233 = vmatmul.mubr.msk.bf16.gmra.mrb[40].mxu1 %vm1841_vm9, %v16329_v19  ;;  %v1811_v19 = vrot.slane %v21387_v11, 3 }
 0x30e   :  { %12236 = vmatprep.mubr.msk.bf16.mxu1 %vm12995_vm2, %v21383_v13 }
 0x315   :  { %12237 = vmatmul.mubr.msk.bf16.gmra.mrb[44].mxu1 %vm1841_vm9, %v16334_v4  ;;  %v3130_v4 = vor.u32 %v3128_v30, %v3127_v26 }
 0x316   :  { %12240 = vmatprep.mubr.msk.bf16.mxu1 %vm12995_vm2, %v21383_v13 }
 0x31d   :  { %12241 = vmatmul.mubr.msk.bf16.gmra.mrb[48].mxu1 %vm1841_vm9, %v16339_v22  ;;  %v3149_v22 = vshrl.u32 %v12715_v49, 16 }
 0x31e   :  { %12244 = vmatprep.mubr.msk.bf16.mxu1 %vm12995_vm2, %v21383_v13 }
 0x325   :  { %12245 = vmatmul.mubr.msk.bf16.gmra.mrb[52].mxu1 %vm1841_vm9, %v16345_v57  ;;  %v21388_v57 = vld [vmem:[#allocation76_spill] sm:$0xff] }
 0x326   :  { %12248 = vmatprep.mubr.msk.bf16.mxu1 %vm12995_vm2, %v21383_v13 }
 0x32d   :  { %12249 = vmatmul.mubr.msk.bf16.gmra.mrb[56].mxu1 %vm1841_vm9, %v16350_v38  ;;  %v1812_v38 = vsel %vm330_vm1, %v21388_v57, %v1811_v19 }
 0x32e   :  { %12252 = vmatprep.mubr.msk.bf16.mxu1 %vm12995_vm2, %v21383_v13 }
 0x335   :  { %12253 = vmatmul.mubr.msk.bf16.gmra.mrb[60].mxu1 %vm1841_vm9, %v16403_v8  ;;  %v16830_v8 = vsel %vm1292_vm6, %v16644_v48, %v3130_v4 }
 0x336   :  { %12256 = vmatprep.mubr.msk.bf16.mxu1 %vm12995_vm2, %v21383_v13  ;;  %21389 = vst [vmem:[#allocation87_spill] sm:$0xff] %v16830_v8 }
 0x33d   :  { %12257 = vmatmul.mubr.msk.bf16.gmra.mrb[64].mxu1 %vm1841_vm9, %v16471_v40  ;;  %v3151_v40 = vrot.slane %v3149_v22, 7 }
 0x33e   :  { %12260 = vmatprep.mubr.msk.bf16.mxu1 %vm12995_vm2, %v21383_v13 }
 0x345   :  { %12261 = vmatmul.mubr.msk.bf16.gmra.mrb[68].mxu1 %vm1841_vm9, %v16530_v53  ;;  %v3152_v53 = vshll.u32 %v12715_v49, 16 }
 0x346   :  { %12264 = vmatprep.mubr.msk.bf16.mxu1 %vm12995_vm2, %v21383_v13 }
 0x347   :  { %v3154_v3 = vor.u32 %v3152_v53, %v3151_v40 }
 0x349   :  { %v16844_v60 = vsel %vm1292_vm6, %v3127_v26, %v3154_v3 }
 0x34a   :  { %21392 = vst [vmem:[#allocation52_spill] sm:$0xff] %v16844_v60 }
 0x34d   :  { %12265 = vmatmul.mubr.msk.bf16.gmra.mrb[72].mxu1 %vm1841_vm9, %v16597_v0  ;;  %v3305_v0 = vmul.bf16 %v16830_v8, %v1812_v38 }
 0x34e   :  { %12268 = vmatprep.mubr.msk.bf16.mxu1 %vm12995_vm2, %v21383_v13 }
 0x34f   :  { %v3915_v1 = vshll.u32 %v3305_v0, 16  ;;  %v3935_v29 = vshrl.u32 %v3305_v0, 16 }
 0x351   :  { %v3917_v32 = vrot.slane %v3915_v1, 1 }
 0x353   :  { %v3937_v37 = vor.u32 %v3935_v29, %v3917_v32 }
 0x355   :  { %12269 = vmatmul.mubr.msk.bf16.gmra.mrb[76].mxu1 %vm1841_vm9, %v16649_v59  ;;  %v21390_v59 = vmov 0.0|0.0  }
 0x356   :  { %12272 = vmatprep.mubr.msk.bf16.mxu1 %vm12995_vm2, %v21383_v13  ;;  %v16836_v23 = vrot.slane %v21390_v59, 3 }
 0x358   :  { %21391 = vst [vmem:[#allocation47_spill] sm:$0xff] %v16836_v23  ;;  %v1814_v48 = vsel %vm330_vm1, %v1811_v19, %v16836_v23  ;;  %v3311_v51 = vmul.bf16 %v3151_v40, %v16836_v23  ;;  %v21394_v40 = vld [vmem:[#allocation6_spill] sm:$0xff] }
 0x359   :  { %v3308_v17 = vmul.bf16 %v16844_v60, %v1814_v48 }
 0x35b   :  { %v3939_v39 = vshll.u32 %v3308_v17, 16  ;;  %v3959_v42 = vshrl.u32 %v3308_v17, 16  ;;  %v21395_v17 = vld [vmem:[#allocation7_spill] sm:$0xff] }
 0x35d   :  { %12273 = vmatmul.mubr.msk.bf16.gmra.mrb[80].mxu1 %vm1841_vm9, %v16703_v27  ;;  %v3911_v27 = vshrl.u32 %v16699_v6, 16  ;;  %v3941_v50 = vrot.slane %v3939_v39, 1 }
 0x35e   :  { %12276 = vmatprep.mubr.msk.bf16.mxu1 %vm12995_vm2, %v21383_v13 }
 0x35f   :  { %v3913_v18 = vor.u32 %v3911_v27, %v16726_v2  ;;  %v3942_v43 = vsel %vm773_vm5, %v3937_v37, %v3941_v50  ;;  %v16856_v2 = vshll.u32 %v3311_v51, 16  ;;  %v3961_v7 = vor.u32 %v3959_v42, %v3941_v50 }
 0x361   :  { %v3918_v6 = vsel %vm773_vm5, %v3913_v18, %v3917_v32  ;;  %21393 = vst [vmem:[#allocation49_spill] sm:$0xff] %v16856_v2  ;;  %v3965_v33 = vrot.slane %v16856_v2, 1 }
 0x363   :  { %v3966_v46 = vsel %vm773_vm5, %v3961_v7, %v3965_v33 }
 0x365   :  { %12277 = vmatmul.mubr.msk.bf16.gmra.mrb[84].mxu1 %vm1841_vm9, %v16731_v61 }
 0x366   :  { %12280 = vmatprep.mubr.msk.bf16.mxu1 %vm12995_vm2, %v21383_v13 }
 0x36d   :  { %12281 = vmatmul.mubr.msk.bf16.gmra.mrb[88].mxu1 %vm1841_vm9, %v3918_v6 }
 0x36e   :  { %12284 = vmatprep.mubr.msk.bf16.mxu1 %vm12995_vm2, %v21383_v13 }
 0x375   :  { %12285 = vmatmul.mubr.msk.bf16.gmra.mrb[92].mxu1 %vm1841_vm9, %v3942_v43 }
 0x376   :  { %12288 = vmatprep.mubr.msk.bf16.mxu1 %vm12995_vm2, %v21383_v13 }
 0x37d   :  { %12289 = vmatmul.mubr.msk.bf16.gmra.mrb[96].mxu1 %vm1841_vm9, %v3966_v46 }
 0x390   :  { %v4467_v16 = vpop.f32.mrb[0].mxu1 }
 0x391   :  { %v12413_v54 = vadd.f32 %v16867_v31, %v4467_v16  ;;  %v12194_v62 = vpop.f32.mrb[1].mxu1 }
 0x392   :  { %v4470_v61 = vpop.f32.mrb[2].mxu1 }
 0x393   :  { %v12414_v55 = vadd.f32 %v16867_v31, %v4470_v61  ;;  %v12195_v5 = vpop.f32.mrb[3].mxu1  ;;  %v4666_v41 = vmax.f32 %v12413_v54, 0.0 }
 0x395   :  { %v4667_v14 = vmax.f32 %v12414_v55, 0.0  ;;  %v4741_v19 = vpack.c.bf16 %v4666_v41, %v21383_v13 }
 0x397   :  { %v16871_v24 = vpack.c.bf16 %v4667_v14, %v4666_v41  ;;  %v5173_v18 = vrot.slane %v4741_v19, 3 }
 0x398   :  { %v4475_v47 = vpop.f32.mrb[4].mxu1 }
 0x399   :  { %v12415_v56 = vadd.f32 %v16867_v31, %v4475_v47  ;;  %5356 = vrot.lane.b32.xlu0 %v16871_v24, %s12998_s22  ;;  %v12198_v26 = vpop.f32.mrb[5].mxu1  ;;  %v5045_v30 = vrot.slane %v16871_v24, 1  ;;  %v4770_v49 = vshll.u32 %v16871_v24, 16  ;;  %v4774_v11 = vshrl.u32 %v16871_v24, 16 }
 0x39a   :  { %v4478_v4 = vpop.f32.mrb[6].mxu1 }
 0x39b   :  { %v4668_v22 = vmax.f32 %v12415_v56, 0.0  ;;  %v12416_v57 = vadd.f32 %v16867_v31, %v4478_v4  ;;  %v12199_v38 = vpop.f32.mrb[7].mxu1  ;;  %v5046_v53 = vsel %vm1058_vm4, %v21394_v40, %v5045_v30  ;;  %v4772_v0 = vrot.slane %v4770_v49, 1 }
 0x39c   :  { %5095 = vrot.lane.b32.xlu1 %v5046_v53, %s12999_s2  ;;  %v5276_v3 = vrot.slane %v4774_v11, 7 }
 0x39d   :  { %v4742_v27 = vpack.c.bf16 %v4668_v22, %v4667_v14  ;;  %v4669_v1 = vmax.f32 %v12416_v57, 0.0  ;;  %v4773_v6 = vsel %vm773_vm5, %v21395_v17, %v4772_v0  ;;  %v4776_v62 = vor.u32 %v4774_v11, %v4772_v0 }
 0x39e   :  { %v16884_v48 = vor.u32 %v5276_v3, %v4770_v49 }
 0x39f   :  { %v16886_v32 = vpack.c.bf16 %v4669_v1, %v4668_v22  ;;  %v5174_v29 = vrot.slane %v4742_v27, 3  ;;  %v5508_v55 = vshrl.u32 %v4742_v27, 16  ;;  %v5511_v5 = vshll.u32 %v4742_v27, 16 }
 0x3a0   :  { %4968 = vrot.lane.b32.xlu1 %v4773_v6, %s12998_s22  ;;  %v4483_v39 = vpop.f32.mrb[8].mxu1  ;;  %v5407_v49 = vrot.slane %v4742_v27, 2 }
 0x3a1   :  { %v12417_v37 = vadd.f32 %v16867_v31, %v4483_v39  ;;  %5358 = vrot.lane.b32.xlu0 %v16886_v32, %s12998_s22  ;;  %v12202_v50 = vpop.f32.mrb[9].mxu1  ;;  %v5175_v51 = vsel %vm330_vm1, %v5173_v18, %v5174_v29  ;;  %v4778_v43 = vshll.u32 %v16886_v32, 16  ;;  %v5047_v7 = vrot.slane %v16886_v32, 1 }
 0x3a2   :  { %v4486_v42 = vpop.f32.mrb[10].mxu1  ;;  %v4782_v33 = vshrl.u32 %v16886_v32, 16  ;;  %v5510_v40 = vrot.slane %v5508_v55, 2  ;;  %v5513_v53 = vrot.slane %v5511_v5, 3 }
 0x3a3   :  { %v4670_v46 = vmax.f32 %v12417_v37, 0.0  ;;  %v12418_v16 = vadd.f32 %v16867_v31, %v4486_v42  ;;  %v12203_v54 = vpop.f32.mrb[11].mxu1  ;;  %v16899_v61 = vrot.slane %v4778_v43, 1  ;;  %v5048_v26 = vsel %vm1058_vm4, %v5045_v30, %v5047_v7 }
 0x3a4   :  { %5224 = vrot.lane.b32.xlu1 %v5175_v51, %s13000_s25  ;;  %v16904_v41 = vrot.slane %v4782_v33, 7 }
 0x3a5   :  { %v4743_v14 = vpack.c.bf16 %v4670_v46, %v4669_v1  ;;  %v4671_v47 = vmax.f32 %v12418_v16, 0.0  ;;  %v4781_v56 = vsel %vm773_vm5, %v4776_v62, %v16899_v61 }
 0x3a6   :  { %4970 = vrot.lane.b32.xlu0 %v4781_v56, %s12998_s22  ;;  %v5279_v11 = vor.u32 %v16904_v41, %v4778_v43 }
 0x3a7   :  { %v16911_v19 = vpack.c.bf16 %v4671_v47, %v4670_v46  ;;  %v5176_v4 = vrot.slane %v4743_v14, 3  ;;  %v5408_v22 = vrot.slane %v4743_v14, 2  ;;  %v5516_v57 = vshrl.u32 %v4743_v14, 16 }
 0x3a8   :  { %5097 = vrot.lane.b32.xlu1 %v5048_v26, %s12999_s2  ;;  %v4491_v38 = vpop.f32.mrb[12].mxu1  ;;  %v5519_v0 = vshll.u32 %v4743_v14, 16  ;;  %v16915_v1 = vsel %vm1292_vm6, %v5276_v3, %v5279_v11 }
 0x3a9   :  { %v12419_v18 = vadd.f32 %v16867_v31, %v4491_v38  ;;  %v12206_v30 = vpop.f32.mrb[13].mxu1  ;;  %v16919_v27 = vsel %vm330_vm1, %v5174_v29, %v5176_v4  ;;  %v5409_v6 = vsel %vm1426_vm7, %v5407_v49, %v5408_v22  ;;  %v5049_v37 = vrot.slane %v16911_v19, 1 }
 0x3aa   :  { %5360 = vrot.lane.b32.xlu0 %v16911_v19, %s12998_s22  ;;  %v4494_v39 = vpop.f32.mrb[14].mxu1  ;;  %v5518_v50 = vrot.slane %v5516_v57, 2  ;;  %v5521_v51 = vrot.slane %v5519_v0, 3  ;;  %v4790_v46 = vshrl.u32 %v16911_v19, 16  ;;  %v5514_v29 = vor.u32 %v5513_v53, %v5510_v40 }
 0x3ab   :  { %v4672_v43 = vmax.f32 %v12419_v18, 0.0  ;;  %v12420_v3 = vadd.f32 %v16867_v31, %v4494_v39  ;;  %v12207_v42 = vpop.f32.mrb[15].mxu1  ;;  %v5050_v5 = vsel %vm1058_vm4, %v5047_v7, %v5049_v37  ;;  %v4786_v56 = vshll.u32 %v16911_v19, 16 }
 0x3ac   :  { %5226 = vrot.lane.b32.xlu1 %v16919_v27, %s13000_s25  ;;  %v5522_v16 = vor.u32 %v5521_v51, %v5518_v50  ;;  %v5281_v55 = vrot.slane %v4790_v46, 7 }
 0x3ad   :  { %v4744_v54 = vpack.c.bf16 %v4672_v43, %v4671_v47  ;;  %v4673_v62 = vmax.f32 %v12420_v3, 0.0  ;;  %v4788_v42 = vrot.slane %v4786_v56, 1 }
 0x3ae   :  { %5457 = vrot.lane.b32.xlu0 %v5409_v6, %s12999_s2  ;;  %v5523_v14 = vsel %vm1530_vm8, %v5514_v29, %v5522_v16  ;;  %v5282_v40 = vor.u32 %v5281_v55, %v4786_v56 }
 0x3af   :  { %v16937_v26 = vpack.c.bf16 %v4673_v62, %v4672_v43  ;;  %v5410_v49 = vrot.slane %v4744_v54, 2  ;;  %v5525_v11 = vshrl.u32 %v4744_v54, 16  ;;  %v5528_v57 = vshll.u32 %v4744_v54, 16 }
 0x3b0   :  { %5099 = vrot.lane.b32.xlu1 %v5050_v5, %s12999_s2  ;;  %v4499_v47 = vpop.f32.mrb[16].mxu1  ;;  %v5178_v38 = vrot.slane %v4744_v54, 3  ;;  %v16953_v54 = vsel %vm1292_vm6, %v16904_v41, %v5282_v40 }
 0x3b1   :  { %v12421_v53 = vadd.f32 %v16867_v31, %v4499_v47  ;;  %v12210_v0 = vpop.f32.mrb[17].mxu1  ;;  %v5411_v18 = vsel %vm1426_vm7, %v5408_v22, %v5410_v49  ;;  %v5527_v7 = vrot.slane %v5525_v11, 2  ;;  %v5530_v30 = vrot.slane %v5528_v57, 3 }
 0x3b2   :  { %5362 = vrot.lane.b32.xlu0 %v16937_v26, %s12998_s22  ;;  %v4502_v6 = vpop.f32.mrb[18].mxu1  ;;  %v16945_v39 = vsel %vm330_vm1, %v5176_v4, %v5178_v38  ;;  %v20885_v50 = vshrl.u32 %v16937_v26, 16  ;;  %v4794_v22 = vshll.u32 %v16937_v26, 16  ;;  %v4784_v57 = vor.u32 %v4782_v33, %v16899_v61 }
 0x3b3   :  { %v4674_v51 = vmax.f32 %v12421_v53, 0.0  ;;  %v12422_v43 = vadd.f32 %v16867_v31, %v4502_v6  ;;  %v12211_v3 = vpop.f32.mrb[19].mxu1  ;;  %v5531_v29 = vor.u32 %v5530_v30, %v5527_v7 }
 0x3b4   :  { %5732 = vrot.lane.b32.xlu1 %v5523_v14, %s13000_s25  ;;  %v5284_v4 = vrot.slane %v20885_v50, 7  ;;  %v4789_v53 = vsel %vm773_vm5, %v4784_v57, %v4788_v42 }
 0x3b5   :  { %v4745_v5 = vpack.c.bf16 %v4674_v51, %v4673_v62  ;;  %v4675_v11 = vmax.f32 %v12422_v43, 0.0  ;;  %v5532_v56 = vsel %vm1530_vm8, %v5522_v16, %v5531_v29 }
 0x3b6   :  { %5459 = vrot.lane.b32.xlu0 %v5411_v18, %s12999_s2  ;;  %v5285_v14 = vor.u32 %v5284_v4, %v4794_v22 }
 0x3b7   :  { %v16962_v47 = vpack.c.bf16 %v4675_v11, %v4674_v51  ;;  %v5412_v41 = vrot.slane %v4745_v5, 2  ;;  %v5534_v40 = vshrl.u32 %v4745_v5, 16  ;;  %v5537_v62 = vshll.u32 %v4745_v5, 16 }
 0x3b8   :  { %4972 = vrot.lane.b32.xlu1 %v4789_v53, %s12998_s22  ;;  %v4507_v0 = vpop.f32.mrb[20].mxu1  ;;  %v5180_v7 = vrot.slane %v4745_v5, 3  ;;  %v16967_v30 = vsel %vm1292_vm6, %v5281_v55, %v5285_v14  ;;  %v20887_v51 = vrot.slane %v16937_v26, 1 }
 0x3b9   :  { %v12423_v33 = vadd.f32 %v16867_v31, %v4507_v0  ;;  %v12214_v61 = vpop.f32.mrb[21].mxu1  ;;  %v5413_v16 = vsel %vm1426_vm7, %v5410_v49, %v5412_v41  ;;  %v5536_v18 = vrot.slane %v5534_v40, 2  ;;  %v5539_v43 = vrot.slane %v5537_v62, 3 }
 0x3ba   :  { %5734 = vrot.lane.b32.xlu0 %v5532_v56, %s13000_s25  ;;  %v4510_v6 = vpop.f32.mrb[22].mxu1  ;;  %v16974_v3 = vsel %vm330_vm1, %v5178_v38, %v5180_v7  ;;  %v20884_v5 = vshrl.u32 %v16962_v47, 16  ;;  %v20886_v53 = vshll.u32 %v16962_v47, 16  ;;  %v5052_v38 = vsel %vm1058_vm4, %v5049_v37, %v20887_v51 }
 0x3bb   :  { %v4676_v57 = vmax.f32 %v12423_v33, 0.0  ;;  %v12424_v55 = vadd.f32 %v16867_v31, %v4510_v6  ;;  %v12215_v14 = vpop.f32.mrb[23].mxu1  ;;  %v5540_v49 = vor.u32 %v5539_v43, %v5536_v18  ;;  %v4796_v18 = vrot.slane %v4794_v22, 1 }
 0x3bc   :  { %5228 = vrot.lane.b32.xlu1 %v16945_v39, %s13000_s25  ;;  %v5287_v56 = vrot.slane %v20884_v5, 7 }
 0x3bd   :  { %v4746_v40 = vpack.c.bf16 %v4676_v57, %v4675_v11  ;;  %v4677_v0 = vmax.f32 %v12424_v55, 0.0  ;;  %v5541_v62 = vsel %vm1530_vm8, %v5531_v29, %v5540_v49  ;;  %v4792_v29 = vor.u32 %v4790_v46, %v4788_v42 }
 0x3be   :  { %5364 = vrot.lane.b32.xlu0 %v16962_v47, %s12998_s22  ;;  %v5288_v33 = vor.u32 %v5287_v56, %v20886_v53 }
 0x3bf   :  { %v16993_v61 = vpack.c.bf16 %v4677_v0, %v4676_v57  ;;  %v5414_v6 = vrot.slane %v4746_v40, 2  ;;  %v5543_v11 = vshrl.u32 %v4746_v40, 16  ;;  %v5546_v55 = vshll.u32 %v4746_v40, 16 }
 0x3c0   :  { %5101 = vrot.lane.b32.xlu1 %v5052_v38, %s12999_s2  ;;  %v4515_v43 = vpop.f32.mrb[24].mxu1  ;;  %v5182_v14 = vrot.slane %v4746_v40, 3  ;;  %v16997_v5 = vsel %vm1292_vm6, %v5284_v4, %v5288_v33 }
 0x3c1   :  { %21396 = vst [vmem:[#allocation73_spill] sm:$0xff] %v16993_v61  ;;  %v12425_v37 = vadd.f32 %v16867_v31, %v4515_v43  ;;  %v12218_v50 = vpop.f32.mrb[25].mxu1  ;;  %v5415_v57 = vsel %vm1426_vm7, %v5412_v41, %v5414_v6  ;;  %v5545_v53 = vrot.slane %v5543_v11, 2  ;;  %v5548_v51 = vrot.slane %v5546_v55, 3 }
 0x3c2   :  { %5461 = vrot.lane.b32.xlu0 %v5413_v16, %s12999_s2  ;;  %v4518_v22 = vpop.f32.mrb[26].mxu1  ;;  %v17005_v38 = vsel %vm330_vm1, %v5180_v7, %v5182_v14  ;;  %v20888_v40 = vshrl.u32 %v16993_v61, 16  ;;  %v4797_v50 = vsel %vm773_vm5, %v4792_v29, %v4796_v18  ;;  %v20889_v42 = vshll.u32 %v16993_v61, 16 }
 0x3c3   :  { %21397 = vst [vmem:[#allocation76_spill] sm:$0xff] %v17005_v38  ;;  %v4678_v4 = vmax.f32 %v12425_v37, 0.0  ;;  %v12426_v33 = vadd.f32 %v16867_v31, %v4518_v22  ;;  %v12219_v43 = vpop.f32.mrb[27].mxu1  ;;  %v5549_v46 = vor.u32 %v5548_v51, %v5545_v53  ;;  %v5053_v29 = vrot.slane %v16962_v47, 1 }
 0x3c4   :  { %4974 = vrot.lane.b32.xlu1 %v4797_v50, %s12998_s22  ;;  %v5290_v41 = vrot.slane %v20888_v40, 7 }
 0x3c5   :  { %v4747_v16 = vpack.c.bf16 %v4678_v4, %v4677_v0  ;;  %v4679_v11 = vmax.f32 %v12426_v33, 0.0  ;;  %v5550_v7 = vsel %vm1530_vm8, %v5540_v49, %v5549_v46 }
 0x3c6   :  { %5736 = vrot.lane.b32.xlu0 %v5541_v62, %s13000_s25  ;;  %v5291_v55 = vor.u32 %v5290_v41, %v20889_v42 }
 0x3c7   :  { %v17018_v37 = vpack.c.bf16 %v4679_v11, %v4678_v4  ;;  %v5416_v22 = vrot.slane %v4747_v16, 2  ;;  %v5552_v51 = vshrl.u32 %v4747_v16, 16  ;;  %v5555_v43 = vshll.u32 %v4747_v16, 16 }
 0x3c8   :  { %5230 = vrot.lane.b32.xlu1 %v16974_v3, %s13000_s25  ;;  %v4523_v53 = vpop.f32.mrb[28].mxu1  ;;  %v5184_v0 = vrot.slane %v4747_v16, 3  ;;  %v17024_v33 = vsel %vm1292_vm6, %v5287_v56, %v5291_v55 }
 0x3c9   :  { %21398 = vst [vmem:[#allocation6_spill] sm:$0xff] %v17018_v37  ;;  %21399 = vst [vmem:[#allocation94_spill] sm:$0xff] %v17024_v33  ;;  %v12427_v49 = vadd.f32 %v16867_v31, %v4523_v53  ;;  %v12222_v62 = vpop.f32.mrb[29].mxu1  ;;  %v17028_v50 = vsel %vm1426_vm7, %v5414_v6, %v5416_v22  ;;  %v5554_v4 = vrot.slane %v5552_v51, 2  ;;  %v5557_v42 = vrot.slane %v5555_v43, 3 }
 0x3ca   :  { %5366 = vrot.lane.b32.xlu0 %v16993_v61, %s12998_s22  ;;  %v4526_v40 = vpop.f32.mrb[30].mxu1  ;;  %v17033_v59 = vsel %vm330_vm1, %v5182_v14, %v5184_v0  ;;  %v20893_v16 = vshrl.u32 %v17018_v37, 16  ;;  %v21401_v53 = vrot.slane %v16937_v26, 1  ;;  %v21402_v51 = vshll.u32 %v16962_v47, 16 }
 0x3cb   :  { %21400 = vst [vmem:[#allocation95_spill] sm:$0xff] %v17033_v59  ;;  %v4680_v17 = vmax.f32 %v12427_v49, 0.0  ;;  %v12428_v56 = vadd.f32 %v16867_v31, %v4526_v40  ;;  %v12223_v55 = vpop.f32.mrb[31].mxu1  ;;  %v5558_v2 = vor.u32 %v5557_v42, %v5554_v4  ;;  %v21403_v14 = vshrl.u32 %v16937_v26, 16 }
 0x3cc   :  { %v5054_v6 = vsel %vm1058_vm4, %v21401_v53, %v5053_v29  ;;  %v4804_v62 = vrot.slane %v21402_v51, 1  ;;  %v20896_v49 = vshll.u32 %v17018_v37, 16  ;;  %v17050_v55 = vrot.slane %v20893_v16, 7 }
 0x3cd   :  { %5103 = vrot.lane.b32.xlu1 %v5054_v6, %s12999_s2  ;;  %v4748_v43 = vpack.c.bf16 %v4680_v17, %v4679_v11  ;;  %v4681_v21 = vmax.f32 %v12428_v56, 0.0  ;;  %v4800_v52 = vor.u32 %v21403_v14, %v4796_v18  ;;  %v5559_v40 = vsel %vm1530_vm8, %v5549_v46, %v5558_v2 }
 0x3ce   :  { %5463 = vrot.lane.b32.xlu0 %v5415_v57, %s12999_s2  ;;  %v5294_v57 = vor.u32 %v17050_v55, %v20896_v49  ;;  %v20897_v16 = vrot.slane %v16993_v61, 1 }
 0x3cf   :  { %v17052_v53 = vpack.c.bf16 %v4681_v21, %v4680_v17  ;;  %v4805_v6 = vsel %vm773_vm5, %v4800_v52, %v4804_v62  ;;  %v5418_v42 = vrot.slane %v4748_v43, 2  ;;  %v5561_v11 = vshrl.u32 %v4748_v43, 16 }
 0x3d0   :  { %v4531_v4 = vpop.f32.mrb[32].mxu1  ;;  %v5564_v18 = vshll.u32 %v4748_v43, 16  ;;  %v5186_v56 = vrot.slane %v4748_v43, 3 }
 0x3d1   :  { %21404 = vst [vmem:[#allocation96_spill] sm:$0xff] %v17052_v53  ;;  %4976 = vrot.lane.b32.xlu1 %v4805_v6, %s12998_s22  ;;  %v12429_v46 = vadd.f32 %v16867_v31, %v4531_v4  ;;  %v12226_v51 = vpop.f32.mrb[33].mxu1  ;;  %v17061_v14 = vsel %vm1426_vm7, %v5416_v22, %v5418_v42  ;;  %v5563_v17 = vrot.slane %v5561_v11, 2  ;;  %v17072_v22 = vsel %vm1292_vm6, %v5290_v41, %v5294_v57 }
 0x3d2   :  { %5738 = vrot.lane.b32.xlu0 %v5550_v7, %s13000_s25  ;;  %v4534_v52 = vpop.f32.mrb[34].mxu1  ;;  %v5566_v6 = vrot.slane %v5564_v18, 3  ;;  %v17066_v10 = vsel %vm330_vm1, %v5184_v0, %v5186_v56  ;;  %21406 = vst [vmem:[#allocation98_spill] sm:$0xff] %v17072_v22  ;;  %v5056_v0 = vsel %vm1058_vm4, %v5053_v29, %v20897_v16 }
 0x3d3   :  { %21405 = vst [vmem:[#allocation97_spill] sm:$0xff] %v17066_v10  ;;  %v4682_v43 = vmax.f32 %v12429_v46, 0.0  ;;  %v12430_v63 = vadd.f32 %v16867_v31, %v4534_v52  ;;  %v12227_v49 = vpop.f32.mrb[35].mxu1  ;;  %v21408_v46 = vshll.u32 %v16993_v61, 16 }
 0x3d4   :  { %v5567_v4 = vor.u32 %v5566_v6, %v5563_v17 }
 0x3d5   :  { %5232 = vrot.lane.b32.xlu1 %v17005_v38, %s13000_s25  ;;  %v4749_v11 = vpack.c.bf16 %v4682_v43, %v4681_v21  ;;  %v4683_v7 = vmax.f32 %v12430_v63, 0.0  ;;  %v4812_v51 = vrot.slane %v21408_v46, 1 }
 0x3d6   :  { %5368 = vrot.lane.b32.xlu0 %v17018_v37, %s12998_s22  ;;  %v17080_v18 = vsel %vm1530_vm8, %v5558_v2, %v5567_v4  ;;  %v21409_v2 = vshrl.u32 %v16962_v47, 16 }
 0x3d7   :  { %v17082_v49 = vpack.c.bf16 %v4683_v7, %v4682_v43  ;;  %v5420_v17 = vrot.slane %v4749_v11, 2  ;;  %v5570_v41 = vshrl.u32 %v4749_v11, 16  ;;  %v5573_v63 = vshll.u32 %v4749_v11, 16 }
 0x3d8   :  { %v4539_v21 = vpop.f32.mrb[36].mxu1  ;;  %v5188_v57 = vrot.slane %v4749_v11, 3  ;;  %v4808_v16 = vor.u32 %v21409_v2, %v4804_v62  ;;  %v20901_v62 = vshll.u32 %v17052_v53, 16 }
 0x3d9   :  { %21407 = vst [vmem:[#allocation99_spill] sm:$0xff] %v17082_v49  ;;  %5105 = vrot.lane.b32.xlu1 %v5056_v0, %s12999_s2  ;;  %v12431_v6 = vadd.f32 %v16867_v31, %v4539_v21  ;;  %v12230_v29 = vpop.f32.mrb[37].mxu1  ;;  %v17092_v43 = vsel %vm1426_vm7, %v5418_v42, %v5420_v17  ;;  %v5572_v36 = vrot.slane %v5570_v41, 2  ;;  %v5575_v0 = vrot.slane %v5573_v63, 3 }
 0x3da   :  { %5465 = vrot.lane.b32.xlu0 %v17028_v50, %s12999_s2  ;;  %v4542_v46 = vpop.f32.mrb[38].mxu1  ;;  %v17097_v9 = vsel %vm330_vm1, %v5186_v56, %v5188_v57  ;;  %v4813_v29 = vsel %vm773_vm5, %v4808_v16, %v4812_v51  ;;  %v21411_v41 = vshrl.u32 %v17052_v53, 16  ;;  %v5057_v16 = vrot.slane %v17018_v37, 1 }
 0x3db   :  { %21410 = vst [vmem:[#allocation100_spill] sm:$0xff] %v17097_v9  ;;  %v4684_v11 = vmax.f32 %v12431_v6, 0.0  ;;  %v12432_v52 = vadd.f32 %v16867_v31, %v4542_v46  ;;  %v12231_v21 = vpop.f32.mrb[39].mxu1  ;;  %v5576_v42 = vor.u32 %v5575_v0, %v5572_v36 }
 0x3dc   :  { %v5296_v2 = vrot.slane %v21411_v41, 7 }
 0x3dd   :  { %4978 = vrot.lane.b32.xlu1 %v4813_v29, %s12998_s22  ;;  %v4750_v50 = vpack.c.bf16 %v4684_v11, %v4683_v7  ;;  %v4685_v28 = vmax.f32 %v12432_v52, 0.0  ;;  %v17107_v56 = vsel %vm1530_vm8, %v5567_v4, %v5576_v42 }
 0x3de   :  { %5740 = vrot.lane.b32.xlu0 %v5559_v40, %s13000_s25  ;;  %v5297_v63 = vor.u32 %v5296_v2, %v20901_v62 }
 0x3df   :  { %v17111_v6 = vpack.c.bf16 %v4685_v28, %v4684_v11  ;;  %v5422_v46 = vrot.slane %v4750_v50, 2  ;;  %v5579_v21 = vshrl.u32 %v4750_v50, 16  ;;  %v5582_v7 = vshll.u32 %v4750_v50, 16 }
 0x3e0   :  { %v4547_v36 = vpop.f32.mrb[40].mxu1  ;;  %v5190_v52 = vrot.slane %v4750_v50, 3  ;;  %v17118_v40 = vsel %vm1292_vm6, %v17050_v55, %v5297_v63  ;;  %v20908_v50 = vshrl.u32 %v17082_v49, 16 }
 0x3e1   :  { %21412 = vst [vmem:[#allocation101_spill] sm:$0xff] %v17111_v6  ;;  %5234 = vrot.lane.b32.xlu1 %v17033_v59, %s13000_s25  ;;  %21413 = vst [vmem:[#allocation102_spill] sm:$0xff] %v17118_v40  ;;  %v12433_v4 = vadd.f32 %v16867_v31, %v4547_v36  ;;  %v12234_v0 = vpop.f32.mrb[41].mxu1  ;;  %v17122_v11 = vsel %vm1426_vm7, %v5420_v17, %v5422_v46  ;;  %v5581_v29 = vrot.slane %v5579_v21, 2  ;;  %v5584_v62 = vrot.slane %v5582_v7, 3 }
 0x3e2   :  { %5370 = vrot.lane.b32.xlu0 %v17052_v53, %s12998_s22  ;;  %v4550_v41 = vpop.f32.mrb[42].mxu1  ;;  %v17127_v20 = vsel %vm330_vm1, %v5188_v57, %v5190_v52  ;;  %v21415_v36 = vrot.slane %v16993_v61, 1  ;;  %v21416_v21 = vshll.u32 %v17018_v37, 16  ;;  %v21417_v57 = vshrl.u32 %v16993_v61, 16 }
 0x3e3   :  { %21414 = vst [vmem:[#allocation103_spill] sm:$0xff] %v17127_v20  ;;  %v4686_v44 = vmax.f32 %v12433_v4, 0.0  ;;  %v12434_v55 = vadd.f32 %v16867_v31, %v4550_v41  ;;  %v12235_v63 = vpop.f32.mrb[43].mxu1  ;;  %v5585_v12 = vor.u32 %v5584_v62, %v5581_v29  ;;  %v20910_v4 = vshll.u32 %v17082_v49, 16 }
 0x3e4   :  { %v5058_v17 = vsel %vm1058_vm4, %v21415_v36, %v5057_v16  ;;  %v4820_v0 = vrot.slane %v21416_v21, 1  ;;  %v4816_v23 = vor.u32 %v21417_v57, %v4812_v51  ;;  %v17147_v63 = vrot.slane %v20908_v50, 7 }
 0x3e5   :  { %5107 = vrot.lane.b32.xlu1 %v5058_v17, %s12999_s2  ;;  %v4751_v7 = vpack.c.bf16 %v4686_v44, %v4685_v28  ;;  %v4687_v60 = vmax.f32 %v12434_v55, 0.0  ;;  %v17143_v41 = vsel %vm1530_vm8, %v5576_v42, %v5585_v12 }
 0x3e6   :  { %5467 = vrot.lane.b32.xlu0 %v17061_v14, %s12999_s2  ;;  %v4821_v28 = vsel %vm773_vm5, %v4816_v23, %v4820_v0  ;;  %v5300_v42 = vor.u32 %v17147_v63, %v20910_v4 }
 0x3e7   :  { %v17149_v36 = vpack.c.bf16 %v4687_v60, %v4686_v44  ;;  %v5424_v62 = vrot.slane %v4751_v7, 2  ;;  %v5588_v29 = vshrl.u32 %v4751_v7, 16  ;;  %v5591_v55 = vshll.u32 %v4751_v7, 16 }
 0x3e8   :  { %v4555_v51 = vpop.f32.mrb[44].mxu1  ;;  %v5192_v14 = vrot.slane %v4751_v7, 3 }
 0x3e9   :  { %21418 = vst [vmem:[#allocation104_spill] sm:$0xff] %v17149_v36  ;;  %4980 = vrot.lane.b32.xlu1 %v4821_v28, %s12998_s22  ;;  %v12435_v17 = vadd.f32 %v16867_v31, %v4555_v51  ;;  %v12238_v21 = vpop.f32.mrb[45].mxu1  ;;  %v17158_v57 = vsel %vm1426_vm7, %v5422_v46, %v5424_v62  ;;  %v5590_v44 = vrot.slane %v5588_v29, 2  ;;  %v20912_v28 = vrot.slane %v17052_v53, 1 }
 0x3ea   :  { %5742 = vrot.lane.b32.xlu0 %v17080_v18, %s13000_s25  ;;  %v4558_v23 = vpop.f32.mrb[46].mxu1  ;;  %v5593_v50 = vrot.slane %v5591_v55, 3  ;;  %v17164_v7 = vsel %vm330_vm1, %v5190_v52, %v5192_v14  ;;  %v17170_v29 = vsel %vm1292_vm6, %v5296_v2, %v5300_v42 }
 0x3eb   :  { %21419 = vst [vmem:[#allocation105_spill] sm:$0xff] %v17164_v7  ;;  %v4688_v8 = vmax.f32 %v12435_v17, 0.0  ;;  %v12436_v4 = vadd.f32 %v16867_v31, %v4558_v23  ;;  %v12239_v35 = vpop.f32.mrb[47].mxu1  ;;  %21420 = vst [vmem:[#allocation106_spill] sm:$0xff] %v17170_v29  ;;  %v5060_v52 = vsel %vm1058_vm4, %v5057_v16, %v20912_v28  ;;  %v21422_v17 = vshll.u32 %v17052_v53, 16 }
 0x3ec   :  { %v5594_v46 = vor.u32 %v5593_v50, %v5590_v44 }
 0x3ed   :  { %5236 = vrot.lane.b32.xlu1 %v17066_v10, %s13000_s25  ;;  %v4752_v51 = vpack.c.bf16 %v4688_v8, %v4687_v60  ;;  %v4689_v18 = vmax.f32 %v12436_v4, 0.0  ;;  %v4828_v50 = vrot.slane %v21422_v17, 1 }
 0x3ee   :  { %5372 = vrot.lane.b32.xlu0 %v17082_v49, %s12998_s22  ;;  %v17178_v55 = vsel %vm1530_vm8, %v5585_v12, %v5594_v46  ;;  %v21423_v12 = vshrl.u32 %v17018_v37, 16 }
 0x3ef   :  { %v17180_v35 = vpack.c.bf16 %v4689_v18, %v4688_v8  ;;  %v5426_v21 = vrot.slane %v4752_v51, 2  ;;  %v5597_v2 = vshrl.u32 %v4752_v51, 16  ;;  %v5600_v42 = vshll.u32 %v4752_v51, 16 }
 0x3f0   :  { %v4563_v60 = vpop.f32.mrb[48].mxu1  ;;  %v5194_v44 = vrot.slane %v4752_v51, 3  ;;  %v4824_v28 = vor.u32 %v21423_v12, %v4820_v0  ;;  %v20916_v0 = vshll.u32 %v17111_v6, 16 }
 0x3f1   :  { %21421 = vst [vmem:[#allocation107_spill] sm:$0xff] %v17180_v35  ;;  %5109 = vrot.lane.b32.xlu1 %v5060_v52, %s12999_s2  ;;  %v12437_v23 = vadd.f32 %v16867_v31, %v4563_v60  ;;  %v12242_v16 = vpop.f32.mrb[49].mxu1  ;;  %v17190_v8 = vsel %vm1426_vm7, %v5424_v62, %v5426_v21  ;;  %v5599_v45 = vrot.slane %v5597_v2, 2  ;;  %v5602_v52 = vrot.slane %v5600_v42, 3 }
 0x3f2   :  { %5469 = vrot.lane.b32.xlu0 %v17092_v43, %s12999_s2  ;;  %v4566_v17 = vpop.f32.mrb[50].mxu1  ;;  %v17195_v58 = vsel %vm330_vm1, %v5192_v14, %v5194_v44  ;;  %v4829_v16 = vsel %vm773_vm5, %v4824_v28, %v4828_v50  ;;  %v21425_v2 = vshrl.u32 %v17111_v6, 16 }
 0x3f3   :  { %21424 = vst [vmem:[#allocation108_spill] sm:$0xff] %v17195_v58  ;;  %v4690_v4 = vmax.f32 %v12437_v23, 0.0  ;;  %v12438_v51 = vadd.f32 %v16867_v31, %v4566_v17  ;;  %v12243_v60 = vpop.f32.mrb[51].mxu1  ;;  %v5603_v62 = vor.u32 %v5602_v52, %v5599_v45  ;;  %v5061_v23 = vrot.slane %v17082_v49, 1 }
 0x3f4   :  { %v5302_v12 = vrot.slane %v21425_v2, 7 }
 0x3f5   :  { %4982 = vrot.lane.b32.xlu1 %v4829_v16, %s12998_s22  ;;  %v4753_v43 = vpack.c.bf16 %v4690_v4, %v4689_v18  ;;  %v4691_v15 = vmax.f32 %v12438_v51, 0.0  ;;  %v17206_v14 = vsel %vm1530_vm8, %v5594_v46, %v5603_v62 }
 0x3f6   :  { %5744 = vrot.lane.b32.xlu0 %v17107_v56, %s13000_s25  ;;  %v5303_v42 = vor.u32 %v5302_v12, %v20916_v0 }
 0x3f7   :  { %v17210_v28 = vpack.c.bf16 %v4691_v15, %v4690_v4  ;;  %v5428_v17 = vrot.slane %v4753_v43, 2  ;;  %v5606_v45 = vshrl.u32 %v4753_v43, 16  ;;  %v5609_v52 = vshll.u32 %v4753_v43, 16 }
 0x3f8   :  { %v4571_v18 = vpop.f32.mrb[52].mxu1  ;;  %v5196_v51 = vrot.slane %v4753_v43, 3  ;;  %v17217_v56 = vsel %vm1292_vm6, %v17147_v63, %v5303_v42 }
 0x3f9   :  { %21426 = vst [vmem:[#allocation109_spill] sm:$0xff] %v17210_v28  ;;  %5238 = vrot.lane.b32.xlu1 %v17097_v9, %s13000_s25  ;;  %21427 = vst [vmem:[#allocation110_spill] sm:$0xff] %v17217_v56  ;;  %v12439_v46 = vadd.f32 %v16867_v31, %v4571_v18  ;;  %v12246_v60 = vpop.f32.mrb[53].mxu1  ;;  %v17221_v4 = vsel %vm1426_vm7, %v5426_v21, %v5428_v17  ;;  %v5608_v16 = vrot.slane %v5606_v45, 2  ;;  %v5611_v34 = vrot.slane %v5609_v52, 3 }
 0x3fa   :  { %5374 = vrot.lane.b32.xlu0 %v17111_v6, %s12998_s22  ;;  %v4574_v2 = vpop.f32.mrb[54].mxu1  ;;  %v17227_v43 = vsel %vm330_vm1, %v5194_v44, %v5196_v51  ;;  %v21429_v18 = vrot.slane %v17052_v53, 1  ;;  %v21430_v45 = vshll.u32 %v17082_v49, 16  ;;  %v21431_v52 = vshrl.u32 %v17052_v53, 16 }
 0x3fb   :  { %21428 = vst [vmem:[#allocation111_spill] sm:$0xff] %v17227_v43  ;;  %v4692_v25 = vmax.f32 %v12439_v46, 0.0  ;;  %v12440_v63 = vadd.f32 %v16867_v31, %v4574_v2  ;;  %v12247_v42 = vpop.f32.mrb[55].mxu1  ;;  %v5612_v56 = vor.u32 %v5611_v34, %v5608_v16  ;;  %v20920_v46 = vshll.u32 %v17149_v36, 16 }
 0x3fc   :  { %v5062_v21 = vsel %vm1058_vm4, %v21429_v18, %v5061_v23  ;;  %v4836_v60 = vrot.slane %v21430_v45, 1  ;;  %v4832_v44 = vor.u32 %v21431_v52, %v4828_v50  ;;  %v21432_v42 = vshrl.u32 %v17149_v36, 16 }
 0x3fd   :  { %5111 = vrot.lane.b32.xlu1 %v5062_v21, %s12999_s2  ;;  %v4754_v29 = vpack.c.bf16 %v4692_v25, %v4691_v15  ;;  %v4693_v0 = vmax.f32 %v12440_v63, 0.0  ;;  %v17242_v2 = vsel %vm1530_vm8, %v5603_v62, %v5612_v56 }
 0x3fe   :  { %5471 = vrot.lane.b32.xlu0 %v17122_v11, %s12999_s2  ;;  %v17246_v18 = vrot.slane %v21432_v42, 7  ;;  %v4837_v34 = vsel %vm773_vm5, %v4832_v44, %v4836_v60 }
 0x3ff   :  { %v17248_v45 = vpack.c.bf16 %v4693_v0, %v4692_v25  ;;  %v5430_v15 = vrot.slane %v4754_v29, 2  ;;  %v5615_v16 = vshrl.u32 %v4754_v29, 16  ;;  %v5618_v63 = vshll.u32 %v4754_v29, 16 }
 0x400   :  { %v4579_v50 = vpop.f32.mrb[56].mxu1  ;;  %v5198_v11 = vrot.slane %v4754_v29, 3  ;;  %v5306_v62 = vor.u32 %v17246_v18, %v20920_v46 }
 0x401   :  { %21433 = vst [vmem:[#allocation112_spill] sm:$0xff] %v17248_v45  ;;  %4984 = vrot.lane.b32.xlu1 %v4837_v34, %s12998_s22  ;;  %v12441_v21 = vadd.f32 %v16867_v31, %v4579_v50  ;;  %v12250_v52 = vpop.f32.mrb[57].mxu1  ;;  %v17257_v42 = vsel %vm1426_vm7, %v5428_v17, %v5430_v15  ;;  %v5617_v25 = vrot.slane %v5615_v16, 2  ;;  %v20922_v34 = vrot.slane %v17111_v6, 1 }
 0x402   :  { %5746 = vrot.lane.b32.xlu0 %v17143_v41, %s13000_s25  ;;  %v4582_v44 = vpop.f32.mrb[58].mxu1  ;;  %v5620_v53 = vrot.slane %v5618_v63, 3  ;;  %v17263_v29 = vsel %vm330_vm1, %v5196_v51, %v5198_v11  ;;  %v17269_v16 = vsel %vm1292_vm6, %v5302_v12, %v5306_v62 }
 0x403   :  { %v4694_v40 = vmax.f32 %v12441_v21, 0.0  ;;  %v12442_v46 = vadd.f32 %v16867_v31, %v4582_v44  ;;  %v12251_v13 = vpop.f32.mrb[59].mxu1  ;;  %21434 = vst [vmem:[#allocation113_spill] sm:$0xff] %v17269_v16  ;;  %v5064_v51 = vsel %vm1058_vm4, %v5061_v23, %v20922_v34  ;;  %v21436_v21 = vshll.u32 %v17111_v6, 16 }
 0x404   :  { %v5621_v17 = vor.u32 %v5620_v53, %v5617_v25 }
 0x405   :  { %5240 = vrot.lane.b32.xlu1 %v17127_v20, %s13000_s25  ;;  %v4755_v50 = vpack.c.bf16 %v4694_v40, %v4693_v0  ;;  %v4695_v41 = vmax.f32 %v12442_v46, 0.0  ;;  %v4844_v53 = vrot.slane %v21436_v21, 1 }
 0x406   :  { %5376 = vrot.lane.b32.xlu0 %v17149_v36, %s12998_s22  ;;  %v17277_v63 = vsel %vm1530_vm8, %v5612_v56, %v5621_v17  ;;  %v21437_v56 = vshrl.u32 %v17082_v49, 16 }
 0x407   :  { %v17279_v13 = vpack.c.bf16 %v4695_v41, %v4694_v40  ;;  %v5432_v52 = vrot.slane %v4755_v50, 2  ;;  %v5624_v12 = vshrl.u32 %v4755_v50, 16  ;;  %v5627_v62 = vshll.u32 %v4755_v50, 16 }
 0x408   :  { %v4587_v0 = vpop.f32.mrb[60].mxu1  ;;  %v5200_v25 = vrot.slane %v4755_v50, 3  ;;  %v4840_v34 = vor.u32 %v21437_v56, %v4836_v60  ;;  %v20924_v60 = vshll.u32 %v17180_v35, 16 }
 0x409   :  { %21435 = vst [vmem:[#allocation114_spill] sm:$0xff] %v17279_v13  ;;  %5113 = vrot.lane.b32.xlu1 %v5064_v51, %s12999_s2  ;;  %v12443_v44 = vadd.f32 %v16867_v31, %v4587_v0  ;;  %v12254_v23 = vpop.f32.mrb[61].mxu1  ;;  %v17289_v40 = vsel %vm1426_vm7, %v5430_v15, %v5432_v52  ;;  %v5626_v16 = vrot.slane %v5624_v12, 2  ;;  %v5629_v51 = vrot.slane %v5627_v62, 3 }
 0x40a   :  { %5473 = vrot.lane.b32.xlu0 %v17158_v57, %s12999_s2  ;;  %v4590_v21 = vpop.f32.mrb[62].mxu1  ;;  %v17294_v37 = vsel %vm330_vm1, %v5198_v11, %v5200_v25  ;;  %v4845_v23 = vsel %vm773_vm5, %v4840_v34, %v4844_v53  ;;  %v21439_v12 = vshrl.u32 %v17180_v35, 16 }
 0x40b   :  { %21438 = vst [vmem:[#allocation115_spill] sm:$0xff] %v17294_v37  ;;  %v4696_v46 = vmax.f32 %v12443_v44, 0.0  ;;  %v12444_v50 = vadd.f32 %v16867_v31, %v4590_v21  ;;  %v12255_v0 = vpop.f32.mrb[63].mxu1  ;;  %v5630_v15 = vor.u32 %v5629_v51, %v5626_v16  ;;  %v17318_v21 = vpop.permute.xlu0 %5356 }
 0x40c   :  { %v17302_v56 = vrot.slane %v21439_v12, 7 }
 0x40d   :  { %4986 = vrot.lane.b32.xlu1 %v4845_v23, %s12998_s22  ;;  %v17304_v57 = vpack.c.bf16 %v4696_v46, %v4695_v41  ;;  %v4697_v62 = vmax.f32 %v12444_v50, 0.0  ;;  %v17311_v44 = vsel %vm1530_vm8, %v5621_v17, %v5630_v15  ;;  %v5065_v41 = vrot.slane %v17149_v36, 1 }
 0x40e   :  { %v17306_v11 = vpop.permute.xlu1 %5095  ;;  %5748 = vrot.lane.b32.xlu0 %v17178_v55, %s13000_s25  ;;  %v5309_v34 = vor.u32 %v17302_v56, %v20924_v60 }
 0x40f   :  { %v17316_v16 = vpack.c.bf16 %v4697_v62, %v4696_v46  ;;  %v5434_v51 = vrot.slane %v17304_v57, 2  ;;  %v5633_v55 = vshrl.u32 %v17304_v57, 16  ;;  %v5636_v17 = vshll.u32 %v17304_v57, 16 }
 0x410   :  { %v4595_v50 = vpop.f32.mrb[64].mxu1  ;;  %v5202_v0 = vrot.slane %v17304_v57, 3  ;;  %v17329_v46 = vsel %vm1292_vm6, %v17246_v18, %v5309_v34 }
 0x411   :  { %21440 = vst [vmem:[#allocation116_spill] sm:$0xff] %v17316_v16  ;;  %5242 = vrot.lane.b32.xlu1 %v17164_v7, %s13000_s25  ;;  %21441 = vst [vmem:[#allocation117_spill] sm:$0xff] %v17329_v46  ;;  %v12445_v23 = vadd.f32 %v16867_v31, %v4595_v50  ;;  %v12258_v12 = vpop.f32.mrb[65].mxu1  ;;  %v17333_v60 = vsel %vm1426_vm7, %v5432_v52, %v5434_v51  ;;  %v5635_v22 = vrot.slane %v5633_v55, 2  ;;  %v5638_v20 = vrot.slane %v5636_v17, 3 }
 0x412   :  { %v4969_v49 = vpop.permute.xlu1 %4968  ;;  %5378 = vrot.lane.b32.xlu0 %v17180_v35, %s12998_s22  ;;  %v4598_v7 = vpop.f32.mrb[66].mxu1  ;;  %v17338_v9 = vsel %vm330_vm1, %v5200_v25, %v5202_v0  ;;  %v21443_v12 = vrot.slane %v17111_v6, 1  ;;  %v21444_v46 = vshll.u32 %v17149_v36, 16 }
 0x413   :  { %21442 = vst [vmem:[#allocation118_spill] sm:$0xff] %v17338_v9  ;;  %v4698_v57 = vmax.f32 %v12445_v23, 0.0  ;;  %v12446_v18 = vadd.f32 %v16867_v31, %v4598_v7  ;;  %v17341_v34 = vpop.permute.xlu0 %5358  ;;  %v12259_v50 = vpop.f32.mrb[67].mxu1  ;;  %v5639_v55 = vor.u32 %v5638_v20, %v5635_v22  ;;  %v21445_v23 = vshrl.u32 %v17111_v6, 16 }
 0x414   :  { %v5066_v52 = vsel %vm1058_vm4, %v21443_v12, %v5065_v41  ;;  %v4852_v10 = vrot.slane %v21444_v46, 1 }
 0x415   :  { %5115 = vrot.lane.b32.xlu1 %v5066_v52, %s12999_s2  ;;  %v17349_v17 = vpack.c.bf16 %v4698_v57, %v4697_v62  ;;  %v4699_v25 = vmax.f32 %v12446_v18, 0.0  ;;  %v4848_v61 = vor.u32 %v21445_v23, %v4844_v53  ;;  %v17356_v50 = vsel %vm1530_vm8, %v5630_v15, %v5639_v55 }
 0x416   :  { %v5225_v7 = vpop.permute.xlu1 %5224  ;;  %5475 = vrot.lane.b32.xlu0 %v17190_v8, %s12999_s2 }
 0x417   :  { %v17358_v12 = vpack.c.bf16 %v4699_v25, %v4698_v57  ;;  %v4853_v46 = vsel %vm773_vm5, %v4848_v61, %v4852_v10  ;;  %v5436_v22 = vrot.slane %v17349_v17, 2  ;;  %v5642_v62 = vshrl.u32 %v17349_v17, 16 }
 0x418   :  { %v4971_v33 = vpop.permute.xlu0 %4970  ;;  %v4603_v20 = vpop.f32.mrb[68].mxu1  ;;  %v5645_v8 = vshll.u32 %v17349_v17, 16  ;;  %v5204_v15 = vrot.slane %v17349_v17, 3 }
 0x419   :  { %21446 = vst [vmem:[#allocation119_spill] sm:$0xff] %v17358_v12  ;;  %4988 = vrot.lane.b32.xlu1 %v4853_v46, %s12998_s22  ;;  %v12447_v53 = vadd.f32 %v16867_v31, %v4603_v20  ;;  %v12262_v18 = vpop.f32.mrb[69].mxu1  ;;  %v17371_v23 = vsel %vm1426_vm7, %v5434_v51, %v5436_v22  ;;  %v5644_v46 = vrot.slane %v5642_v62, 2  ;;  %v17376_v31 = vld [vmem:[%s20696_s5] ss:$0 sm:$0xff] }
 0x41a   :  { %v5098_v52 = vpop.permute.xlu1 %5097  ;;  %5750 = vrot.lane.b32.xlu0 %v17206_v14, %s13000_s25  ;;  %v4606_v61 = vpop.f32.mrb[70].mxu1  ;;  %v5647_v18 = vrot.slane %v5645_v8, 3  ;;  %v17384_v14 = vsel %vm330_vm1, %v5202_v0, %v5204_v15 }
 0x41b   :  { %v4700_v6 = vmax.f32 %v12447_v53, 0.0  ;;  %v12448_v20 = vadd.f32 %v17376_v31, %v4606_v61  ;;  %v12263_v17 = vpop.f32.mrb[71].mxu1  ;;  %21447 = vst [vmem:[#allocation120_spill] sm:$0xff] %v17384_v14  ;;  %v21448_v61 = vrot.slane %v17180_v35, 1  ;;  %v21452_v14 = vshrl.u32 %v17149_v36, 16 }
 0x41c   :  { %v17379_v59 = vpop.permute.xlu0 %5360  ;;  %v17388_v53 = vor.u32 %v5647_v18, %v5644_v46  ;;  %v21449_v17 = vshll.u32 %v17180_v35, 16 }
 0x41d   :  { %5244 = vrot.lane.b32.xlu1 %v17195_v58, %s13000_s25  ;;  %v17386_v51 = vpack.c.bf16 %v4700_v6, %v4699_v25  ;;  %v4701_v62 = vmax.f32 %v12448_v20, 0.0  ;;  %v5068_v8 = vsel %vm1058_vm4, %v5065_v41, %v21448_v61  ;;  %v5811_v58 = vsel %vm1841_vm9, 0.0|0.0, %v4969_v49 }
 0x41e   :  { %v5227_v57 = vpop.permute.xlu1 %5226  ;;  %5380 = vrot.lane.b32.xlu0 %v17210_v28, %s12998_s22  ;;  %v4860_v38 = vrot.slane %v21449_v17, 1  ;;  %v17402_v25 = vsel %vm1530_vm8, %v5639_v55, %v17388_v53  ;;  %v4856_v41 = vor.u32 %v21452_v14, %v4852_v10  ;;  %v5813_v61 = vsel %vm1841_vm9, %v16871_v24, %v4971_v33 }
 0x41f   :  { %v17398_v0 = vpack.c.bf16 %v4701_v62, %v4700_v6  ;;  %21451 = vst [vmem:[#allocation122_spill] sm:$0xff] %v17402_v25  ;;  %v5438_v46 = vrot.slane %v17386_v51, 2  ;;  %v5651_v55 = vshrl.u32 %v17386_v51, 16 }
 0x420   :  { %v5458_v20 = vpop.permute.xlu0 %5457  ;;  %v4611_v18 = vpop.f32.mrb[72].mxu1  ;;  %v4861_v14 = vsel %vm773_vm5, %v4856_v41, %v4860_v38 }
 0x421   :  { %21450 = vst [vmem:[#allocation121_spill] sm:$0xff] %v17398_v0  ;;  %5117 = vrot.lane.b32.xlu1 %v5068_v8, %s12999_s2  ;;  %v12449_v49 = vadd.f32 %v17376_v31, %v4611_v18  ;;  %v12266_v6 = vpop.f32.mrb[73].mxu1  ;;  %v17412_v17 = vsel %vm1426_vm7, %v5436_v22, %v5438_v46  ;;  %v5863_v0 = vsel %vm1894_vm10, %v5811_v58, %v17306_v11  ;;  %v20938_v18 = vshll.u32 %v17210_v28, 16 }
 0x422   :  { %v17417_v25 = vpop.permute.xlu1 %5099  ;;  %5477 = vrot.lane.b32.xlu0 %v17221_v4, %s12999_s2  ;;  %v4614_v10 = vpop.f32.mrb[74].mxu1  ;;  %v5915_v24 = vsel %vm1947_vm11, %v5863_v0, %v5225_v7  ;;  %v5865_v6 = vsel %vm1894_vm10, %v5813_v61, %v5098_v52  ;;  %v5653_v58 = vrot.slane %v5651_v55, 2  ;;  %v5654_v4 = vshll.u32 %v17386_v51, 16 }
 0x423   :  { %v4702_v33 = vmax.f32 %v12449_v49, 0.0  ;;  %v12450_v8 = vadd.f32 %v17376_v31, %v4614_v10  ;;  %v12267_v22 = vpop.f32.mrb[75].mxu1  ;;  %v20940_v11 = vrot.slane %v17386_v51, 3  ;;  %v5994_v7 = vsel %vm1841_vm9, %v16884_v48, %v17318_v21  ;;  %v21454_v48 = vld [vmem:[#allocation44_spill] sm:$0xff] }
 0x424   :  { %v17426_v36 = vpop.permute.xlu0 %5362  ;;  %v5918_v0 = vsel %vm1947_vm11, %v5865_v6, %v5227_v57  ;;  %v6070_v52 = vsel %vm1894_vm10, %v5994_v7, %v5458_v20  ;;  %v20939_v55 = vrot.slane %v17210_v28, 1  ;;  %v5656_v10 = vrot.slane %v5654_v4, 3  ;;  %v21456_v22 = vld [vmem:[#allocation58_spill] sm:$0xff] }
 0x425   :  { %4990 = vrot.lane.b32.xlu1 %v4861_v14, %s12998_s22  ;;  %v17435_v41 = vpack.c.bf16 %v4702_v33, %v4701_v62  ;;  %v4703_v49 = vmax.f32 %v12450_v8, 0.0  ;;  %v17444_v14 = vsel %vm330_vm1, %v5204_v15, %v20940_v11  ;;  %v17447_v21 = vmul.bf16 %v5915_v24, %v21454_v48 }
 0x426   :  { %v5733_v61 = vpop.permute.xlu1 %5732  ;;  %5752 = vrot.lane.b32.xlu0 %v17242_v2, %s13000_s25  ;;  %21453 = vst [vmem:[#allocation123_spill] sm:$0xff] %v17444_v14  ;;  %v17454_v20 = vrot.slane %v20938_v18, 1  ;;  %v21455_v2 = vld [vmem:[#allocation45_spill] sm:$0xff]  ;;  %v17462_v24 = vor.u32 %v5656_v10, %v5653_v58 }
 0x427   :  { %v17449_v57 = vpack.c.bf16 %v4703_v49, %v4702_v33  ;;  %v6121_v62 = vsel %vm1947_vm11, %v6070_v52, %v5733_v61  ;;  %v17457_v8 = vmul.bf16 %v5918_v0, %v21455_v2  ;;  %v20942_v33 = vrot.slane %v17435_v41, 2 }
 0x428   :  { %v6198_v6 = vmul.bf16 %v6121_v62, %v21456_v22  ;;  %v5460_v4 = vpop.permute.xlu0 %5459  ;;  %v4619_v15 = vpop.f32.mrb[76].mxu1  ;;  %v21457_v61 = vshrl.u32 %v17180_v35, 16  ;;  %v21458_v2 = vrot.slane %v17180_v35, 1  ;;  %v17478_v10 = vsel %vm1530_vm8, %v17388_v53, %v17462_v24 }
 0x429   :  { %5246 = vrot.lane.b32.xlu1 %v17227_v43, %s13000_s25  ;;  %v12451_v7 = vadd.f32 %v17376_v31, %v4619_v15  ;;  %v12270_v52 = vpop.f32.mrb[77].mxu1  ;;  %v5997_v22 = vsel %vm1841_vm9, %v16915_v1, %v17341_v34  ;;  %v6317_v15 = vshll.u32 %v17447_v21, 16 }
 0x42a   :  { %v4864_v48 = vor.u32 %v21457_v61, %v4860_v38  ;;  %v6329_v18 = vshll.u32 %v6198_v6, 16  ;;  %v4973_v0 = vpop.permute.xlu1 %4972  ;;  %5382 = vrot.lane.b32.xlu0 %v17248_v45, %s12998_s22  ;;  %v4622_v62 = vpop.f32.mrb[78].mxu1  ;;  %v5070_v58 = vsel %vm1058_vm4, %v21458_v2, %v20939_v55  ;;  %v17483_v38 = vsel %vm1426_vm7, %v5438_v46, %v20942_v33 }
 0x42b   :  { %v4704_v52 = vmax.f32 %v12451_v7, 0.0  ;;  %v12452_v61 = vadd.f32 %v17376_v31, %v4622_v62  ;;  %v12271_v2 = vpop.f32.mrb[79].mxu1  ;;  %v6322_v55 = vshll.u32 %v17457_v8, 16  ;;  %v6072_v53 = vsel %vm1894_vm10, %v5997_v22, %v5460_v4  ;;  %v21459_v4 = vld [vmem:[#allocation61_spill] sm:$0xff] }
 0x42c   :  { %v5815_v11 = vsel %vm1841_vm9, %v16886_v32, %v4973_v0  ;;  %v5735_v35 = vpop.permute.xlu0 %5734  ;;  %v4869_v46 = vsel %vm773_vm5, %v4864_v48, %v17454_v20  ;;  %v5660_v62 = vshrl.u32 %v17435_v41, 16  ;;  %v6315_v2 = vshrl.u32 %v17447_v21, 16 }
 0x42d   :  { %5119 = vrot.lane.b32.xlu1 %v5070_v58, %s12999_s2  ;;  %v17497_v1 = vpack.c.bf16 %v4704_v52, %v4703_v49  ;;  %v4705_v34 = vmax.f32 %v12452_v61, 0.0  ;;  %v6124_v7 = vsel %vm1947_vm11, %v6072_v53, %v5735_v35  ;;  %v6331_v33 = vrot.slane %v6329_v18, 1 }
 0x42e   :  { %v17503_v22 = vmul.bf16 %v6124_v7, %v21459_v4  ;;  %v5229_v32 = vpop.permute.xlu1 %5228  ;;  %5479 = vrot.lane.b32.xlu0 %v17257_v42, %s12999_s2  ;;  %v5663_v0 = vshll.u32 %v17435_v41, 16  ;;  %v6319_v48 = vrot.slane %v6317_v15, 1  ;;  %v5662_v58 = vrot.slane %v5660_v62, 2 }
 0x42f   :  { %v17508_v49 = vpack.c.bf16 %v4705_v34, %v4704_v52  ;;  %v20945_v35 = vrot.slane %v17435_v41, 3  ;;  %v17511_v61 = vrot.slane %v6322_v55, 1  ;;  %v6327_v53 = vshrl.u32 %v6198_v6, 16 }
 0x430   :  { %v6334_v18 = vshll.u32 %v17503_v22, 16  ;;  %v5867_v21 = vsel %vm1894_vm10, %v5815_v11, %v17417_v25  ;;  %v17516_v7 = vpop.permute.xlu0 %5364  ;;  %v4627_v42 = vpop.f32.mrb[80].mxu1  ;;  %v5665_v4 = vrot.slane %v5663_v0, 3  ;;  %v21461_v55 = vrot.slane %v17386_v51, 3 }
 0x431   :  { %21460 = vst [vmem:[#allocation44_spill] sm:$0xff] %v17508_v49  ;;  %4992 = vrot.lane.b32.xlu1 %v4869_v46, %s12998_s22  ;;  %v5921_v15 = vsel %vm1947_vm11, %v5867_v21, %v5229_v32  ;;  %v12453_v52 = vadd.f32 %v17376_v31, %v4627_v42  ;;  %v12274_v62 = vpop.f32.mrb[81].mxu1  ;;  %v6332_v46 = vor.u32 %v6331_v33, %v6327_v53  ;;  %v20949_v32 = vrot.slane %v17248_v45, 1 }
 0x432   :  { %v17526_v6 = vsel %vm330_vm1, %v21461_v55, %v20945_v35  ;;  %v17528_v43 = vrot.slane %v6334_v18, 1  ;;  %v5102_v25 = vpop.permute.xlu1 %5101  ;;  %5754 = vrot.lane.b32.xlu0 %v17277_v63, %s13000_s25  ;;  %v4630_v11 = vpop.f32.mrb[82].mxu1  ;;  %v20946_v21 = vshll.u32 %v17248_v45, 16  ;;  %v6320_v0 = vor.u32 %v6319_v48, %v6315_v2  ;;  %v21463_v55 = vld [vmem:[#allocation65_spill] sm:$0xff] }
 0x433   :  { %21462 = vst [vmem:[#allocation45_spill] sm:$0xff] %v17526_v6  ;;  %v4706_v42 = vmax.f32 %v12453_v52, 0.0  ;;  %v12454_v62 = vadd.f32 %v17376_v31, %v4630_v11  ;;  %v12275_v51 = vpop.f32.mrb[83].mxu1  ;;  %v17535_v49 = vor.u32 %v5665_v4, %v5662_v58  ;;  %v17538_v18 = vmul.bf16 %v5921_v15, %v21463_v55  ;;  %v21464_v58 = vld [vmem:[#allocation23_spill] sm:$0xff] }
 0x434   :  { %v5462_v35 = vpop.permute.xlu0 %5461  ;;  %v6337_v63 = vsel %vm773_vm5, %v6332_v46, %v17528_v43  ;;  %v6325_v2 = vsel %vm773_vm5, %v6320_v0, %v17511_v61  ;;  %v17555_v15 = vmul.bf16 %v16919_v27, %v21464_v58  ;;  %v17562_v4 = vrot.slane %v20946_v21, 1 }
 0x435   :  { %5248 = vrot.lane.b32.xlu1 %v17263_v29, %s13000_s25  ;;  %v17544_v33 = vpack.c.bf16 %v4706_v42, %v4705_v34  ;;  %v4707_v53 = vmax.f32 %v12454_v62, 0.0  ;;  %6681 = vmatprep.subr.bf16.mxu0 %v6337_v63  ;;  %v17551_v48 = vsel %vm1530_vm8, %v17462_v24, %v17535_v49  ;;  %v20947_v34 = vshrl.u32 %v17210_v28, 16 }
 0x436   :  { %6682 = vmatpush1.bf16.msra.mxu0 %v6325_v2  ;;  %v4975_v52 = vpop.permute.xlu1 %4974  ;;  %5384 = vrot.lane.b32.xlu0 %v17279_v13, %s12998_s22  ;;  %v6000_v24 = vsel %vm1841_vm9, %v16953_v54, %v17379_v59  ;;  %v21466_v27 = vrot.slane %v17210_v28, 1  ;;  %v20948_v0 = vrot.slane %v17497_v1, 2  ;;  %v6354_v62 = vshll.u32 %v17538_v18, 16 }
 0x437   :  { %v17567_v11 = vpack.c.bf16 %v4707_v53, %v4706_v42  ;;  %v6074_v51 = vsel %vm1894_vm10, %v6000_v24, %v5462_v35  ;;  %v5817_v55 = vsel %vm1841_vm9, %v16911_v19, %v4975_v52  ;;  %v4872_v54 = vor.u32 %v20947_v34, %v17454_v20  ;;  %v21468_v52 = vld [vmem:[#allocation5_spill] sm:$0xff] }
 0x438   :  { %v5072_v46 = vsel %vm1058_vm4, %v21466_v27, %v20949_v32  ;;  %v5737_v63 = vpop.permute.xlu0 %5736  ;;  %v4635_v59 = vpop.f32.mrb[84].mxu1  ;;  %v21467_v35 = vrot.slane %v17435_v41, 2  ;;  %v5669_v19 = vshrl.u32 %v17497_v1, 16  ;;  %v5869_v32 = vsel %vm1894_vm10, %v5817_v55, %v5102_v25 }
 0x439   :  { %21465 = vst [vmem:[#allocation58_spill] sm:$0xff] %v17567_v11  ;;  %5121 = vrot.lane.b32.xlu1 %v5072_v46, %s12999_s2  ;;  %v6127_v42 = vsel %vm1947_vm11, %v6074_v51, %v5737_v63  ;;  %v12455_v2 = vadd.f32 %v17376_v31, %v4635_v59  ;;  %v12278_v58 = vpop.f32.mrb[85].mxu1  ;;  %v4877_v51 = vsel %vm773_vm5, %v4872_v54, %v17562_v4  ;;  %v5672_v59 = vshll.u32 %v17497_v1, 16 }
 0x43a   :  { %v17590_v24 = vsel %vm1426_vm7, %v21467_v35, %v20948_v0  ;;  %v17594_v27 = vmul.bf16 %v6127_v42, %v21468_v52  ;;  %v5231_v46 = vpop.permute.xlu1 %5230  ;;  %5481 = vrot.lane.b32.xlu0 %v17289_v40, %s12999_s2  ;;  %v4638_v20 = vpop.f32.mrb[86].mxu1  ;;  %v6350_v58 = vshrl.u32 %v17457_v8, 16  ;;  %v5671_v42 = vrot.slane %v5669_v19, 2 }
 0x43b   :  { %v4708_v35 = vmax.f32 %v12455_v2, 0.0  ;;  %v12456_v21 = vadd.f32 %v17376_v31, %v4638_v20  ;;  %v12279_v34 = vpop.f32.mrb[87].mxu1  ;;  %v6358_v52 = vshrl.u32 %v17503_v22, 16  ;;  %v17605_v0 = vrot.slane %v6354_v62, 1 }
 0x43c   :  { %v6362_v40 = vshll.u32 %v17594_v27, 16  ;;  %v17609_v54 = vpop.permute.xlu0 %5366  ;;  %v5924_v8 = vsel %vm1947_vm11, %v5869_v32, %v5231_v46  ;;  %v5674_v20 = vrot.slane %v5672_v59, 3  ;;  %v20951_v25 = vshrl.u32 %v17248_v45, 16  ;;  %v21470_v46 = vld [vmem:[#allocation9_spill] sm:$0xff] }
 0x43d   :  { %4994 = vrot.lane.b32.xlu1 %v4877_v51, %s12998_s22  ;;  %v17612_v63 = vpack.c.bf16 %v4708_v35, %v4707_v53  ;;  %v4709_v2 = vmax.f32 %v12456_v21, 0.0  ;;  %v6360_v22 = vor.u32 %v6358_v52, %v17528_v43  ;;  %v20950_v62 = vrot.slane %v17497_v1, 3 }
 0x43e   :  { %v17615_v34 = vrot.slane %v6362_v40, 1  ;;  %5756 = vrot.lane.b32.xlu0 %v17311_v44, %s13000_s25  ;;  %v6352_v55 = vor.u32 %v6350_v58, %v17511_v61  ;;  %v20952_v32 = vrot.slane %v17279_v13, 1  ;;  %v17626_v21 = vor.u32 %v5674_v20, %v5671_v42 }
 0x43f   :  { %v5104_v19 = vpop.permute.xlu1 %5103  ;;  %v17623_v53 = vpack.c.bf16 %v4709_v2, %v4708_v35  ;;  %v17629_v51 = vmul.bf16 %v5924_v8, %v21470_v46  ;;  %v21471_v61 = vrot.slane %v17435_v41, 3  ;;  %v20953_v35 = vrot.slane %v17544_v33, 2 }
 0x440   :  { %v5464_v59 = vpop.permute.xlu0 %5463  ;;  %v4643_v43 = vpop.f32.mrb[88].mxu1  ;;  %v6365_v44 = vsel %vm773_vm5, %v6360_v22, %v17615_v34  ;;  %v6357_v40 = vsel %vm773_vm5, %v6352_v55, %v17605_v0  ;;  %v21473_v8 = vshll.u32 %v17279_v13, 16  ;;  %v17653_v41 = vsel %vm1530_vm8, %v17535_v49, %v17626_v21 }
 0x441   :  { %21469 = vst [vmem:[#allocation61_spill] sm:$0xff] %v17623_v53  ;;  %5250 = vrot.lane.b32.xlu1 %v17294_v37, %s13000_s25  ;;  %v17640_v58 = vsel %vm330_vm1, %v21471_v61, %v20950_v62  ;;  %v12457_v42 = vadd.f32 %v17376_v31, %v4643_v43  ;;  %v12282_v52 = vpop.f32.mrb[89].mxu1  ;;  %6683 = vmatprep.subr.bf16.mxu0 %v6365_v44  ;;  %v6341_v22 = vshll.u32 %v17555_v15, 16  ;;  %v6378_v62 = vshll.u32 %v17629_v51, 16 }
 0x442   :  { %21472 = vst [vmem:[#allocation65_spill] sm:$0xff] %v17640_v58  ;;  %v17648_v20 = vrot.slane %v21473_v8, 1  ;;  %6684 = vmatpush1.bf16.msra.mxu0 %v6357_v40  ;;  %5386 = vrot.lane.b32.xlu0 %v17316_v16, %s12998_s22  ;;  %v4646_v43 = vpop.f32.mrb[90].mxu1  ;;  %v4880_v55 = vor.u32 %v20951_v25, %v17562_v4  ;;  %v6003_v44 = vsel %vm1841_vm9, %v16967_v30, %v17426_v36  ;;  %v21474_v40 = vrot.slane %v17248_v45, 1 }
 0x443   :  { %v4977_v46 = vpop.permute.xlu1 %4976  ;;  %v4710_v61 = vmax.f32 %v12457_v42, 0.0  ;;  %v12458_v49 = vadd.f32 %v17376_v31, %v4646_v43  ;;  %v12283_v52 = vpop.f32.mrb[91].mxu1  ;;  %v6076_v4 = vsel %vm1894_vm10, %v6003_v44, %v5464_v59  ;;  %v21475_v30 = vrot.slane %v17497_v1, 2  ;;  %v21476_v44 = vld [vmem:[#allocation68_spill] sm:$0xff] }
 0x444   :  { %v5074_v8 = vsel %vm1058_vm4, %v21474_v40, %v20952_v32  ;;  %v5739_v25 = vpop.permute.xlu0 %5738  ;;  %v4885_v40 = vsel %vm773_vm5, %v4880_v55, %v17648_v20  ;;  %v5819_v59 = vsel %vm1841_vm9, %v16937_v26, %v4977_v46  ;;  %v5681_v55 = vshll.u32 %v17544_v33, 16 }
 0x445   :  { %5123 = vrot.lane.b32.xlu1 %v5074_v8, %s12999_s2  ;;  %v17679_v36 = vsel %vm1426_vm7, %v21475_v30, %v20953_v35  ;;  %v17681_v42 = vpack.c.bf16 %v4710_v61, %v4709_v2  ;;  %v4711_v43 = vmax.f32 %v12458_v49, 0.0  ;;  %v6130_v52 = vsel %vm1947_vm11, %v6076_v4, %v5739_v25 }
 0x446   :  { %v17689_v8 = vmul.bf16 %v6130_v52, %v21476_v44  ;;  %5483 = vrot.lane.b32.xlu0 %v17333_v60, %s12999_s2  ;;  %v5678_v2 = vshrl.u32 %v17544_v33, 16  ;;  %v6374_v26 = vshrl.u32 %v17538_v18, 16  ;;  %v6382_v46 = vshrl.u32 %v17594_v27, 16 }
 0x447   :  { %v5233_v32 = vpop.permute.xlu1 %5232  ;;  %v17695_v49 = vpack.c.bf16 %v4711_v43, %v4710_v61  ;;  %v17702_v52 = vrot.slane %v6378_v62, 1  ;;  %v5871_v35 = vsel %vm1894_vm10, %v5819_v59, %v5104_v19  ;;  %v5683_v4 = vrot.slane %v5681_v55, 3 }
 0x448   :  { %v6386_v60 = vshll.u32 %v17689_v8, 16  ;;  %v17705_v44 = vpop.permute.xlu0 %5368  ;;  %v4651_v61 = vpop.f32.mrb[92].mxu1  ;;  %v5680_v37 = vrot.slane %v5678_v2, 2  ;;  %v6376_v18 = vor.u32 %v6374_v26, %v17605_v0  ;;  %v5927_v27 = vsel %vm1947_vm11, %v5871_v35, %v5233_v32  ;;  %v21480_v35 = vld [vmem:[#allocation24_spill] sm:$0xff] }
 0x449   :  { %21477 = vst [vmem:[#allocation23_spill] sm:$0xff] %v17695_v49  ;;  %4996 = vrot.lane.b32.xlu1 %v4885_v40, %s12998_s22  ;;  %v12459_v25 = vadd.f32 %v17376_v31, %v4651_v61  ;;  %v12286_v30 = vpop.f32.mrb[93].mxu1  ;;  %v6384_v49 = vor.u32 %v6382_v46, %v17615_v34  ;;  %v21478_v0 = vrot.slane %v17544_v33, 3  ;;  %v21479_v55 = vrot.slane %v17497_v1, 3 }
 0x44a   :  { %v17711_v45 = vrot.slane %v6386_v60, 1  ;;  %5758 = vrot.lane.b32.xlu0 %v17356_v50, %s13000_s25  ;;  %v4654_v40 = vpop.f32.mrb[94].mxu1  ;;  %v17720_v2 = vor.u32 %v5683_v4, %v5680_v37  ;;  %v17731_v26 = vmul.bf16 %v16945_v39, %v21480_v35  ;;  %v6381_v37 = vsel %vm773_vm5, %v6376_v18, %v17702_v52  ;;  %v21483_v4 = vld [vmem:[#allocation69_spill] sm:$0xff] }
 0x44b   :  { %v17714_v62 = vpop.permute.xlu1 %5105  ;;  %v4712_v19 = vmax.f32 %v12459_v25, 0.0  ;;  %v12460_v59 = vadd.f32 %v17376_v31, %v4654_v40  ;;  %v12287_v30 = vpop.f32.mrb[95].mxu1  ;;  %v17727_v32 = vsel %vm330_vm1, %v21479_v55, %v21478_v0  ;;  %v21481_v25 = vshrl.u32 %v17210_v28, 16  ;;  %v21484_v40 = vld [vmem:[#allocation25_spill] sm:$0xff] }
 0x44c   :  { %v5466_v50 = vpop.permute.xlu0 %5465  ;;  %v6389_v34 = vsel %vm773_vm5, %v6384_v49, %v17711_v45  ;;  %v17744_v46 = vmul.bf16 %v5927_v27, %v21483_v4  ;;  %v17751_v61 = vsel %vm1530_vm8, %v17626_v21, %v17720_v2  ;;  %v17753_v49 = vrot.slane %v6341_v22, 1 }
 0x44d   :  { %5252 = vrot.lane.b32.xlu1 %v17338_v9, %s13000_s25  ;;  %v17741_v1 = vrot.slane %v21481_v25, 7  ;;  %v17746_v60 = vpack.c.bf16 %v4712_v19, %v4711_v43  ;;  %v4713_v39 = vmax.f32 %v12460_v59, 0.0  ;;  %6685 = vmatprep.subr.bf16.mxu0 %v6389_v34  ;;  %v17757_v18 = vmul.bf16 %v16974_v3, %v21484_v40 }
 0x44e   :  { %6686 = vmatpush1.bf16.msra.mxu0 %v6381_v37  ;;  %5388 = vrot.lane.b32.xlu0 %v17358_v12, %s12998_s22  ;;  %v21485_v43 = vrot.slane %v17316_v16, 1  ;;  %v21486_v27 = vrot.slane %v17279_v13, 1  ;;  %v20958_v21 = vshrl.u32 %v17279_v13, 16  ;;  %v6006_v22 = vsel %vm1841_vm9, %v16997_v5, %v17516_v7 }
 0x44f   :  { %21482 = vst [vmem:[#allocation5_spill] sm:$0xff] %v17741_v1  ;;  %v4979_v30 = vpop.permute.xlu1 %4978  ;;  %v17770_v0 = vpack.c.bf16 %v4713_v39, %v4712_v19  ;;  %v21488_v3 = vshll.u32 %v17316_v16, 16  ;;  %v20960_v35 = vrot.slane %v17612_v63, 2  ;;  %v6346_v34 = vshll.u32 %v17731_v26, 16 }
 0x450   :  { %v5076_v59 = vsel %vm1058_vm4, %v21486_v27, %v21485_v43  ;;  %v6078_v37 = vsel %vm1894_vm10, %v6006_v22, %v5466_v50  ;;  %v5741_v25 = vpop.permute.xlu0 %5740  ;;  %v4659_v4 = vpop.f32.mrb[96].mxu1  ;;  %v4888_v5 = vor.u32 %v20958_v21, %v17648_v20  ;;  %v21489_v7 = vshll.u32 %v17210_v28, 16 }
 0x451   :  { %21487 = vst [vmem:[#allocation9_spill] sm:$0xff] %v17770_v0  ;;  %v17774_v55 = vrot.slane %v21488_v3, 1  ;;  %5125 = vrot.lane.b32.xlu1 %v5076_v59, %s12999_s2  ;;  %v6402_v40 = vshll.u32 %v17744_v46, 16  ;;  %v6133_v43 = vsel %vm1947_vm11, %v6078_v37, %v5741_v25  ;;  %v12461_v27 = vadd.f32 %v17376_v31, %v4659_v4  ;;  %v12290_v3 = vpop.f32.mrb[97].mxu1  ;;  %v21494_v4 = vld [vmem:[#allocation32_spill] sm:$0xff] }
 0x452   :  { %v5312_v19 = vor.u32 %v17741_v1, %v21489_v7  ;;  %v21490_v50 = vrot.slane %v17544_v33, 2  ;;  %v6370_v20 = vshll.u32 %v17757_v18, 16  ;;  %v5821_v22 = vsel %vm1841_vm9, %v16962_v47, %v4979_v30  ;;  %v21492_v7 = vld [vmem:[#allocation55_spill] sm:$0xff]  ;;  %5485 = vrot.lane.b32.xlu0 %v17371_v23, %s12999_s2  ;;  %v4662_v37 = vpop.f32.mrb[98].mxu1  ;;  %v21495_v3 = vld [vmem:[#allocation76_spill] sm:$0xff] }
 0x453   :  { %v17800_v21 = vmul.bf16 %v6133_v43, %v21492_v7  ;;  %v5235_v28 = vpop.permute.xlu1 %5234  ;;  %v12462_v47 = vadd.f32 %v17376_v31, %v4662_v37  ;;  %v12291_v30 = vpop.f32.mrb[99].mxu1  ;;  %v4893_v43 = vsel %vm773_vm5, %v4888_v5, %v17774_v55  ;;  %v6398_v7 = vshrl.u32 %v17629_v51, 16 }
 0x454   :  { %v17794_v59 = vsel %vm1426_vm7, %v21490_v50, %v20960_v35  ;;  %v17806_v25 = vsel %vm1292_vm6, %v17302_v56, %v5312_v19  ;;  %v17810_v50 = vmul.bf16 %v21495_v3, %v21494_v4  ;;  %v17812_v35 = vmax.f32 %v12461_v27, 0.0  ;;  %v17820_v56 = vpop.permute.xlu0 %5370  ;;  %v21497_v3 = vld [vmem:[#allocation122_spill] sm:$0xff]  ;;  %v21503_v19 = vld [vmem:[#allocation121_spill] sm:$0xff] }
 0x455   :  { %21491 = vst [vmem:[#allocation68_spill] sm:$0xff] %v17794_v59  ;;  %21493 = vst [vmem:[#allocation24_spill] sm:$0xff] %v17806_v25  ;;  %v6406_v23 = vshrl.u32 %v17689_v8, 16  ;;  %v6410_v13 = vshll.u32 %v17800_v21, 16  ;;  %4998 = vrot.lane.b32.xlu1 %v4893_v43, %s12998_s22  ;;  %v17824_v27 = vrot.slane %v6402_v40, 1  ;;  %v5873_v5 = vsel %vm1894_vm10, %v5821_v22, %v17714_v62 }
 0x456   :  { %21496 = vst [vmem:[#allocation69_spill] sm:$0xff] %v17812_v35  ;;  %v17827_v31 = vpack.c.bf16 %v17812_v35, %v4713_v39  ;;  %v17831_v37 = vmax.f32 %v12462_v47, 0.0  ;;  %v5930_v8 = vsel %vm1947_vm11, %v5873_v5, %v5235_v28  ;;  %5760 = vrot.lane.b32.xlu0 %v21497_v3, %s13000_s25  ;;  %v5687_v40 = vshrl.u32 %v17612_v63, 16  ;;  %v21501_v3 = vld [vmem:[#allocation95_spill] sm:$0xff] }
 0x457   :  { %v17833_v51 = vrot.slane %v6410_v13, 1  ;;  %v5108_v4 = vpop.permute.xlu1 %5107  ;;  %v6408_v30 = vor.u32 %v6406_v23, %v17711_v45  ;;  %v6400_v43 = vor.u32 %v6398_v7, %v17702_v52  ;;  %v17847_v22 = vrot.slane %v6346_v34, 1  ;;  %v21499_v45 = vld [vmem:[#allocation120_spill] sm:$0xff]  ;;  %v21500_v7 = vld [vmem:[#allocation33_spill] sm:$0xff] }
 0x458   :  { %v17844_v62 = vpack.c.bf16 %v17831_v37, %v17812_v35  ;;  %v17849_v28 = vrot.slane %v6370_v20, 1  ;;  %v5468_v5 = vpop.permute.xlu0 %5467  ;;  %v6394_v52 = vshll.u32 %v17810_v50, 16  ;;  %v17859_v39 = vmul.bf16 %v21501_v3, %v21500_v7  ;;  %v21502_v13 = vld [vmem:[#allocation20_spill] sm:$0xff] }
 0x459   :  { %5254 = vrot.lane.b32.xlu1 %v21499_v45, %s13000_s25  ;;  %v6413_v23 = vsel %vm773_vm5, %v6408_v30, %v17833_v51  ;;  %v17862_v34 = vmul.bf16 %v5930_v8, %v21502_v13  ;;  %v6405_v20 = vsel %vm773_vm5, %v6400_v43, %v17824_v27  ;;  %v21504_v30 = vrot.slane %v17358_v12, 1  ;;  %v21506_v13 = vld [vmem:[#allocation94_spill] sm:$0xff] }
 0x45a   :  { %21498 = vst [vmem:[#allocation25_spill] sm:$0xff] %v17844_v62  ;;  %6687 = vmatprep.subr.bf16.mxu0 %v6413_v23  ;;  %5390 = vrot.lane.b32.xlu0 %v21503_v19, %s12998_s22  ;;  %v21505_v45 = vrot.slane %v17316_v16, 1  ;;  %v20966_v7 = vshrl.u32 %v17316_v16, 16  ;;  %v5689_v3 = vrot.slane %v5687_v40, 2  ;;  %v5690_v8 = vshll.u32 %v17612_v63, 16  ;;  %v21516_v62 = vld [vmem:[#allocation97_spill] sm:$0xff] }
 0x45b   :  { %6688 = vmatpush1.bf16.msra.mxu0 %v6405_v20  ;;  %v4981_v47 = vpop.permute.xlu1 %4980  ;;  %v6009_v43 = vsel %vm1841_vm9, %v21506_v13, %v17609_v54  ;;  %v21507_v23 = vshll.u32 %v17358_v12, 16  ;;  %v20969_v1 = vrot.slane %v17612_v63, 3  ;;  %v6426_v13 = vshll.u32 %v17862_v34, 16 }
 0x45c   :  { %v5078_v9 = vsel %vm1058_vm4, %v21505_v45, %v21504_v30  ;;  %v6080_v45 = vsel %vm1894_vm10, %v6009_v43, %v5468_v5  ;;  %v5743_v30 = vpop.permute.xlu0 %5742  ;;  %v4896_v40 = vor.u32 %v20966_v7, %v17774_v55  ;;  %v5692_v54 = vrot.slane %v5690_v8, 3  ;;  %v21513_v8 = vld [vmem:[#allocation73_spill] sm:$0xff] }
 0x45d   :  { %v17880_v20 = vrot.slane %v21507_v23, 1  ;;  %5127 = vrot.lane.b32.xlu1 %v5078_v9, %s12999_s2  ;;  %v6136_v23 = vsel %vm1947_vm11, %v6080_v45, %v5743_v30  ;;  %v21508_v35 = vrot.slane %v17544_v33, 3  ;;  %v21510_v5 = vrot.slane %v17681_v42, 2  ;;  %v21514_v45 = vld [vmem:[#allocation19_spill] sm:$0xff] }
 0x45e   :  { %v21511_v9 = vrot.slane %v17612_v63, 2  ;;  %v17906_v55 = vrot.slane %v6394_v52, 1  ;;  %v5823_v7 = vsel %vm1841_vm9, %v21513_v8, %v4981_v47  ;;  %v17911_v30 = vmul.bf16 %v6136_v23, %v21514_v45  ;;  %5487 = vrot.lane.b32.xlu0 %v17412_v17, %s12999_s2  ;;  %v21517_v47 = vld [vmem:[#allocation35_spill] sm:$0xff] }
 0x45f   :  { %v17897_v25 = vsel %vm330_vm1, %v21508_v35, %v20969_v1  ;;  %v5237_v16 = vpop.permute.xlu1 %5236  ;;  %v5693_v33 = vor.u32 %v5692_v54, %v5689_v3  ;;  %v6418_v35 = vshll.u32 %v17859_v39, 16  ;;  %v21515_v1 = vld [vmem:[#allocation34_spill] sm:$0xff]  ;;  %v4901_v52 = vsel %vm773_vm5, %v4896_v40, %v17880_v20 }
 0x460   :  { %21509 = vst [vmem:[#allocation55_spill] sm:$0xff] %v17897_v25  ;;  %v17904_v43 = vsel %vm1426_vm7, %v21511_v9, %v21510_v5  ;;  %v17918_v0 = vmul.bf16 %v21516_v62, %v21515_v1  ;;  %v5696_v5 = vshrl.u32 %v17681_v42, 16  ;;  %v21518_v9 = vld [vmem:[#allocation100_spill] sm:$0xff]  ;;  %v6430_v8 = vshrl.u32 %v17800_v21, 16  ;;  %v17929_v3 = vpop.permute.xlu0 %5372 }
 0x461   :  { %21512 = vst [vmem:[#allocation32_spill] sm:$0xff] %v17904_v43  ;;  %v17925_v23 = vmul.bf16 %v21518_v9, %v21517_v47  ;;  %v6434_v17 = vshll.u32 %v17911_v30, 16  ;;  %5000 = vrot.lane.b32.xlu1 %v4901_v52, %s12998_s22  ;;  %v17934_v1 = vsel %vm1530_vm8, %v17720_v2, %v5693_v33  ;;  %v6422_v40 = vshrl.u32 %v17744_v46, 16 }
 0x462   :  { %21519 = vst [vmem:[#allocation76_spill] sm:$0xff] %v17934_v1  ;;  %v17938_v54 = vrot.slane %v6426_v13, 1  ;;  %v5875_v45 = vsel %vm1894_vm10, %v5823_v7, %v5108_v4  ;;  %5762 = vrot.lane.b32.xlu0 %v17478_v10, %s13000_s25  ;;  %v6432_v52 = vor.u32 %v6430_v8, %v17833_v51  ;;  %v20974_v2 = vrot.slane %v21503_v19, 1  ;;  %v21520_v51 = vld [vmem:[#allocation22_spill] sm:$0xff] }
 0x463   :  { %v6436_v47 = vrot.slane %v6434_v17, 1  ;;  %v5933_v21 = vsel %vm1947_vm11, %v5875_v45, %v5237_v16  ;;  %v5110_v9 = vpop.permute.xlu1 %5109  ;;  %v6424_v43 = vor.u32 %v6422_v40, %v17824_v27  ;;  %v5698_v46 = vrot.slane %v5696_v5, 2  ;;  %v21521_v17 = vld [vmem:[#allocation36_spill] sm:$0xff]  ;;  %v21522_v40 = vld [vmem:[#allocation103_spill] sm:$0xff] }
 0x464   :  { %v5699_v13 = vshll.u32 %v17681_v42, 16  ;;  %v17949_v25 = vrot.slane %v6418_v35, 1  ;;  %v6442_v4 = vshll.u32 %v17918_v0, 16  ;;  %v6466_v16 = vshll.u32 %v17925_v23, 16  ;;  %v5470_v7 = vpop.permute.xlu0 %5469 }
 0x465   :  { %5256 = vrot.lane.b32.xlu1 %v17444_v14, %s13000_s25  ;;  %v6437_v10 = vsel %vm773_vm5, %v6432_v52, %v6436_v47  ;;  %v17957_v8 = vmul.bf16 %v5933_v21, %v21520_v51  ;;  %v6429_v27 = vsel %vm773_vm5, %v6424_v43, %v17938_v54  ;;  %v5216_v35 = vrot.slane %v17681_v42, 3 }
 0x466   :  { %6689 = vmatprep.subr.bf16.mxu0 %v6437_v10  ;;  %v5701_v5 = vrot.slane %v5699_v13, 3  ;;  %v17964_v45 = vmul.bf16 %v21522_v40, %v21521_v17  ;;  %5392 = vrot.lane.b32.xlu0 %v17449_v57, %s12998_s22  ;;  %v21523_v21 = vrot.slane %v17358_v12, 1  ;;  %v5450_v13 = vrot.slane %v17746_v60, 2  ;;  %v21524_v10 = vld [vmem:[#allocation98_spill] sm:$0xff] }
 0x467   :  { %6690 = vmatpush1.bf16.msra.mxu0 %v6429_v27  ;;  %v4983_v62 = vpop.permute.xlu1 %4982  ;;  %v6012_v51 = vsel %vm1841_vm9, %v21524_v10, %v17705_v44  ;;  %v21525_v27 = vshll.u32 %v21503_v19, 16  ;;  %v21526_v14 = vrot.slane %v17612_v63, 3  ;;  %v21527_v44 = vrot.slane %v17681_v42, 2  ;;  %v21530_v42 = vld [vmem:[#allocation6_spill] sm:$0xff] }
 0x468   :  { %v5080_v52 = vsel %vm1058_vm4, %v21523_v21, %v20974_v2  ;;  %v17982_v40 = vor.u32 %v5701_v5, %v5698_v46  ;;  %v17989_v21 = vrot.slane %v6442_v4, 1  ;;  %v6082_v43 = vsel %vm1894_vm10, %v6012_v51, %v5470_v7  ;;  %v5745_v59 = vpop.permute.xlu0 %5744 }
 0x469   :  { %v17980_v17 = vrot.slane %v21525_v27, 1  ;;  %v17987_v1 = vsel %vm330_vm1, %v21526_v14, %v5216_v35  ;;  %5129 = vrot.lane.b32.xlu1 %v5080_v52, %s12999_s2  ;;  %v17997_v10 = vsel %vm1426_vm7, %v21527_v44, %v5450_v13  ;;  %v6450_v46 = vshll.u32 %v17957_v8, 16  ;;  %v21531_v27 = vld [vmem:[#allocation30_spill] sm:$0xff] }
 0x46a   :  { %21528 = vst [vmem:[#allocation122_spill] sm:$0xff] %v17997_v10  ;;  %v6139_v63 = vsel %vm1947_vm11, %v6082_v43, %v5745_v59  ;;  %v21529_v14 = vshrl.u32 %v17358_v12, 16  ;;  %v18006_v5 = vsel %vm1530_vm8, %v5693_v33, %v17982_v40  ;;  %v18008_v7 = vrot.slane %v6466_v16, 1  ;;  %5489 = vrot.lane.b32.xlu0 %v17483_v38, %s12999_s2 }
 0x46b   :  { %v5825_v51 = vsel %vm1841_vm9, %v21530_v42, %v4983_v62  ;;  %v18014_v44 = vmul.bf16 %v6139_v63, %v21531_v27  ;;  %v5239_v2 = vpop.permute.xlu1 %5238  ;;  %v6490_v59 = vshll.u32 %v17964_v45, 16  ;;  %v5705_v16 = vshrl.u32 %v17746_v60, 16  ;;  %v21533_v62 = vld [vmem:[#allocation105_spill] sm:$0xff] }
 0x46c   :  { %v4904_v4 = vor.u32 %v21529_v14, %v17880_v20  ;;  %v6454_v20 = vshrl.u32 %v17911_v30, 16  ;;  %v21532_v14 = vld [vmem:[#allocation37_spill] sm:$0xff]  ;;  %v18029_v27 = vpop.permute.xlu0 %5374  ;;  %v6446_v30 = vshrl.u32 %v17862_v34, 16  ;;  %v18034_v52 = vrot.slane %v6450_v46, 1 }
 0x46d   :  { %v18026_v42 = vmul.bf16 %v21533_v62, %v21532_v14  ;;  %v6458_v63 = vshll.u32 %v18014_v44, 16  ;;  %v5707_v10 = vrot.slane %v5705_v16, 2  ;;  %v5218_v46 = vrot.slane %v17746_v60, 3  ;;  %v21536_v16 = vld [vmem:[#allocation50_spill] sm:$0xff] }
 0x46e   :  { %v4909_v33 = vsel %vm773_vm5, %v4904_v4, %v17980_v17  ;;  %v5877_v4 = vsel %vm1894_vm10, %v5825_v51, %v5110_v9  ;;  %v6456_v12 = vor.u32 %v6454_v20, %v6436_v47  ;;  %5764 = vrot.lane.b32.xlu0 %v17551_v48, %s13000_s25  ;;  %v6448_v38 = vor.u32 %v6446_v30, %v17938_v54 }
 0x46f   :  { %5002 = vrot.lane.b32.xlu1 %v4909_v33, %s12998_s22  ;;  %v18037_v43 = vrot.slane %v6458_v63, 1  ;;  %v5936_v14 = vsel %vm1947_vm11, %v5877_v4, %v5239_v2  ;;  %v5112_v62 = vpop.permute.xlu1 %5111  ;;  %v5708_v33 = vshll.u32 %v17746_v60, 16  ;;  %v5452_v9 = vrot.slane %v17827_v31, 2 }
 0x470   :  { %v18047_v47 = vrot.slane %v6490_v59, 1  ;;  %v21534_v51 = vmov 0.0   ;;  %v5472_v20 = vpop.permute.xlu0 %5471  ;;  %v18058_v63 = vmul.bf16 %v5936_v14, %v21536_v16  ;;  %v6453_v60 = vsel %vm773_vm5, %v6448_v38, %v18034_v52  ;;  %v21540_v38 = vld [vmem:[#allocation38_spill] sm:$0xff]  ;;  %v21541_v16 = vld [vmem:[#allocation108_spill] sm:$0xff] }
 0x471   :  { %v18051_v2 = vpack.c.bf16 %v21534_v51, %v17831_v37  ;;  %v6461_v48 = vsel %vm773_vm5, %v6456_v12, %v18037_v43  ;;  %v5710_v54 = vrot.slane %v5708_v33, 3  ;;  %v18063_v59 = vsel %vm330_vm1, %v5216_v35, %v5218_v46  ;;  %v21539_v33 = vld [vmem:[#allocation44_spill] sm:$0xff] }
 0x472   :  { %6691 = vmatprep.subr.bf16.mxu0 %v6461_v48  ;;  %21537 = vst [vmem:[#allocation95_spill] sm:$0xff] %v18063_v59  ;;  %v18066_v30 = vsel %vm1426_vm7, %v5450_v13, %v5452_v9  ;;  %v6514_v4 = vshll.u32 %v18026_v42, 16  ;;  %5394 = vrot.lane.b32.xlu0 %v21539_v33, %s12998_s22  ;;  %v20979_v14 = vshrl.u32 %v21503_v19, 16  ;;  %v18077_v35 = vmul.bf16 %v21541_v16, %v21540_v38  ;;  %v21542_v13 = vld [vmem:[#allocation102_spill] sm:$0xff] }
 0x473   :  { %21535 = vst [vmem:[#allocation33_spill] sm:$0xff] %v18051_v2  ;;  %5258 = vrot.lane.b32.xlu1 %v17526_v6, %s13000_s25  ;;  %21538 = vst [vmem:[#allocation20_spill] sm:$0xff] %v18066_v30  ;;  %6692 = vmatpush1.bf16.msra.mxu0 %v6453_v60  ;;  %v4985_v12 = vpop.permute.xlu1 %4984  ;;  %v18073_v48 = vor.u32 %v5710_v54, %v5707_v10  ;;  %v6015_v51 = vsel %vm1841_vm9, %v21542_v13, %v17820_v56  ;;  %v21543_v6 = vrot.slane %v17449_v57, 1  ;;  %v21546_v13 = vld [vmem:[#allocation96_spill] sm:$0xff] }
 0x474   :  { %v21544_v60 = vrot.slane %v21503_v19, 1  ;;  %v21545_v30 = vshll.u32 %v17449_v57, 16  ;;  %v6084_v10 = vsel %vm1894_vm10, %v6015_v51, %v5472_v20  ;;  %v5747_v54 = vpop.permute.xlu0 %5746  ;;  %v4912_v38 = vor.u32 %v20979_v14, %v17980_v17 }
 0x475   :  { %v18097_v56 = vsel %vm1530_vm8, %v17982_v40, %v18073_v48  ;;  %v20980_v16 = vrot.slane %v18051_v2, 2  ;;  %v5827_v51 = vsel %vm1841_vm9, %v21546_v13, %v4985_v12  ;;  %v18105_v20 = vrot.slane %v6514_v4, 1  ;;  %v21550_v4 = vld [vmem:[#allocation111_spill] sm:$0xff] }
 0x476   :  { %v5082_v34 = vsel %vm1058_vm4, %v21544_v60, %v21543_v6  ;;  %v4916_v59 = vrot.slane %v21545_v30, 1  ;;  %v6474_v30 = vshll.u32 %v18058_v63, 16  ;;  %v21547_v60 = vld [vmem:[#allocation27_spill] sm:$0xff]  ;;  %5491 = vrot.lane.b32.xlu0 %v17590_v24, %s12999_s2  ;;  %v18118_v6 = vrot.slane %v17827_v31, 3 }
 0x477   :  { %5131 = vrot.lane.b32.xlu1 %v5082_v34, %s12999_s2  ;;  %v6142_v34 = vsel %vm1947_vm11, %v6084_v10, %v5747_v54  ;;  %v5241_v14 = vpop.permute.xlu1 %5240  ;;  %v18115_v40 = vsel %vm1426_vm7, %v5452_v9, %v20980_v16  ;;  %v6538_v12 = vshll.u32 %v18077_v35, 16  ;;  %v21549_v10 = vld [vmem:[#allocation39_spill] sm:$0xff]  ;;  %v6470_v24 = vshrl.u32 %v17957_v8, 16 }
 0x478   :  { %v18108_v17 = vmul.bf16 %v6142_v34, %v21547_v60  ;;  %21548 = vst [vmem:[#allocation94_spill] sm:$0xff] %v18115_v40  ;;  %v18123_v54 = vmul.bf16 %v21550_v4, %v21549_v10  ;;  %v4917_v13 = vsel %vm773_vm5, %v4912_v38, %v4916_v59  ;;  %v6478_v60 = vshrl.u32 %v18014_v44, 16  ;;  %v18131_v19 = vpop.permute.xlu0 %5376  ;;  %v21554_v4 = vld [vmem:[#allocation43_spill] sm:$0xff] }
 0x479   :  { %v5879_v16 = vsel %vm1894_vm10, %v5827_v51, %v5112_v62  ;;  %v18134_v40 = vrot.slane %v6474_v30, 1  ;;  %v18139_v38 = vsel %vm330_vm1, %v5218_v46, %v18118_v6  ;;  %v21552_v8 = vrot.slane %v18051_v2, 3 }
 0x47a   :  { %v6482_v9 = vshll.u32 %v18108_v17, 16  ;;  %v5939_v10 = vsel %vm1947_vm11, %v5879_v16, %v5241_v14  ;;  %21551 = vst [vmem:[#allocation73_spill] sm:$0xff] %v18139_v38  ;;  %v18149_v62 = vmul.bf16 %v17263_v29, %v21554_v4  ;;  %5766 = vrot.lane.b32.xlu0 %v17653_v41, %s13000_s25  ;;  %v6480_v14 = vor.u32 %v6478_v60, %v18037_v43  ;;  %v21556_v4 = vld [vmem:[#allocation70_spill] sm:$0xff] }
 0x47b   :  { %5004 = vrot.lane.b32.xlu1 %v4917_v13, %s12998_s22  ;;  %v18145_v44 = vsel %vm330_vm1, %v18118_v6, %v21552_v8  ;;  %v5114_v30 = vpop.permute.xlu1 %5113  ;;  %v4766_v16 = vpack.c.bf16 %v17831_v37, %v17831_v37  ;;  %v6472_v13 = vor.u32 %v6470_v24, %v18034_v52  ;;  %v5714_v8 = vshrl.u32 %v17827_v31, 16 }
 0x47c   :  { %21553 = vst [vmem:[#allocation19_spill] sm:$0xff] %v18145_v44  ;;  %21555 = vst [vmem:[#allocation34_spill] sm:$0xff] %v18149_v62  ;;  %v18151_v51 = vrot.slane %v6482_v9, 1  ;;  %v5717_v29 = vshll.u32 %v17827_v31, 16  ;;  %v18163_v9 = vmul.bf16 %v5939_v10, %v21556_v4  ;;  %v5474_v34 = vpop.permute.xlu0 %5473  ;;  %v21557_v37 = vshll.u32 %v21539_v33, 16 }
 0x47d   :  { %v6477_v31 = vsel %vm773_vm5, %v6472_v13, %v18134_v40  ;;  %v5716_v24 = vrot.slane %v5714_v8, 2  ;;  %v18180_v4 = vld [vmem:[%s20699_s8 + $0x4] ss:$8 sps:$4 sm:$0xff]   ;;  %v21558_v13 = vshrl.u32 %v17449_v57, 16  ;;  %v21561_v46 = vrot.slane %v17449_v57, 1 }
 0x47e   :  { %v6485_v41 = vsel %vm773_vm5, %v6480_v14, %v18151_v51  ;;  %v18172_v60 = vrot.slane %v21557_v37, 1  ;;  %v5719_v10 = vrot.slane %v5717_v29, 3  ;;  %v18182_v14 = vrot.slane %v6538_v12, 1  ;;  %5396 = vrot.lane.b32.xlu0 %v17567_v11, %s12998_s22  ;;  %11396 = vmatprep.mubr.msk.bf16.mxu0 %vm6659_vm12, %v18180_v4 }
 0x47f   :  { %5260 = vrot.lane.b32.xlu1 %v17640_v58, %s13000_s25  ;;  %6693 = vmatprep.subr.bf16.mxu0 %v6485_v41  ;;  %v6586_v37 = vshll.u32 %v18149_v62, 16  ;;  %v4987_v43 = vpop.permute.xlu1 %4986  ;;  %v4920_v8 = vor.u32 %v21558_v13, %v4916_v59  ;;  %v18190_v29 = vrot.slane %v4766_v16, 3  ;;  %v21559_v41 = vld [vmem:[#allocation106_spill] sm:$0xff]  ;;  %v21560_v12 = vrot.slane %v21539_v33, 1  ;;  %v21562_v16 = vld [vmem:[#allocation99_spill] sm:$0xff] }
 0x480   :  { %6694 = vmatpush1.bf16.msra.mxu0 %v6477_v31  ;;  %v6018_v52 = vsel %vm1841_vm9, %v21559_v41, %v17929_v3  ;;  %v5720_v31 = vor.u32 %v5719_v10, %v5716_v24  ;;  %v6498_v62 = vshll.u32 %v18163_v9, 16  ;;  %v5749_v38 = vpop.permute.xlu0 %5748  ;;  %v5829_v3 = vsel %vm1841_vm9, %v21562_v16, %v4987_v43 }
 0x481   :  { %v5084_v44 = vsel %vm1058_vm4, %v21561_v46, %v21560_v12  ;;  %v6086_v58 = vsel %vm1894_vm10, %v6018_v52, %v5474_v34  ;;  %v4925_v59 = vsel %vm773_vm5, %v4920_v8, %v18172_v60  ;;  %v21563_v34 = vshrl.u32 %v17555_v15, 16  ;;  %v21564_v52 = vld [vmem:[#allocation29_spill] sm:$0xff] }
 0x482   :  { %v6145_v13 = vsel %vm1947_vm11, %v6086_v58, %v5749_v38  ;;  %v18210_v46 = vsel %vm1530_vm8, %v18073_v48, %v5720_v31  ;;  %5493 = vrot.lane.b32.xlu0 %v17679_v36, %s12999_s2  ;;  %v4930_v58 = vshll.u32 %v17567_v11, 16  ;;  %v5723_v38 = vshrl.u32 %v18051_v2, 16 }
 0x483   :  { %5133 = vrot.lane.b32.xlu1 %v5084_v44, %s12999_s2  ;;  %v6344_v44 = vor.u32 %v17753_v49, %v21563_v34  ;;  %v18218_v24 = vmul.bf16 %v6145_v13, %v21564_v52  ;;  %v5243_v10 = vpop.permute.xlu1 %5242  ;;  %v5726_v48 = vshll.u32 %v18051_v2, 16  ;;  %v6494_v43 = vshrl.u32 %v18058_v63, 16 }
 0x484   :  { %v18233_v49 = vsel %vm330_vm1, %v18118_v6, %v18190_v29  ;;  %v21565_v36 = vshrl.u32 %v17731_v26, 16  ;;  %v6502_v41 = vshrl.u32 %v18108_v17, 16  ;;  %v18239_v12 = vrot.slane %v6498_v62, 1  ;;  %v18243_v13 = vpop.permute.xlu0 %5378 }
 0x485   :  { %v18228_v15 = vsel %vm773_vm5, %v6344_v44, %v17847_v22  ;;  %v6506_v16 = vshll.u32 %v18218_v24, 16  ;;  %v5881_v63 = vsel %vm1894_vm10, %v5829_v3, %v5114_v30  ;;  %v5725_v6 = vrot.slane %v5723_v38, 2 }
 0x486   :  { %v6368_v8 = vor.u32 %v21565_v36, %v17847_v22  ;;  %v5942_v34 = vsel %vm1947_vm11, %v5881_v63, %v5243_v10  ;;  %v5728_v44 = vrot.slane %v5726_v48, 3  ;;  %5768 = vrot.lane.b32.xlu0 %v17751_v61, %s13000_s25  ;;  %v6504_v62 = vor.u32 %v6502_v41, %v18151_v51  ;;  %v21567_v36 = vld [vmem:[#allocation67_spill] sm:$0xff] }
 0x487   :  { %5006 = vrot.lane.b32.xlu1 %v4925_v59, %s12998_s22  ;;  %v18251_v22 = vrot.slane %v6506_v16, 1  ;;  %v5116_v17 = vpop.permute.xlu1 %5115  ;;  %v5085_v30 = vrot.slane %v17567_v11, 1  ;;  %v21566_v59 = vshrl.u32 %v17757_v18, 16  ;;  %v6496_v52 = vor.u32 %v6494_v43, %v18134_v40 }
 0x488   :  { %v18249_v26 = vsel %vm773_vm5, %v6368_v8, %v17849_v28  ;;  %v4926_v10 = vshrl.u32 %v21539_v33, 16  ;;  %v18264_v38 = vrot.slane %v4930_v58, 1  ;;  %v18266_v48 = vor.u32 %v5728_v44, %v5725_v6  ;;  %v5476_v51 = vpop.permute.xlu0 %5475 }
 0x489   :  { %v6392_v3 = vor.u32 %v21566_v59, %v17849_v28  ;;  %v18269_v61 = vmul.bf16 %v5942_v34, %v21567_v36  ;;  %v6509_v18 = vsel %vm773_vm5, %v6504_v62, %v18251_v22  ;;  %v21568_v40 = vshrl.u32 %v17810_v50, 16 }
 0x48a   :  { %v6582_v8 = vshrl.u32 %v18123_v54, 16  ;;  %6695 = vmatprep.subr.bf16.mxu0 %v6509_v18  ;;  %v6501_v41 = vsel %vm773_vm5, %v6496_v52, %v18239_v12  ;;  %v4928_v16 = vor.u32 %v4926_v10, %v18172_v60  ;;  %v18290_v63 = vsel %vm1530_vm8, %v5720_v31, %v18266_v48  ;;  %5398 = vrot.lane.b32.xlu0 %v17623_v53, %s12998_s22 }
 0x48b   :  { %5262 = vrot.lane.b32.xlu1 %v17727_v32, %s13000_s25  ;;  %v18277_v28 = vsel %vm773_vm5, %v6392_v3, %v17906_v55  ;;  %v6416_v43 = vor.u32 %v21568_v40, %v17906_v55  ;;  %v21569_v34 = vshll.u32 %v18123_v54, 16  ;;  %v18294_v44 = vrot.slane %v6586_v37, 1  ;;  %6696 = vmatpush1.bf16.msra.mxu0 %v6501_v41  ;;  %v4989_v50 = vpop.permute.xlu1 %4988  ;;  %v21571_v54 = vld [vmem:[#allocation110_spill] sm:$0xff] }
 0x48c   :  { %v21570_v55 = vrot.slane %v21539_v33, 1  ;;  %v6021_v37 = vsel %vm1841_vm9, %v21571_v54, %v18029_v27  ;;  %v4933_v62 = vsel %vm773_vm5, %v4928_v16, %v18264_v38  ;;  %v21572_v59 = vshrl.u32 %v17859_v39, 16  ;;  %v21578_v54 = vld [vmem:[#allocation15_spill] sm:$0xff] }
 0x48d   :  { %v6564_v6 = vrot.slane %v21569_v34, 1  ;;  %v18305_v31 = vsel %vm773_vm5, %v6416_v43, %v17949_v25  ;;  %v21573_v52 = vshrl.u32 %v17918_v0, 16  ;;  %v6522_v18 = vshll.u32 %v18269_v61, 16  ;;  %v5751_v43 = vpop.permute.xlu0 %5750 }
 0x48e   :  { %v5086_v60 = vsel %vm1058_vm4, %v21570_v55, %v5085_v30  ;;  %v6440_v3 = vor.u32 %v21572_v59, %v17949_v25  ;;  %v6088_v40 = vsel %vm1894_vm10, %v6021_v37, %v5476_v51  ;;  %v21574_v27 = vshrl.u32 %v17925_v23, 16  ;;  %v21577_v23 = vld [vmem:[#allocation101_spill] sm:$0xff]  ;;  %v21579_v59 = vld [vmem:[#allocation68_spill] sm:$0xff] }
 0x48f   :  { %v6464_v36 = vor.u32 %v21573_v52, %v17989_v21  ;;  %5135 = vrot.lane.b32.xlu1 %v5086_v60, %s12999_s2  ;;  %v21575_v16 = vshrl.u32 %v17964_v45, 16  ;;  %v6148_v25 = vsel %vm1947_vm11, %v6088_v40, %v5751_v43  ;;  %v21576_v34 = vshrl.u32 %v18026_v42, 16  ;;  %v5245_v37 = vpop.permute.xlu1 %5244  ;;  %5495 = vrot.lane.b32.xlu0 %v21579_v59, %s12999_s2 }
 0x490   :  { %v6488_v41 = vor.u32 %v21574_v27, %v18008_v7  ;;  %v18330_v0 = vsel %vm773_vm5, %v6440_v3, %v17989_v21  ;;  %v5831_v60 = vsel %vm1841_vm9, %v21577_v23, %v4989_v50  ;;  %v18342_v45 = vmul.bf16 %v6148_v25, %v21578_v54  ;;  %v21585_v23 = vld [vmem:[#allocation55_spill] sm:$0xff] }
 0x491   :  { %v6512_v39 = vor.u32 %v21575_v16, %v18047_v47  ;;  %v18334_v51 = vsel %vm773_vm5, %v6464_v36, %v18008_v7  ;;  %v6536_v55 = vor.u32 %v21576_v34, %v18105_v20  ;;  %v20988_v42 = vrot.slane %v17623_v53, 1  ;;  %v18365_v43 = vpop.permute.xlu0 %5380  ;;  %v21582_v34 = vld [vmem:[#allocation76_spill] sm:$0xff] }
 0x492   :  { %v18348_v21 = vsel %vm773_vm5, %v6488_v41, %v18047_v47  ;;  %v4934_v3 = vshrl.u32 %v17567_v11, 16  ;;  %v21580_v52 = vshrl.u32 %v18077_v35, 16  ;;  %v6526_v40 = vshrl.u32 %v18218_v24, 16 }
 0x493   :  { %v18352_v7 = vsel %vm773_vm5, %v6512_v39, %v18105_v20  ;;  %v18358_v50 = vsel %vm773_vm5, %v6536_v55, %v18182_v14  ;;  %v6530_v47 = vshll.u32 %v18342_v45, 16  ;;  %5008 = vrot.lane.b32.xlu1 %v4933_v62, %s12998_s22  ;;  %v20986_v20 = vshrl.u32 %v17623_v53, 16  ;;  %v5118_v25 = vpop.permute.xlu1 %5117  ;;  %5770 = vrot.lane.b32.xlu0 %v21582_v34, %s13000_s25 }
 0x494   :  { %v6560_v36 = vor.u32 %v21580_v52, %v18182_v14  ;;  %v6584_v27 = vor.u32 %v6582_v8, %v6564_v6  ;;  %v6518_v41 = vshrl.u32 %v18163_v9, 16  ;;  %v18370_v16 = vrot.slane %v6522_v18, 1  ;;  %v21584_v18 = vld [vmem:[#allocation23_spill] sm:$0xff] }
 0x495   :  { %v5883_v39 = vsel %vm1894_vm10, %v5831_v60, %v5116_v17  ;;  %v6532_v14 = vrot.slane %v6530_v47, 1  ;;  %v6528_v62 = vor.u32 %v6526_v40, %v18251_v22  ;;  %v4938_v17 = vshll.u32 %v17623_v53, 16  ;;  %v5478_v55 = vpop.permute.xlu0 %5477 }
 0x496   :  { %v18374_v35 = vsel %vm773_vm5, %v6560_v36, %v6564_v6  ;;  %v5945_v24 = vsel %vm1947_vm11, %v5883_v39, %v5245_v37  ;;  %v18382_v8 = vsel %vm773_vm5, %v6584_v27, %v18294_v44  ;;  %v6520_v9 = vor.u32 %v6518_v41, %v18239_v12  ;;  %v21586_v37 = vld [vmem:[#allocation12_spill] sm:$0xff]  ;;  %v21587_v36 = vld [vmem:[#allocation9_spill] sm:$0xff] }
 0x497   :  { %21581 = vst [vmem:[#allocation97_spill] sm:$0xff] %v18374_v35  ;;  %21583 = vst [vmem:[#allocation35_spill] sm:$0xff] %v18382_v8  ;;  %v20987_v6 = vshrl.u32 %v21584_v18, 16  ;;  %5264 = vrot.lane.b32.xlu1 %v21585_v23, %s13000_s25  ;;  %v6533_v60 = vsel %vm773_vm5, %v6528_v62, %v6532_v14  ;;  %v5335_v54 = vrot.slane %v4934_v3, 7  ;;  %v18391_v59 = vmul.bf16 %v5945_v24, %v21586_v37  ;;  %v4991_v52 = vpop.permute.xlu1 %4990  ;;  %v21588_v39 = vld [vmem:[#allocation113_spill] sm:$0xff] }
 0x498   :  { %6697 = vmatprep.subr.bf16.mxu0 %v6533_v60  ;;  %v6525_v22 = vsel %vm773_vm5, %v6520_v9, %v18370_v16  ;;  %v5088_v12 = vsel %vm1058_vm4, %v5085_v30, %v20988_v42  ;;  %5400 = vrot.lane.b32.xlu0 %v21584_v18, %s12998_s22  ;;  %v20989_v40 = vshrl.u32 %v21587_v36, 16  ;;  %v18405_v47 = vrot.slane %v4926_v10, 7 }
 0x499   :  { %6698 = vmatpush1.bf16.msra.mxu0 %v6525_v22  ;;  %v5336_v27 = vor.u32 %v5335_v54, %v4930_v58  ;;  %v5338_v41 = vrot.slane %v20986_v20, 7  ;;  %v6024_v30 = vsel %vm1841_vm9, %v21588_v39, %v18131_v19  ;;  %v4940_v24 = vrot.slane %v4938_v17, 1  ;;  %v5753_v10 = vpop.permute.xlu0 %5752 }
 0x49a   :  { %v4946_v34 = vshll.u32 %v21584_v18, 16  ;;  %v5341_v62 = vrot.slane %v20987_v6, 7  ;;  %v6090_v9 = vsel %vm1894_vm10, %v6024_v30, %v5478_v55  ;;  %v4936_v58 = vor.u32 %v4934_v3, %v18264_v38  ;;  %v21590_v6 = vld [vmem:[#allocation104_spill] sm:$0xff]  ;;  %v21591_v30 = vld [vmem:[#allocation26_spill] sm:$0xff] }
 0x49b   :  { %5137 = vrot.lane.b32.xlu1 %v5088_v12, %s12999_s2  ;;  %v18422_v60 = vsel %vm1292_vm6, %v18405_v47, %v5336_v27  ;;  %v5339_v37 = vor.u32 %v5338_v41, %v4938_v17  ;;  %v6546_v19 = vshll.u32 %v18391_v59, 16  ;;  %v6151_v22 = vsel %vm1947_vm11, %v6090_v9, %v5753_v10  ;;  %v5247_v12 = vpop.permute.xlu1 %5246  ;;  %v21592_v38 = vld [vmem:[#allocation32_spill] sm:$0xff] }
 0x49c   :  { %21589 = vst [vmem:[#allocation100_spill] sm:$0xff] %v18422_v60  ;;  %v20990_v39 = vshll.u32 %v21587_v36, 16  ;;  %v5342_v20 = vor.u32 %v5341_v62, %v4946_v34  ;;  %v5833_v55 = vsel %vm1841_vm9, %v21590_v6, %v4991_v52  ;;  %v6228_v42 = vmul.bf16 %v6151_v22, %v21591_v30  ;;  %5497 = vrot.lane.b32.xlu0 %v21592_v38, %s12999_s2 }
 0x49d   :  { %v18433_v3 = vsel %vm1292_vm6, %v5335_v54, %v5339_v37  ;;  %v18437_v17 = vrot.slane %v20989_v40, 7  ;;  %v4941_v27 = vsel %vm773_vm5, %v4936_v58, %v4940_v24  ;;  %v6550_v6 = vshrl.u32 %v18342_v45, 16  ;;  %v18444_v10 = vpop.permute.xlu0 %5382 }
 0x49e   :  { %21593 = vst [vmem:[#allocation22_spill] sm:$0xff] %v18433_v3  ;;  %v18441_v9 = vsel %vm1292_vm6, %v5338_v41, %v5342_v20  ;;  %v6554_v52 = vshll.u32 %v6228_v42, 16  ;;  %v6542_v37 = vshrl.u32 %v18269_v61, 16  ;;  %v6548_v22 = vrot.slane %v6546_v19, 1 }
 0x49f   :  { %21594 = vst [vmem:[#allocation36_spill] sm:$0xff] %v18437_v17  ;;  %21595 = vst [vmem:[#allocation103_spill] sm:$0xff] %v18441_v9  ;;  %5010 = vrot.lane.b32.xlu1 %v4941_v27, %s12998_s22  ;;  %v5345_v54 = vor.u32 %v18437_v17, %v20990_v39  ;;  %v5885_v30 = vsel %vm1894_vm10, %v5833_v55, %v5118_v25  ;;  %v5120_v41 = vpop.permute.xlu1 %5119  ;;  %v6552_v45 = vor.u32 %v6550_v6, %v6532_v14  ;;  %v21597_v25 = vld [vmem:[#allocation31_spill] sm:$0xff] }
 0x4a0   :  { %v6556_v58 = vrot.slane %v6554_v52, 1  ;;  %v5948_v20 = vsel %vm1947_vm11, %v5885_v30, %v5247_v12  ;;  %5772 = vrot.lane.b32.xlu0 %v18006_v5, %s13000_s25  ;;  %v6544_v27 = vor.u32 %v6542_v37, %v18370_v16  ;;  %v5089_v40 = vrot.slane %v21584_v18, 1  ;;  %v21598_v16 = vld [vmem:[#allocation117_spill] sm:$0xff] }
 0x4a1   :  { %v18456_v38 = vsel %vm1292_vm6, %v5341_v62, %v5345_v54  ;;  %v5480_v39 = vpop.permute.xlu0 %5479  ;;  %v18464_v19 = vmul.bf16 %v5948_v20, %v21597_v25  ;;  %v6027_v62 = vsel %vm1841_vm9, %v21598_v16, %v18243_v13  ;;  %v21599_v55 = vrot.slane %v17623_v53, 1  ;;  %v21602_v25 = vld [vmem:[#allocation122_spill] sm:$0xff] }
 0x4a2   :  { %21596 = vst [vmem:[#allocation98_spill] sm:$0xff] %v18456_v38  ;;  %v6557_v61 = vsel %vm773_vm5, %v6552_v45, %v6556_v58  ;;  %v6549_v5 = vsel %vm773_vm5, %v6544_v27, %v6548_v22  ;;  %v4948_v6 = vrot.slane %v4946_v34, 1  ;;  %v6092_v52 = vsel %vm1894_vm10, %v6027_v62, %v5480_v39  ;;  %v21601_v27 = vld [vmem:[#allocation63_spill] sm:$0xff] }
 0x4a3   :  { %5266 = vrot.lane.b32.xlu1 %v17987_v1, %s13000_s25  ;;  %6699 = vmatprep.subr.bf16.mxu0 %v6557_v61  ;;  %v4993_v14 = vpop.permute.xlu1 %4992  ;;  %v5090_v12 = vsel %vm1058_vm4, %v21599_v55, %v5089_v40  ;;  %v6570_v37 = vshll.u32 %v18464_v19, 16  ;;  %v21600_v20 = vshrl.u32 %v17623_v53, 16  ;;  %v6574_v16 = vshrl.u32 %v6228_v42, 16 }
 0x4a4   :  { %6700 = vmatpush1.bf16.msra.mxu0 %v6549_v5  ;;  %5402 = vrot.lane.b32.xlu0 %v21587_v36, %s12998_s22  ;;  %v21603_v5 = vld [vmem:[#allocation107_spill] sm:$0xff]  ;;  %v21620_v53 = vrot.slane %v18051_v2, 2 }
 0x4a5   :  { %v5755_v54 = vpop.permute.xlu0 %5754  ;;  %v4944_v45 = vor.u32 %v21600_v20, %v4940_v24  ;;  %v5835_v34 = vsel %vm1841_vm9, %v21603_v5, %v4993_v14  ;;  %v6572_v24 = vrot.slane %v6570_v37, 1  ;;  %v6576_v14 = vor.u32 %v6574_v16, %v6556_v58  ;;  %v21605_v37 = vld [vmem:[#allocation72_spill] sm:$0xff] }
 0x4a6   :  { %v6154_v30 = vsel %vm1947_vm11, %v6092_v52, %v5755_v54  ;;  %v5887_v54 = vsel %vm1894_vm10, %v5835_v34, %v5120_v41  ;;  %v21607_v58 = vld [vmem:[#allocation24_spill] sm:$0xff] }
 0x4a7   :  { %5139 = vrot.lane.b32.xlu1 %v5090_v12, %s12999_s2  ;;  %v6231_v61 = vmul.bf16 %v6154_v30, %v21601_v27  ;;  %v5249_v13 = vpop.permute.xlu1 %5248  ;;  %v4949_v39 = vsel %vm773_vm5, %v4944_v45, %v4948_v6  ;;  %v6566_v12 = vshrl.u32 %v18391_v59, 16  ;;  %v5091_v45 = vrot.slane %v21587_v36, 1 }
 0x4a8   :  { %5499 = vrot.lane.b32.xlu0 %v21602_v25, %s12999_s2  ;;  %v5951_v42 = vsel %vm1947_vm11, %v5887_v54, %v5249_v13  ;;  %v21604_v25 = vld [vmem:[#allocation95_spill] sm:$0xff]  ;;  %v6030_v13 = vsel %vm1841_vm9, %v21607_v58, %v18365_v43  ;;  %v21612_v43 = vld [vmem:[#allocation112_spill] sm:$0xff]  ;;  %v21614_v58 = vld [vmem:[#allocation41_spill] sm:$0xff] }
 0x4a9   :  { %v6578_v62 = vshll.u32 %v6231_v61, 16  ;;  %v18487_v55 = vpop.permute.xlu0 %5384  ;;  %v6568_v20 = vor.u32 %v6566_v12, %v6548_v22  ;;  %v18503_v5 = vmul.bf16 %v5951_v42, %v21605_v37  ;;  %v21606_v22 = vld [vmem:[#allocation25_spill] sm:$0xff]  ;;  %v5092_v34 = vsel %vm1058_vm4, %v5089_v40, %v5091_v45 }
 0x4aa   :  { %v21610_v42 = vld [vmem:[#allocation69_spill] sm:$0xff] }
 0x4ab   :  { %5012 = vrot.lane.b32.xlu1 %v4949_v39, %s12998_s22  ;;  %v6580_v52 = vrot.slane %v6578_v62, 1  ;;  %v18492_v30 = vpop.permute.xlu1 %5121  ;;  %v6573_v41 = vsel %vm773_vm5, %v6568_v20, %v6572_v24  ;;  %v21608_v39 = vshll.u32 %v21587_v36, 16  ;;  %v20993_v37 = vshll.u32 %v18503_v5, 16 }
 0x4ac   :  { %5774 = vrot.lane.b32.xlu0 %v18097_v56, %s13000_s25  ;;  %v20995_v9 = vshrl.u32 %v18503_v5, 16 }
 0x4ad   :  { %v5482_v27 = vpop.permute.xlu0 %5481  ;;  %v6581_v59 = vsel %vm773_vm5, %v6576_v14, %v6580_v52  ;;  %v4956_v16 = vrot.slane %v21608_v39, 1  ;;  %v21609_v14 = vshrl.u32 %v21584_v18, 16 }
 0x4ae   :  { %6701 = vmatprep.subr.bf16.mxu0 %v6581_v59  ;;  %v6094_v62 = vsel %vm1894_vm10, %v6030_v13, %v5482_v27  ;;  %v18522_v59 = vpack.c.bf16 %v21610_v42, %v21610_v42  ;;  %v21616_v42 = vshll.u32 %v21612_v43, 16 }
 0x4af   :  { %5268 = vrot.lane.b32.xlu1 %v21604_v25, %s13000_s25  ;;  %6702 = vmatpush1.bf16.msra.mxu0 %v6573_v41  ;;  %v18505_v56 = vpop.permute.xlu1 %4994  ;;  %v4952_v20 = vor.u32 %v21609_v14, %v4948_v6  ;;  %v21613_v41 = vshrl.u32 %v21612_v43, 16  ;;  %v6590_v14 = vshrl.u32 %v18464_v19, 16 }
 0x4b0   :  { %5404 = vrot.lane.b32.xlu0 %v21606_v22, %s12998_s22  ;;  %21611 = vst [vmem:[#allocation6_spill] sm:$0xff] %v18522_v59  ;;  %v21619_v22 = vld [vmem:[#allocation77_spill] sm:$0xff] }
 0x4b1   :  { %v5757_v12 = vpop.permute.xlu0 %5756  ;;  %v18526_v40 = vrot.slane %v21613_v41, 7  ;;  %v4957_v39 = vsel %vm773_vm5, %v4952_v20, %v4956_v16  ;;  %v6592_v19 = vor.u32 %v6590_v14, %v6572_v24 }
 0x4b2   :  { %v6157_v54 = vsel %vm1947_vm11, %v6094_v62, %v5757_v12  ;;  %v6598_v12 = vshrl.u32 %v6231_v61, 16  ;;  %v4962_v61 = vshll.u32 %v18522_v59, 16 }
 0x4b3   :  { %5141 = vrot.lane.b32.xlu1 %v5092_v34, %s12999_s2  ;;  %v6234_v27 = vmul.bf16 %v6157_v54, %v21614_v58  ;;  %v18530_v13 = vpop.permute.xlu1 %5250  ;;  %v21615_v34 = vld [vmem:[#allocation20_spill] sm:$0xff]  ;;  %v5315_v41 = vor.u32 %v18526_v40, %v21616_v42  ;;  %v6596_v54 = vrot.slane %v20993_v37, 1  ;;  %v21618_v42 = vld [vmem:[#allocation73_spill] sm:$0xff] }
 0x4b4   :  { %5501 = vrot.lane.b32.xlu0 %v21615_v34, %s12999_s2  ;;  %v21617_v34 = vld [vmem:[#allocation94_spill] sm:$0xff]  ;;  %v6600_v38 = vor.u32 %v6598_v12, %v6580_v52 }
 0x4b5   :  { %v6602_v6 = vshll.u32 %v6234_v27, 16  ;;  %v18535_v62 = vpop.permute.xlu0 %5386  ;;  %v6617_v17 = vshrl.u32 %v6234_v27, 16  ;;  %v21621_v27 = vld [vmem:[#allocation5_spill] sm:$0xff]  ;;  %v6597_v24 = vsel %vm773_vm5, %v6592_v19, %v6596_v54  ;;  %v6616_v14 = vor.u32 %v20995_v9, %v6596_v54 }
 0x4b6   :  { %v5316_v52 = vsel %vm1292_vm6, %v21621_v27, %v5315_v41  ;;  %v21623_v54 = vshrl.u32 %v21587_v36, 16  ;;  %v21624_v27 = vld [vmem:[#allocation79_spill] sm:$0xff] }
 0x4b7   :  { %5014 = vrot.lane.b32.xlu1 %v4957_v39, %s12998_s22  ;;  %v18544_v58 = vpop.permute.xlu1 %5123  ;;  %v6604_v39 = vrot.slane %v6602_v6, 1 }
 0x4b8   :  { %5503 = vrot.lane.b32.xlu0 %v21617_v34, %s12999_s2  ;;  %v5456_v34 = vsel %vm1426_vm7, %v21620_v53, %v21619_v22  ;;  %v21622_v53 = vrot.slane %v18522_v59, 1 }
 0x4b9   :  { %v5484_v18 = vpop.permute.xlu0 %5483  ;;  %v6605_v37 = vsel %vm773_vm5, %v6600_v38, %v6604_v39  ;;  %v6619_v20 = vor.u32 %v6617_v17, %v6604_v39  ;;  %v6033_v38 = vsel %vm1841_vm9, %v5316_v52, %v18444_v10  ;;  %v4964_v39 = vrot.slane %v4962_v61, 1 }
 0x4ba   :  { %6703 = vmatprep.subr.bf16.mxu0 %v6605_v37  ;;  %v5094_v22 = vsel %vm1058_vm4, %v5091_v45, %v21622_v53  ;;  %v6096_v37 = vsel %vm1894_vm10, %v6033_v38, %v5484_v18  ;;  %v6673_v52 = vsel %vm329_vm0, %v6616_v14, 0  ;;  %v18586_v18 = vld [vmem:[%s20699_s8] ss:$8 sps:$4 sm:$0xff]   ;;  %v6842_v61 = vrot.slane %v6602_v6, 5 }
 0x4bb   :  { %5270 = vrot.lane.b32.xlu1 %v21618_v42, %s13000_s25  ;;  %v18561_v12 = vpop.permute.xlu1 %4996  ;;  %6704 = vmatpush1.bf16.msra.mxu0 %v6597_v24  ;;  %21625 = vst [vmem:[#allocation30_spill] sm:$0xff] %v18586_v18 }
 0x4bc   :  { %5505 = vrot.lane.b32.xlu0 %v5456_v34, %s12999_s2  ;;  %11395 = vmatprep.subr.msk.bf16.mxu0 %vm329_vm0, %v6619_v20  ;;  %v4960_v34 = vor.u32 %v21623_v54, %v4956_v16  ;;  %v18592_v16 = vld [vmem:[%s20699_s8 + $0x14] ss:$8 sps:$4 sm:$0xff]   ;;  %v6841_v20 = vrot.slane %v6617_v17, 4  ;;  %v21629_v17 = vld [vmem:[#allocation118_spill] sm:$0xff] }
 0x4bd   :  { %v5759_v41 = vpop.permute.xlu0 %5758  ;;  %21626 = vst [vmem:[#allocation37_spill] sm:$0xff] %v18592_v16  ;;  %v21631_v54 = vld [vmem:[#allocation120_spill] sm:$0xff] }
 0x4be   :  { %v6160_v19 = vsel %vm1947_vm11, %v6096_v37, %v5759_v41  ;;  %v4965_v45 = vsel %vm773_vm5, %v4960_v34, %v4964_v39  ;;  %v21628_v41 = vld [vmem:[#allocation48_spill] sm:$0xff] }
 0x4bf   :  { %5143 = vrot.lane.b32.xlu1 %v5094_v22, %s12999_s2  ;;  %v6237_v10 = vmul.bf16 %v6160_v19, %v21624_v27  ;;  %v18579_v24 = vpop.permute.xlu1 %5252  ;;  %6706 = vmatpush1.bf16.msra.mxu0 %v6673_v52  ;;  %v6238_v6 = vmul.bf16 %v21629_v17, %v21628_v41  ;;  %v21630_v19 = vld [vmem:[#allocation83_spill] sm:$0xff]  ;;  %v21633_v52 = vld [vmem:[#allocation81_spill] sm:$0xff] }
 0x4c0   :  { %5776 = vrot.lane.b32.xlu0 %v18210_v46, %s13000_s25  ;;  %v21627_v46 = vmov 0   ;;  %v6241_v34 = vmul.bf16 %v21631_v54, %v21630_v19  ;;  %v21638_v41 = vld [vmem:[#allocation123_spill] sm:$0xff]  ;;  %v21639_v54 = vrot.slane %v18522_v59, 1 }
 0x4c1   :  { %v6845_v14 = vshrl.u32 %v6237_v10, 16  ;;  %v6848_v38 = vshll.u32 %v6237_v10, 16  ;;  %v18594_v53 = vpop.permute.xlu0 %5388  ;;  %6752 = vmatprep.subr.bf16.mxu0 %v21627_v46  ;;  %v6843_v10 = vor.u32 %v6842_v61, %v6841_v20  ;;  %v6857_v20 = vshrl.u32 %v6238_v6, 16 }
 0x4c2   :  { %6714 = vmatmul.mubr.bf16.vlgmr.msra.gmra.mrb[100].mxu0 %v18586_v18  ;;  %v6860_v61 = vshll.u32 %v6238_v6, 16  ;;  %v4966_v6 = vshrl.u32 %v18522_v59, 16 }
 0x4c3   :  { %5016 = vrot.lane.b32.xlu1 %v4965_v45, %s12998_s22  ;;  %v6847_v22 = vrot.slane %v6845_v14, 4  ;;  %v6850_v37 = vrot.slane %v6848_v38, 5  ;;  %v18599_v39 = vpop.permute.xlu1 %5125  ;;  %6753 = vmatpush1.bf16.msra.mxu0 %v18228_v15  ;;  %v5731_v45 = vsel %vm1530_vm8, %v18266_v48, %v21633_v52  ;;  %v18626_v15 = vld [vmem:[%s20699_s8 + $0x10] ss:$8 sps:$4 sm:$0xff]   ;;  %v6884_v38 = vshrl.u32 %v6241_v34, 16  ;;  %v21642_v52 = vld [vmem:[#allocation53_spill] sm:$0xff] }
 0x4c4   :  { %5778 = vrot.lane.b32.xlu0 %v18290_v63, %s13000_s25  ;;  %11397 = vmatprep.mubr.msk.bf16.mxu0 %vm6659_vm12, %v18592_v16  ;;  %21634 = vst [vmem:[#allocation50_spill] sm:$0xff] %v18626_v15  ;;  %v18636_v48 = vld [vmem:[%s20699_s8 + $0x24] ss:$8 sps:$4 sm:$0xff]  }
 0x4c5   :  { %v18610_v27 = vpop.permute.xlu0 %5485  ;;  %6754 = vmatprep.subr.bf16.mxu0 %v21627_v46  ;;  %v18615_v63 = vor.u32 %v6850_v37, %v6847_v22  ;;  %v6887_v22 = vshll.u32 %v6241_v34, 16  ;;  %21636 = vst [vmem:[#allocation38_spill] sm:$0xff] %v18636_v48  ;;  %v21637_v37 = vld [vmem:[#allocation85_spill] sm:$0xff]  ;;  %v6886_v3 = vrot.slane %v6884_v38, 4 }
 0x4c6   :  { %v6244_v17 = vmul.bf16 %v21638_v41, %v21637_v37  ;;  %v21640_v34 = vld [vmem:[#allocation89_spill] sm:$0xff]  ;;  %v6859_v37 = vrot.slane %v6857_v20, 4  ;;  %v6862_v41 = vrot.slane %v6860_v61, 5  ;;  %v6280_v20 = vld [vmem:[%s20699_s8 + $0x30] sm:$0xff] }
 0x4c7   :  { %5272 = vrot.lane.b32.xlu1 %v18233_v49, %s13000_s25  ;;  %21632 = vst [vmem:[#allocation105_spill] sm:$0xff] %v18615_v63  ;;  %v18620_v14 = vpop.permute.xlu1 %4998  ;;  %v18630_v49 = vsel %vm6828_vm13, %v6843_v10, %v18615_v63  ;;  %6755 = vmatpush1.bf16.msra.mxu0 %v18249_v26  ;;  %v21641_v26 = vld [vmem:[#allocation45_spill] sm:$0xff]  ;;  %v21646_v61 = vld [vmem:[#allocation34_spill] sm:$0xff]  ;;  %v21655_v63 = vld [vmem:[#allocation71_spill] sm:$0xff]  ;;  %v18727_v35 = vcombine.low %v6280_v20, %v6280_v20 }
 0x4c8   :  { %5780 = vrot.lane.b32.xlu0 %v5731_v45, %s13000_s25  ;;  %21635 = vst [vmem:[#allocation44_spill] sm:$0xff] %v18630_v49  ;;  %6756 = vmatprep.subr.bf16.mxu0 %v21627_v46  ;;  %v6247_v10 = vmul.bf16 %v21641_v26, %v21640_v34  ;;  %v21643_v45 = vld [vmem:[#allocation65_spill] sm:$0xff]  ;;  %v6911_v59 = vshrl.u32 %v6244_v17, 16  ;;  %v21644_v34 = vld [vmem:[#allocation60_spill] sm:$0xff] }
 0x4c9   :  { %v18640_v19 = vpop.permute.xlu0 %5760  ;;  %v6250_v9 = vmul.bf16 %v21643_v45, %v21642_v52  ;;  %v6253_v26 = vmul.bf16 %v17727_v32, %v21644_v34  ;;  %v18678_v32 = vld [vmem:[%s20699_s8 + $0x20] ss:$8 sps:$4 sm:$0xff]  }
 0x4ca   :  { %6724 = vmatmul.mubr.bf16.gmra.mrb[104].mxu0 %v18626_v15  ;;  %v6938_v11 = vshrl.u32 %v6247_v10, 16  ;;  %v6941_v60 = vshll.u32 %v6247_v10, 16  ;;  %21650 = vst [vmem:[#allocation96_spill] sm:$0xff] %v18678_v32  ;;  %v6913_v10 = vrot.slane %v6911_v59, 4  ;;  %v21653_v16 = vld [vmem:[#allocation17_spill] sm:$0xff] }
 0x4cb   :  { %5145 = vrot.lane.b32.xlu1 %v21639_v54, %s12999_s2  ;;  %v18651_v36 = vpop.permute.xlu1 %5254  ;;  %v6889_v54 = vrot.slane %v6887_v22, 5  ;;  %6757 = vmatpush1.bf16.msra.mxu0 %v18277_v28  ;;  %v6914_v22 = vshll.u32 %v6244_v17, 16  ;;  %v21648_v28 = vld [vmem:[#allocation115_spill] sm:$0xff]  ;;  %v6968_v34 = vshll.u32 %v6250_v9, 16  ;;  %v18681_v17 = vcombine.high %v6280_v20, %v6280_v20 }
 0x4cc   :  { %5018 = vrot.lane.b32.xlu0 %v4966_v6, %s12998_s22  ;;  %11398 = vmatprep.mubr.msk.bf16.mxu0 %vm6659_vm12, %v18636_v48  ;;  %v21647_v6 = vld [vmem:[#allocation40_spill] sm:$0xff]  ;;  %v6965_v48 = vshrl.u32 %v6250_v9, 16  ;;  %v6992_v38 = vshrl.u32 %v6253_v26, 16  ;;  %v6995_v2 = vshll.u32 %v6253_v26, 16  ;;  %v6256_v18 = vmul.bf16 %v21585_v23, %v21653_v16  ;;  %s11208_s22 = sshll.u32 %s13001_s27, 4  ;;  %s11209_s22 = int_to_ptr.vmem [resolvable:$true] %s11208_s22 }
 0x4cd   :  { %v18660_v52 = vpop.permute.xlu0 %5390  ;;  %6758 = vmatprep.subr.bf16.mxu0 %v21627_v46  ;;  %v18669_v45 = vmul.bf16 %v21648_v28, %v21647_v6  ;;  %21651 = vst [vmem:[#allocation27_spill] sm:$0xff] %v18681_v17  ;;  %v18683_v6 = vor.u32 %v6862_v41, %v6859_v37  ;;  %v6890_v28 = vor.u32 %v6889_v54, %v6886_v3  ;;  %v6916_v49 = vrot.slane %v6914_v22, 5  ;;  %v21659_v16 = vld [vmem:[#allocation116_spill] sm:$0xff]  ;;  %s12969_s26 = scalar_lea.vmem %s11209_s22, 32  ;;  %p12974_p1 = scmp.lt.s32.totalorder %s11209_s22, %s11209_s22 }
 0x4ce   :  { %21645 = vst [vmem:[#allocation108_spill] sm:$0xff] %v18660_v52  ;;  %v6259_v9 = vmul.bf16 %v17987_v1, %v21655_v63  ;;  %v6940_v23 = vrot.slane %v6938_v11, 4  ;;  %v21660_v41 = vshrl.u32 %v21659_v16, 16  ;;  %v6943_v1 = vrot.slane %v6941_v60, 5  ;;  %v21661_v22 = vld [vmem:[#allocation64_spill] sm:$0xff]  ;;  %p12970_p0 = scmp.ne.s32.totalorder %s11209_s22, %s12969_s26  ;;  %p12975_p2 = scmp.lt.s32.totalorder %s12969_s26, %s12969_s26 }
 0x4cf   :  { %v18671_v15 = vpop.permute.xlu1 %5127  ;;  %6759 = vmatpush1.bf16.msra.mxu0 %v18305_v31  ;;  %21652 = vst [vmem:[#allocation39_spill] sm:$0xff] %v18683_v6  ;;  %v21656_v31 = vld [vmem:[#allocation114_spill] sm:$0xff]  ;;  %v18696_v3 = vsel %vm6828_vm13, %v18683_v6, %v6890_v28  ;;  %v6967_v63 = vrot.slane %v6965_v48, 4  ;;  %v6262_v6 = vmul.bf16 %v21604_v25, %v21661_v22  ;;  %v6994_v11 = vrot.slane %v6992_v38, 4  ;;  %v21664_v25 = vld [vmem:[#allocation109_spill] sm:$0xff] }
 0x4d0   :  { %21649 = vst [vmem:[#allocation102_spill] sm:$0xff] %v18671_v15  ;;  %5274 = vrot.lane.b32.xlu0 %v18190_v29, %s13000_s25  ;;  %6760 = vmatprep.subr.bf16.mxu0 %v21627_v46  ;;  %v21657_v52 = vshrl.u32 %v21656_v31, 16  ;;  %21658 = vst [vmem:[#allocation43_spill] sm:$0xff] %v18696_v3  ;;  %v18702_v54 = vrot.slane %v21660_v41, 7  ;;  %v6997_v37 = vrot.slane %v6995_v2, 5  ;;  %v7019_v59 = vshrl.u32 %v6256_v18, 16  ;;  %p12976_p3 = por %p12975_p2, %p12974_p1 }
 0x4d1   :  { %v18687_v29 = vpop.permute.xlu0 %5487  ;;  %v7022_v41 = vshll.u32 %v6256_v18, 16  ;;  %v7049_v60 = vshll.u32 %v6259_v9, 16  ;;  %v21663_v48 = vshll.u32 %v21656_v31, 16  ;;  %v6917_v15 = vor.u32 %v6916_v49, %v6913_v10  ;;  %v21666_v38 = vld [vmem:[#allocation93_spill] sm:$0xff] }
 0x4d2   :  { %21654 = vst [vmem:[#allocation111_spill] sm:$0xff] %v18687_v29  ;;  %v5317_v8 = vrot.slane %v21657_v52, 7  ;;  %6734 = vmatmul.mubr.bf16.gmra.mrb[108].mxu0 %v18678_v32  ;;  %v6970_v52 = vrot.slane %v6968_v34, 5  ;;  %v7046_v32 = vshrl.u32 %v6259_v9, 16  ;;  %v21665_v22 = vshll.u32 %v21659_v16, 16  ;;  %p12977_p4 = pnand %p12976_p3, %p12970_p0 }
 0x4d3   :  { %v18704_v26 = vpop.permute.xlu1 %5000  ;;  %6761 = vmatpush1.bf16.msra.mxu0 %v18330_v0  ;;  %11399 = vmatprep.mubr.msk.bf16.mxu0 %vm6659_vm12, %v18681_v17  ;;  %v5837_v0 = vsel %vm1841_vm9, %v21664_v25, %v18505_v56  ;;  %v6265_v18 = vmul.bf16 %v21618_v42, %v21666_v38  ;;  %v7073_v9 = vshrl.u32 %v6262_v6, 16  ;;  %v18731_v49 = vsel %vm6828_vm13, %v6890_v28, %v6917_v15  ;;  %v21668_v25 = vld [vmem:[#allocation119_spill] sm:$0xff]  ;;  %v21670_v42 = vld [vmem:[#allocation121_spill] sm:$0xff] }
 0x4d4   :  { %6762 = vmatprep.subr.bf16.mxu0 %v21627_v46  ;;  %v5318_v34 = vor.u32 %v5317_v8, %v21663_v48  ;;  %v5321_v2 = vor.u32 %v18702_v54, %v21665_v22  ;;  %v6944_v10 = vor.u32 %v6943_v1, %v6940_v23  ;;  %v18733_v56 = vrot.slane %v7019_v59, 4 }
 0x4d5   :  { %v18712_v3 = vpop.permute.xlu0 %5762  ;;  %v18735_v48 = vrot.slane %v7022_v41, 5  ;;  %v21669_v22 = vshrl.u32 %v21668_v25, 16  ;;  %v21671_v38 = vshrl.u32 %v21670_v42, 16  ;;  %v5839_v28 = vsel %vm1841_vm9, %v21612_v43, %v18561_v12 }
 0x4d6   :  { %21662 = vst [vmem:[#allocation70_spill] sm:$0xff] %v18712_v3  ;;  %v7076_v3 = vshll.u32 %v6262_v6, 16  ;;  %v5889_v6 = vsel %vm1894_vm10, %v5837_v0, %v18492_v30  ;;  %v18752_v59 = vsel %vm6828_vm13, %v6917_v15, %v6944_v10  ;;  %v18754_v23 = vrot.slane %v7046_v32, 4 }
 0x4d7   :  { %v18725_v17 = vpop.permute.xlu1 %5256  ;;  %6763 = vmatpush1.bf16.msra.mxu0 %v18334_v51  ;;  %v5323_v29 = vrot.slane %v21669_v22, 7  ;;  %v5319_v51 = vsel %vm1292_vm6, %v18526_v40, %v5318_v34  ;;  %v5954_v1 = vsel %vm1947_vm11, %v5889_v6, %v18530_v13  ;;  %v7100_v41 = vshrl.u32 %v6265_v18, 16 }
 0x4d8   :  { %21667 = vst [vmem:[#allocation106_spill] sm:$0xff] %v18725_v17  ;;  %v5326_v17 = vrot.slane %v21671_v38, 7  ;;  %6764 = vmatprep.subr.bf16.mxu0 %v21627_v46  ;;  %v21672_v22 = vshrl.u32 %v17449_v57, 16  ;;  %v18765_v30 = vrot.slane %v7049_v60, 5  ;;  %v18767_v43 = vrot.slane %v7073_v9, 4 }
 0x4d9   :  { %v18741_v20 = vpop.permute.xlu0 %5392  ;;  %v18769_v12 = vrot.slane %v7076_v3, 5  ;;  %v5322_v15 = vsel %vm1292_vm6, %v5317_v8, %v5321_v2  ;;  %v7103_v13 = vshll.u32 %v6265_v18, 16  ;;  %v5891_v32 = vsel %vm1894_vm10, %v5839_v28, %v18544_v58 }
 0x4da   :  { %v18760_v38 = vrot.slane %v21672_v22, 7  ;;  %6744 = vmatmul.mubr.bf16.gmra.mrb[112].mxu0 %v18727_v35  ;;  %v21673_v34 = vshll.u32 %v21668_v25, 16  ;;  %v21674_v60 = vshll.u32 %v21670_v42, 16  ;;  %v6036_v8 = vsel %vm1841_vm9, %v5319_v51, %v18487_v55 }
 0x4db   :  { %v18762_v40 = vpop.permute.xlu1 %5129  ;;  %6765 = vmatpush1.bf16.msra.mxu0 %v18348_v21  ;;  %11400 = vmatprep.mubr.msk.bf16.mxu0 %vm6659_vm12, %v18180_v4  ;;  %v21675_v21 = vld [vmem:[#allocation75_spill] sm:$0xff]  ;;  %v5957_v4 = vsel %vm1947_vm11, %v5891_v32, %v18579_v24  ;;  %v6971_v2 = vor.u32 %v6970_v52, %v6967_v63  ;;  %v18787_v18 = vrot.slane %v7100_v41, 4  ;;  %v6098_v58 = vsel %vm1894_vm10, %v6036_v8, %v18610_v27 }
 0x4dc   :  { %v5324_v0 = vor.u32 %v5323_v29, %v21673_v34  ;;  %v5327_v9 = vor.u32 %v5326_v17, %v21674_v60  ;;  %6766 = vmatprep.subr.bf16.mxu0 %v21627_v46  ;;  %v6236_v3 = vmul.bf16 %v5954_v1, %v21675_v21  ;;  %v5841_v28 = vsel %vm1841_vm9, %v21656_v31, %v18620_v14  ;;  %v21678_v14 = vld [vmem:[#allocation80_spill] sm:$0xff]  ;;  %v21680_v8 = vld [vmem:[#allocation51_spill] sm:$0xff] }
 0x4dd   :  { %v5490_v6 = vpop.permute.xlu0 %5489  ;;  %v21676_v22 = vshll.u32 %v17449_v57, 16  ;;  %v6163_v51 = vsel %vm1947_vm11, %v6098_v58, %v18640_v19  ;;  %v21677_v24 = vshll.u32 %v18669_v45, 16  ;;  %v18805_v27 = vsel %vm6828_vm13, %v6944_v10, %v6971_v2 }
 0x4de   :  { %v6998_v52 = vor.u32 %v6997_v37, %v6994_v11  ;;  %v18807_v1 = vrot.slane %v7103_v13, 5  ;;  %v6239_v31 = vmul.bf16 %v5957_v4, %v21678_v14  ;;  %v5325_v41 = vsel %vm1292_vm6, %v18702_v54, %v5324_v0  ;;  %v21686_v14 = vld [vmem:[#allocation111_spill] sm:$0xff] }
 0x4df   :  { %v5330_v34 = vor.u32 %v18760_v38, %v21676_v22  ;;  %6767 = vmatpush1.bf16.msra.mxu0 %v18352_v7  ;;  %v6612_v63 = vrot.slane %v21677_v24, 1  ;;  %v5328_v32 = vsel %vm1292_vm6, %v5323_v29, %v5327_v9  ;;  %v6833_v7 = vshrl.u32 %v6236_v3, 16 }
 0x4e0   :  { %6768 = vmatprep.subr.bf16.mxu0 %v21627_v46  ;;  %v5893_v19 = vsel %vm1894_vm10, %v5841_v28, %v18599_v39  ;;  %v21679_v10 = vshrl.u32 %v21646_v61, 16  ;;  %v18820_v11 = vsel %vm6828_vm13, %v6971_v2, %v6998_v52  ;;  %v6836_v13 = vshll.u32 %v6236_v3, 16 }
 0x4e1   :  { %v18797_v55 = vpop.permute.xlu1 %5002  ;;  %v5765_v60 = vpop.permute.xlu0 %5764  ;;  %v6240_v21 = vmul.bf16 %v6163_v51, %v21680_v8  ;;  %v5960_v29 = vsel %vm1947_vm11, %v5893_v19, %v18651_v36  ;;  %v18826_v54 = vsel %vm1292_vm6, %v5326_v17, %v5330_v34  ;;  %v21681_v39 = vshrl.u32 %v18503_v5, 16  ;;  %v21685_v34 = vld [vmem:[#allocation82_spill] sm:$0xff]  ;;  %v21688_v8 = vld [vmem:[#allocation97_spill] sm:$0xff] }
 0x4e2   :  { %v6608_v37 = vor.u32 %v21679_v10, %v18294_v44  ;;  %v21682_v44 = vshll.u32 %v21539_v33, 16  ;;  %v21683_v36 = vshrl.u32 %v18669_v45, 16  ;;  %v21684_v17 = vshll.u32 %v18503_v5, 16  ;;  %v21687_v10 = vld [vmem:[#allocation70_spill] sm:$0xff] }
 0x4e3   :  { %v18832_v9 = vrot.slane %v21681_v39, 4  ;;  %6769 = vmatpush1.bf16.msra.mxu0 %v18358_v50  ;;  %v6039_v58 = vsel %vm1841_vm9, %v5322_v15, %v18535_v62  ;;  %v6866_v28 = vshrl.u32 %v6239_v31, 16  ;;  %v6869_v22 = vshll.u32 %v6239_v31, 16  ;;  %v21690_v39 = vld [vmem:[#allocation106_spill] sm:$0xff] }
 0x4e4   :  { %v18838_v61 = vor.u32 %v18405_v47, %v21682_v44  ;;  %v6613_v3 = vsel %vm773_vm5, %v6608_v37, %v6612_v63  ;;  %v6622_v4 = vor.u32 %v21683_v36, %v6612_v63  ;;  %v18845_v2 = vrot.slane %v21684_v17, 5  ;;  %6770 = vmatprep.subr.bf16.mxu0 %v21627_v46 }
 0x4e5   :  { %v18828_v0 = vpop.permute.xlu1 %5258  ;;  %v18849_v50 = vpop.permute.xlu0 %5394  ;;  %v6835_v47 = vrot.slane %v6833_v7, 4  ;;  %v6242_v51 = vmul.bf16 %v5960_v29, %v21685_v34  ;;  %v5843_v24 = vsel %vm1841_vm9, %v21659_v16, %v18704_v26  ;;  %v7025_v5 = vor.u32 %v18735_v48, %v18733_v56  ;;  %v21689_v48 = vld [vmem:[#allocation102_spill] sm:$0xff] }
 0x4e6   :  { %v6838_v63 = vrot.slane %v6836_v13, 5  ;;  %v6042_v62 = vsel %vm1841_vm9, %v5325_v41, %v18594_v53  ;;  %v6875_v15 = vshrl.u32 %v6240_v21, 16  ;;  %v6100_v31 = vsel %vm1894_vm10, %v6039_v58, %v21686_v14 }
 0x4e7   :  { %v6878_v7 = vshll.u32 %v6240_v21, 16  ;;  %v6166_v37 = vsel %vm1947_vm11, %v6100_v31, %v21687_v10  ;;  %6771 = vmatpush1.bf16.msra.mxu0 %v21688_v8  ;;  %v18868_v16 = vsel %vm6828_vm13, %v6998_v52, %v7025_v5  ;;  %v7052_v26 = vor.u32 %v18765_v30, %v18754_v23  ;;  %v21691_v30 = vld [vmem:[#allocation56_spill] sm:$0xff] }
 0x4e8   :  { %v6868_v56 = vrot.slane %v6866_v28, 4  ;;  %v6871_v53 = vrot.slane %v6869_v22, 5  ;;  %v5895_v41 = vsel %vm1894_vm10, %v5843_v24, %v21689_v48  ;;  %v6102_v13 = vsel %vm1894_vm10, %v6042_v62, %v5490_v6  ;;  %6772 = vmatprep.subr.bf16.mxu0 %v21627_v46  ;;  %v21692_v62 = vld [vmem:[#allocation35_spill] sm:$0xff]  ;;  %v21694_v31 = vld [vmem:[#allocation84_spill] sm:$0xff] }
 0x4e9   :  { %v18862_v19 = vpop.permute.xlu1 %5131  ;;  %v5492_v29 = vpop.permute.xlu0 %5491  ;;  %v6893_v21 = vshrl.u32 %v6242_v51, 16  ;;  %v5963_v44 = vsel %vm1947_vm11, %v5895_v41, %v21690_v39  ;;  %v6169_v52 = vsel %vm1947_vm11, %v6102_v13, %v5765_v60  ;;  %v18880_v36 = vsel %vm6828_vm13, %v7025_v5, %v7052_v26  ;;  %v21695_v10 = vld [vmem:[#allocation8_spill] sm:$0xff] }
 0x4ea   :  { %v6877_v23 = vrot.slane %v6875_v15, 4  ;;  %v6243_v17 = vmul.bf16 %v6166_v37, %v21691_v30  ;;  %v6679_v28 = vsel %vm329_vm0, %v6622_v4, 0  ;;  %v6831_v6 = vor.u32 %v18845_v2, %v18832_v9  ;;  %v21693_v15 = vld [vmem:[#allocation108_spill] sm:$0xff] }
 0x4eb   :  { %v6880_v22 = vrot.slane %v6878_v7, 5  ;;  %v6896_v34 = vshll.u32 %v6242_v51, 16  ;;  %v5845_v24 = vsel %vm1841_vm9, %v21668_v25, %v18797_v55  ;;  %6773 = vmatpush1.bf16.msra.mxu0 %v21692_v62  ;;  %v7079_v60 = vor.u32 %v18769_v12, %v18767_v43  ;;  %v21700_v62 = vld [vmem:[#allocation19_spill] sm:$0xff] }
 0x4ec   :  { %v6839_v5 = vor.u32 %v6838_v63, %v6835_v47  ;;  %v6045_v14 = vsel %vm1841_vm9, %v5328_v32, %v21693_v15  ;;  %v6245_v4 = vmul.bf16 %v5963_v44, %v21694_v31  ;;  %v6246_v37 = vmul.bf16 %v6169_v52, %v21695_v10  ;;  %6774 = vmatprep.subr.bf16.mxu0 %v21627_v46  ;;  %v21697_v44 = vld [vmem:[#allocation86_spill] sm:$0xff] }
 0x4ed   :  { %v5005_v58 = vpop.permute.xlu1 %5004  ;;  %v5767_v9 = vpop.permute.xlu0 %5766  ;;  %v18897_v2 = vor.u32 %v6871_v53, %v6868_v56  ;;  %v6895_v51 = vrot.slane %v6893_v21, 4  ;;  %v6104_v25 = vsel %vm1894_vm10, %v6045_v14, %v5492_v29  ;;  %v18901_v55 = vsel %vm6828_vm13, %v7052_v26, %v7079_v60 }
 0x4ee   :  { %v6902_v43 = vshrl.u32 %v6243_v17, 16  ;;  %v6905_v12 = vshll.u32 %v6243_v17, 16  ;;  %v5897_v32 = vsel %vm1894_vm10, %v5845_v24, %v18762_v40  ;;  %v6172_v47 = vsel %vm1947_vm11, %v6104_v25, %v5767_v9  ;;  %v21696_v40 = vld [vmem:[#allocation10_spill] sm:$0xff]  ;;  %v21699_v24 = vld [vmem:[#allocation87_spill] sm:$0xff] }
 0x4ef   :  { %v6898_v7 = vrot.slane %v6896_v34, 5  ;;  %v5966_v8 = vsel %vm1947_vm11, %v5897_v32, %v18828_v0  ;;  %6775 = vmatpush1.bf16.msra.mxu0 %v6613_v3  ;;  %v6881_v56 = vor.u32 %v6880_v22, %v6877_v23  ;;  %v18910_v53 = vor.u32 %v18807_v1, %v18787_v18  ;;  %v21698_v22 = vld [vmem:[#allocation105_spill] sm:$0xff] }
 0x4f0   :  { %v6920_v26 = vshrl.u32 %v6245_v4, 16  ;;  %v6923_v48 = vshll.u32 %v6245_v4, 16  ;;  %v6929_v41 = vshrl.u32 %v6246_v37, 16  ;;  %v6932_v13 = vshll.u32 %v6246_v37, 16  ;;  %6776 = vmatprep.subr.bf16.mxu0 %v21627_v46  ;;  %v21701_v4 = vld [vmem:[#allocation44_spill] sm:$0xff]  ;;  %v21703_v32 = vld [vmem:[#allocation37_spill] sm:$0xff] }
 0x4f1   :  { %v5261_v63 = vpop.permute.xlu1 %5260  ;;  %v18912_v29 = vpop.permute.xlu0 %5396  ;;  %v6249_v21 = vmul.bf16 %v6172_v47, %v21696_v40  ;;  %v6840_v39 = vsel %vm6828_vm13, %v6831_v6, %v6839_v5  ;;  %v6873_v0 = vsel %vm6828_vm13, %v6839_v5, %v18897_v2  ;;  %v18921_v3 = vsel %vm6828_vm13, %v7079_v60, %v18910_v53 }
 0x4f2   :  { %v6904_v18 = vrot.slane %v6902_v43, 4  ;;  %v6907_v1 = vrot.slane %v6905_v12, 5  ;;  %v6248_v52 = vmul.bf16 %v5966_v8, %v21697_v44  ;;  %v5847_v23 = vsel %vm1841_vm9, %v21670_v42, %v5005_v58  ;;  %v21704_v8 = vld [vmem:[#allocation47_spill] sm:$0xff] }
 0x4f3   :  { %v18926_v17 = vor.u32 %v6898_v7, %v6895_v51  ;;  %v6048_v6 = vsel %vm1841_vm9, %v18826_v54, %v18741_v20  ;;  %6777 = vmatpush1.bf16.msra.mxu0 %v6679_v28  ;;  %v6882_v34 = vsel %vm6828_vm13, %v21698_v22, %v6881_v56  ;;  %v6268_v60 = vmul.bf16 %v21700_v62, %v21699_v24  ;;  %v21702_v51 = vld [vmem:[#allocation30_spill] sm:$0xff]  ;;  %v21709_v24 = vld [vmem:[#allocation11_spill] sm:$0xff] }
 0x4f4   :  { %v6922_v5 = vrot.slane %v6920_v26, 4  ;;  %v6925_v15 = vrot.slane %v6923_v48, 5  ;;  %v6931_v14 = vrot.slane %v6929_v41, 4  ;;  %v6934_v31 = vrot.slane %v6932_v13, 5  ;;  %7219 = vmatprep.subr.bf16.mxu0 %v21701_v4  ;;  %v21705_v26 = vld [vmem:[#allocation33_spill] sm:$0xff] }
 0x4f5   :  { %v5134_v30 = vpop.permute.xlu1 %5133  ;;  %v5494_v42 = vpop.permute.xlu0 %5493  ;;  %v6956_v58 = vshrl.u32 %v6249_v21, 16  ;;  %v5899_v10 = vsel %vm1894_vm10, %v5847_v23, %v18862_v19  ;;  %v7127_v37 = vshrl.u32 %v6268_v60, 16  ;;  %v7130_v20 = vshll.u32 %v6268_v60, 16 }
 0x4f6   :  { %v6947_v54 = vshrl.u32 %v6248_v52, 16  ;;  %v6959_v28 = vshll.u32 %v6249_v21, 16  ;;  %v5969_v9 = vsel %vm1947_vm11, %v5899_v10, %v5261_v63  ;;  %6785 = vmatmul.mubr.bf16.vlgmr.msra.gmra.mrb[116].mxu0 %v21702_v51  ;;  %v6908_v43 = vor.u32 %v6907_v1, %v6904_v18  ;;  %v21707_v21 = vld [vmem:[#allocation52_spill] sm:$0xff]  ;;  %v21708_v1 = vld [vmem:[#allocation91_spill] sm:$0xff] }
 0x4f7   :  { %v6950_v12 = vshll.u32 %v6248_v52, 16  ;;  %7220 = vmatpush1.bf16.msra.mxu0 %v6840_v39  ;;  %11401 = vmatprep.mubr.msk.bf16.mxu0 %vm6659_vm12, %v21703_v32  ;;  %v7129_v47 = vrot.slane %v7127_v37, 4  ;;  %v7132_v7 = vrot.slane %v7130_v20, 5  ;;  %v21706_v19 = vrot.slane %v21705_v26, 3  ;;  %v21711_v26 = vld [vmem:[#allocation46_spill] sm:$0xff] }
 0x4f8   :  { %v6106_v41 = vsel %vm1894_vm10, %v6048_v6, %v5494_v42  ;;  %7221 = vmatprep.subr.bf16.mxu0 %v6882_v34  ;;  %v6935_v40 = vor.u32 %v6934_v31, %v6931_v14  ;;  %v6958_v18 = vrot.slane %v6956_v58, 4  ;;  %v6251_v44 = vmul.bf16 %v5969_v9, %v21708_v1 }
 0x4f9   :  { %v5007_v25 = vpop.permute.xlu1 %5006  ;;  %v5784_v48 = vsel %vm330_vm1, %v21706_v19, %v21704_v8  ;;  %v5769_v13 = vpop.permute.xlu0 %5768  ;;  %v7133_v23 = vor.u32 %v7132_v7, %v7129_v47  ;;  %v6961_v22 = vrot.slane %v6959_v28, 5  ;;  %v6909_v34 = vsel %vm6828_vm13, %v6881_v56, %v6908_v43 }
 0x4fa   :  { %v5849_v63 = vsel %vm1841_vm9, %v17449_v57, %v5007_v25  ;;  %v6271_v39 = vmul.bf16 %v5784_v48, %v21707_v21  ;;  %v6175_v52 = vsel %vm1947_vm11, %v6106_v41, %v5769_v13  ;;  %v6900_v14 = vsel %vm6828_vm13, %v18897_v2, %v18926_v17  ;;  %v21712_v48 = vld [vmem:[#allocation38_spill] sm:$0xff] }
 0x4fb   :  { %v6252_v62 = vmul.bf16 %v6175_v52, %v21709_v24  ;;  %7222 = vmatpush1.bf16.msra.mxu0 %v6873_v0  ;;  %v5901_v57 = vsel %vm1894_vm10, %v5849_v63, %v5134_v30  ;;  %v18960_v31 = vsel %vm6828_vm13, %v18910_v53, %v7133_v23  ;;  %v6926_v20 = vor.u32 %v6925_v15, %v6922_v5  ;;  %v21710_v53 = vld [vmem:[#allocation50_spill] sm:$0xff] }
 0x4fc   :  { %v7154_v4 = vshrl.u32 %v6271_v39, 16  ;;  %v7157_v6 = vshll.u32 %v6271_v39, 16  ;;  %7223 = vmatprep.subr.bf16.mxu0 %v6909_v34  ;;  %v6949_v30 = vrot.slane %v6947_v54, 4  ;;  %v6952_v28 = vrot.slane %v6950_v12, 5 }
 0x4fd   :  { %v5263_v60 = vpop.permute.xlu1 %5262  ;;  %v6983_v42 = vshrl.u32 %v6252_v62, 16  ;;  %v6986_v58 = vshll.u32 %v6252_v62, 16  ;;  %v18963_v37 = vpop.permute.xlu0 %5398  ;;  %v6974_v9 = vshrl.u32 %v6251_v44, 16  ;;  %v6977_v51 = vshll.u32 %v6251_v44, 16 }
 0x4fe   :  { %v5972_v10 = vsel %vm1947_vm11, %v5901_v57, %v5263_v60  ;;  %v7156_v0 = vrot.slane %v7154_v4, 4  ;;  %v7159_v56 = vrot.slane %v7157_v6, 5  ;;  %v6936_v2 = vsel %vm6828_vm13, %v6908_v43, %v6935_v40  ;;  %6793 = vmatmul.mubr.bf16.gmra.mrb[120].mxu0 %v21710_v53  ;;  %v21714_v4 = vld [vmem:[#allocation96_spill] sm:$0xff] }
 0x4ff   :  { %v6962_v32 = vor.u32 %v6961_v22, %v6958_v18  ;;  %v6985_v47 = vrot.slane %v6983_v42, 4  ;;  %v6988_v7 = vrot.slane %v6986_v58, 5  ;;  %v6254_v19 = vmul.bf16 %v5972_v10, %v21711_v26  ;;  %7224 = vmatpush1.bf16.msra.mxu0 %v6900_v14  ;;  %11402 = vmatprep.mubr.msk.bf16.mxu0 %vm6659_vm12, %v21712_v48 }
 0x500   :  { %v18970_v5 = vor.u32 %v7159_v56, %v7156_v0  ;;  %7225 = vmatprep.subr.bf16.mxu0 %v6936_v2  ;;  %v5334_v54 = vsel %vm1292_vm6, %v18760_v38, %v18838_v61  ;;  %v6927_v43 = vsel %vm6828_vm13, %v18926_v17, %v6926_v20  ;;  %v6953_v41 = vor.u32 %v6952_v28, %v6949_v30 }
 0x501   :  { %v5136_v25 = vpop.permute.xlu1 %5135  ;;  %v5496_v15 = vpop.permute.xlu0 %5495  ;;  %v6051_v63 = vsel %vm1841_vm9, %v5334_v54, %v18849_v50  ;;  %v6976_v13 = vrot.slane %v6974_v9, 4  ;;  %v6979_v21 = vrot.slane %v6977_v51, 5  ;;  %v7001_v18 = vshrl.u32 %v6254_v19, 16  ;;  %v21713_v50 = vld [vmem:[#allocation59_spill] sm:$0xff]  ;;  %v21716_v9 = vld [vmem:[#allocation54_spill] sm:$0xff] }
 0x502   :  { %v18979_v12 = vsel %vm6828_vm13, %v7133_v23, %v18970_v5  ;;  %v7004_v1 = vshll.u32 %v6254_v19, 16  ;;  %v6963_v44 = vsel %vm6828_vm13, %v6935_v40, %v6962_v32  ;;  %v6989_v38 = vor.u32 %v6988_v7, %v6985_v47  ;;  %v21717_v7 = vld [vmem:[#allocation100_spill] sm:$0xff] }
 0x503   :  { %7226 = vmatpush1.bf16.msra.mxu0 %v6927_v43  ;;  %v6108_v61 = vsel %vm1894_vm10, %v6051_v63, %v5496_v15  ;;  %v6980_v22 = vor.u32 %v6979_v21, %v6976_v13  ;;  %v6954_v62 = vsel %vm6828_vm13, %v6926_v20, %v6953_v41  ;;  %v7003_v6 = vrot.slane %v7001_v18, 4  ;;  %v19009_v43 = vld [vmem:[%s20699_s8 + $0x4] ss:$8 sps:$4 sm:$0xff]  }
 0x504   :  { %7227 = vmatprep.subr.bf16.mxu0 %v6963_v44  ;;  %v7006_v40 = vrot.slane %v7004_v1, 5  ;;  %v6990_v34 = vsel %vm6828_vm13, %v6962_v32, %v6989_v38  ;;  %v6054_v26 = vsel %vm1841_vm9, %v21717_v7, %v18912_v29  ;;  %v21718_v63 = vld [vmem:[#allocation58_spill] sm:$0xff] }
 0x505   :  { %v5009_v39 = vpop.permute.xlu1 %5008  ;;  %v5771_v52 = vpop.permute.xlu0 %5770  ;;  %v6981_v30 = vsel %vm6828_vm13, %v6953_v41, %v6980_v22 }
 0x506   :  { %v5851_v17 = vsel %vm1841_vm9, %v21539_v33, %v5009_v39  ;;  %v6178_v23 = vsel %vm1947_vm11, %v6108_v61, %v5771_v52  ;;  %6801 = vmatmul.mubr.bf16.gmra.mrb[124].mxu0 %v21714_v4  ;;  %v21715_v33 = vld [vmem:[#allocation27_spill] sm:$0xff]  ;;  %v7007_v56 = vor.u32 %v7006_v40, %v7003_v6  ;;  %v21719_v39 = vld [vmem:[#allocation14_spill] sm:$0xff] }
 0x507   :  { %v6255_v24 = vmul.bf16 %v6178_v23, %v21713_v50  ;;  %7228 = vmatpush1.bf16.msra.mxu0 %v6954_v62  ;;  %v5903_v57 = vsel %vm1894_vm10, %v5851_v17, %v5136_v25  ;;  %11403 = vmatprep.mubr.msk.bf16.mxu0 %vm6659_vm12, %v21715_v33  ;;  %v21720_v6 = vld [vmem:[#allocation62_spill] sm:$0xff] }
 0x508   :  { %7229 = vmatprep.subr.bf16.mxu0 %v6990_v34  ;;  %v7008_v54 = vsel %vm6828_vm13, %v6980_v22, %v7007_v56 }
 0x509   :  { %v5265_v60 = vpop.permute.xlu1 %5264  ;;  %v7010_v14 = vshrl.u32 %v6255_v24, 16  ;;  %v7013_v42 = vshll.u32 %v6255_v24, 16 }
 0x50a   :  { %v5975_v58 = vsel %vm1947_vm11, %v5903_v57, %v5265_v60  ;;  %v18996_v10 = vpop.permute.xlu0 %5400 }
 0x50b   :  { %v7012_v0 = vrot.slane %v7010_v14, 4  ;;  %v7015_v20 = vrot.slane %v7013_v42, 5  ;;  %v6257_v51 = vmul.bf16 %v5975_v58, %v21716_v9  ;;  %7230 = vmatpush1.bf16.msra.mxu0 %v6981_v30  ;;  %v21721_v58 = vld [vmem:[#allocation22_spill] sm:$0xff] }
 0x50d   :  { %v5138_v28 = vpop.permute.xlu1 %5137  ;;  %v7016_v2 = vor.u32 %v7015_v20, %v7012_v0  ;;  %v7028_v19 = vshrl.u32 %v6257_v51, 16  ;;  %v7031_v15 = vshll.u32 %v6257_v51, 16  ;;  %v6057_v0 = vsel %vm1841_vm9, %v21721_v58, %v18963_v37  ;;  %v21723_v37 = vld [vmem:[#allocation61_spill] sm:$0xff] }
 0x50e   :  { %v5498_v25 = vpop.permute.xlu0 %5497  ;;  %6809 = vmatmul.mubr.bf16.gmra.mrb[128].mxu0 %v18727_v35 }
 0x50f   :  { %v7017_v47 = vsel %vm6828_vm13, %v6989_v38, %v7016_v2  ;;  %11405 = vmatprep.mubr.msk.bf16.mxu0 %vm6659_vm12, %v19009_v43  ;;  %v6110_v41 = vsel %vm1894_vm10, %v6054_v26, %v5498_v25  ;;  %v7030_v44 = vrot.slane %v7028_v19, 4  ;;  %v7033_v38 = vrot.slane %v7031_v15, 5 }
 0x510   :  { %7231 = vmatprep.subr.bf16.mxu0 %v7017_v47 }
 0x511   :  { %v5011_v32 = vpop.permute.xlu1 %5010  ;;  %7232 = vmatpush1.bf16.msra.mxu0 %v7008_v54  ;;  %v7034_v60 = vor.u32 %v7033_v38, %v7030_v44 }
 0x512   :  { %v5853_v13 = vsel %vm1841_vm9, %v21718_v63, %v5011_v32  ;;  %v5773_v29 = vpop.permute.xlu0 %5772  ;;  %v21722_v32 = vld [vmem:[#allocation18_spill] sm:$0xff] }
 0x513   :  { %v6181_v21 = vsel %vm1947_vm11, %v6110_v41, %v5773_v29  ;;  %v5905_v61 = vsel %vm1894_vm10, %v5853_v13, %v5138_v28  ;;  %v7035_v28 = vsel %vm6828_vm13, %v7007_v56, %v7034_v60 }
 0x514   :  { %v6258_v18 = vmul.bf16 %v6181_v21, %v21719_v39 }
 0x515   :  { %v5267_v1 = vpop.permute.xlu1 %5266 }
 0x516   :  { %v7037_v17 = vshrl.u32 %v6258_v18, 16  ;;  %v7040_v52 = vshll.u32 %v6258_v18, 16  ;;  %v5978_v23 = vsel %vm1947_vm11, %v5905_v61, %v5267_v1  ;;  %v19020_v22 = vpop.permute.xlu0 %5402  ;;  %v21724_v61 = vld [vmem:[#allocation25_spill] sm:$0xff] }
 0x517   :  { %v6260_v40 = vmul.bf16 %v5978_v23, %v21720_v6  ;;  %v21725_v23 = vld [vmem:[#allocation23_spill] sm:$0xff]  ;;  %v21726_v6 = vld [vmem:[#allocation13_spill] sm:$0xff] }
 0x518   :  { %v7039_v50 = vrot.slane %v7037_v17, 4  ;;  %v7042_v24 = vrot.slane %v7040_v52, 5  ;;  %v5348_v17 = vshrl.u32 %v21724_v61, 16 }
 0x519   :  { %v5140_v62 = vpop.permute.xlu1 %5139  ;;  %v7055_v20 = vshrl.u32 %v6260_v40, 16  ;;  %v7058_v30 = vshll.u32 %v6260_v40, 16 }
 0x51a   :  { %v5500_v57 = vpop.permute.xlu0 %5499  ;;  %v7043_v34 = vor.u32 %v7042_v24, %v7039_v50 }
 0x51b   :  { %v6112_v9 = vsel %vm1894_vm10, %v6057_v0, %v5500_v57  ;;  %v7057_v26 = vrot.slane %v7055_v20, 4  ;;  %v5350_v57 = vrot.slane %v5348_v17, 7  ;;  %v5351_v20 = vshll.u32 %v21724_v61, 16  ;;  %v21734_v61 = vld [vmem:[#allocation36_spill] sm:$0xff] }
 0x51c   :  { %v7044_v42 = vsel %vm6828_vm13, %v7016_v2, %v7043_v34  ;;  %v7060_v2 = vrot.slane %v7058_v30, 5 }
 0x51d   :  { %v5013_v14 = vpop.permute.xlu1 %5012  ;;  %7233 = vmatprep.subr.bf16.mxu0 %v7044_v42 }
 0x51e   :  { %7234 = vmatpush1.bf16.msra.mxu0 %v7035_v28  ;;  %v5775_v51 = vpop.permute.xlu0 %5774  ;;  %v5855_v41 = vsel %vm1841_vm9, %v21723_v37, %v5013_v14  ;;  %v19033_v29 = vor.u32 %v7060_v2, %v7057_v26  ;;  %v21730_v37 = vld [vmem:[#allocation66_spill] sm:$0xff] }
 0x51f   :  { %v6184_v25 = vsel %vm1947_vm11, %v6112_v9, %v5775_v51  ;;  %v5907_v18 = vsel %vm1894_vm10, %v5855_v41, %v5140_v62  ;;  %v21728_v9 = vld [vmem:[#allocation21_spill] sm:$0xff] }
 0x520   :  { %v6261_v47 = vmul.bf16 %v6184_v25, %v21722_v32  ;;  %v7062_v52 = vsel %vm6828_vm13, %v7034_v60, %v19033_v29  ;;  %v21727_v60 = vld [vmem:[#allocation103_spill] sm:$0xff]  ;;  %v21729_v25 = vld [vmem:[#allocation92_spill] sm:$0xff] }
 0x521   :  { %v5269_v7 = vpop.permute.xlu1 %5268  ;;  %v6060_v28 = vsel %vm1841_vm9, %v21727_v60, %v18996_v10  ;;  %v6068_v32 = vsel %vm1841_vm9, %v5350_v57, %v21729_v25  ;;  %v21732_v10 = vld [vmem:[#allocation98_spill] sm:$0xff] }
 0x522   :  { %v7064_v19 = vshrl.u32 %v6261_v47, 16  ;;  %v7067_v15 = vshll.u32 %v6261_v47, 16  ;;  %v5405_v54 = vpop.permute.xlu0 %5404  ;;  %v5981_v1 = vsel %vm1947_vm11, %v5907_v18, %v5269_v7  ;;  %v5353_v47 = vor.u32 %v5351_v20, %v5350_v57 }
 0x523   :  { %v6263_v40 = vmul.bf16 %v5981_v1, %v21726_v6  ;;  %v6063_v18 = vsel %vm1841_vm9, %v21732_v10, %v19020_v22  ;;  %v21739_v10 = vld [vmem:[#allocation88_spill] sm:$0xff] }
 0x524   :  { %v7066_v63 = vrot.slane %v7064_v19, 4  ;;  %v7069_v13 = vrot.slane %v7067_v15, 5  ;;  %v5354_v17 = vsel %vm1292_vm6, %v21734_v61, %v5353_v47  ;;  %v21737_v47 = vld [vmem:[#allocation16_spill] sm:$0xff] }
 0x525   :  { %v5142_v56 = vpop.permute.xlu1 %5141  ;;  %v7082_v58 = vshrl.u32 %v6263_v40, 16  ;;  %v7085_v0 = vshll.u32 %v6263_v40, 16 }
 0x526   :  { %v5502_v21 = vpop.permute.xlu0 %5501  ;;  %v19035_v39 = vor.u32 %v7069_v13, %v7066_v63  ;;  %v21731_v13 = vld [vmem:[#allocation78_spill] sm:$0xff] }
 0x527   :  { %v6114_v7 = vsel %vm1894_vm10, %v6060_v28, %v5502_v21  ;;  %v7084_v2 = vrot.slane %v7082_v58, 4  ;;  %v7087_v19 = vrot.slane %v7085_v0, 5  ;;  %v21736_v0 = vld [vmem:[#allocation28_spill] sm:$0xff] }
 0x528   :  { %v7071_v38 = vsel %vm6828_vm13, %v7043_v34, %v19035_v39 }
 0x529   :  { %v5015_v44 = vpop.permute.xlu1 %5014  ;;  %7235 = vmatprep.subr.bf16.mxu0 %v7071_v38  ;;  %v21733_v38 = vld [vmem:[#allocation9_spill] sm:$0xff]  ;;  %v7088_v40 = vor.u32 %v7087_v19, %v7084_v2 }
 0x52a   :  { %v5857_v50 = vsel %vm1841_vm9, %v21725_v23, %v5015_v44  ;;  %7236 = vmatpush1.bf16.msra.mxu0 %v7062_v52  ;;  %v5504_v24 = vpop.permute.xlu0 %5503 }
 0x52b   :  { %v5909_v14 = vsel %vm1894_vm10, %v5857_v50, %v5142_v56  ;;  %v6119_v56 = vsel %vm1894_vm10, %v6068_v32, %v21731_v13  ;;  %v6116_v52 = vsel %vm1894_vm10, %v6063_v18, %v5504_v24 }
 0x52d   :  { %v5271_v62 = vpop.permute.xlu1 %5270 }
 0x52e   :  { %v5984_v42 = vsel %vm1947_vm11, %v5909_v14, %v5271_v62  ;;  %v5506_v34 = vpop.permute.xlu0 %5505  ;;  %v6066_v62 = vsel %vm1841_vm9, %v5354_v17, %v5405_v54  ;;  %v21735_v14 = vld [vmem:[#allocation74_spill] sm:$0xff] }
 0x52f   :  { %v6266_v51 = vmul.bf16 %v5984_v42, %v21728_v9  ;;  %v6195_v22 = vsel %vm1947_vm11, %v6119_v56, %v21735_v14 }
 0x530   :  { %v6273_v18 = vmul.bf16 %v6195_v22, %v21739_v10  ;;  %v12738_v10 = vld [vmem:[%s20697_s6 + $0x28] sm:$0xff]  }
 0x531   :  { %v5144_v30 = vpop.permute.xlu1 %5143  ;;  %v7109_v1 = vshrl.u32 %v6266_v51, 16  ;;  %v7112_v44 = vshll.u32 %v6266_v51, 16  ;;  %v6118_v51 = vsel %vm1894_vm10, %v6066_v62, %v5506_v34  ;;  %v7089_v34 = vsel %vm6828_vm13, %v19033_v29, %v7088_v40 }
 0x532   :  { %v5777_v26 = vpop.permute.xlu0 %5776  ;;  %v7168_v29 = vshll.u32 %v6273_v18, 16  ;;  %v12739_v18 = vld [vmem:[%s20697_s6 + $0x70] sm:$0xff]  }
 0x533   :  { %v6187_v15 = vsel %vm1947_vm11, %v6114_v7, %v5777_v26  ;;  %v7111_v9 = vrot.slane %v7109_v1, 4  ;;  %v7114_v24 = vrot.slane %v7112_v44, 5 }
 0x534   :  { %v6264_v41 = vmul.bf16 %v6187_v15, %v21730_v37 }
 0x535   :  { %v5017_v63 = vpop.permute.xlu1 %5016  ;;  %v7115_v1 = vor.u32 %v7114_v24, %v7111_v9  ;;  %v7170_v24 = vrot.slane %v7168_v29, 5 }
 0x536   :  { %v5859_v21 = vsel %vm1841_vm9, %v21733_v38, %v5017_v63  ;;  %v7091_v23 = vshrl.u32 %v6264_v41, 16  ;;  %v7094_v50 = vshll.u32 %v6264_v41, 16  ;;  %v5779_v6 = vpop.permute.xlu0 %5778 }
 0x537   :  { %v6190_v57 = vsel %vm1947_vm11, %v6116_v52, %v5779_v6  ;;  %v5911_v60 = vsel %vm1894_vm10, %v5859_v21, %v5144_v30  ;;  %v21738_v30 = vld [vmem:[#allocation90_spill] sm:$0xff]  ;;  %v7116_v22 = vsel %vm6828_vm13, %v7088_v40, %v7115_v1 }
 0x538   :  { %v7093_v42 = vrot.slane %v7091_v23, 4  ;;  %v7096_v58 = vrot.slane %v7094_v50, 5  ;;  %v6267_v20 = vmul.bf16 %v6190_v57, %v21736_v0  ;;  %v21740_v23 = vld [vmem:[#allocation6_spill] sm:$0xff] }
 0x539   :  { %v5273_v28 = vpop.permute.xlu1 %5272 }
 0x53a   :  { %v5987_v25 = vsel %vm1947_vm11, %v5911_v60, %v5273_v28  ;;  %v7118_v32 = vshrl.u32 %v6267_v20, 16  ;;  %v7121_v54 = vshll.u32 %v6267_v20, 16  ;;  %v5781_v26 = vpop.permute.xlu0 %5780  ;;  %v7097_v2 = vor.u32 %v7096_v58, %v7093_v42  ;;  %v21741_v60 = vld [vmem:[#allocation57_spill] sm:$0xff] }
 0x53b   :  { %v6269_v7 = vmul.bf16 %v5987_v25, %v21737_v47  ;;  %v6193_v19 = vsel %vm1947_vm11, %v6118_v51, %v5781_v26 }
 0x53c   :  { %v7120_v15 = vrot.slane %v7118_v32, 4  ;;  %v7123_v37 = vrot.slane %v7121_v54, 5  ;;  %v6270_v13 = vmul.bf16 %v6193_v19, %v21738_v30  ;;  %v7098_v56 = vsel %vm6828_vm13, %v19035_v39, %v7097_v2  ;;  %v21745_v30 = vld [vmem:[#allocation43_spill] sm:$0xff] }
 0x53d   :  { %v7136_v41 = vshrl.u32 %v6269_v7, 16  ;;  %v7139_v63 = vshll.u32 %v6269_v7, 16  ;;  %7237 = vmatprep.subr.bf16.mxu0 %v7098_v56  ;;  %v5146_v57 = vpop.permute.xlu1 %5145  ;;  %v21742_v54 = vshrl.u32 %v18669_v45, 16  ;;  %v21743_v7 = vshll.u32 %v18669_v45, 16  ;;  %v12936_v45 = vld [vmem:[%s20699_s8 + $0x14] ss:$8 sps:$4 sm:$0xff]  }
 0x53e   :  { %v5019_v21 = vpop.permute.xlu0 %5018  ;;  %v7124_v61 = vor.u32 %v7123_v37, %v7120_v15  ;;  %v7145_v17 = vshrl.u32 %v6270_v13, 16  ;;  %v7148_v52 = vshll.u32 %v6270_v13, 16  ;;  %7238 = vmatpush1.bf16.msra.mxu0 %v7089_v34  ;;  %v12935_v37 = vld [vmem:[%s20699_s8] ss:$8 sps:$4 sm:$0xff]  }
 0x53f   :  { %v7138_v44 = vrot.slane %v7136_v41, 4  ;;  %v7141_v38 = vrot.slane %v7139_v63, 5  ;;  %v5861_v50 = vsel %vm1841_vm9, %v21740_v23, %v5019_v21  ;;  %v6853_v47 = vrot.slane %v21742_v54, 4  ;;  %v21744_v41 = vld [vmem:[#allocation39_spill] sm:$0xff]  ;;  %v12736_v13 = vld [vmem:[%s20697_s6 + $0x20] sm:$0xff]   ;;  %v12737_v56 = vld [vmem:[%s20697_s6 + $0x68] sm:$0xff]  }
 0x540   :  { %v7125_v6 = vsel %vm6828_vm13, %v7097_v2, %v7124_v61  ;;  %v7147_v39 = vrot.slane %v7145_v17, 4  ;;  %v7150_v62 = vrot.slane %v7148_v52, 5  ;;  %v5913_v58 = vsel %vm1894_vm10, %v5861_v50, %v5146_v57  ;;  %v12939_v34 = vld [vmem:[%s20699_s8 + $0x20] ss:$8 sps:$4 sm:$0xff]   ;;  %v12742_v23 = vld [vmem:[%s20697_s6 + $0x38] sm:$0xff]  }
 0x541   :  { %7239 = vmatprep.subr.bf16.mxu0 %v7125_v6  ;;  %v7142_v14 = vor.u32 %v7141_v38, %v7138_v44  ;;  %v6854_v26 = vrot.slane %v21743_v7, 5  ;;  %v12740_v44 = vld [vmem:[%s20697_s6 + $0x30] sm:$0xff]  }
 0x542   :  { %v5275_v42 = vpop.permute.xlu0 %5274  ;;  %7240 = vmatpush1.bf16.msra.mxu0 %v7116_v22  ;;  %v7151_v20 = vor.u32 %v7150_v62, %v7147_v39  ;;  %v21747_v62 = vmov 0.0  }
 0x543   :  { %v5990_v0 = vsel %vm1947_vm11, %v5913_v58, %v5275_v42  ;;  %v7143_v25 = vsel %vm6828_vm13, %v7115_v1, %v7142_v14  ;;  %v6855_v15 = vor.u32 %v6854_v26, %v6853_v47 }
 0x544   :  { %v6272_v28 = vmul.bf16 %v5990_v0, %v21741_v60  ;;  %v7152_v9 = vsel %vm6828_vm13, %v7124_v61, %v7151_v20  ;;  %v7171_v32 = vsel %vm6828_vm13, %v7151_v20, %v7170_v24 }
 0x545   :  { %7241 = vmatprep.subr.bf16.mxu0 %v7152_v9  ;;  %v6864_v63 = vsel %vm6828_vm13, %v6855_v15, %v21744_v41  ;;  %v12743_v9 = vld [vmem:[%s20697_s6 + $0x80] sm:$0xff]  }
 0x546   :  { %v7163_v51 = vshll.u32 %v6272_v28, 16  ;;  %7242 = vmatpush1.bf16.msra.mxu0 %v7143_v25  ;;  %v12744_v25 = vld [vmem:[%s20697_s6 + $0x88] sm:$0xff]  }
 0x547   :  { %11404 = vmatprep.subr.msk.bf16.mxu0 %vm329_vm0, %v7171_v32 }
 0x548   :  { %v7165_v40 = vrot.slane %v7163_v51, 5 }
 0x54a   :  { %v7166_v2 = vsel %vm6828_vm13, %v7142_v14, %v7165_v40 }
 0x54b   :  { %v7211_v19 = vsel %vm329_vm0, %v7166_v2, 0 }
 0x54c   :  { %7244 = vmatpush1.bf16.msra.mxu0 %v7211_v19 }
 0x54d   :  { %7290 = vmatprep.subr.bf16.mxu0 %v21627_v46 }
 0x54f   :  { %7252 = vmatmul.mubr.bf16.vlgmr.msra.gmra.mrb[132].mxu0 %v12935_v37 }
 0x550   :  { %7291 = vmatpush1.bf16.msra.mxu0 %v6864_v63  ;;  %11406 = vmatprep.mubr.msk.bf16.mxu0 %vm6659_vm12, %v12936_v45 }
 0x551   :  { %7292 = vmatprep.subr.bf16.mxu0 %v21627_v46 }
 0x554   :  { %7293 = vmatpush1.bf16.msra.mxu0 %v21745_v30 }
 0x555   :  { %7294 = vmatprep.subr.bf16.mxu0 %v21627_v46 }
 0x557   :  { %7262 = vmatmul.mubr.bf16.gmra.mrb[136].mxu0 %v21710_v53  ;;  %v12732_v53 = vld [vmem:[%s20697_s6 + $0x10] sm:$0xff]  }
 0x558   :  { %7295 = vmatpush1.bf16.msra.mxu0 %v18731_v49  ;;  %11407 = vmatprep.mubr.msk.bf16.mxu0 %vm6659_vm12, %v21712_v48  ;;  %v21746_v49 = vld [vmem:[#allocation49_spill] sm:$0xff]  ;;  %v12733_v48 = vld [vmem:[%s20697_s6 + $0x58] sm:$0xff]  }
 0x559   :  { %7296 = vmatprep.subr.bf16.mxu0 %v21627_v46 }
 0x55c   :  { %7297 = vmatpush1.bf16.msra.mxu0 %v18752_v59  ;;  %v7172_v59 = vrot.slane %v21746_v49, 5 }
 0x55d   :  { %7298 = vmatprep.subr.bf16.mxu0 %v21627_v46 }
 0x55f   :  { %7272 = vmatmul.mubr.bf16.gmra.mrb[140].mxu0 %v21714_v4  ;;  %v12734_v4 = vld [vmem:[%s20697_s6 + $0x18] sm:$0xff]  }
 0x560   :  { %7299 = vmatpush1.bf16.msra.mxu0 %v18805_v27  ;;  %11408 = vmatprep.mubr.msk.bf16.mxu0 %vm6659_vm12, %v21715_v33  ;;  %v7173_v27 = vsel %vm6828_vm13, %v18970_v5, %v7172_v59  ;;  %v12937_v5 = vld [vmem:[%s20699_s8 + $0x10] ss:$8 sps:$4 sm:$0xff]  }
 0x561   :  { %7300 = vmatprep.subr.bf16.mxu0 %v21627_v46 }
 0x564   :  { %7301 = vmatpush1.bf16.msra.mxu0 %v18820_v11  ;;  %v12727_v11 = vld [vmem:[%s20697_s6 + $0x40] sm:$0xff]  }
 0x565   :  { %7302 = vmatprep.subr.bf16.mxu0 %v21627_v46 }
 0x567   :  { %7282 = vmatmul.mubr.bf16.gmra.mrb[144].mxu0 %v18727_v35 }
 0x568   :  { %7303 = vmatpush1.bf16.msra.mxu0 %v18868_v16  ;;  %11409 = vmatprep.mubr.msk.bf16.mxu0 %vm6659_vm12, %v19009_v43  ;;  %v7217_v16 = vsel %vm329_vm0, %v7173_v27, 0  ;;  %v12735_v43 = vld [vmem:[%s20697_s6 + $0x60] sm:$0xff]  }
 0x569   :  { %7304 = vmatprep.subr.bf16.mxu0 %v21627_v46 }
 0x56c   :  { %7305 = vmatpush1.bf16.msra.mxu0 %v18880_v36  ;;  %v12728_v36 = vld [vmem:[%s20697_s6] sm:$0xff]  }
 0x56d   :  { %7306 = vmatprep.subr.bf16.mxu0 %v21627_v46 }
 0x570   :  { %7307 = vmatpush1.bf16.msra.mxu0 %v18901_v55  ;;  %v12729_v55 = vld [vmem:[%s20697_s6 + $0x48] sm:$0xff]  }
 0x571   :  { %7308 = vmatprep.subr.bf16.mxu0 %v21627_v46 }
 0x574   :  { %7309 = vmatpush1.bf16.msra.mxu0 %v18921_v3  ;;  %v12730_v3 = vld [vmem:[%s20697_s6 + $0x8] sm:$0xff]  }
 0x575   :  { %7310 = vmatprep.subr.bf16.mxu0 %v21627_v46 }
 0x578   :  { %7311 = vmatpush1.bf16.msra.mxu0 %v18960_v31  ;;  %v12731_v31 = vld [vmem:[%s20697_s6 + $0x50] sm:$0xff]  }
 0x579   :  { %7312 = vmatprep.subr.bf16.mxu0 %v21627_v46 }
 0x57c   :  { %7313 = vmatpush1.bf16.msra.mxu0 %v18979_v12  ;;  %v12938_v12 = vld [vmem:[%s20699_s8 + $0x24] ss:$8 sps:$4 sm:$0xff]  }
 0x57d   :  { %7314 = vmatprep.subr.bf16.mxu0 %v21627_v46 }
 0x580   :  { %7315 = vmatpush1.bf16.msra.mxu0 %v7217_v16 }
 0x581   :  { %11703 = vmatprep.subr.bf16.mxu0 %v12727_v11 }
 0x583   :  { %7323 = vmatmul.mubr.bf16.vlgmr.msra.gmra.mrb[148].mxu0 %v12935_v37 }
 0x584   :  { %11410 = vmatprep.mubr.msk.bf16.mxu0 %vm6659_vm12, %v12936_v45  ;;  %11704 = vmatpush3.bf16.msra.mxu0 %v12728_v36  ;;  %v12745_v36 = vld [vmem:[%s20701_s10 + $0x40] sm:$0xff]  }
 0x585   :  { %11705 = vmatprep.subr.bf16.mxu0 %v12729_v55  ;;  %v12746_v55 = vld [vmem:[%s20701_s10] sm:$0xff]   ;;  %11770 = vmatprep.subr.bf16.mxu1 %v12745_v36 }
 0x586   :  { %11771 = vmatpush3.bf16.msra.mxu1 %v12746_v55 }
 0x588   :  { %11706 = vmatpush3.bf16.msra.mxu0 %v12730_v3 }
 0x589   :  { %11707 = vmatprep.subr.bf16.mxu0 %v12731_v31 }
 0x58b   :  { %7331 = vmatmul.mubr.bf16.gmra.mrb[152].mxu0 %v12937_v5 }
 0x58c   :  { %11411 = vmatprep.mubr.msk.bf16.mxu0 %vm6659_vm12, %v12938_v12  ;;  %11708 = vmatpush3.bf16.msra.mxu0 %v12732_v53 }
 0x58d   :  { %11709 = vmatprep.subr.bf16.mxu0 %v12733_v48 }
 0x590   :  { %11710 = vmatpush3.bf16.msra.mxu0 %v12734_v4 }
 0x591   :  { %11711 = vmatprep.subr.bf16.mxu0 %v12735_v43 }
 0x593   :  { %7339 = vmatmul.mubr.bf16.gmra.mrb[156].mxu0 %v12939_v34 }
 0x594   :  { %11412 = vmatprep.mubr.msk.bf16.mxu0 %vm6659_vm12, %v21715_v33  ;;  %11712 = vmatpush3.bf16.msra.mxu0 %v12736_v13  ;;  %v12741_v33 = vld [vmem:[%s20697_s6 + $0x78] sm:$0xff]  }
 0x595   :  { %11713 = vmatprep.subr.bf16.mxu0 %v12737_v56  ;;  %v6715_v1 = vpop.f32.mrb[100].mxu0 }
 0x596   :  { %v6717_v38 = vpop.f32.mrb[101].mxu0 }
 0x597   :  { %v6719_v21 = vpop.f32.mrb[102].mxu0 }
 0x598   :  { %11714 = vmatpush3.bf16.msra.mxu0 %v12738_v10  ;;  %v6816_v61 = vpack.c.bf16 %v6719_v21, %v6715_v1  ;;  %v6721_v17 = vpop.f32.mrb[103].mxu0 }
 0x599   :  { %11715 = vmatprep.subr.bf16.mxu0 %v12739_v18  ;;  %v6817_v52 = vpack.c.bf16 %v6721_v17, %v6717_v38 }
 0x59b   :  { %7347 = vmatmul.mubr.bf16.gmra.mrb[160].mxu0 %v18727_v35 }
 0x59c   :  { %11716 = vmatpush3.bf16.msra.mxu0 %v12740_v44  ;;  %7620 = vmatprep.mubr.bf16.mxu0 %v6817_v52 }
 0x59d   :  { %11717 = vmatprep.subr.bf16.mxu0 %v12741_v33  ;;  %v6725_v50 = vpop.f32.mrb[104].mxu0 }
 0x59e   :  { %v6727_v6 = vpop.f32.mrb[105].mxu0 }
 0x59f   :  { %v6729_v39 = vpop.f32.mrb[106].mxu0 }
 0x5a0   :  { %11718 = vmatpush3.bf16.msra.mxu0 %v12742_v23  ;;  %v6819_v57 = vpack.c.bf16 %v6729_v39, %v6725_v50  ;;  %v6731_v29 = vpop.f32.mrb[107].mxu0 }
 0x5a1   :  { %12292 = vmatprep.subr.bf16.mxu0 %v21747_v62  ;;  %v6820_v14 = vpack.c.bf16 %v6731_v29, %v6727_v6 }
 0x5a3   :  { %7621 = vmatmul.mubr.bf16.vlgmr.msra.gmra.mrb[164].mxu0 %v6816_v61 }
 0x5a4   :  { %7628 = vmatprep.mubr.bf16.mxu0 %v6820_v14  ;;  %12293 = vmatpush3.bf16.msra.mxu0 %v12743_v9 }
 0x5a5   :  { %v6735_v35 = vpop.f32.mrb[108].mxu0  ;;  %12294 = vmatprep.subr.bf16.mxu0 %v21747_v62 }
 0x5a6   :  { %v6737_v22 = vpop.f32.mrb[109].mxu0 }
 0x5a7   :  { %v6739_v42 = vpop.f32.mrb[110].mxu0 }
 0x5a8   :  { %v6822_v58 = vpack.c.bf16 %v6739_v42, %v6735_v35  ;;  %v6741_v0 = vpop.f32.mrb[111].mxu0  ;;  %12295 = vmatpush3.bf16.msra.mxu0 %v12744_v25 }
 0x5a9   :  { %v6823_v20 = vpack.c.bf16 %v6741_v0, %v6737_v22 }
 0x5ab   :  { %7629 = vmatmul.mubr.bf16.gmra.mrb[168].mxu0 %v6819_v57 }
 0x5ac   :  { %7636 = vmatprep.mubr.bf16.mxu0 %v6823_v20 }
 0x5ad   :  { %v6745_v60 = vpop.f32.mrb[112].mxu0 }
 0x5ae   :  { %v6747_v28 = vpop.f32.mrb[113].mxu0  ;;  %v6825_v4 = vpack.c.bf16 %v6745_v60, %v6745_v60 }
 0x5af   :  { %v6749_v24 = vpop.f32.mrb[114].mxu0  ;;  %v6826_v13 = vpack.c.bf16 %v6747_v28, %v6747_v28 }
 0x5b0   :  { %v6750_v51 = vpop.f32.mrb[115].mxu0 }
 0x5b3   :  { %7637 = vmatmul.mubr.bf16.gmra.mrb[172].mxu0 %v6822_v58 }
 0x5c9   :  { %v19218_v32 = vpop.f32.mrb[116].mxu0 }
 0x5ca   :  { %v6788_v40 = vpop.f32.mrb[117].mxu0 }
 0x5cb   :  { %v19220_v54 = vpop.f32.mrb[118].mxu0 }
 0x5cc   :  { %v6818_v47 = vpack.c.bf16 %v19220_v54, %v19218_v32  ;;  %v6791_v7 = vpop.f32.mrb[119].mxu0 }
 0x5d1   :  { %v19224_v26 = vpop.f32.mrb[120].mxu0 }
 0x5d2   :  { %v6796_v2 = vpop.f32.mrb[121].mxu0 }
 0x5d3   :  { %v19226_v19 = vpop.f32.mrb[122].mxu0 }
 0x5d4   :  { %v6821_v15 = vpack.c.bf16 %v19226_v19, %v19224_v26  ;;  %v6799_v37 = vpop.f32.mrb[123].mxu0 }
 0x5d9   :  { %v19230_v41 = vpop.f32.mrb[124].mxu0 }
 0x5da   :  { %v6804_v63 = vpop.f32.mrb[125].mxu0 }
 0x5db   :  { %v19232_v45 = vpop.f32.mrb[126].mxu0 }
 0x5dc   :  { %v6824_v30 = vpack.c.bf16 %v19232_v45, %v19230_v41  ;;  %v6807_v49 = vpop.f32.mrb[127].mxu0 }
 0x5e1   :  { %v19236_v59 = vpop.f32.mrb[128].mxu0 }
 0x5e2   :  { %v6812_v27 = vpop.f32.mrb[129].mxu0  ;;  %v6827_v32 = vpack.c.bf16 %v19236_v59, %v19236_v59 }
 0x5e3   :  { %v6813_v11 = vpop.f32.mrb[130].mxu0 }
 0x5e4   :  { %v6814_v16 = vpop.f32.mrb[131].mxu0 }
 0x622   :  { %v7253_v3 = vpop.f32.mrb[132].mxu0 }
 0x623   :  { %v7255_v31 = vpop.f32.mrb[133].mxu0 }
 0x624   :  { %v7257_v53 = vpop.f32.mrb[134].mxu0 }
 0x625   :  { %v7354_v48 = vpack.c.bf16 %v7257_v53, %v7253_v3  ;;  %v7259_v5 = vpop.f32.mrb[135].mxu0 }
 0x626   :  { %v7355_v12 = vpack.c.bf16 %v7259_v5, %v7255_v31 }
 0x627   :  { %v7379_v43 = vrot.slane %v7354_v48, 4 }
 0x628   :  { %v7380_v56 = vrot.slane %v7355_v12, 4 }
 0x629   :  { %v7408_v34 = vsel %vm329_vm0, %v6825_v4, %v7379_v43 }
 0x62a   :  { %v7263_v10 = vpop.f32.mrb[136].mxu0  ;;  %v7412_v18 = vsel %vm329_vm0, %v6826_v13, %v7380_v56 }
 0x62b   :  { %v7265_v1 = vpop.f32.mrb[137].mxu0  ;;  %7644 = vmatprep.mubr.bf16.mxu0 %v7412_v18 }
 0x62c   :  { %v7267_v44 = vpop.f32.mrb[138].mxu0  ;;  %7645 = vmatmul.mubr.bf16.gmra.mrb[176].mxu0 %v7408_v34 }
 0x62d   :  { %v7357_v38 = vpack.c.bf16 %v7267_v44, %v7263_v10  ;;  %v7269_v21 = vpop.f32.mrb[139].mxu0 }
 0x62e   :  { %v7358_v33 = vpack.c.bf16 %v7269_v21, %v7265_v1 }
 0x62f   :  { %v7382_v61 = vrot.slane %v7357_v38, 4 }
 0x630   :  { %v7384_v17 = vrot.slane %v7358_v33, 4 }
 0x631   :  { %v7383_v52 = vsel %vm329_vm0, %v7379_v43, %v7382_v61 }
 0x632   :  { %v7273_v23 = vpop.f32.mrb[140].mxu0  ;;  %v7385_v50 = vsel %vm329_vm0, %v7380_v56, %v7384_v17 }
 0x633   :  { %v7275_v6 = vpop.f32.mrb[141].mxu0  ;;  %7652 = vmatprep.mubr.bf16.mxu0 %v7385_v50 }
 0x634   :  { %v7277_v39 = vpop.f32.mrb[142].mxu0  ;;  %7653 = vmatmul.mubr.bf16.gmra.mrb[180].mxu0 %v7383_v52 }
 0x635   :  { %v7360_v57 = vpack.c.bf16 %v7277_v39, %v7273_v23  ;;  %v7279_v29 = vpop.f32.mrb[143].mxu0 }
 0x636   :  { %v7361_v14 = vpack.c.bf16 %v7279_v29, %v7275_v6 }
 0x637   :  { %v7388_v35 = vrot.slane %v7360_v57, 4 }
 0x638   :  { %v7390_v22 = vrot.slane %v7361_v14, 4 }
 0x639   :  { %v7389_v42 = vsel %vm329_vm0, %v7382_v61, %v7388_v35 }
 0x63a   :  { %v7283_v58 = vpop.f32.mrb[144].mxu0  ;;  %v7391_v0 = vsel %vm329_vm0, %v7384_v17, %v7390_v22 }
 0x63b   :  { %v7363_v20 = vpack.c.bf16 %v7283_v58, %v7283_v58  ;;  %v7285_v60 = vpop.f32.mrb[145].mxu0  ;;  %7660 = vmatprep.mubr.bf16.mxu0 %v7391_v0  ;;  %v12751_v58 = vld [vmem:[%s20701_s10 + $0x10] sm:$0xff]   ;;  %v12752_v0 = vld [vmem:[%s20701_s10 + $0x58] sm:$0xff]  }
 0x63c   :  { %v7364_v28 = vpack.c.bf16 %v7285_v60, %v7285_v60  ;;  %v7287_v9 = vpop.f32.mrb[146].mxu0  ;;  %7661 = vmatmul.mubr.bf16.gmra.mrb[184].mxu0 %v7389_v42  ;;  %v12750_v42 = vld [vmem:[%s20701_s10 + $0x50] sm:$0xff]   ;;  %v12754_v60 = vld [vmem:[%s20701_s10 + $0x60] sm:$0xff]  }
 0x63d   :  { %v7394_v24 = vrot.slane %v7363_v20, 4  ;;  %v7288_v51 = vpop.f32.mrb[147].mxu0  ;;  %v12753_v20 = vld [vmem:[%s20701_s10 + $0x18] sm:$0xff]   ;;  %v12756_v9 = vld [vmem:[%s20701_s10 + $0x68] sm:$0xff]  }
 0x63e   :  { %v7396_v25 = vrot.slane %v7364_v28, 4  ;;  %v12755_v28 = vld [vmem:[%s20701_s10 + $0x20] sm:$0xff]   ;;  %v12758_v51 = vld [vmem:[%s20701_s10 + $0x70] sm:$0xff]  }
 0x63f   :  { %v7395_v40 = vsel %vm329_vm0, %v7388_v35, %v7394_v24  ;;  %v12747_v35 = vld [vmem:[%s20701_s10 + $0x48] sm:$0xff]  }
 0x640   :  { %v7397_v7 = vsel %vm329_vm0, %v7390_v22, %v7396_v25  ;;  %11772 = vmatprep.subr.bf16.mxu1 %v12747_v35  ;;  %v12748_v22 = vld [vmem:[%s20701_s10 + $0x8] sm:$0xff]   ;;  %v12759_v25 = vld [vmem:[%s20701_s10 + $0x30] sm:$0xff]  }
 0x641   :  { %7668 = vmatprep.mubr.bf16.mxu0 %v7397_v7  ;;  %11773 = vmatpush3.bf16.msra.mxu1 %v12748_v22  ;;  %v12757_v24 = vld [vmem:[%s20701_s10 + $0x28] sm:$0xff]  }
 0x642   :  { %11774 = vmatprep.subr.bf16.mxu1 %v12750_v42  ;;  %v12763_v42 = vld [vmem:[%s20701_s10 + $0x78] sm:$0xff]  }
 0x644   :  { %7669 = vmatmul.mubr.bf16.gmra.mrb[188].mxu0 %v7395_v40 }
 0x645   :  { %12296 = vmatprep.mubr.msk.bf16.mxu0 %vm12995_vm2, %v21747_v62  ;;  %11775 = vmatpush3.bf16.msra.mxu1 %v12751_v58 }
 0x646   :  { %11776 = vmatprep.subr.bf16.mxu1 %v12752_v0 }
 0x649   :  { %11777 = vmatpush3.bf16.msra.mxu1 %v12753_v20 }
 0x64a   :  { %11778 = vmatprep.subr.bf16.mxu1 %v12754_v60 }
 0x64c   :  { %12297 = vmatmul.mubr.msk.bf16.vlgmr.msra.gmra.mrb[192].mxu0 %vm1841_vm9, %v6818_v47 }
 0x64d   :  { %12300 = vmatprep.mubr.msk.bf16.mxu0 %vm12995_vm2, %v21747_v62  ;;  %11779 = vmatpush3.bf16.msra.mxu1 %v12755_v28 }
 0x64e   :  { %11780 = vmatprep.subr.bf16.mxu1 %v12756_v9 }
 0x651   :  { %11781 = vmatpush3.bf16.msra.mxu1 %v12757_v24 }
 0x652   :  { %11782 = vmatprep.subr.bf16.mxu1 %v12758_v51 }
 0x654   :  { %12301 = vmatmul.mubr.msk.bf16.gmra.mrb[196].mxu0 %vm1841_vm9, %v6821_v15 }
 0x655   :  { %12304 = vmatprep.mubr.msk.bf16.mxu0 %vm12995_vm2, %v21747_v62  ;;  %11783 = vmatpush3.bf16.msra.mxu1 %v12759_v25 }
 0x656   :  { %v7324_v2 = vpop.f32.mrb[148].mxu0  ;;  %11784 = vmatprep.subr.bf16.mxu1 %v12763_v42  ;;  %v12772_v42 = vld [vmem:[%s20701_s10 + $0x80] sm:$0xff]  }
 0x657   :  { %v7326_v37 = vpop.f32.mrb[149].mxu0 }
 0x658   :  { %v7327_v63 = vpop.f32.mrb[150].mxu0 }
 0x659   :  { %v7356_v49 = vpack.c.bf16 %v7327_v63, %v7324_v2  ;;  %v7329_v27 = vpop.f32.mrb[151].mxu0 }
 0x65b   :  { %v7381_v54 = vrot.slane %v7356_v49, 4 }
 0x65c   :  { %12305 = vmatmul.mubr.msk.bf16.gmra.mrb[200].mxu0 %vm1841_vm9, %v6824_v30 }
 0x65d   :  { %12308 = vmatprep.mubr.msk.bf16.mxu0 %vm12995_vm2, %v21747_v62  ;;  %v7416_v47 = vsel %vm329_vm0, %v6827_v32, %v7381_v54 }
 0x65e   :  { %v7332_v26 = vpop.f32.mrb[152].mxu0 }
 0x65f   :  { %v7334_v19 = vpop.f32.mrb[153].mxu0 }
 0x660   :  { %v7335_v15 = vpop.f32.mrb[154].mxu0 }
 0x661   :  { %v7359_v11 = vpack.c.bf16 %v7335_v15, %v7332_v26  ;;  %v7337_v16 = vpop.f32.mrb[155].mxu0 }
 0x663   :  { %v7386_v36 = vrot.slane %v7359_v11, 4 }
 0x664   :  { %12309 = vmatmul.mubr.msk.bf16.gmra.mrb[204].mxu0 %vm1841_vm9, %v7416_v47 }
 0x665   :  { %12312 = vmatprep.mubr.msk.bf16.mxu0 %vm12995_vm2, %v21747_v62  ;;  %v7387_v41 = vsel %vm329_vm0, %v7381_v54, %v7386_v36 }
 0x666   :  { %v7340_v45 = vpop.f32.mrb[156].mxu0 }
 0x667   :  { %v7342_v30 = vpop.f32.mrb[157].mxu0 }
 0x668   :  { %v7343_v59 = vpop.f32.mrb[158].mxu0 }
 0x669   :  { %v7362_v55 = vpack.c.bf16 %v7343_v59, %v7340_v45  ;;  %v7345_v3 = vpop.f32.mrb[159].mxu0 }
 0x66b   :  { %v7392_v31 = vrot.slane %v7362_v55, 4 }
 0x66c   :  { %12313 = vmatmul.mubr.msk.bf16.gmra.mrb[208].mxu0 %vm1841_vm9, %v7387_v41 }
 0x66d   :  { %12316 = vmatprep.mubr.msk.bf16.mxu0 %vm12995_vm2, %v21747_v62  ;;  %v7393_v53 = vsel %vm329_vm0, %v7386_v36, %v7392_v31 }
 0x66e   :  { %v7348_v48 = vpop.f32.mrb[160].mxu0 }
 0x66f   :  { %v7365_v5 = vpack.c.bf16 %v7348_v48, %v7348_v48  ;;  %v7350_v12 = vpop.f32.mrb[161].mxu0  ;;  %v19355_v48 = vld [vmem:[%s20698_s7] ss:$0 sm:$0xff] }
 0x670   :  { %v7351_v4 = vpop.f32.mrb[162].mxu0 }
 0x671   :  { %v7398_v43 = vrot.slane %v7365_v5, 4  ;;  %v7352_v13 = vpop.f32.mrb[163].mxu0 }
 0x673   :  { %v7399_v56 = vsel %vm329_vm0, %v7392_v31, %v7398_v43 }
 0x674   :  { %12317 = vmatmul.mubr.msk.bf16.gmra.mrb[212].mxu0 %vm1841_vm9, %v7393_v53 }
 0x675   :  { %12320 = vmatprep.mubr.msk.bf16.mxu0 %vm12995_vm2, %v21747_v62 }
 0x676   :  { %v11719_v34 = vpop.f32.mrb[164].mxu0 }
 0x677   :  { %v11720_v10 = vpop.f32.mrb[165].mxu0 }
 0x678   :  { %v19287_v18 = vadd.f32 %v11720_v10, %v11719_v34  ;;  %v11722_v1 = vpop.f32.mrb[166].mxu0 }
 0x679   :  { %v11723_v44 = vpop.f32.mrb[167].mxu0 }
 0x67a   :  { %v19289_v38 = vadd.f32 %v11723_v44, %v11722_v1  ;;  %v7623_v5 = vadd.f32 %v19287_v18, %v19355_v48 }
 0x67c   :  { %12321 = vmatmul.mubr.msk.bf16.gmra.mrb[216].mxu0 %vm1841_vm9, %v7399_v56  ;;  %v7626_v13 = vadd.f32 %v19289_v38, %v19355_v48 }
 0x67e   :  { %v11725_v21 = vpop.f32.mrb[168].mxu0 }
 0x67f   :  { %v11726_v33 = vpop.f32.mrb[169].mxu0 }
 0x680   :  { %v19292_v61 = vadd.f32 %v11726_v33, %v11725_v21  ;;  %v11728_v17 = vpop.f32.mrb[170].mxu0 }
 0x681   :  { %v11729_v52 = vpop.f32.mrb[171].mxu0 }
 0x682   :  { %v19294_v23 = vadd.f32 %v11729_v52, %v11728_v17  ;;  %v7631_v17 = vadd.f32 %v19292_v61, %v19355_v48  ;;  %v12764_v61 = vld [vmem:[%s20701_s10 + $0x38] sm:$0xff]  }
 0x683   :  { %11785 = vmatpush3.bf16.msra.mxu1 %v12764_v61 }
 0x684   :  { %v7634_v38 = vadd.f32 %v19294_v23, %v19355_v48  ;;  %12324 = vmatprep.subr.bf16.mxu1 %v21747_v62 }
 0x686   :  { %v11731_v50 = vpop.f32.mrb[172].mxu0 }
 0x687   :  { %v11732_v6 = vpop.f32.mrb[173].mxu0 }
 0x688   :  { %v19296_v39 = vadd.f32 %v11732_v6, %v11731_v50  ;;  %v11734_v57 = vpop.f32.mrb[174].mxu0 }
 0x689   :  { %v11735_v29 = vpop.f32.mrb[175].mxu0 }
 0x68a   :  { %v19298_v14 = vadd.f32 %v11735_v29, %v11734_v57  ;;  %v7639_v28 = vadd.f32 %v19296_v39, %v19355_v48 }
 0x68c   :  { %v7642_v25 = vadd.f32 %v19298_v14, %v19355_v48 }
 0x6ff   :  { %v11737_v40 = vpop.f32.mrb[176].mxu0 }
 0x700   :  { %v11738_v7 = vpop.f32.mrb[177].mxu0 }
 0x701   :  { %v19336_v2 = vadd.f32 %v11738_v7, %v11737_v40  ;;  %v11740_v37 = vpop.f32.mrb[178].mxu0 }
 0x702   :  { %v11741_v63 = vpop.f32.mrb[179].mxu0 }
 0x703   :  { %v19338_v49 = vadd.f32 %v11741_v63, %v11740_v37 }
 0x707   :  { %v11743_v27 = vpop.f32.mrb[180].mxu0 }
 0x708   :  { %v11744_v32 = vpop.f32.mrb[181].mxu0 }
 0x709   :  { %v19340_v54 = vadd.f32 %v11744_v32, %v11743_v27  ;;  %v11746_v47 = vpop.f32.mrb[182].mxu0 }
 0x70a   :  { %v11747_v26 = vpop.f32.mrb[183].mxu0 }
 0x70b   :  { %v19342_v19 = vadd.f32 %v11747_v26, %v11746_v47 }
 0x70f   :  { %v11749_v15 = vpop.f32.mrb[184].mxu0 }
 0x710   :  { %v11750_v11 = vpop.f32.mrb[185].mxu0 }
 0x711   :  { %v19344_v16 = vadd.f32 %v11750_v11, %v11749_v15  ;;  %v11752_v36 = vpop.f32.mrb[186].mxu0 }
 0x712   :  { %v11753_v41 = vpop.f32.mrb[187].mxu0 }
 0x713   :  { %v19346_v45 = vadd.f32 %v11753_v41, %v11752_v36 }
 0x717   :  { %v11755_v30 = vpop.f32.mrb[188].mxu0 }
 0x718   :  { %v11756_v59 = vpop.f32.mrb[189].mxu0 }
 0x719   :  { %v19348_v55 = vadd.f32 %v11756_v59, %v11755_v30  ;;  %v11758_v3 = vpop.f32.mrb[190].mxu0 }
 0x71a   :  { %v11759_v31 = vpop.f32.mrb[191].mxu0 }
 0x71b   :  { %v19350_v53 = vadd.f32 %v11759_v31, %v11758_v3 }
 0x71f   :  { %v7711_v12 = vpop.f32.mrb[192].mxu0 }
 0x720   :  { %v7712_v4 = vadd.f32 %v7711_v12, %v7623_v5  ;;  %v12298_v43 = vpop.f32.mrb[193].mxu0  ;;  %v7647_v12 = vadd.f32 %v19336_v2, %v19355_v48 }
 0x721   :  { %v7714_v56 = vpop.f32.mrb[194].mxu0 }
 0x722   :  { %v7766_v34 = vmax.f32 %v7712_v4, 0.0  ;;  %v7715_v10 = vadd.f32 %v7714_v56, %v7626_v13  ;;  %v12299_v1 = vpop.f32.mrb[195].mxu0  ;;  %v7650_v56 = vadd.f32 %v19338_v49, %v19355_v48 }
 0x724   :  { %v19362_v44 = vpack.c.bf16 %v7766_v34, %v21747_v62  ;;  %v7767_v21 = vmax.f32 %v7715_v10, 0.0 }
 0x726   :  { %v19364_v33 = vpack.c.bf16 %v7767_v21, %v7766_v34  ;;  %v7841_v52 = vshll.u32 %v19362_v44, 16  ;;  %v7839_v58 = vshrl.u32 %v19362_v44, 16 }
 0x727   :  { %v7719_v18 = vpop.f32.mrb[196].mxu0 }
 0x728   :  { %v7720_v50 = vadd.f32 %v7719_v18, %v7631_v17  ;;  %v12302_v6 = vpop.f32.mrb[197].mxu0  ;;  %v7843_v60 = vrot.slane %v7841_v52, 1  ;;  %v7936_v40 = vrot.slane %v7839_v58, 3  ;;  %v7937_v7 = vrot.slane %v7841_v52, 4 }
 0x729   :  { %v7722_v57 = vpop.f32.mrb[198].mxu0 }
 0x72a   :  { %v7768_v29 = vmax.f32 %v7720_v50, 0.0  ;;  %v7723_v35 = vadd.f32 %v7722_v57, %v7634_v38  ;;  %v12303_v22 = vpop.f32.mrb[199].mxu0  ;;  %v7844_v27 = vor.u32 %v7843_v60, %v7839_v58  ;;  %v7938_v30 = vor.u32 %v7937_v7, %v7936_v40 }
 0x72b   :  { %v12771_v22 = vld [vmem:[%s20701_s10 + $0xc0] sm:$0xff]   ;;  %v7655_v58 = vadd.f32 %v19340_v54, %v19355_v48 }
 0x72c   :  { %v19378_v0 = vpack.c.bf16 %v7768_v29, %v7767_v21  ;;  %v7769_v20 = vmax.f32 %v7723_v35, 0.0  ;;  %11828 = vmatprep.subr.bf16.mxu0 %v12771_v22  ;;  %v12787_v22 = vld [vmem:[%s20701_s10 + $0xa0] sm:$0xff]  }
 0x72d   :  { %11829 = vmatpush3.bf16.msra.mxu0 %v12772_v42 }
 0x72e   :  { %v19380_v23 = vpack.c.bf16 %v7769_v20, %v7768_v29  ;;  %v7846_v9 = vshll.u32 %v19378_v0, 16  ;;  %v7850_v24 = vshrl.u32 %v19378_v0, 16 }
 0x72f   :  { %v7727_v51 = vpop.f32.mrb[200].mxu0 }
 0x730   :  { %v7728_v37 = vadd.f32 %v7727_v51, %v7639_v28  ;;  %v12306_v63 = vpop.f32.mrb[201].mxu0  ;;  %v7848_v32 = vrot.slane %v7846_v9, 1  ;;  %v7939_v47 = vrot.slane %v7850_v24, 3  ;;  %v7940_v15 = vrot.slane %v7846_v9, 4 }
 0x731   :  { %v7730_v26 = vpop.f32.mrb[202].mxu0  ;;  %v7658_v9 = vadd.f32 %v19342_v19, %v19355_v48  ;;  %v12777_v19 = vld [vmem:[%s20701_s10 + $0x88] sm:$0xff]  }
 0x732   :  { %v7770_v39 = vmax.f32 %v7728_v37, 0.0  ;;  %v7731_v11 = vadd.f32 %v7730_v26, %v7642_v25  ;;  %v12307_v36 = vpop.f32.mrb[203].mxu0  ;;  %v7849_v41 = vsel %vm773_vm5, %v7844_v27, %v7848_v32  ;;  %v7941_v59 = vor.u32 %v7940_v15, %v7939_v47  ;;  %v12776_v26 = vld [vmem:[%s20701_s10 + $0xc8] sm:$0xff]  }
 0x733   :  { %7898 = vrot.lane.b32.xlu0 %v7849_v41, %s12999_s2  ;;  %v7852_v1 = vor.u32 %v7850_v24, %v7848_v32  ;;  %11830 = vmatprep.subr.bf16.mxu0 %v12776_v26  ;;  %v12778_v41 = vld [vmem:[%s20701_s10 + $0xd0] sm:$0xff]  }
 0x734   :  { %v19391_v14 = vpack.c.bf16 %v7770_v39, %v7769_v20  ;;  %v7771_v3 = vmax.f32 %v7731_v11, 0.0  ;;  %v7942_v31 = vsel %vm7935_vm14, %v7938_v30, %v7941_v59  ;;  %11831 = vmatpush3.bf16.msra.mxu0 %v12777_v19  ;;  %v12779_v30 = vld [vmem:[%s20701_s10 + $0x90] sm:$0xff]  }
 0x735   :  { %7969 = vrot.lane.b32.xlu1 %v7942_v31, %s12999_s2  ;;  %11832 = vmatprep.subr.bf16.mxu0 %v12778_v41 }
 0x736   :  { %v19394_v5 = vpack.c.bf16 %v7771_v3, %v7770_v39  ;;  %v7854_v4 = vshll.u32 %v19391_v14, 16  ;;  %v7858_v43 = vshrl.u32 %v19391_v14, 16 }
 0x737   :  { %v7735_v13 = vpop.f32.mrb[204].mxu0 }
 0x738   :  { %v7736_v34 = vadd.f32 %v7735_v13, %v7647_v12  ;;  %v12310_v10 = vpop.f32.mrb[205].mxu0  ;;  %v7856_v21 = vrot.slane %v7854_v4, 1  ;;  %v7943_v17 = vrot.slane %v7858_v43, 3  ;;  %v7944_v52 = vrot.slane %v7854_v4, 4  ;;  %11833 = vmatpush3.bf16.msra.mxu0 %v12779_v30 }
 0x739   :  { %v7738_v18 = vpop.f32.mrb[206].mxu0 }
 0x73a   :  { %v7772_v50 = vmax.f32 %v7736_v34, 0.0  ;;  %v7739_v6 = vadd.f32 %v7738_v18, %v7650_v56  ;;  %v12311_v38 = vpop.f32.mrb[207].mxu0  ;;  %v7857_v2 = vsel %vm773_vm5, %v7852_v1, %v7856_v21  ;;  %v7945_v57 = vor.u32 %v7944_v52, %v7943_v17 }
 0x73b   :  { %7900 = vrot.lane.b32.xlu0 %v7857_v2, %s12999_s2  ;;  %v7860_v25 = vor.u32 %v7858_v43, %v7856_v21  ;;  %v7666_v43 = vadd.f32 %v19346_v45, %v19355_v48  ;;  %v12785_v45 = vld [vmem:[%s20701_s10 + $0x98] sm:$0xff]  }
 0x73c   :  { %v19405_v29 = vpack.c.bf16 %v7772_v50, %v7771_v3  ;;  %v7773_v35 = vmax.f32 %v7739_v6, 0.0  ;;  %v7946_v49 = vsel %vm7935_vm14, %v7941_v59, %v7945_v57  ;;  %v7663_v3 = vadd.f32 %v19344_v16, %v19355_v48  ;;  %v12784_v6 = vld [vmem:[%s20701_s10 + $0xd8] sm:$0xff]  }
 0x73d   :  { %7971 = vrot.lane.b32.xlu1 %v7946_v49, %s12999_s2  ;;  %11834 = vmatprep.subr.bf16.mxu0 %v12784_v6  ;;  %v12786_v49 = vld [vmem:[%s20701_s10 + $0xe0] sm:$0xff]   ;;  %v12803_v6 = vld [vmem:[%s20701_s10 + $0xb8] sm:$0xff]  }
 0x73e   :  { %v19414_v61 = vpack.c.bf16 %v7773_v35, %v7772_v50  ;;  %v7862_v20 = vshll.u32 %v19405_v29, 16  ;;  %v7866_v60 = vshrl.u32 %v19405_v29, 16  ;;  %11835 = vmatpush3.bf16.msra.mxu0 %v12785_v45 }
 0x73f   :  { %v7743_v28 = vpop.f32.mrb[208].mxu0  ;;  %11836 = vmatprep.subr.bf16.mxu0 %v12786_v49 }
 0x740   :  { %v7744_v24 = vadd.f32 %v7743_v28, %v7655_v58  ;;  %v12314_v51 = vpop.f32.mrb[209].mxu0  ;;  %v7864_v40 = vrot.slane %v7862_v20, 1  ;;  %v7947_v7 = vrot.slane %v7866_v60, 3  ;;  %v7948_v63 = vrot.slane %v7862_v20, 4 }
 0x741   :  { %v7746_v37 = vpop.f32.mrb[210].mxu0  ;;  %v7671_v58 = vadd.f32 %v19348_v55, %v19355_v48 }
 0x742   :  { %v7774_v27 = vmax.f32 %v7744_v24, 0.0  ;;  %v7747_v32 = vadd.f32 %v7746_v37, %v7658_v9  ;;  %v12315_v54 = vpop.f32.mrb[211].mxu0  ;;  %v7865_v47 = vsel %vm773_vm5, %v7860_v25, %v7864_v40  ;;  %v7949_v15 = vor.u32 %v7948_v63, %v7947_v7  ;;  %11837 = vmatpush3.bf16.msra.mxu0 %v12787_v22 }
 0x743   :  { %7902 = vrot.lane.b32.xlu0 %v7865_v47, %s12999_s2  ;;  %v7868_v34 = vor.u32 %v7866_v60, %v7864_v40  ;;  %v7674_v9 = vadd.f32 %v19350_v53, %v19355_v48  ;;  %v12791_v47 = vld [vmem:[%s20701_s10 + $0xe8] sm:$0xff]  }
 0x744   :  { %v19431_v39 = vpack.c.bf16 %v7774_v27, %v7773_v35  ;;  %v7775_v11 = vmax.f32 %v7747_v32, 0.0  ;;  %v7950_v36 = vsel %vm7935_vm14, %v7945_v57, %v7949_v15  ;;  %v12792_v53 = vld [vmem:[%s20701_s10 + $0xa8] sm:$0xff]   ;;  %11838 = vmatprep.subr.bf16.mxu0 %v12791_v47 }
 0x745   :  { %7973 = vrot.lane.b32.xlu1 %v7950_v36, %s12999_s2 }
 0x746   :  { %v19440_v59 = vpack.c.bf16 %v7775_v11, %v7774_v27  ;;  %v7870_v31 = vshll.u32 %v19431_v39, 16  ;;  %v7874_v12 = vshrl.u32 %v19431_v39, 16  ;;  %11839 = vmatpush3.bf16.msra.mxu0 %v12792_v53 }
 0x747   :  { %v7751_v4 = vpop.f32.mrb[212].mxu0 }
 0x748   :  { %v7752_v13 = vadd.f32 %v7751_v4, %v7663_v3  ;;  %v12318_v56 = vpop.f32.mrb[213].mxu0  ;;  %v7872_v10 = vrot.slane %v7870_v31, 1  ;;  %v7951_v1 = vrot.slane %v7874_v12, 3  ;;  %v7952_v17 = vrot.slane %v7870_v31, 4  ;;  %v12796_v3 = vld [vmem:[%s20701_s10 + $0xf0] sm:$0xff]  }
 0x749   :  { %v7754_v21 = vpop.f32.mrb[214].mxu0  ;;  %v12798_v31 = vld [vmem:[%s20701_s10 + $0xb0] sm:$0xff]   ;;  %11840 = vmatprep.subr.bf16.mxu0 %v12796_v3  ;;  %v8015_v3 = vshll.u32 %v19440_v59, 16 }
 0x74a   :  { %v7776_v18 = vmax.f32 %v7752_v13, 0.0  ;;  %v7755_v52 = vadd.f32 %v7754_v21, %v7666_v43  ;;  %v12319_v16 = vpop.f32.mrb[215].mxu0  ;;  %v7873_v50 = vsel %vm773_vm5, %v7868_v34, %v7872_v10  ;;  %v7953_v38 = vor.u32 %v7952_v17, %v7951_v1  ;;  %11841 = vmatpush3.bf16.msra.mxu0 %v12798_v31 }
 0x74b   :  { %7904 = vrot.lane.b32.xlu0 %v7873_v50, %s12999_s2  ;;  %v7876_v25 = vor.u32 %v7874_v12, %v7872_v10  ;;  %v7995_v12 = vshrl.u32 %v19380_v23, 16  ;;  %v7991_v13 = vshll.u32 %v19380_v23, 16  ;;  %v12802_v50 = vld [vmem:[%s20701_s10 + $0xf8] sm:$0xff]  }
 0x74c   :  { %v19457_v2 = vpack.c.bf16 %v7776_v18, %v7775_v11  ;;  %v7777_v57 = vmax.f32 %v7755_v52, 0.0  ;;  %v7954_v35 = vsel %vm7935_vm14, %v7949_v15, %v7953_v38  ;;  %v7986_v11 = vshll.u32 %v19364_v33, 16  ;;  %11842 = vmatprep.subr.bf16.mxu0 %v12802_v50 }
 0x74d   :  { %7975 = vrot.lane.b32.xlu1 %v7954_v35, %s12999_s2  ;;  %v8077_v49 = vrot.slane %v7995_v12, 3  ;;  %v8078_v22 = vrot.slane %v7991_v13, 4 }
 0x74e   :  { %v19466_v42 = vpack.c.bf16 %v7777_v57, %v7776_v18  ;;  %v7878_v20 = vshll.u32 %v19457_v2, 16  ;;  %v7882_v60 = vshrl.u32 %v19457_v2, 16  ;;  %v7988_v35 = vrot.slane %v7986_v11, 1  ;;  %11843 = vmatpush3.bf16.msra.mxu0 %v12803_v6 }
 0x74f   :  { %v7759_v28 = vpop.f32.mrb[216].mxu0 }
 0x750   :  { %v7760_v24 = vadd.f32 %v7759_v28, %v7671_v58  ;;  %v12322_v51 = vpop.f32.mrb[217].mxu0  ;;  %v7880_v40 = vrot.slane %v7878_v20, 1  ;;  %v7955_v7 = vrot.slane %v7882_v60, 3  ;;  %v7956_v63 = vrot.slane %v7878_v20, 4 }
 0x751   :  { %v7762_v37 = vpop.f32.mrb[218].mxu0  ;;  %v8003_v58 = vshrl.u32 %v19394_v5, 16  ;;  %v7999_v28 = vshll.u32 %v19394_v5, 16 }
 0x752   :  { %v7778_v27 = vmax.f32 %v7760_v24, 0.0  ;;  %v7763_v32 = vadd.f32 %v7762_v37, %v7674_v9  ;;  %v12323_v55 = vpop.f32.mrb[219].mxu0  ;;  %v7881_v54 = vsel %vm773_vm5, %v7876_v25, %v7880_v40  ;;  %v7957_v48 = vor.u32 %v7956_v63, %v7955_v7 }
 0x753   :  { %7906 = vrot.lane.b32.xlu0 %v7881_v54, %s12999_s2  ;;  %v7884_v4 = vor.u32 %v7882_v60, %v7880_v40  ;;  %v7993_v24 = vrot.slane %v7991_v13, 1  ;;  %v8075_v25 = vrot.slane %v7986_v11, 4  ;;  %v8011_v40 = vshrl.u32 %v19414_v61, 16 }
 0x754   :  { %v19483_v26 = vpack.c.bf16 %v7778_v27, %v7777_v57  ;;  %v19485_v19 = vmax.f32 %v7763_v32, 0.0  ;;  %v7958_v15 = vsel %vm7935_vm14, %v7953_v38, %v7957_v48  ;;  %v7984_v57 = vshrl.u32 %v19364_v33, 16 }
 0x755   :  { %7977 = vrot.lane.b32.xlu1 %v7958_v15, %s12999_s2  ;;  %v8007_v37 = vshll.u32 %v19414_v61, 16  ;;  %v8081_v32 = vrot.slane %v8003_v58, 3  ;;  %v8082_v55 = vrot.slane %v7999_v28, 4  ;;  %v8001_v47 = vrot.slane %v7999_v28, 1 }
 0x756   :  { %v19491_v36 = vpack.c.bf16 %v19485_v19, %v19485_v19  ;;  %v19494_v41 = vpack.c.bf16 %v19485_v19, %v7778_v27  ;;  %v7886_v30 = vshll.u32 %v19483_v26, 16  ;;  %v7890_v43 = vshrl.u32 %v19483_v26, 16 }
 0x757   :  { %v8074_v51 = vrot.slane %v7984_v57, 3  ;;  %v7989_v7 = vor.u32 %v7988_v35, %v7984_v57  ;;  %v8079_v27 = vor.u32 %v8078_v22, %v8077_v49  ;;  %v8019_v15 = vshrl.u32 %v19440_v59, 16 }
 0x758   :  { %v7963_v56 = vshrl.u32 %v19491_v36, 16  ;;  %v7888_v34 = vrot.slane %v7886_v30, 1  ;;  %v7960_v10 = vrot.slane %v7886_v30, 4  ;;  %v7894_v1 = vshll.u32 %v19491_v36, 16 }
 0x759   :  { %v7959_v21 = vrot.slane %v7890_v43, 3  ;;  %v7994_v54 = vsel %vm773_vm5, %v7989_v7, %v7993_v24  ;;  %v8076_v53 = vor.u32 %v8075_v25, %v8074_v51  ;;  %v8085_v11 = vrot.slane %v8011_v40, 3 }
 0x75a   :  { %v7889_v17 = vsel %vm773_vm5, %v7884_v4, %v7888_v34  ;;  %v7892_v18 = vor.u32 %v7890_v43, %v7888_v34  ;;  %v7896_v52 = vrot.slane %v7894_v1, 1  ;;  %v7965_v16 = vrot.slane %v7963_v56, 3 }
 0x75b   :  { %7908 = vrot.lane.b32.xlu0 %v7889_v17, %s12999_s2  ;;  %v7961_v45 = vor.u32 %v7960_v10, %v7959_v21  ;;  %v7966_v38 = vrot.slane %v7894_v1, 4  ;;  %v8086_v30 = vrot.slane %v8007_v37, 4  ;;  %v8080_v31 = vsel %vm7935_vm14, %v8076_v53, %v8079_v27 }
 0x75c   :  { %v7897_v9 = vsel %vm773_vm5, %v7892_v18, %v7896_v52  ;;  %v8083_v4 = vor.u32 %v8082_v55, %v8081_v32  ;;  %v8009_v13 = vrot.slane %v8007_v37, 1  ;;  %v8005_v56 = vor.u32 %v8003_v58, %v8001_v47  ;;  %v21748_v55 = vld [vmem:[#allocation42_spill] sm:$0xff] }
 0x75d   :  { %v7962_v20 = vsel %vm7935_vm14, %v7957_v48, %v7961_v45  ;;  %v7967_v60 = vor.u32 %v7966_v38, %v7965_v16  ;;  %v7997_v48 = vor.u32 %v7995_v12, %v7993_v24  ;;  %v8087_v34 = vor.u32 %v8086_v30, %v8085_v11 }
 0x75e   :  { %7979 = vrot.lane.b32.xlu1 %v7962_v20, %s12999_s2  ;;  %v8089_v10 = vrot.slane %v8019_v15, 3  ;;  %v8090_v12 = vrot.slane %v8015_v3, 4  ;;  %v8027_v1 = vshrl.u32 %v19466_v42, 16  ;;  %v8084_v21 = vsel %vm7935_vm14, %v8079_v27, %v8083_v4 }
 0x75f   :  { %7910 = vrot.lane.b32.xlu0 %v7897_v9, %s12999_s2  ;;  %v7968_v63 = vsel %vm7935_vm14, %v7961_v45, %v7967_v60  ;;  %v8002_v43 = vsel %vm773_vm5, %v7997_v48, %v8001_v47  ;;  %v8023_v17 = vshll.u32 %v19466_v42, 16  ;;  %v8010_v18 = vsel %vm773_vm5, %v8005_v56, %v8009_v13  ;;  %v21749_v47 = vld [vmem:[#allocation7_spill] sm:$0xff] }
 0x760   :  { %v8017_v52 = vrot.slane %v8015_v3, 1  ;;  %v8088_v16 = vsel %vm7935_vm14, %v8083_v4, %v8087_v34  ;;  %v8013_v50 = vor.u32 %v8011_v40, %v8009_v13  ;;  %v8091_v6 = vor.u32 %v8090_v12, %v8089_v10  ;;  %v12762_v3 = vld [vmem:[%s20700_s9 + $0x4] ss:$20 sps:$4 sm:$0xff]  }
 0x761   :  { %v8093_v45 = vrot.slane %v8027_v1, 3  ;;  %v8094_v38 = vrot.slane %v8023_v17, 4  ;;  %v8031_v57 = vshll.u32 %v19494_v41, 16  ;;  %v8035_v35 = vshrl.u32 %v19494_v41, 16  ;;  %v12782_v10 = vld [vmem:[%s20701_s10 + $0x100] sm:$0xff]  }
 0x762   :  { %7981 = vrot.lane.b32.xlu1 %v7968_v63, %s12999_s2  ;;  %v8018_v49 = vsel %vm773_vm5, %v8013_v50, %v8017_v52  ;;  %v8025_v22 = vrot.slane %v8023_v17, 1  ;;  %v8021_v58 = vor.u32 %v8019_v15, %v8017_v52  ;;  %v8092_v20 = vsel %vm7935_vm14, %v8087_v34, %v8091_v6  ;;  %v12797_v17 = vld [vmem:[%s20701_s10 + $0x108] sm:$0xff]  }
 0x763   :  { %8039 = vrot.lane.b32.xlu0 %v7994_v54, %s12999_s2  ;;  %v8095_v60 = vor.u32 %v8094_v38, %v8093_v45  ;;  %v8097_v28 = vrot.slane %v8035_v35, 3  ;;  %v8098_v9 = vrot.slane %v8031_v57, 4  ;;  %v8033_v51 = vrot.slane %v8031_v57, 1  ;;  %v12807_v38 = vld [vmem:[%s20701_s10 + $0x110] sm:$0xff]  }
 0x764   :  { %v8026_v24 = vsel %vm773_vm5, %v8021_v58, %v8025_v22  ;;  %v8029_v25 = vor.u32 %v8027_v1, %v8025_v22  ;;  %v8102_v37 = vrot.slane %v21627_v46, 4  ;;  %v7921_v15 = vrot.slane %v19378_v0, 1  ;;  %v12770_v22 = vld [vmem:[%s20700_s9 + $0x54] ss:$20 sps:$4 sm:$0xff]   ;;  %v12811_v58 = vld [vmem:[%s20701_s10 + $0x118] sm:$0xff]  }
 0x765   :  { %v8096_v40 = vsel %vm7935_vm14, %v8091_v6, %v8095_v60  ;;  %v8099_v7 = vor.u32 %v8098_v9, %v8097_v28  ;;  %v8037_v27 = vor.u32 %v8035_v35, %v8033_v51  ;;  %v7920_v30 = vrot.slane %v19362_v44, 1 }
 0x766   :  { %8105 = vrot.lane.b32.xlu1 %v8080_v31, %s12999_s2  ;;  %v8034_v63 = vsel %vm773_vm5, %v8029_v25, %v8033_v51  ;;  %v19559_v54 = vor.u32 %v8102_v37, %v21748_v55  ;;  %v12760_v31 = vld [vmem:[%s20700_s9] ss:$20 sps:$4 sm:$0xff]   ;;  %v7923_v1 = vrot.slane %v19391_v14, 1  ;;  %v7925_v35 = vrot.slane %v19405_v29, 1  ;;  %v12775_v37 = vld [vmem:[%s20700_s9 + $0x7c] ss:$20 sps:$4 sm:$0xff]  }
 0x767   :  { %8041 = vrot.lane.b32.xlu0 %v8002_v43, %s12999_s2  ;;  %v8100_v32 = vsel %vm7935_vm14, %v8095_v60, %v8099_v7  ;;  %v8038_v53 = vsel %vm773_vm5, %v8037_v27, %v21749_v47  ;;  %v7922_v43 = vsel %vm1058_vm4, %v7920_v30, %v7921_v15 }
 0x768   :  { %v8104_v48 = vsel %vm7935_vm14, %v8099_v7, %v19559_v54  ;;  %v7926_v28 = vsel %vm1058_vm4, %v7923_v1, %v7925_v35 }
 0x76a   :  { %8107 = vrot.lane.b32.xlu1 %v8084_v21, %s12999_s2 }
 0x76b   :  { %8043 = vrot.lane.b32.xlu0 %v8010_v18, %s12999_s2  ;;  %v12765_v18 = vld [vmem:[%s20700_s9 + $0x28] ss:$20 sps:$4 sm:$0xff]  }
 0x76e   :  { %8109 = vrot.lane.b32.xlu1 %v8088_v16, %s12999_s2  ;;  %v7924_v16 = vsel %vm1058_vm4, %v7921_v15, %v7923_v1 }
 0x76f   :  { %8045 = vrot.lane.b32.xlu0 %v8018_v49, %s12999_s2 }
 0x772   :  { %8111 = vrot.lane.b32.xlu1 %v8092_v20, %s12999_s2  ;;  %v12768_v20 = vld [vmem:[%s20700_s9 + $0x50] ss:$20 sps:$4 sm:$0xff]  }
 0x773   :  { %8047 = vrot.lane.b32.xlu0 %v8026_v24, %s12999_s2 }
 0x776   :  { %8113 = vrot.lane.b32.xlu1 %v8096_v40, %s12999_s2  ;;  %v7927_v40 = vrot.slane %v19431_v39, 1 }
 0x777   :  { %8049 = vrot.lane.b32.xlu0 %v8034_v63, %s12999_s2  ;;  %v12773_v63 = vld [vmem:[%s20700_s9 + $0x78] ss:$20 sps:$4 sm:$0xff]  }
 0x77a   :  { %8115 = vrot.lane.b32.xlu1 %v8100_v32, %s12999_s2  ;;  %v7928_v32 = vsel %vm1058_vm4, %v7925_v35, %v7927_v40 }
 0x77b   :  { %8051 = vrot.lane.b32.xlu0 %v8038_v53, %s12999_s2 }
 0x77e   :  { %8117 = vrot.lane.b32.xlu1 %v8104_v48, %s12999_s2 }
 0x7a5   :  { %v7899_v11 = vpop.permute.xlu0 %7898 }
 0x7a6   :  { %v8120_v4 = vsel %vm1894_vm10, %v19362_v44, %v7899_v11  ;;  %v12767_v44 = vld [vmem:[%s20700_s9 + $0x2c] ss:$20 sps:$4 sm:$0xff]   ;;  %v7929_v11 = vrot.slane %v19457_v2, 1 }
 0x7a7   :  { %v7970_v13 = vpop.permute.xlu1 %7969  ;;  %v8399_v12 = vmul.bf16 %v12760_v31, %v8120_v4  ;;  %v12780_v31 = vld [vmem:[%s20700_s9 + $0xa0] ss:$20 sps:$4 sm:$0xff]  }
 0x7a8   :  { %v8142_v56 = vsel %vm1894_vm10, %v7922_v43, %v7970_v13  ;;  %v7930_v43 = vsel %vm1058_vm4, %v7927_v40, %v7929_v11 }
 0x7a9   :  { %v8400_v34 = vmul.bf16 %v12762_v3, %v8142_v56  ;;  %v12783_v3 = vld [vmem:[%s20700_s9 + $0xa4] ss:$20 sps:$4 sm:$0xff]  }
 0x7ab   :  { %8782 = vmatprep.mubr.bf16.mxu1 %v8400_v34 }
 0x7ac   :  { %8783 = vmatmul.mubr.bf16.vlgmr.msra.gmra.mrb[100].mxu1 %v8399_v12  ;;  %v7931_v12 = vrot.slane %v19483_v26, 1 }
 0x7ad   :  { %v7901_v21 = vpop.permute.xlu0 %7900  ;;  %12325 = vmatpush3.bf16.msra.mxu1 %v12782_v10 }
 0x7ae   :  { %12326 = vmatprep.subr.bf16.mxu1 %v21747_v62  ;;  %v8123_v52 = vsel %vm1894_vm10, %v19378_v0, %v7901_v21  ;;  %v12790_v21 = vld [vmem:[%s20700_s9 + $0xcc] ss:$20 sps:$4 sm:$0xff]  }
 0x7af   :  { %v7972_v50 = vpop.permute.xlu1 %7971  ;;  %v8404_v57 = vmul.bf16 %v12765_v18, %v8123_v52  ;;  %v7932_v18 = vsel %vm1058_vm4, %v7929_v11, %v7931_v12 }
 0x7b0   :  { %v8146_v6 = vsel %vm1894_vm10, %v7924_v16, %v7972_v50  ;;  %v7933_v16 = vrot.slane %v19491_v36, 1 }
 0x7b1   :  { %v8405_v45 = vmul.bf16 %v12767_v44, %v8146_v6  ;;  %12327 = vmatpush3.bf16.msra.mxu1 %v12797_v17  ;;  %v12788_v44 = vld [vmem:[%s20700_s9 + $0xc8] ss:$20 sps:$4 sm:$0xff]  }
 0x7b2   :  { %12328 = vmatprep.subr.bf16.mxu1 %v21747_v62  ;;  %v7934_v35 = vsel %vm1058_vm4, %v7931_v12, %v7933_v16 }
 0x7b3   :  { %8790 = vmatprep.mubr.bf16.mxu1 %v8405_v45 }
 0x7b4   :  { %8791 = vmatmul.mubr.bf16.gmra.mrb[104].mxu1 %v8404_v57 }
 0x7b5   :  { %v7903_v49 = vpop.permute.xlu0 %7902  ;;  %12329 = vmatpush3.bf16.msra.mxu1 %v12807_v38  ;;  %v12795_v38 = vld [vmem:[%s20700_s9 + $0xf4] ss:$20 sps:$4 sm:$0xff]  }
 0x7b6   :  { %12330 = vmatprep.subr.bf16.mxu1 %v21747_v62  ;;  %v8126_v60 = vsel %vm1894_vm10, %v19391_v14, %v7903_v49 }
 0x7b7   :  { %v7974_v9 = vpop.permute.xlu1 %7973  ;;  %v8409_v25 = vmul.bf16 %v12768_v20, %v8126_v60  ;;  %v8060_v60 = vrot.slane %v19364_v33, 3 }
 0x7b8   :  { %v8150_v24 = vsel %vm1894_vm10, %v7926_v28, %v7974_v9  ;;  %v12801_v28 = vld [vmem:[%s20700_s9 + $0xc] ss:$20 sps:$4 sm:$0xff]   ;;  %v12793_v9 = vld [vmem:[%s20700_s9 + $0xf0] ss:$20 sps:$4 sm:$0xff]  }
 0x7b9   :  { %v8410_v51 = vmul.bf16 %v12770_v22, %v8150_v24  ;;  %12331 = vmatpush3.bf16.msra.mxu1 %v12811_v58  ;;  %v8061_v22 = vrot.slane %v19380_v23, 3  ;;  %v12799_v24 = vld [vmem:[%s20700_s9 + $0x8] ss:$20 sps:$4 sm:$0xff]  }
 0x7ba   :  { %12360 = vmatprep.subr.bf16.mxu1 %v21747_v62 }
 0x7bb   :  { %8798 = vmatprep.mubr.bf16.mxu1 %v8410_v51  ;;  %v8062_v40 = vsel %vm330_vm1, %v8060_v60, %v8061_v22 }
 0x7bc   :  { %8799 = vmatmul.mubr.bf16.gmra.mrb[108].mxu1 %v8409_v25 }
 0x7bd   :  { %v7905_v7 = vpop.permute.xlu0 %7904 }
 0x7be   :  { %v8129_v27 = vsel %vm1894_vm10, %v19405_v29, %v7905_v7 }
 0x7bf   :  { %v7976_v55 = vpop.permute.xlu1 %7975  ;;  %v8414_v15 = vmul.bf16 %v12773_v63, %v8129_v27 }
 0x7c0   :  { %v8154_v53 = vsel %vm1894_vm10, %v7928_v32, %v7976_v55  ;;  %v12806_v32 = vld [vmem:[%s20700_s9 + $0x34] ss:$20 sps:$4 sm:$0xff]  }
 0x7c1   :  { %v8415_v48 = vmul.bf16 %v12775_v37, %v8154_v53  ;;  %v8063_v37 = vrot.slane %v19394_v5, 3 }
 0x7c3   :  { %8806 = vmatprep.mubr.bf16.mxu1 %v8415_v48  ;;  %v8064_v48 = vsel %vm330_vm1, %v8061_v22, %v8063_v37  ;;  %v19731_v22 = vld [vmem:[%s20700_s9 + $0x80] ss:$20 sps:$4 sm:$0xff]  }
 0x7c4   :  { %8807 = vmatmul.mubr.bf16.gmra.mrb[112].mxu1 %v8414_v15 }
 0x7c5   :  { %v7907_v30 = vpop.permute.xlu0 %7906 }
 0x7c6   :  { %v8132_v4 = vsel %vm1894_vm10, %v19431_v39, %v7907_v30 }
 0x7c7   :  { %v7978_v13 = vpop.permute.xlu1 %7977  ;;  %v8419_v10 = vmul.bf16 %v12780_v31, %v8132_v4  ;;  %v19686_v31 = vld [vmem:[%s20700_s9 + $0x10] ss:$20 sps:$4 sm:$0xff]  }
 0x7c8   :  { %v8158_v56 = vsel %vm1894_vm10, %v7930_v43, %v7978_v13  ;;  %v12804_v4 = vld [vmem:[%s20700_s9 + $0x30] ss:$20 sps:$4 sm:$0xff]   ;;  %v8403_v12 = vmul.bf16 %v19686_v31, %v19378_v0  ;;  %v19712_v0 = vld [vmem:[%s20700_s9 + $0x38] ss:$20 sps:$4 sm:$0xff]  }
 0x7c9   :  { %v8420_v34 = vmul.bf16 %v12783_v3, %v8158_v56  ;;  %v12810_v56 = vld [vmem:[%s20700_s9 + $0x5c] ss:$20 sps:$4 sm:$0xff]  }
 0x7cb   :  { %8814 = vmatprep.mubr.bf16.mxu1 %v8420_v34 }
 0x7cc   :  { %8815 = vmatmul.mubr.bf16.gmra.mrb[116].mxu1 %v8419_v10 }
 0x7cd   :  { %v7909_v1 = vpop.permute.xlu0 %7908 }
 0x7ce   :  { %v8135_v17 = vsel %vm1894_vm10, %v19457_v2, %v7909_v1 }
 0x7cf   :  { %v8424_v57 = vmul.bf16 %v12788_v44, %v8135_v17  ;;  %v8067_v44 = vrot.slane %v19440_v59, 3 }
 0x7d0   :  { %v7980_v52 = vpop.permute.xlu1 %7979 }
 0x7d1   :  { %v8162_v50 = vsel %vm1894_vm10, %v7932_v18, %v7980_v52  ;;  %v7911_v6 = vpop.permute.xlu0 %7910  ;;  %v19707_v18 = vld [vmem:[%s20700_s9 + $0x58] ss:$20 sps:$4 sm:$0xff]  }
 0x7d2   :  { %v8425_v45 = vmul.bf16 %v12790_v21, %v8162_v50  ;;  %v8138_v51 = vsel %vm1894_vm10, %v19483_v26, %v7911_v6  ;;  %v12814_v50 = vld [vmem:[%s20700_s9 + $0x84] ss:$20 sps:$4 sm:$0xff]  }
 0x7d3   :  { %v8429_v55 = vmul.bf16 %v12793_v9, %v8138_v51  ;;  %v8071_v51 = vrot.slane %v19494_v41, 3 }
 0x7d4   :  { %v7982_v49 = vpop.permute.xlu1 %7981  ;;  %8822 = vmatprep.mubr.bf16.mxu1 %v8425_v45 }
 0x7d5   :  { %v8166_v58 = vsel %vm1894_vm10, %v7934_v35, %v7982_v49  ;;  %8823 = vmatmul.mubr.bf16.gmra.mrb[120].mxu1 %v8424_v57  ;;  %v8040_v20 = vpop.permute.xlu0 %8039  ;;  %v8069_v35 = vrot.slane %v19466_v42, 3 }
 0x7d6   :  { %v8430_v36 = vmul.bf16 %v12795_v38, %v8166_v58  ;;  %v8169_v25 = vsel %vm1894_vm10, %v19364_v33, %v8040_v20  ;;  %v8065_v33 = vrot.slane %v19414_v61, 3  ;;  %v8408_v38 = vmul.bf16 %v19712_v0, %v19391_v14  ;;  %v19736_v14 = vld [vmem:[%s20700_s9 + $0x60] ss:$20 sps:$4 sm:$0xff]  }
 0x7d7   :  { %v8401_v53 = vmul.bf16 %v12799_v24, %v8169_v25  ;;  %v8070_v20 = vsel %vm330_vm1, %v8067_v44, %v8069_v35  ;;  %v8413_v9 = vmul.bf16 %v19736_v14, %v19405_v29  ;;  %v19758_v29 = vld [vmem:[%s20700_s9 + $0x88] ss:$20 sps:$4 sm:$0xff]  }
 0x7d8   :  { %v8106_v7 = vpop.permute.xlu1 %8105  ;;  %8830 = vmatprep.mubr.bf16.mxu1 %v8430_v36  ;;  %v8066_v13 = vsel %vm330_vm1, %v8063_v37, %v8065_v33  ;;  %v8068_v16 = vsel %vm330_vm1, %v8065_v33, %v8067_v44  ;;  %v12817_v36 = vld [vmem:[%s20700_s9 + $0xac] ss:$20 sps:$4 sm:$0xff]   ;;  %v8072_v37 = vsel %vm330_vm1, %v8069_v35, %v8071_v51  ;;  %v12827_v33 = vld [vmem:[%s20700_s9 + $0xb0] ss:$20 sps:$4 sm:$0xff]  }
 0x7d9   :  { %v8191_v63 = vsel %vm1894_vm10, %v8062_v40, %v8106_v7  ;;  %v8042_v11 = vpop.permute.xlu0 %8041  ;;  %v12815_v40 = vld [vmem:[%s20700_s9 + $0xa8] ss:$20 sps:$4 sm:$0xff]  }
 0x7da   :  { %v8402_v27 = vmul.bf16 %v12801_v28, %v8191_v63  ;;  %v8172_v43 = vsel %vm1894_vm10, %v19380_v23, %v8042_v11  ;;  %v12820_v63 = vld [vmem:[%s20700_s9 + $0xd4] ss:$20 sps:$4 sm:$0xff]   ;;  %v8073_v11 = vsel %vm330_vm1, %v8071_v51, %v21704_v8 }
 0x7db   :  { %v8406_v1 = vmul.bf16 %v12804_v4, %v8172_v43  ;;  %v8423_v43 = vmul.bf16 %v12827_v33, %v19457_v2  ;;  %v19830_v33 = vld [vmem:[%s20702_s11] ss:$0 sm:$0xff] }
 0x7dc   :  { %8871 = vmatprep.mubr.bf16.mxu0 %v8402_v27  ;;  %v8108_v15 = vpop.permute.xlu1 %8107 }
 0x7dd   :  { %v8195_v30 = vsel %vm1894_vm10, %v8064_v48, %v8108_v15  ;;  %8831 = vmatmul.mubr.bf16.gmra.mrb[124].mxu1 %v8429_v55  ;;  %8872 = vmatmul.mubr.bf16.vlgmr.msra.gmra.mrb[220].mxu0 %v8401_v53  ;;  %v8044_v17 = vpop.permute.xlu0 %8043  ;;  %v8418_v55 = vmul.bf16 %v19758_v29, %v19431_v39 }
 0x7de   :  { %v8407_v3 = vmul.bf16 %v12806_v32, %v8195_v30  ;;  %12332 = vmatprep.mubr.msk.bf16.mxu1 %vm12995_vm2, %v21747_v62  ;;  %v8175_v52 = vsel %vm1894_vm10, %v19394_v5, %v8044_v17  ;;  %v12824_v30 = vld [vmem:[%s20700_s9 + $0xfc] ss:$20 sps:$4 sm:$0xff]  }
 0x7df   :  { %v8411_v45 = vmul.bf16 %v19707_v18, %v8175_v52 }
 0x7e0   :  { %v8110_v34 = vpop.permute.xlu1 %8109  ;;  %8879 = vmatprep.mubr.bf16.mxu0 %v8407_v3 }
 0x7e1   :  { %v8199_v10 = vsel %vm1894_vm10, %v8066_v13, %v8110_v34  ;;  %v8046_v49 = vpop.permute.xlu0 %8045  ;;  %v12828_v34 = vld [vmem:[%s20700_s9 + $0xd8] ss:$20 sps:$4 sm:$0xff]  }
 0x7e2   :  { %v8412_v21 = vmul.bf16 %v12810_v56, %v8199_v10  ;;  %v8178_v58 = vsel %vm1894_vm10, %v19414_v61, %v8046_v49 }
 0x7e3   :  { %v8416_v28 = vmul.bf16 %v19731_v22, %v8178_v58 }
 0x7e4   :  { %v8112_v23 = vpop.permute.xlu1 %8111 }
 0x7e5   :  { %8880 = vmatmul.mubr.bf16.gmra.mrb[224].mxu0 %v8406_v1  ;;  %12333 = vmatmul.mubr.msk.bf16.vlgmr.msra.gmra.mrb[128].mxu1 %vm1894_vm10, %v8403_v12  ;;  %v8203_v6 = vsel %vm1894_vm10, %v8068_v16, %v8112_v23  ;;  %v8048_v25 = vpop.permute.xlu0 %8047  ;;  %v8428_v12 = vmul.bf16 %v12828_v34, %v19483_v26  ;;  %v7837_v1 = vpack.c.bf16 %v21747_v62, %v19485_v19 }
 0x7e6   :  { %8887 = vmatprep.mubr.bf16.mxu0 %v8412_v21  ;;  %12336 = vmatprep.mubr.msk.bf16.mxu1 %vm12995_vm2, %v21747_v62  ;;  %v8417_v57 = vmul.bf16 %v12814_v50, %v8203_v6  ;;  %v8181_v7 = vsel %vm1894_vm10, %v19440_v59, %v8048_v25  ;;  %v12818_v59 = vld [vmem:[%s20700_s9 + $0xd0] ss:$20 sps:$4 sm:$0xff]   ;;  %v12829_v21 = vld [vmem:[%s20700_s9 + $0x100] ss:$20 sps:$4 sm:$0xff]  }
 0x7e7   :  { %v8421_v32 = vmul.bf16 %v12815_v40, %v8181_v7  ;;  %v8433_v44 = vmul.bf16 %v12829_v21, %v7837_v1 }
 0x7e8   :  { %v8114_v5 = vpop.permute.xlu1 %8113 }
 0x7e9   :  { %v8207_v60 = vsel %vm1894_vm10, %v8070_v20, %v8114_v5  ;;  %v8050_v48 = vpop.permute.xlu0 %8049 }
 0x7ea   :  { %v8422_v24 = vmul.bf16 %v12817_v36, %v8207_v60  ;;  %v8184_v39 = vsel %vm1894_vm10, %v19466_v42, %v8050_v48  ;;  %v12822_v42 = vld [vmem:[%s20700_s9 + $0xf8] ss:$20 sps:$4 sm:$0xff]  }
 0x7eb   :  { %v8426_v4 = vmul.bf16 %v12818_v59, %v8184_v39 }
 0x7ec   :  { %v8116_v61 = vpop.permute.xlu1 %8115 }
 0x7ed   :  { %8888 = vmatmul.mubr.bf16.gmra.mrb[228].mxu0 %v8411_v45  ;;  %12337 = vmatmul.mubr.msk.bf16.gmra.mrb[132].mxu1 %vm1894_vm10, %v8408_v38  ;;  %v8211_v27 = vsel %vm1894_vm10, %v8072_v37, %v8116_v61  ;;  %v8052_v56 = vpop.permute.xlu0 %8051 }
 0x7ee   :  { %8895 = vmatprep.mubr.bf16.mxu0 %v8417_v57  ;;  %12340 = vmatprep.mubr.msk.bf16.mxu1 %vm12995_vm2, %v21747_v62  ;;  %v8427_v53 = vmul.bf16 %v12820_v63, %v8211_v27  ;;  %v8187_v2 = vsel %vm1894_vm10, %v19494_v41, %v8052_v56 }
 0x7ef   :  { %v8431_v10 = vmul.bf16 %v12822_v42, %v8187_v2 }
 0x7f0   :  { %v8118_v15 = vpop.permute.xlu1 %8117 }
 0x7f1   :  { %v8215_v3 = vsel %vm1894_vm10, %v8073_v11, %v8118_v15 }
 0x7f2   :  { %v8432_v13 = vmul.bf16 %v12824_v30, %v8215_v3 }
 0x7f5   :  { %8896 = vmatmul.mubr.bf16.gmra.mrb[232].mxu0 %v8416_v28  ;;  %12341 = vmatmul.mubr.msk.bf16.gmra.mrb[136].mxu1 %vm1894_vm10, %v8413_v9 }
 0x7f6   :  { %8903 = vmatprep.mubr.bf16.mxu0 %v8422_v24  ;;  %12344 = vmatprep.mubr.msk.bf16.mxu1 %vm12995_vm2, %v21747_v62 }
 0x7fd   :  { %8904 = vmatmul.mubr.bf16.gmra.mrb[236].mxu0 %v8421_v32  ;;  %12345 = vmatmul.mubr.msk.bf16.gmra.mrb[140].mxu1 %vm1894_vm10, %v8418_v55 }
 0x7fe   :  { %8911 = vmatprep.mubr.bf16.mxu0 %v8427_v53  ;;  %12348 = vmatprep.mubr.msk.bf16.mxu1 %vm12995_vm2, %v21747_v62 }
 0x805   :  { %8912 = vmatmul.mubr.bf16.gmra.mrb[240].mxu0 %v8426_v4  ;;  %12349 = vmatmul.mubr.msk.bf16.gmra.mrb[144].mxu1 %vm1894_vm10, %v8423_v43 }
 0x806   :  { %8919 = vmatprep.mubr.bf16.mxu0 %v8432_v13  ;;  %12352 = vmatprep.mubr.msk.bf16.mxu1 %vm12995_vm2, %v21747_v62 }
 0x80d   :  { %8920 = vmatmul.mubr.bf16.gmra.mrb[244].mxu0 %v8431_v10  ;;  %12353 = vmatmul.mubr.msk.bf16.gmra.mrb[148].mxu1 %vm1894_vm10, %v8428_v12 }
 0x80e   :  { %12356 = vmatprep.mubr.msk.bf16.mxu1 %vm12995_vm2, %v21747_v62  ;;  %9515 = vmatprep.mubr.bf16.mxu0 %v21627_v46 }
 0x815   :  { %12357 = vmatmul.mubr.msk.bf16.gmra.mrb[152].mxu1 %vm1894_vm10, %v8433_v44 }
 0x816   :  { %12368 = vmatprep.mubr.msk.bf16.mxu1 %vm12995_vm2, %v21747_v62 }
 0x87f   :  { %v11786_v26 = vpop.f32.mrb[100].mxu1 }
 0x880   :  { %v11787_v41 = vpop.f32.mrb[101].mxu1 }
 0x881   :  { %v11788_v17 = vadd.f32 %v11787_v41, %v11786_v26  ;;  %v11789_v23 = vpop.f32.mrb[102].mxu1 }
 0x882   :  { %v11790_v52 = vpop.f32.mrb[103].mxu1 }
 0x883   :  { %v11791_v16 = vadd.f32 %v11790_v52, %v11789_v23  ;;  %v8785_v4 = vadd.f32 %v11788_v17, %v19830_v33 }
 0x885   :  { %v8788_v10 = vadd.f32 %v11791_v16, %v19830_v33 }
 0x887   :  { %v11792_v50 = vpop.f32.mrb[104].mxu1 }
 0x888   :  { %v11793_v6 = vpop.f32.mrb[105].mxu1 }
 0x889   :  { %v11794_v45 = vadd.f32 %v11793_v6, %v11792_v50  ;;  %v11795_v19 = vpop.f32.mrb[106].mxu1 }
 0x88a   :  { %v11796_v38 = vpop.f32.mrb[107].mxu1 }
 0x88b   :  { %v11797_v57 = vadd.f32 %v11796_v38, %v11795_v19  ;;  %v8793_v17 = vadd.f32 %v11794_v45, %v19830_v33 }
 0x88d   :  { %v8796_v16 = vadd.f32 %v11797_v57, %v19830_v33 }
 0x88f   :  { %v11798_v35 = vpop.f32.mrb[108].mxu1 }
 0x890   :  { %v11799_v49 = vpop.f32.mrb[109].mxu1 }
 0x891   :  { %v19811_v5 = vadd.f32 %v11799_v49, %v11798_v35  ;;  %v11801_v58 = vpop.f32.mrb[110].mxu1 }
 0x892   :  { %v11802_v20 = vpop.f32.mrb[111].mxu1 }
 0x893   :  { %v19813_v36 = vadd.f32 %v11802_v20, %v11801_v58 }
 0x897   :  { %v11804_v60 = vpop.f32.mrb[112].mxu1 }
 0x898   :  { %v11805_v28 = vpop.f32.mrb[113].mxu1 }
 0x899   :  { %v19815_v9 = vadd.f32 %v11805_v28, %v11804_v60  ;;  %v11807_v24 = vpop.f32.mrb[114].mxu1 }
 0x89a   :  { %v11808_v51 = vpop.f32.mrb[115].mxu1 }
 0x89b   :  { %v19817_v25 = vadd.f32 %v11808_v51, %v11807_v24 }
 0x89f   :  { %v11810_v61 = vpop.f32.mrb[116].mxu1 }
 0x8a0   :  { %v11811_v40 = vpop.f32.mrb[117].mxu1 }
 0x8a1   :  { %v19819_v7 = vadd.f32 %v11811_v40, %v11810_v61  ;;  %v11813_v37 = vpop.f32.mrb[118].mxu1 }
 0x8a2   :  { %v11814_v63 = vpop.f32.mrb[119].mxu1 }
 0x8a3   :  { %v19821_v27 = vadd.f32 %v11814_v63, %v11813_v37 }
 0x8a8   :  { %v11816_v32 = vpop.f32.mrb[120].mxu1 }
 0x8a9   :  { %v11817_v55 = vpop.f32.mrb[121].mxu1 }
 0x8aa   :  { %v19823_v53 = vadd.f32 %v11817_v55, %v11816_v32  ;;  %v11819_v48 = vpop.f32.mrb[122].mxu1 }
 0x8ab   :  { %v11820_v15 = vpop.f32.mrb[123].mxu1 }
 0x8ac   :  { %v19825_v59 = vadd.f32 %v11820_v15, %v11819_v48  ;;  %v8801_v15 = vadd.f32 %v19811_v5, %v19830_v33 }
 0x8b0   :  { %v11822_v39 = vpop.f32.mrb[124].mxu1  ;;  %v11844_v11 = vpop.f32.mrb[220].mxu0 }
 0x8b1   :  { %v11823_v30 = vpop.f32.mrb[125].mxu1  ;;  %v11845_v3 = vpop.f32.mrb[221].mxu0 }
 0x8b2   :  { %v19833_v43 = vadd.f32 %v11823_v30, %v11822_v39  ;;  %v11846_v13 = vadd.f32 %v11845_v3, %v11844_v11  ;;  %v11825_v56 = vpop.f32.mrb[126].mxu1  ;;  %v11847_v42 = vpop.f32.mrb[222].mxu0 }
 0x8b3   :  { %v11826_v34 = vpop.f32.mrb[127].mxu1  ;;  %v11848_v2 = vpop.f32.mrb[223].mxu0 }
 0x8b4   :  { %v19836_v12 = vadd.f32 %v11826_v34, %v11825_v56  ;;  %v11849_v1 = vadd.f32 %v11848_v2, %v11847_v42  ;;  %v8874_v21 = vadd.f32 %v11846_v13, %v8785_v4  ;;  %v8804_v56 = vadd.f32 %v19813_v36, %v19830_v33 }
 0x8b6   :  { %v8877_v44 = vadd.f32 %v11849_v1, %v8788_v10 }
 0x8b8   :  { %v11850_v26 = vpop.f32.mrb[224].mxu0  ;;  %v8962_v41 = vpop.f32.mrb[128].mxu1 }
 0x8b9   :  { %v8963_v23 = vadd.f32 %v8962_v41, %v8874_v21  ;;  %v11851_v52 = vpop.f32.mrb[225].mxu0  ;;  %v12334_v50 = vpop.f32.mrb[129].mxu1 }
 0x8ba   :  { %v11852_v6 = vadd.f32 %v11851_v52, %v11850_v26  ;;  %v11853_v19 = vpop.f32.mrb[226].mxu0  ;;  %v8965_v38 = vpop.f32.mrb[130].mxu1 }
 0x8bb   :  { %v9017_v35 = vmax.f32 %v8963_v23, 0.0  ;;  %v8966_v49 = vadd.f32 %v8965_v38, %v8877_v44  ;;  %v11854_v58 = vpop.f32.mrb[227].mxu0  ;;  %v12335_v20 = vpop.f32.mrb[131].mxu1 }
 0x8bc   :  { %v11855_v60 = vadd.f32 %v11854_v58, %v11853_v19  ;;  %v8882_v28 = vadd.f32 %v11852_v6, %v8793_v17  ;;  %v8809_v58 = vadd.f32 %v19815_v9, %v19830_v33 }
 0x8bd   :  { %v19841_v24 = vpack.c.bf16 %v9017_v35, %v21747_v62  ;;  %v9018_v51 = vmax.f32 %v8966_v49, 0.0 }
 0x8be   :  { %v8885_v61 = vadd.f32 %v11855_v60, %v8796_v16 }
 0x8bf   :  { %v19843_v40 = vpack.c.bf16 %v9018_v51, %v9017_v35  ;;  %v9050_v63 = vshll.u32 %v19841_v24, 16  ;;  %v9048_v2 = vshrl.u32 %v19841_v24, 16 }
 0x8c0   :  { %v11856_v37 = vpop.f32.mrb[228].mxu0  ;;  %v8970_v45 = vpop.f32.mrb[132].mxu1 }
 0x8c1   :  { %v8971_v32 = vadd.f32 %v8970_v45, %v8882_v28  ;;  %v11857_v55 = vpop.f32.mrb[229].mxu0  ;;  %v12338_v48 = vpop.f32.mrb[133].mxu1  ;;  %v9052_v21 = vrot.slane %v9050_v63, 1  ;;  %v9144_v50 = vrot.slane %v9048_v2, 3  ;;  %v9145_v17 = vrot.slane %v9050_v63, 4 }
 0x8c2   :  { %v11858_v57 = vadd.f32 %v11857_v55, %v11856_v37  ;;  %v11859_v39 = vpop.f32.mrb[230].mxu0  ;;  %v8973_v11 = vpop.f32.mrb[134].mxu1 }
 0x8c3   :  { %v9019_v30 = vmax.f32 %v8971_v32, 0.0  ;;  %v8974_v3 = vadd.f32 %v8973_v11, %v8885_v61  ;;  %v11860_v4 = vpop.f32.mrb[231].mxu0  ;;  %v12339_v13 = vpop.f32.mrb[135].mxu1  ;;  %v9053_v35 = vor.u32 %v9052_v21, %v9048_v2  ;;  %v9146_v9 = vor.u32 %v9145_v17, %v9144_v50 }
 0x8c4   :  { %v11861_v42 = vadd.f32 %v11860_v4, %v11859_v39  ;;  %v8890_v34 = vadd.f32 %v11858_v57, %v8801_v15 }
 0x8c5   :  { %v19851_v10 = vpack.c.bf16 %v9019_v30, %v9018_v51  ;;  %v9020_v1 = vmax.f32 %v8974_v3, 0.0  ;;  %v8812_v51 = vadd.f32 %v19817_v25, %v19830_v33 }
 0x8c6   :  { %v8893_v44 = vadd.f32 %v11861_v42, %v8804_v56 }
 0x8c7   :  { %v19853_v5 = vpack.c.bf16 %v9020_v1, %v9019_v30  ;;  %v9426_v26 = vmul.bf16 %v19686_v31, %v19851_v10  ;;  %v9055_v41 = vshll.u32 %v19851_v10, 16  ;;  %v9059_v23 = vshrl.u32 %v19851_v10, 16 }
 0x8c8   :  { %v11862_v52 = vpop.f32.mrb[232].mxu0  ;;  %v8978_v36 = vpop.f32.mrb[136].mxu1 }
 0x8c9   :  { %v8979_v6 = vadd.f32 %v8978_v36, %v8890_v34  ;;  %v11863_v19 = vpop.f32.mrb[233].mxu0  ;;  %v12342_v38 = vpop.f32.mrb[137].mxu1  ;;  %12361 = vmatpush3.bf16.msra.mxu1 %v9426_v26  ;;  %v9057_v49 = vrot.slane %v9055_v41, 1  ;;  %v9147_v60 = vrot.slane %v9059_v23, 3  ;;  %v9148_v28 = vrot.slane %v9055_v41, 4 }
 0x8ca   :  { %v11864_v20 = vadd.f32 %v11863_v19, %v11862_v52  ;;  %v11865_v16 = vpop.f32.mrb[234].mxu0  ;;  %v8981_v31 = vpop.f32.mrb[138].mxu1  ;;  %12362 = vmatprep.subr.bf16.mxu1 %v21747_v62  ;;  %v8817_v26 = vadd.f32 %v19819_v7, %v19830_v33 }
 0x8cb   :  { %v9021_v61 = vmax.f32 %v8979_v6, 0.0  ;;  %v8982_v37 = vadd.f32 %v8981_v31, %v8893_v44  ;;  %v11866_v45 = vpop.f32.mrb[235].mxu0  ;;  %v12343_v63 = vpop.f32.mrb[139].mxu1  ;;  %v9058_v32 = vsel %vm773_vm5, %v9053_v35, %v9057_v49  ;;  %v9149_v48 = vor.u32 %v9148_v28, %v9147_v60 }
 0x8cc   :  { %v11867_v55 = vadd.f32 %v11866_v45, %v11865_v16  ;;  %9107 = vrot.lane.b32.xlu0 %v9058_v32, %s12999_s2  ;;  %v8898_v15 = vadd.f32 %v11864_v20, %v8809_v58  ;;  %v9061_v21 = vor.u32 %v9059_v23, %v9057_v49  ;;  %v8820_v23 = vadd.f32 %v19821_v27, %v19830_v33 }
 0x8cd   :  { %v19866_v57 = vpack.c.bf16 %v9021_v61, %v9020_v1  ;;  %v9022_v39 = vmax.f32 %v8982_v37, 0.0  ;;  %v9150_v11 = vsel %vm7935_vm14, %v9146_v9, %v9149_v48  ;;  %v9199_v31 = vshll.u32 %v19853_v5, 16 }
 0x8ce   :  { %v8901_v30 = vadd.f32 %v11867_v55, %v8812_v51  ;;  %9177 = vrot.lane.b32.xlu1 %v9150_v11, %s12999_s2  ;;  %v9203_v60 = vshrl.u32 %v19853_v5, 16  ;;  %v8825_v63 = vadd.f32 %v19823_v53, %v19830_v33  ;;  %v8828_v32 = vadd.f32 %v19825_v59, %v19830_v33 }
 0x8cf   :  { %v19869_v3 = vpack.c.bf16 %v9022_v39, %v9021_v61  ;;  %v9431_v25 = vmul.bf16 %v19712_v0, %v19866_v57  ;;  %v9063_v4 = vshll.u32 %v19866_v57, 16  ;;  %v9067_v13 = vshrl.u32 %v19866_v57, 16 }
 0x8d0   :  { %v11868_v56 = vpop.f32.mrb[236].mxu0  ;;  %v8986_v42 = vpop.f32.mrb[140].mxu1  ;;  %v9192_v55 = vshrl.u32 %v19843_v40, 16  ;;  %v9285_v59 = vrot.slane %v9203_v60, 3 }
 0x8d1   :  { %v8987_v34 = vadd.f32 %v8986_v42, %v8898_v15  ;;  %v11869_v2 = vpop.f32.mrb[237].mxu0  ;;  %v12346_v1 = vpop.f32.mrb[141].mxu1  ;;  %12363 = vmatpush3.bf16.msra.mxu1 %v9431_v25  ;;  %v9065_v44 = vrot.slane %v9063_v4, 1  ;;  %v9151_v50 = vrot.slane %v9067_v13, 3  ;;  %v9152_v0 = vrot.slane %v9063_v4, 4 }
 0x8d2   :  { %v11870_v41 = vadd.f32 %v11869_v2, %v11868_v56  ;;  %v11871_v52 = vpop.f32.mrb[238].mxu0  ;;  %v8989_v36 = vpop.f32.mrb[142].mxu1  ;;  %12364 = vmatprep.subr.bf16.mxu1 %v21747_v62  ;;  %v9194_v15 = vshll.u32 %v19843_v40, 16 }
 0x8d3   :  { %v9023_v17 = vmax.f32 %v8987_v34, 0.0  ;;  %v8990_v6 = vadd.f32 %v8989_v36, %v8901_v30  ;;  %v11872_v19 = vpop.f32.mrb[239].mxu0  ;;  %v12347_v38 = vpop.f32.mrb[143].mxu1  ;;  %v9066_v35 = vsel %vm773_vm5, %v9061_v21, %v9065_v44  ;;  %v9153_v7 = vor.u32 %v9152_v0, %v9151_v50 }
 0x8d4   :  { %v11873_v49 = vadd.f32 %v11872_v19, %v11871_v52  ;;  %9109 = vrot.lane.b32.xlu0 %v9066_v35, %s12999_s2  ;;  %v8906_v58 = vadd.f32 %v11870_v41, %v8817_v26  ;;  %v8833_v0 = vadd.f32 %v19833_v43, %v19830_v33  ;;  %v8836_v38 = vadd.f32 %v19836_v12, %v19830_v33 }
 0x8d5   :  { %v19883_v20 = vpack.c.bf16 %v9023_v17, %v9022_v39  ;;  %v9024_v16 = vmax.f32 %v8990_v6, 0.0  ;;  %v9154_v28 = vsel %vm7935_vm14, %v9149_v48, %v9153_v7  ;;  %v9283_v12 = vrot.slane %v9194_v15, 4 }
 0x8d6   :  { %v8909_v51 = vadd.f32 %v11873_v49, %v8820_v23  ;;  %9179 = vrot.lane.b32.xlu1 %v9154_v28, %s12999_s2  ;;  %v9282_v49 = vrot.slane %v9192_v55, 3 }
 0x8d7   :  { %v19888_v61 = vpack.c.bf16 %v9024_v16, %v9023_v17  ;;  %v9436_v27 = vmul.bf16 %v19736_v14, %v19883_v20  ;;  %v9071_v37 = vshll.u32 %v19883_v20, 16  ;;  %v9075_v45 = vshrl.u32 %v19883_v20, 16 }
 0x8d8   :  { %v11874_v9 = vpop.f32.mrb[240].mxu0  ;;  %v8994_v48 = vpop.f32.mrb[144].mxu1  ;;  %v9069_v14 = vor.u32 %v9067_v13, %v9065_v44  ;;  %v9286_v13 = vrot.slane %v9199_v31, 4  ;;  %v9211_v44 = vshrl.u32 %v19869_v3, 16  ;;  %v9207_v17 = vshll.u32 %v19869_v3, 16 }
 0x8d9   :  { %v8995_v39 = vadd.f32 %v8994_v48, %v8906_v58  ;;  %v11875_v11 = vpop.f32.mrb[241].mxu0  ;;  %v12350_v30 = vpop.f32.mrb[145].mxu1  ;;  %12365 = vmatpush3.bf16.msra.mxu1 %v9436_v27  ;;  %v9073_v25 = vrot.slane %v9071_v37, 1  ;;  %v9155_v34 = vrot.slane %v9075_v45, 3  ;;  %v9156_v53 = vrot.slane %v9071_v37, 4 }
 0x8da   :  { %v11876_v4 = vadd.f32 %v11875_v11, %v11874_v9  ;;  %v11877_v56 = vpop.f32.mrb[242].mxu0  ;;  %v8997_v42 = vpop.f32.mrb[146].mxu1  ;;  %12366 = vmatprep.subr.bf16.mxu1 %v21747_v62  ;;  %v9196_v27 = vrot.slane %v9194_v15, 1  ;;  %v9289_v37 = vrot.slane %v9211_v44, 3 }
 0x8db   :  { %v9025_v2 = vmax.f32 %v8995_v39, 0.0  ;;  %v8998_v1 = vadd.f32 %v8997_v42, %v8909_v51  ;;  %v11878_v21 = vpop.f32.mrb[243].mxu0  ;;  %v12351_v26 = vpop.f32.mrb[147].mxu1  ;;  %v9074_v41 = vsel %vm773_vm5, %v9069_v14, %v9073_v25  ;;  %v9157_v36 = vor.u32 %v9156_v53, %v9155_v34 }
 0x8dc   :  { %v11879_v52 = vadd.f32 %v11878_v21, %v11877_v56  ;;  %9111 = vrot.lane.b32.xlu0 %v9074_v41, %s12999_s2  ;;  %v8914_v50 = vadd.f32 %v11876_v4, %v8825_v63  ;;  %v9290_v39 = vrot.slane %v9207_v17, 4  ;;  %v9215_v42 = vshll.u32 %v19888_v61, 16 }
 0x8dd   :  { %v19912_v6 = vpack.c.bf16 %v9025_v2, %v9024_v16  ;;  %v9026_v19 = vmax.f32 %v8998_v1, 0.0  ;;  %v9158_v35 = vsel %vm7935_vm14, %v9153_v7, %v9157_v36  ;;  %v9287_v7 = vor.u32 %v9286_v13, %v9285_v59 }
 0x8de   :  { %v8917_v23 = vadd.f32 %v11879_v52, %v8828_v32  ;;  %9181 = vrot.lane.b32.xlu1 %v9158_v35, %s12999_s2  ;;  %v9219_v34 = vshrl.u32 %v19888_v61, 16 }
 0x8df   :  { %v19919_v58 = vpack.c.bf16 %v9026_v19, %v9025_v2  ;;  %v19924_v43 = vmul.bf16 %v19758_v29, %v19912_v6  ;;  %v9079_v16 = vshll.u32 %v19912_v6, 16  ;;  %v9083_v28 = vshrl.u32 %v19912_v6, 16 }
 0x8e0   :  { %v11880_v51 = vpop.f32.mrb[244].mxu0  ;;  %v9002_v33 = vpop.f32.mrb[148].mxu1  ;;  %v9077_v29 = vor.u32 %v9075_v45, %v9073_v25 }
 0x8e1   :  { %v9003_v63 = vadd.f32 %v9002_v33, %v8914_v50  ;;  %v11881_v32 = vpop.f32.mrb[245].mxu0  ;;  %v12354_v9 = vpop.f32.mrb[149].mxu1  ;;  %v9481_v48 = vsel %vm329_vm0, %v19924_v43, 0  ;;  %v19932_v4 = vrot.slane %v9079_v16, 1  ;;  %v9159_v15 = vrot.slane %v9083_v28, 3 }
 0x8e2   :  { %v11882_v11 = vadd.f32 %v11881_v32, %v11880_v51  ;;  %v11883_v30 = vpop.f32.mrb[246].mxu0  ;;  %v9005_v14 = vpop.f32.mrb[150].mxu1  ;;  %12367 = vmatpush3.bf16.msra.mxu1 %v9481_v48  ;;  %v9160_v56 = vrot.slane %v9079_v16, 4  ;;  %v9284_v50 = vor.u32 %v9283_v12, %v9282_v49  ;;  %v9291_v33 = vor.u32 %v9290_v39, %v9289_v37 }
 0x8e3   :  { %v9027_v53 = vmax.f32 %v9003_v63, 0.0  ;;  %v9006_v59 = vadd.f32 %v9005_v14, %v8917_v23  ;;  %v11884_v2 = vpop.f32.mrb[247].mxu0  ;;  %v12355_v1 = vpop.f32.mrb[151].mxu1  ;;  %v9082_v25 = vsel %vm773_vm5, %v9077_v29, %v19932_v4  ;;  %v9201_v23 = vrot.slane %v9199_v31, 1 }
 0x8e4   :  { %v11885_v45 = vadd.f32 %v11884_v2, %v11883_v30  ;;  %v19940_v21 = vor.u32 %v9160_v56, %v9159_v15  ;;  %v8922_v26 = vadd.f32 %v11882_v11, %v8833_v0  ;;  %9113 = vrot.lane.b32.xlu1 %v9082_v25, %s12999_s2  ;;  %v9197_v0 = vor.u32 %v9196_v27, %v9192_v55 }
 0x8e5   :  { %v19942_v41 = vpack.c.bf16 %v9027_v53, %v9026_v19  ;;  %v9028_v13 = vmax.f32 %v9006_v59, 0.0  ;;  %v9288_v51 = vsel %vm7935_vm14, %v9284_v50, %v9287_v7  ;;  %v9293_v63 = vrot.slane %v9219_v34, 3 }
 0x8e6   :  { %v9162_v52 = vsel %vm7935_vm14, %v9157_v36, %v19940_v21  ;;  %v8925_v35 = vadd.f32 %v11885_v45, %v8836_v38  ;;  %v9294_v36 = vrot.slane %v9215_v42, 4  ;;  %v9209_v31 = vrot.slane %v9207_v17, 1 }
 0x8e7   :  { %v19949_v16 = vpack.c.bf16 %v9028_v13, %v9027_v53  ;;  %9183 = vrot.lane.b32.xlu0 %v9162_v52, %s12999_s2  ;;  %v9227_v12 = vshrl.u32 %v19919_v58, 16  ;;  %v9202_v9 = vsel %vm773_vm5, %v9197_v0, %v9201_v23  ;;  %v9205_v55 = vor.u32 %v9203_v60, %v9201_v23  ;;  %v19976_v53 = vld [vmem:[%s20705_s14] sm:$0xff]  }
 0x8e8   :  { %v9010_v19 = vpop.f32.mrb[152].mxu1  ;;  %9310 = vrot.lane.b32.xlu1 %v9288_v51, %s12999_s2  ;;  %v9223_v27 = vshll.u32 %v19919_v58, 16  ;;  %v9087_v39 = vshll.u32 %v19942_v41, 16  ;;  %v9091_v11 = vshrl.u32 %v19942_v41, 16  ;;  %v9292_v17 = vsel %vm7935_vm14, %v9287_v7, %v9291_v33  ;;  %12369 = vmatmul.mubr.msk.bf16.vlgmr.msra.gmra.mrb[156].mxu1 %vm9464_vm15, %v19976_v53 }
 0x8e9   :  { %v9011_v49 = vadd.f32 %v9010_v19, %v8922_v26  ;;  %v12358_v38 = vpop.f32.mrb[153].mxu1  ;;  %v9295_v30 = vor.u32 %v9294_v36, %v9293_v63  ;;  %v9210_v60 = vsel %vm773_vm5, %v9205_v55, %v9209_v31  ;;  %v9217_v56 = vrot.slane %v9215_v42, 1  ;;  %9775 = vmatprep.mubr.bf16.mxu1 %v21627_v46 }
 0x8ea   :  { %v9013_v32 = vpop.f32.mrb[154].mxu1  ;;  %v9213_v59 = vor.u32 %v9211_v44, %v9209_v31  ;;  %v9297_v7 = vrot.slane %v9227_v12, 3  ;;  %v9298_v2 = vrot.slane %v9223_v27, 4  ;;  %v9225_v45 = vrot.slane %v9223_v27, 1 }
 0x8eb   :  { %v9029_v37 = vmax.f32 %v9011_v49, 0.0  ;;  %v9014_v48 = vadd.f32 %v9013_v32, %v8925_v35  ;;  %9247 = vrot.lane.b32.xlu0 %v9202_v9, %s12999_s2  ;;  %v12359_v29 = vpop.f32.mrb[155].mxu1  ;;  %v9163_v42 = vrot.slane %v9091_v11, 3  ;;  %v9164_v25 = vrot.slane %v9087_v39, 4 }
 0x8ec   :  { %9312 = vrot.lane.b32.xlu1 %v9292_v17, %s12999_s2  ;;  %v9296_v44 = vsel %vm7935_vm14, %v9291_v33, %v9295_v30  ;;  %v9221_v50 = vor.u32 %v9219_v34, %v9217_v56  ;;  %v9218_v35 = vsel %vm773_vm5, %v9213_v59, %v9217_v56  ;;  %v9299_v23 = vor.u32 %v9298_v2, %v9297_v7 }
 0x8ed   :  { %v19967_v14 = vpack.c.bf16 %v9029_v37, %v9028_v13  ;;  %v19969_v15 = vmax.f32 %v9014_v48, 0.0  ;;  %v9165_v19 = vor.u32 %v9164_v25, %v9163_v42  ;;  %v9089_v38 = vrot.slane %v9087_v39, 1 }
 0x8ee   :  { %v9226_v0 = vsel %vm773_vm5, %v9221_v50, %v9225_v45  ;;  %v9300_v49 = vsel %vm7935_vm14, %v9295_v30, %v9299_v23  ;;  %v9231_v34 = vshll.u32 %v19949_v16, 16  ;;  %v9235_v31 = vshrl.u32 %v19949_v16, 16 }
 0x8ef   :  { %v19983_v1 = vpack.c.bf16 %v19969_v15, %v9029_v37  ;;  %9249 = vrot.lane.b32.xlu0 %v9210_v60, %s12999_s2  ;;  %v19990_v26 = vpack.c.bf16 %v19969_v15, %v19969_v15  ;;  %v9095_v13 = vshll.u32 %v19967_v14, 16  ;;  %v9099_v52 = vshrl.u32 %v19967_v14, 16 }
 0x8f0   :  { %9314 = vrot.lane.b32.xlu1 %v9296_v44, %s12999_s2  ;;  %v9085_v32 = vor.u32 %v9083_v28, %v19932_v4  ;;  %v9166_v9 = vsel %vm7935_vm14, %v19940_v21, %v9165_v19  ;;  %v9093_v39 = vor.u32 %v9091_v11, %v9089_v38  ;;  %v9301_v17 = vrot.slane %v9235_v31, 3 }
 0x8f1   :  { %v9103_v51 = vshll.u32 %v19990_v26, 16  ;;  %v9171_v33 = vshrl.u32 %v19990_v26, 16  ;;  %v9167_v63 = vrot.slane %v9099_v52, 3  ;;  %v9168_v36 = vrot.slane %v9095_v13, 4 }
 0x8f2   :  { %v9090_v48 = vsel %vm773_vm5, %v9085_v32, %v9089_v38  ;;  %v9097_v29 = vrot.slane %v9095_v13, 1  ;;  %v9302_v30 = vrot.slane %v9231_v34, 4  ;;  %v9239_v28 = vshll.u32 %v19983_v1, 16 }
 0x8f3   :  { %9251 = vrot.lane.b32.xlu0 %v9218_v35, %s12999_s2  ;;  %v9169_v55 = vor.u32 %v9168_v36, %v9167_v63  ;;  %v9173_v27 = vrot.slane %v9171_v33, 3  ;;  %v9174_v37 = vrot.slane %v9103_v51, 4  ;;  %v9243_v4 = vshrl.u32 %v19983_v1, 16 }
 0x8f4   :  { %9253 = vrot.lane.b32.xlu1 %v9226_v0, %s12999_s2  ;;  %v9098_v21 = vsel %vm773_vm5, %v9093_v39, %v9097_v29  ;;  %v9101_v59 = vor.u32 %v9099_v52, %v9097_v29  ;;  %v9105_v7 = vrot.slane %v9103_v51, 1  ;;  %v9303_v11 = vor.u32 %v9302_v30, %v9301_v17  ;;  %v12942_v30 = vld [vmem:[%s20700_s9 + $0x2c] ss:$20 sps:$4 sm:$0xff]  }
 0x8f5   :  { %v9170_v60 = vsel %vm7935_vm14, %v9165_v19, %v9169_v55  ;;  %v9175_v56 = vor.u32 %v9174_v37, %v9173_v27  ;;  %v9305_v42 = vrot.slane %v9243_v4, 3  ;;  %v9306_v25 = vrot.slane %v9239_v28, 4 }
 0x8f6   :  { %v9106_v44 = vsel %vm773_vm5, %v9101_v59, %v9105_v7  ;;  %v9233_v13 = vrot.slane %v9231_v34, 1  ;;  %v9304_v50 = vsel %vm7935_vm14, %v9299_v23, %v9303_v11  ;;  %v9229_v52 = vor.u32 %v9227_v12, %v9225_v45 }
 0x8f7   :  { %9316 = vrot.lane.b32.xlu0 %v9300_v49, %s12999_s2  ;;  %v9176_v2 = vsel %vm7935_vm14, %v9169_v55, %v9175_v56  ;;  %v9307_v35 = vor.u32 %v9306_v25, %v9305_v42  ;;  %v9241_v19 = vrot.slane %v9239_v28, 1  ;;  %v9130_v23 = vrot.slane %v19851_v10, 1  ;;  %v12941_v55 = vld [vmem:[%s20700_s9] ss:$20 sps:$4 sm:$0xff]   ;;  %v12943_v56 = vld [vmem:[%s20700_s9 + $0x28] ss:$20 sps:$4 sm:$0xff]  }
 0x8f8   :  { %9185 = vrot.lane.b32.xlu1 %v9166_v9, %s12999_s2  ;;  %v9234_v0 = vsel %vm773_vm5, %v9229_v52, %v9233_v13  ;;  %v9237_v33 = vor.u32 %v9235_v31, %v9233_v13  ;;  %v9129_v38 = vrot.slane %v19841_v24, 1  ;;  %v12940_v9 = vld [vmem:[%s20700_s9 + $0x4] ss:$20 sps:$4 sm:$0xff]   ;;  %v9132_v37 = vrot.slane %v19866_v57, 1 }
 0x8f9   :  { %v9308_v51 = vsel %vm7935_vm14, %v9303_v11, %v9307_v35  ;;  %v9245_v36 = vor.u32 %v9243_v4, %v9241_v19  ;;  %v9309_v12 = vsel %vm7935_vm14, %v9307_v35, %v19559_v54  ;;  %v9134_v4 = vrot.slane %v19883_v20, 1  ;;  %v12944_v11 = vld [vmem:[%s20700_s9 + $0x54] ss:$20 sps:$4 sm:$0xff]   ;;  %v12945_v25 = vld [vmem:[%s20700_s9 + $0x50] ss:$20 sps:$4 sm:$0xff]  }
 0x8fa   :  { %v9242_v63 = vsel %vm773_vm5, %v9237_v33, %v9241_v19  ;;  %v9131_v31 = vsel %vm1058_vm4, %v9129_v38, %v9130_v23  ;;  %v9133_v29 = vsel %vm1058_vm4, %v9130_v23, %v9132_v37  ;;  %v9136_v13 = vrot.slane %v19912_v6, 1  ;;  %v12946_v35 = vld [vmem:[%s20700_s9 + $0x78] ss:$20 sps:$4 sm:$0xff]  }
 0x8fb   :  { %9115 = vrot.lane.b32.xlu0 %v9090_v48, %s12999_s2  ;;  %v9246_v45 = vsel %vm773_vm5, %v9245_v36, %v21749_v47  ;;  %v9135_v59 = vsel %vm1058_vm4, %v9132_v37, %v9134_v4  ;;  %v9268_v33 = vrot.slane %v19843_v40, 3  ;;  %v12947_v36 = vld [vmem:[%s20700_s9 + $0x7c] ss:$20 sps:$4 sm:$0xff]   ;;  %v9271_v23 = vrot.slane %v19869_v3, 3  ;;  %v12948_v38 = vld [vmem:[%s20700_s9 + $0xc] ss:$20 sps:$4 sm:$0xff]  }
 0x8fc   :  { %9187 = vrot.lane.b32.xlu1 %v9170_v60, %s12999_s2  ;;  %v9137_v19 = vsel %vm1058_vm4, %v9134_v4, %v9136_v13  ;;  %v9273_v37 = vrot.slane %v19888_v61, 3  ;;  %v12952_v4 = vld [vmem:[%s20700_s9 + $0x5c] ss:$20 sps:$4 sm:$0xff]  }
 0x8ff   :  { %9117 = vrot.lane.b32.xlu0 %v9098_v21, %s12999_s2 }
 0x900   :  { %9189 = vrot.lane.b32.xlu1 %v9176_v2, %s12999_s2 }
 0x903   :  { %9119 = vrot.lane.b32.xlu0 %v9106_v44, %s12999_s2 }
 0x904   :  { %9318 = vrot.lane.b32.xlu1 %v9304_v50, %s12999_s2  ;;  %v9269_v50 = vrot.slane %v19853_v5, 3 }
 0x907   :  { %9255 = vrot.lane.b32.xlu0 %v9234_v0, %s12999_s2 }
 0x908   :  { %9320 = vrot.lane.b32.xlu1 %v9308_v51, %s12999_s2 }
 0x90b   :  { %9257 = vrot.lane.b32.xlu0 %v9242_v63, %s12999_s2 }
 0x90c   :  { %9322 = vrot.lane.b32.xlu1 %v9309_v12, %s12999_s2  ;;  %v9270_v12 = vsel %vm330_vm1, %v9268_v33, %v9269_v50 }
 0x90f   :  { %9259 = vrot.lane.b32.xlu0 %v9246_v45, %s12999_s2 }
 0x93e   :  { %v9108_v49 = vpop.permute.xlu0 %9107 }
 0x93f   :  { %v9325_v34 = vsel %vm1894_vm10, %v19841_v24, %v9108_v49 }
 0x940   :  { %v9178_v32 = vpop.permute.xlu1 %9177  ;;  %v9422_v27 = vmul.bf16 %v12941_v55, %v9325_v34  ;;  %v9272_v55 = vsel %vm330_vm1, %v9269_v50, %v9271_v23  ;;  %v12953_v50 = vld [vmem:[%s20700_s9 + $0x84] ss:$20 sps:$4 sm:$0xff]  }
 0x941   :  { %v9347_v54 = vsel %vm1894_vm10, %v9131_v31, %v9178_v32 }
 0x942   :  { %v9423_v47 = vmul.bf16 %v12940_v9, %v9347_v54  ;;  %v12949_v9 = vld [vmem:[%s20700_s9 + $0x8] ss:$20 sps:$4 sm:$0xff]  }
 0x944   :  { %9483 = vmatprep.subr.bf16.mxu0 %v9423_v47 }
 0x945   :  { %9484 = vmatpush1.bf16.msra.mxu0 %v9422_v27 }
 0x946   :  { %v9110_v24 = vpop.permute.xlu0 %9109 }
 0x947   :  { %v9328_v48 = vsel %vm1894_vm10, %v19851_v10, %v9110_v24 }
 0x948   :  { %v9180_v39 = vpop.permute.xlu1 %9179  ;;  %v9427_v28 = vmul.bf16 %v12943_v56, %v9328_v48  ;;  %v12950_v48 = vld [vmem:[%s20700_s9 + $0x34] ss:$20 sps:$4 sm:$0xff]  }
 0x949   :  { %v9351_v17 = vsel %vm1894_vm10, %v9133_v29, %v9180_v39 }
 0x94a   :  { %v9428_v60 = vmul.bf16 %v12942_v30, %v9351_v17  ;;  %v12951_v17 = vld [vmem:[%s20700_s9 + $0x30] ss:$20 sps:$4 sm:$0xff]  }
 0x94c   :  { %9485 = vmatprep.subr.bf16.mxu0 %v9428_v60  ;;  %v9274_v60 = vsel %vm330_vm1, %v9271_v23, %v9273_v37  ;;  %v12955_v23 = vld [vmem:[%s20700_s9 + $0xa0] ss:$20 sps:$4 sm:$0xff]  }
 0x94d   :  { %9486 = vmatpush1.bf16.msra.mxu0 %v9427_v28 }
 0x94e   :  { %v9112_v10 = vpop.permute.xlu0 %9111 }
 0x94f   :  { %v9331_v21 = vsel %vm1894_vm10, %v19866_v57, %v9112_v10 }
 0x950   :  { %v9182_v7 = vpop.permute.xlu1 %9181  ;;  %v9432_v44 = vmul.bf16 %v12945_v25, %v9331_v21  ;;  %v9275_v21 = vrot.slane %v19919_v58, 3 }
 0x951   :  { %v9355_v2 = vsel %vm1894_vm10, %v9135_v59, %v9182_v7 }
 0x952   :  { %v9433_v42 = vmul.bf16 %v12944_v11, %v9355_v2  ;;  %v9138_v11 = vrot.slane %v19942_v41, 1 }
 0x954   :  { %9487 = vmatprep.subr.bf16.mxu0 %v9433_v42 }
 0x955   :  { %9488 = vmatpush1.bf16.msra.mxu0 %v9432_v44  ;;  %v9276_v44 = vsel %vm330_vm1, %v9273_v37, %v9275_v21 }
 0x956   :  { %v9114_v57 = vpop.permute.xlu1 %9113 }
 0x957   :  { %v9334_v52 = vsel %vm1894_vm10, %v19883_v20, %v9114_v57 }
 0x958   :  { %v20084_v0 = vmul.bf16 %v12946_v35, %v9334_v52 }
 0x959   :  { %v9184_v51 = vpop.permute.xlu0 %9183 }
 0x95a   :  { %v9359_v63 = vsel %vm1894_vm10, %v9137_v19, %v9184_v51  ;;  %v9311_v45 = vpop.permute.xlu1 %9310  ;;  %v9469_v32 = vsel %vm329_vm0, %v20084_v0, 0  ;;  %v12954_v19 = vld [vmem:[%s20700_s9 + $0xa4] ss:$20 sps:$4 sm:$0xff]  }
 0x95b   :  { %v20094_v20 = vmul.bf16 %v12947_v36, %v9359_v63  ;;  %v9396_v49 = vsel %vm1894_vm10, %v9270_v12, %v9311_v45 }
 0x95c   :  { %v9425_v34 = vmul.bf16 %v12948_v38, %v9396_v49 }
 0x95d   :  { %11519 = vmatprep.subr.msk.bf16.mxu0 %vm329_vm0, %v20094_v20  ;;  %v9248_v31 = vpop.permute.xlu0 %9247  ;;  %v9638_v12 = vrot.slane %v20094_v20, 4 }
 0x95e   :  { %v9374_v54 = vsel %vm1894_vm10, %v19843_v40, %v9248_v31  ;;  %9490 = vmatpush1.bf16.msra.mxu0 %v9469_v32  ;;  %v9313_v27 = vpop.permute.xlu1 %9312  ;;  %v9635_v32 = vrot.slane %v20084_v0, 4 }
 0x95f   :  { %v9424_v47 = vmul.bf16 %v12949_v9, %v9374_v54  ;;  %9526 = vmatprep.subr.bf16.mxu0 %v9425_v34  ;;  %v9400_v24 = vsel %vm1894_vm10, %v9272_v55, %v9313_v27  ;;  %v9142_v34 = vrot.slane %v19990_v26, 1  ;;  %v9277_v26 = vrot.slane %v19949_v16, 3  ;;  %v12957_v27 = vld [vmem:[%s20700_s9 + $0xc8] ss:$20 sps:$4 sm:$0xff]  }
 0x960   :  { %v9430_v29 = vmul.bf16 %v12950_v48, %v9400_v24 }
 0x961   :  { %v9250_v40 = vpop.permute.xlu0 %9249  ;;  %11520 = vmatmul.mubr.msk.bf16.vlgmr.msra.gmra.mrb[248].mxu0 %vm9464_vm15, %v19976_v53 }
 0x962   :  { %v9377_v39 = vsel %vm1894_vm10, %v19853_v5, %v9250_v40  ;;  %9527 = vmatpush1.bf16.msra.mxu0 %v9424_v47  ;;  %9558 = vmatprep.mubr.bf16.mxu0 %v21627_v46  ;;  %v9315_v56 = vpop.permute.xlu1 %9314 }
 0x963   :  { %v9429_v30 = vmul.bf16 %v12951_v17, %v9377_v39  ;;  %9528 = vmatprep.subr.bf16.mxu0 %v9430_v29  ;;  %v9404_v28 = vsel %vm1894_vm10, %v9274_v60, %v9315_v56  ;;  %v12958_v17 = vld [vmem:[%s20700_s9 + $0xf4] ss:$20 sps:$4 sm:$0xff]  }
 0x964   :  { %v9435_v10 = vmul.bf16 %v12952_v4, %v9404_v28  ;;  %v9279_v28 = vrot.slane %v19983_v1, 3 }
 0x965   :  { %v9252_v5 = vpop.permute.xlu0 %9251 }
 0x966   :  { %v9380_v59 = vsel %vm1894_vm10, %v19869_v3, %v9252_v5  ;;  %9529 = vmatpush1.bf16.msra.mxu0 %v9429_v30  ;;  %v9254_v2 = vpop.permute.xlu1 %9253 }
 0x967   :  { %v9434_v7 = vmul.bf16 %v19707_v18, %v9380_v59  ;;  %9530 = vmatprep.subr.bf16.mxu0 %v9435_v10  ;;  %v9383_v42 = vsel %vm1894_vm10, %v19888_v61, %v9254_v2  ;;  %v9140_v18 = vrot.slane %v19967_v14, 1  ;;  %v12959_v10 = vld [vmem:[%s20700_s9 + $0xf0] ss:$20 sps:$4 sm:$0xff]   ;;  %v9278_v59 = vsel %vm330_vm1, %v9275_v21, %v9277_v26 }
 0x968   :  { %v20138_v25 = vmul.bf16 %v19731_v22, %v9383_v42  ;;  %v9139_v22 = vsel %vm1058_vm4, %v9136_v13, %v9138_v11  ;;  %v9280_v21 = vsel %vm330_vm1, %v9277_v26, %v9279_v28 }
 0x969   :  { %v9317_v57 = vpop.permute.xlu0 %9316  ;;  %v9141_v13 = vsel %vm1058_vm4, %v9138_v11, %v9140_v18  ;;  %v9143_v24 = vsel %vm1058_vm4, %v9140_v18, %v9142_v34 }
 0x96a   :  { %v9408_v3 = vsel %vm1894_vm10, %v9276_v44, %v9317_v57  ;;  %9531 = vmatpush1.bf16.msra.mxu0 %v9434_v7  ;;  %v9186_v61 = vpop.permute.xlu1 %9185  ;;  %v9475_v63 = vsel %vm329_vm0, %v20138_v25, 0  ;;  %v12960_v44 = vld [vmem:[%s20700_s9 + $0xac] ss:$20 sps:$4 sm:$0xff]  }
 0x96b   :  { %v20148_v52 = vmul.bf16 %v12953_v50, %v9408_v3  ;;  %v9363_v35 = vsel %vm1894_vm10, %v9139_v22, %v9186_v61  ;;  %v12961_v22 = vld [vmem:[%s20700_s9 + $0xb0] ss:$20 sps:$4 sm:$0xff]  }
 0x96c   :  { %v9443_v51 = vmul.bf16 %v12954_v19, %v9363_v35  ;;  %v9446_v61 = vmul.bf16 %v12961_v22, %v19942_v41  ;;  %v12842_v22 = vld [vmem:[%s20703_s12 + $0x90] sm:$0xff]  }
 0x96d   :  { %11521 = vmatprep.subr.msk.bf16.mxu0 %vm329_vm0, %v20148_v52  ;;  %v9116_v33 = vpop.permute.xlu0 %9115  ;;  %v9644_v35 = vrot.slane %v20148_v52, 4  ;;  %v12963_v52 = vld [vmem:[%s20700_s9 + $0xd4] ss:$20 sps:$4 sm:$0xff]  }
 0x96e   :  { %v9337_v36 = vsel %vm1894_vm10, %v19912_v6, %v9116_v33  ;;  %9533 = vmatpush1.bf16.msra.mxu0 %v9475_v63  ;;  %v9639_v45 = vrot.slane %v9443_v51, 4  ;;  %v9188_v38 = vpop.permute.xlu1 %9187  ;;  %v12956_v6 = vld [vmem:[%s20700_s9 + $0xcc] ss:$20 sps:$4 sm:$0xff]   ;;  %v12962_v51 = vld [vmem:[%s20700_s9 + $0xa8] ss:$20 sps:$4 sm:$0xff]   ;;  %v9648_v34 = vrot.slane %v9446_v61, 4 }
 0x96f   :  { %v9442_v49 = vmul.bf16 %v12955_v23, %v9337_v36  ;;  %v9367_v31 = vsel %vm1894_vm10, %v9141_v13, %v9188_v38  ;;  %v9046_v36 = vpack.c.bf16 %v21747_v62, %v19969_v15  ;;  %v9281_v15 = vsel %vm330_vm1, %v9279_v28, %v21704_v8  ;;  %v12844_v61 = vld [vmem:[%s20703_s12 + $0x18] sm:$0xff]  }
 0x970   :  { %v9448_v9 = vmul.bf16 %v12956_v6, %v9367_v31  ;;  %v9640_v47 = vsel %vm329_vm0, %v9638_v12, %v9639_v45  ;;  %v9641_v12 = vrot.slane %v20138_v25, 4  ;;  %v12964_v25 = vld [vmem:[%s20700_s9 + $0xd8] ss:$20 sps:$4 sm:$0xff]   ;;  %v9647_v8 = vrot.slane %v19924_v43, 4 }
 0x971   :  { %v9636_v54 = vrot.slane %v9442_v49, 4  ;;  %v9118_v20 = vpop.permute.xlu0 %9117  ;;  %11522 = vmatmul.mubr.msk.bf16.vlgmr.msra.gmra.mrb[252].mxu0 %vm9464_vm15, %v19976_v53  ;;  %9700 = vmatprep.subr.bf16.mxu0 %v9640_v47  ;;  %v9451_v31 = vmul.bf16 %v12964_v25, %v19967_v14  ;;  %v12862_v25 = vld [vmem:[%s20703_s12 + $0xb8] sm:$0xff]  }
 0x972   :  { %v9340_v55 = vsel %vm1894_vm10, %v19942_v41, %v9118_v20  ;;  %9732 = vmatprep.mubr.bf16.mxu0 %v21627_v46  ;;  %v9652_v0 = vrot.slane %v9448_v9, 4  ;;  %v9190_v48 = vpop.permute.xlu1 %9189 }
 0x973   :  { %v9447_v37 = vmul.bf16 %v12957_v27, %v9340_v55  ;;  %v9637_v29 = vsel %vm329_vm0, %v9635_v32, %v9636_v54  ;;  %v9371_v40 = vsel %vm1894_vm10, %v9143_v24, %v9190_v48  ;;  %v9649_v48 = vsel %vm329_vm0, %v9647_v8, %v9648_v34 }
 0x974   :  { %9701 = vmatpush1.bf16.msra.mxu0 %v9637_v29  ;;  %v9453_v46 = vmul.bf16 %v12958_v17, %v9371_v40  ;;  %v9653_v60 = vsel %vm329_vm0, %v9639_v45, %v9652_v0  ;;  %v12968_v40 = vld [vmem:[%s20700_s9 + $0xf8] ss:$20 sps:$4 sm:$0xff]  }
 0x975   :  { %v9650_v39 = vrot.slane %v9447_v37, 4  ;;  %v9120_v30 = vpop.permute.xlu0 %9119  ;;  %9702 = vmatprep.subr.bf16.mxu0 %v9653_v60  ;;  %v12967_v37 = vld [vmem:[%s20700_s9 + $0x100] ss:$20 sps:$4 sm:$0xff]  }
 0x976   :  { %v9343_v56 = vsel %vm1894_vm10, %v19967_v14, %v9120_v30  ;;  %v9662_v4 = vrot.slane %v9453_v46, 4  ;;  %v9319_v7 = vpop.permute.xlu1 %9318  ;;  %v12966_v14 = vld [vmem:[%s20700_s9 + $0xfc] ss:$20 sps:$4 sm:$0xff]   ;;  %v9456_v43 = vmul.bf16 %v12967_v37, %v9046_v36  ;;  %v9658_v46 = vrot.slane %v9451_v31, 4  ;;  %v12850_v36 = vld [vmem:[%s20703_s12 + $0xa0] sm:$0xff]  }
 0x977   :  { %v9452_v5 = vmul.bf16 %v12959_v10, %v9343_v56  ;;  %v9651_v2 = vsel %vm329_vm0, %v9636_v54, %v9650_v39  ;;  %v9412_v11 = vsel %vm1894_vm10, %v9278_v59, %v9319_v7  ;;  %v12965_v54 = vld [vmem:[%s20700_s9 + $0xd0] ss:$20 sps:$4 sm:$0xff]   ;;  %v12866_v37 = vld [vmem:[%s20703_s12 + $0x118] sm:$0xff]  }
 0x978   :  { %9703 = vmatpush1.bf16.msra.mxu0 %v9651_v2  ;;  %v9445_v57 = vmul.bf16 %v12960_v44, %v9412_v11  ;;  %v9663_v18 = vsel %vm329_vm0, %v9652_v0, %v9662_v4  ;;  %v9659_v56 = vsel %vm329_vm0, %v9648_v34, %v9658_v46  ;;  %v9668_v28 = vrot.slane %v9456_v43, 4  ;;  %v12832_v59 = vld [vmem:[%s20703_s12] sm:$0xff]   ;;  %v12835_v2 = vld [vmem:[%s20703_s12 + $0x48] sm:$0xff]   ;;  %v12861_v34 = vld [vmem:[%s20703_s12 + $0xf8] sm:$0xff]  }
 0x979   :  { %v9660_v42 = vrot.slane %v9452_v5, 4  ;;  %v9256_v3 = vpop.permute.xlu0 %9255  ;;  %9704 = vmatprep.subr.bf16.mxu0 %v9663_v18  ;;  %v12833_v7 = vld [vmem:[%s20703_s12 + $0xc0] sm:$0xff]   ;;  %v12836_v44 = vld [vmem:[%s20703_s12 + $0x8] sm:$0xff]  }
 0x97a   :  { %v9386_v50 = vsel %vm1894_vm10, %v19919_v58, %v9256_v3  ;;  %v9645_v19 = vrot.slane %v9445_v57, 4  ;;  %v9321_v63 = vpop.permute.xlu1 %9320  ;;  %v9669_v5 = vsel %vm329_vm0, %v9658_v46, %v9668_v28  ;;  %v9698_v11 = vsel %vm329_vm0, %v9668_v28, 0  ;;  %v12837_v57 = vld [vmem:[%s20703_s12 + $0xc8] sm:$0xff]   ;;  %v12839_v3 = vld [vmem:[%s20703_s12 + $0x50] sm:$0xff]   ;;  %v12863_v31 = vld [vmem:[%s20703_s12 + $0x100] sm:$0xff]  }
 0x97b   :  { %v9444_v33 = vmul.bf16 %v12962_v51, %v9386_v50  ;;  %v9661_v58 = vsel %vm329_vm0, %v9650_v39, %v9660_v42  ;;  %v9416_v13 = vsel %vm1894_vm10, %v9280_v21, %v9321_v63  ;;  %v12838_v18 = vld [vmem:[%s20703_s12 + $0x88] sm:$0xff]   ;;  %v12840_v50 = vld [vmem:[%s20703_s12 + $0x10] sm:$0xff]   ;;  %v12846_v51 = vld [vmem:[%s20703_s12 + $0x98] sm:$0xff]  }
 0x97c   :  { %9705 = vmatpush1.bf16.msra.mxu0 %v9661_v58  ;;  %v9450_v45 = vmul.bf16 %v12963_v52, %v9416_v13  ;;  %v9646_v49 = vsel %vm329_vm0, %v9644_v35, %v9645_v19  ;;  %v12841_v21 = vld [vmem:[%s20703_s12 + $0xd0] sm:$0xff]   ;;  %v12845_v35 = vld [vmem:[%s20703_s12 + $0xd8] sm:$0xff]   ;;  %v12849_v63 = vld [vmem:[%s20703_s12 + $0xe0] sm:$0xff]  }
 0x97d   :  { %v9642_v41 = vrot.slane %v9444_v33, 4  ;;  %11524 = vmatprep.subr.msk.bf16.mxu0 %vm329_vm0, %v9662_v4  ;;  %v9258_v23 = vpop.permute.xlu0 %9257  ;;  %9743 = vmatprep.subr.bf16.mxu1 %v9646_v49  ;;  %v12831_v4 = vld [vmem:[%s20703_s12 + $0x40] sm:$0xff]   ;;  %v12851_v58 = vld [vmem:[%s20703_s12 + $0x68] sm:$0xff]   ;;  %v12855_v52 = vld [vmem:[%s20703_s12 + $0x70] sm:$0xff]  }
 0x97e   :  { %v9389_v38 = vsel %vm1894_vm10, %v19949_v16, %v9258_v23  ;;  %v9656_v32 = vrot.slane %v9450_v45, 4  ;;  %v9323_v9 = vpop.permute.xlu1 %9322  ;;  %v9686_v16 = vsel %vm329_vm0, %v9660_v42, 0  ;;  %v12834_v42 = vld [vmem:[%s20703_s12 + $0x80] sm:$0xff]   ;;  %v12852_v13 = vld [vmem:[%s20703_s12 + $0x28] sm:$0xff]   ;;  %v12856_v45 = vld [vmem:[%s20703_s12 + $0x30] sm:$0xff]  }
 0x97f   :  { %v9449_v6 = vmul.bf16 %v12965_v54, %v9389_v38  ;;  %v9643_v20 = vsel %vm329_vm0, %v9641_v12, %v9642_v41  ;;  %v9420_v47 = vsel %vm1894_vm10, %v9281_v15, %v9323_v9  ;;  %v12848_v33 = vld [vmem:[%s20703_s12 + $0x20] sm:$0xff]   ;;  %v12853_v12 = vld [vmem:[%s20703_s12 + $0xe8] sm:$0xff]   ;;  %v12857_v23 = vld [vmem:[%s20703_s12 + $0xf0] sm:$0xff]  }
 0x980   :  { %9707 = vmatpush1.bf16.msra.mxu0 %v9686_v16  ;;  %9744 = vmatpush1.bf16.msra.mxu1 %v9643_v20  ;;  %v9455_v26 = vmul.bf16 %v12966_v14, %v9420_v47  ;;  %v9657_v27 = vsel %vm329_vm0, %v9645_v19, %v9656_v32  ;;  %v12847_v19 = vld [vmem:[%s20703_s12 + $0x60] sm:$0xff]   ;;  %v12858_v49 = vld [vmem:[%s20703_s12 + $0xb0] sm:$0xff]   ;;  %v12859_v38 = vld [vmem:[%s20703_s12 + $0x78] sm:$0xff]  }
 0x981   :  { %v9654_v55 = vrot.slane %v9449_v6, 4  ;;  %v9260_v0 = vpop.permute.xlu0 %9259  ;;  %12372 = vmatprep.subr.bf16.mxu0 %v21747_v62  ;;  %9745 = vmatprep.subr.bf16.mxu1 %v9657_v27  ;;  %v12860_v15 = vld [vmem:[%s20703_s12 + $0x38] sm:$0xff]   ;;  %v12865_v27 = vld [vmem:[%s20703_s12 + $0x110] sm:$0xff]  }
 0x982   :  { %v9392_v24 = vsel %vm1894_vm10, %v19983_v1, %v9260_v0  ;;  %v9666_v29 = vrot.slane %v9455_v26, 4  ;;  %v12864_v0 = vld [vmem:[%s20703_s12 + $0x108] sm:$0xff]  }
 0x983   :  { %v9454_v39 = vmul.bf16 %v12968_v40, %v9392_v24  ;;  %11525 = vmatmul.mubr.msk.bf16.vlgmr.msra.gmra.mrb[0].mxu0 %vm9464_vm15, %v19976_v53  ;;  %v9655_v17 = vsel %vm329_vm0, %v9642_v41, %v9654_v55  ;;  %v12854_v41 = vld [vmem:[%s20703_s12 + $0xa8] sm:$0xff]  }
 0x984   :  { %9746 = vmatpush1.bf16.msra.mxu1 %v9655_v17  ;;  %12373 = vmatpush3.bf16.msra.mxu0 %v9649_v48  ;;  %v9667_v1 = vsel %vm329_vm0, %v9656_v32, %v9666_v29 }
 0x985   :  { %v9664_v30 = vrot.slane %v9454_v39, 4  ;;  %12374 = vmatprep.subr.bf16.mxu0 %v21747_v62  ;;  %12380 = vmatprep.mubr.msk.bf16.mxu0 %vm12995_vm2, %v21747_v62 }
 0x986   :  { %9747 = vmatprep.subr.bf16.mxu1 %v9667_v1 }
 0x987   :  { %v9665_v60 = vsel %vm329_vm0, %v9654_v55, %v9664_v30  ;;  %v9692_v10 = vsel %vm329_vm0, %v9664_v30, 0 }
 0x988   :  { %9748 = vmatpush1.bf16.msra.mxu1 %v9665_v60  ;;  %12375 = vmatpush3.bf16.msra.mxu0 %v9659_v56 }
 0x989   :  { %11526 = vmatprep.subr.msk.bf16.mxu1 %vm329_vm0, %v9666_v29  ;;  %12376 = vmatprep.subr.bf16.mxu0 %v21747_v62 }
 0x98c   :  { %9750 = vmatpush1.bf16.msra.mxu1 %v9692_v10  ;;  %12377 = vmatpush3.bf16.msra.mxu0 %v9669_v5 }
 0x98d   :  { %12378 = vmatprep.subr.bf16.mxu0 %v21747_v62  ;;  %11907 = vmatprep.subr.bf16.mxu1 %v12831_v4 }
 0x98f   :  { %11527 = vmatmul.mubr.msk.bf16.vlgmr.msra.gmra.mrb[160].mxu1 %vm9464_vm15, %v19976_v53 }
 0x990   :  { %12379 = vmatpush3.bf16.msra.mxu0 %v9698_v11  ;;  %11908 = vmatpush3.bf16.msra.mxu1 %v12832_v59 }
 0x991   :  { %11935 = vmatprep.subr.bf16.mxu0 %v12833_v7  ;;  %11909 = vmatprep.subr.bf16.mxu1 %v12835_v2 }
 0x993   :  { %12381 = vmatmul.mubr.msk.bf16.vlgmr.msra.gmra.mrb[4].mxu0 %vm9464_vm15, %v19976_v53  ;;  %v12843_v53 = vld [vmem:[%s20703_s12 + $0x58] sm:$0xff]  }
 0x994   :  { %11936 = vmatpush3.bf16.msra.mxu0 %v12834_v42  ;;  %11910 = vmatpush3.bf16.msra.mxu1 %v12836_v44 }
 0x995   :  { %11937 = vmatprep.subr.bf16.mxu0 %v12837_v57  ;;  %11911 = vmatprep.subr.bf16.mxu1 %v12839_v3  ;;  %v12867_v3 = vld [vmem:[%s20706_s15 + $0x40] sm:$0xff]  }
 0x998   :  { %11938 = vmatpush3.bf16.msra.mxu0 %v12838_v18  ;;  %11912 = vmatpush3.bf16.msra.mxu1 %v12840_v50  ;;  %v12868_v18 = vld [vmem:[%s20706_s15 + $0xc0] sm:$0xff]  }
 0x999   :  { %11939 = vmatprep.subr.bf16.mxu0 %v12841_v21  ;;  %11913 = vmatprep.subr.bf16.mxu1 %v12843_v53  ;;  %v12869_v50 = vld [vmem:[%s20706_s15] sm:$0xff]   ;;  %v12871_v53 = vld [vmem:[%s20706_s15 + $0x48] sm:$0xff]  }
 0x99a   :  { %v12870_v21 = vld [vmem:[%s20706_s15 + $0x80] sm:$0xff]  }
 0x99c   :  { %11940 = vmatpush3.bf16.msra.mxu0 %v12842_v22  ;;  %11914 = vmatpush3.bf16.msra.mxu1 %v12844_v61  ;;  %v12872_v22 = vld [vmem:[%s20706_s15 + $0xc8] sm:$0xff]  }
 0x99d   :  { %11941 = vmatprep.subr.bf16.mxu0 %v12845_v35  ;;  %11915 = vmatprep.subr.bf16.mxu1 %v12847_v19  ;;  %v12873_v61 = vld [vmem:[%s20706_s15 + $0x8] sm:$0xff]   ;;  %v12875_v19 = vld [vmem:[%s20706_s15 + $0x50] sm:$0xff]  }
 0x99e   :  { %v12874_v35 = vld [vmem:[%s20706_s15 + $0x88] sm:$0xff]  }
 0x9a0   :  { %11942 = vmatpush3.bf16.msra.mxu0 %v12846_v51  ;;  %11916 = vmatpush3.bf16.msra.mxu1 %v12848_v33  ;;  %v12876_v51 = vld [vmem:[%s20706_s15 + $0xd0] sm:$0xff]  }
 0x9a1   :  { %11943 = vmatprep.subr.bf16.mxu0 %v12849_v63  ;;  %11917 = vmatprep.subr.bf16.mxu1 %v12851_v58  ;;  %v12877_v33 = vld [vmem:[%s20706_s15 + $0x10] sm:$0xff]   ;;  %v12879_v58 = vld [vmem:[%s20706_s15 + $0x58] sm:$0xff]  }
 0x9a2   :  { %v12878_v63 = vld [vmem:[%s20706_s15 + $0x90] sm:$0xff]  }
 0x9a4   :  { %11944 = vmatpush3.bf16.msra.mxu0 %v12850_v36  ;;  %11918 = vmatpush3.bf16.msra.mxu1 %v12852_v13  ;;  %v12880_v36 = vld [vmem:[%s20706_s15 + $0xd8] sm:$0xff]  }
 0x9a5   :  { %11945 = vmatprep.subr.bf16.mxu0 %v12853_v12  ;;  %11919 = vmatprep.subr.bf16.mxu1 %v12855_v52  ;;  %v12881_v13 = vld [vmem:[%s20706_s15 + $0x18] sm:$0xff]   ;;  %v12884_v52 = vld [vmem:[%s20706_s15 + $0xe0] sm:$0xff]  }
 0x9a6   :  { %v12882_v12 = vld [vmem:[%s20706_s15 + $0x98] sm:$0xff]  }
 0x9a8   :  { %11946 = vmatpush3.bf16.msra.mxu0 %v12854_v41  ;;  %11920 = vmatpush3.bf16.msra.mxu1 %v12856_v45  ;;  %v12883_v41 = vld [vmem:[%s20706_s15 + $0x60] sm:$0xff]  }
 0x9a9   :  { %11947 = vmatprep.subr.bf16.mxu0 %v12857_v23  ;;  %11921 = vmatprep.subr.bf16.mxu1 %v12859_v38  ;;  %v12885_v45 = vld [vmem:[%s20706_s15 + $0x20] sm:$0xff]   ;;  %v12888_v38 = vld [vmem:[%s20706_s15 + $0xe8] sm:$0xff]  }
 0x9aa   :  { %v12886_v23 = vld [vmem:[%s20706_s15 + $0xa0] sm:$0xff]  }
 0x9ac   :  { %11948 = vmatpush3.bf16.msra.mxu0 %v12858_v49  ;;  %11922 = vmatpush3.bf16.msra.mxu1 %v12860_v15  ;;  %v12887_v49 = vld [vmem:[%s20706_s15 + $0x68] sm:$0xff]  }
 0x9ad   :  { %11949 = vmatprep.subr.bf16.mxu0 %v12861_v34  ;;  %12384 = vmatprep.subr.bf16.mxu1 %v12863_v31  ;;  %v12889_v15 = vld [vmem:[%s20706_s15 + $0x28] sm:$0xff]  }
 0x9ae   :  { %v12890_v34 = vld [vmem:[%s20706_s15 + $0xa8] sm:$0xff]  }
 0x9b0   :  { %11950 = vmatpush3.bf16.msra.mxu0 %v12862_v25  ;;  %v12891_v25 = vld [vmem:[%s20706_s15 + $0x70] sm:$0xff]  }
 0x9b1   :  { %11969 = vmatprep.subr.bf16.mxu0 %v12867_v3 }
 0x9bb   :  { %v9603_v32 = vpop.f32.mrb[156].mxu1 }
 0x9bc   :  { %v12370_v54 = vpop.f32.mrb[157].mxu1 }
 0x9bd   :  { %v9606_v6 = vpop.f32.mrb[158].mxu1  ;;  %v12894_v54 = vld [vmem:[%s20706_s15 + $0xb0] sm:$0xff]  }
 0x9be   :  { %v9614_v9 = vpack.c.bf16 %v9606_v6, %v9603_v32  ;;  %v12371_v16 = vpop.f32.mrb[159].mxu1  ;;  %v12893_v32 = vld [vmem:[%s20706_s15 + $0x30] sm:$0xff]   ;;  %v12895_v6 = vld [vmem:[%s20706_s15 + $0x78] sm:$0xff]  }
 0xa34   :  { %v9517_v20 = vpop.f32.mrb[248].mxu0 }
 0xa35   :  { %v9519_v8 = vpop.f32.mrb[249].mxu0 }
 0xa36   :  { %v9521_v47 = vpop.f32.mrb[250].mxu0 }
 0xa37   :  { %v9610_v55 = vpack.c.bf16 %v9521_v47, %v9517_v20  ;;  %v9523_v14 = vpop.f32.mrb[251].mxu0 }
 0xa38   :  { %v9611_v26 = vpack.c.bf16 %v9523_v14, %v9519_v8 }
 0xa3a   :  { %10165 = vmatprep.mubr.bf16.mxu1 %v9611_v26  ;;  %v11529_v26 = vld [vmem:[%s20704_s13] ss:$0 sm:$0xff] }
 0xa3b   :  { %10166 = vmatmul.mubr.bf16.vlgmr.msra.gmra.mrb[164].mxu1 %v9610_v55 }
 0xa3c   :  { %12385 = vmatpush3.bf16.msra.mxu1 %v12863_v31  ;;  %v12892_v31 = vld [vmem:[%s20706_s15 + $0xf0] sm:$0xff]  }
 0xa3d   :  { %12386 = vmatprep.subr.bf16.mxu1 %v12864_v0 }
 0xa40   :  { %12387 = vmatpush3.bf16.msra.mxu1 %v12864_v0 }
 0xa41   :  { %12388 = vmatprep.subr.bf16.mxu1 %v12865_v27 }
 0xa44   :  { %v9560_v43 = vpop.f32.mrb[252].mxu0  ;;  %12389 = vmatpush3.bf16.msra.mxu1 %v12865_v27 }
 0xa45   :  { %v9562_v24 = vpop.f32.mrb[253].mxu0  ;;  %12390 = vmatprep.subr.bf16.mxu1 %v12866_v37 }
 0xa46   :  { %v9564_v48 = vpop.f32.mrb[254].mxu0 }
 0xa47   :  { %v9612_v29 = vpack.c.bf16 %v9564_v48, %v9560_v43  ;;  %v9566_v40 = vpop.f32.mrb[255].mxu0 }
 0xa48   :  { %v9613_v39 = vpack.c.bf16 %v9566_v40, %v9562_v24  ;;  %12391 = vmatpush3.bf16.msra.mxu1 %v12866_v37 }
 0xa49   :  { %11997 = vmatprep.subr.bf16.mxu1 %v12868_v18  ;;  %v12900_v18 = vld [vmem:[%s20706_s15 + $0x1c0] sm:$0xff]  }
 0xa4a   :  { %10214 = vmatprep.mubr.bf16.mxu0 %v9613_v39 }
 0xa4b   :  { %10215 = vmatmul.mubr.bf16.vlgmr.msra.gmra.mrb[8].mxu0 %v9612_v29 }
 0xa4c   :  { %11970 = vmatpush3.bf16.msra.mxu0 %v12869_v50 }
 0xa4d   :  { %11971 = vmatprep.subr.bf16.mxu0 %v12871_v53 }
 0xa50   :  { %11972 = vmatpush3.bf16.msra.mxu0 %v12873_v61 }
 0xa51   :  { %11973 = vmatprep.subr.bf16.mxu0 %v12875_v19 }
 0xa54   :  { %11974 = vmatpush3.bf16.msra.mxu0 %v12877_v33 }
 0xa55   :  { %11975 = vmatprep.subr.bf16.mxu0 %v12879_v58 }
 0xa56   :  { %v9734_v17 = vpop.f32.mrb[0].mxu0 }
 0xa57   :  { %v9736_v46 = vpop.f32.mrb[1].mxu0 }
 0xa58   :  { %v9738_v30 = vpop.f32.mrb[2].mxu0  ;;  %11976 = vmatpush3.bf16.msra.mxu0 %v12881_v13 }
 0xa59   :  { %v9827_v1 = vpack.c.bf16 %v9738_v30, %v9734_v17  ;;  %v9740_v60 = vpop.f32.mrb[3].mxu0  ;;  %11977 = vmatprep.subr.bf16.mxu0 %v12883_v41 }
 0xa5a   :  { %v9828_v56 = vpack.c.bf16 %v9740_v60, %v9736_v46 }
 0xa5c   :  { %10173 = vmatprep.mubr.bf16.mxu1 %v9828_v56  ;;  %11978 = vmatpush3.bf16.msra.mxu0 %v12885_v45  ;;  %v10300_v45 = vld [vmem:[%s20707_s16] sm:$0xff] }
 0xa5d   :  { %10174 = vmatmul.mubr.bf16.gmra.mrb[168].mxu1 %v9827_v1  ;;  %11979 = vmatprep.subr.bf16.mxu0 %v12887_v49  ;;  %v10301_v49 = vld [vmem:[%s20707_s16 + $0x8] sm:$0xff] }
 0xa5e   :  { %12392 = vmatprep.mubr.msk.bf16.mxu1 %vm1894_vm10, %v9614_v9  ;;  %v12896_v9 = vld [vmem:[%s20706_s15 + $0xf8] sm:$0xff]  }
 0xa60   :  { %11980 = vmatpush3.bf16.msra.mxu0 %v12889_v15  ;;  %v10308_v15 = vld [vmem:[%s20707_s16 + $0x40] sm:$0xff] }
 0xa61   :  { %11981 = vmatprep.subr.bf16.mxu0 %v12891_v25  ;;  %v10309_v25 = vld [vmem:[%s20707_s16 + $0x48] sm:$0xff] }
 0xa62   :  { %v9777_v28 = vpop.f32.mrb[160].mxu1 }
 0xa63   :  { %v9779_v4 = vpop.f32.mrb[161].mxu1 }
 0xa64   :  { %v9781_v10 = vpop.f32.mrb[162].mxu1  ;;  %11982 = vmatpush3.bf16.msra.mxu0 %v12893_v32 }
 0xa65   :  { %v9829_v5 = vpack.c.bf16 %v9781_v10, %v9777_v28  ;;  %v9783_v59 = vpop.f32.mrb[163].mxu1  ;;  %11983 = vmatprep.subr.bf16.mxu0 %v12895_v6  ;;  %v12898_v10 = vld [vmem:[%s20706_s15 + $0xb8] sm:$0xff]  }
 0xa66   :  { %v9830_v7 = vpack.c.bf16 %v9783_v59, %v9779_v4  ;;  %v9820_v2 = vpop.f32.mrb[4].mxu0  ;;  %v12897_v4 = vld [vmem:[%s20706_s15 + $0x38] sm:$0xff]  }
 0xa67   :  { %v12382_v11 = vpop.f32.mrb[5].mxu0 }
 0xa68   :  { %v9823_v42 = vpop.f32.mrb[6].mxu0  ;;  %10222 = vmatprep.mubr.bf16.mxu0 %v9830_v7  ;;  %11984 = vmatpush3.bf16.msra.mxu0 %v12897_v4  ;;  %v12907_v4 = vld [vmem:[%s20706_s15 + $0x150] sm:$0xff]  }
 0xa69   :  { %v9831_v44 = vpack.c.bf16 %v9823_v42, %v9820_v2  ;;  %10223 = vmatmul.mubr.bf16.gmra.mrb[12].mxu0 %v9829_v5  ;;  %v12383_v57 = vpop.f32.mrb[7].mxu0 }
 0xa6b   :  { %12393 = vmatmul.mubr.msk.bf16.vlgmr.msra.gmra.mrb[172].mxu1 %vm1894_vm10, %v9831_v44  ;;  %v12899_v44 = vld [vmem:[%s20706_s15 + $0x140] sm:$0xff]  }
 0xa6c   :  { %11998 = vmatpush3.bf16.msra.mxu1 %v12870_v21  ;;  %12025 = vmatprep.subr.bf16.mxu0 %v12899_v44 }
 0xa6d   :  { %11999 = vmatprep.subr.bf16.mxu1 %v12872_v22 }
 0xa70   :  { %12000 = vmatpush3.bf16.msra.mxu1 %v12874_v35 }
 0xa71   :  { %12001 = vmatprep.subr.bf16.mxu1 %v12876_v51 }
 0xa74   :  { %12002 = vmatpush3.bf16.msra.mxu1 %v12878_v63 }
 0xa75   :  { %12003 = vmatprep.subr.bf16.mxu1 %v12880_v36 }
 0xa78   :  { %12004 = vmatpush3.bf16.msra.mxu1 %v12882_v12 }
 0xa79   :  { %12005 = vmatprep.subr.bf16.mxu1 %v12884_v52 }
 0xa7c   :  { %12006 = vmatpush3.bf16.msra.mxu1 %v12886_v23  ;;  %v10304_v23 = vld [vmem:[%s20707_s16 + $0x20] sm:$0xff] }
 0xa7d   :  { %12007 = vmatprep.subr.bf16.mxu1 %v12888_v38  ;;  %v10305_v38 = vld [vmem:[%s20707_s16 + $0x28] sm:$0xff]  ;;  %v11568_v32 = vcombine.low %v10300_v45, %v10304_v23 }
 0xa7e   :  { %v11570_v6 = vcombine.low %v10301_v49, %v10305_v38 }
 0xa80   :  { %12008 = vmatpush3.bf16.msra.mxu1 %v12890_v34  ;;  %v10312_v34 = vld [vmem:[%s20707_s16 + $0x60] sm:$0xff] }
 0xa81   :  { %12009 = vmatprep.subr.bf16.mxu1 %v12892_v31  ;;  %v10313_v31 = vld [vmem:[%s20707_s16 + $0x68] sm:$0xff] }
 0xa84   :  { %12010 = vmatpush3.bf16.msra.mxu1 %v12894_v54  ;;  %v11569_v54 = vcombine.high %v10300_v45, %v10304_v23  ;;  %v12928_v45 = vld [vmem:[%s20706_s15 + $0x1f8] sm:$0xff]   ;;  %v10310_v23 = vld [vmem:[%s20707_s16 + $0x50] sm:$0xff] }
 0xa85   :  { %12011 = vmatprep.subr.bf16.mxu1 %v12896_v9  ;;  %v11571_v9 = vcombine.high %v10301_v49, %v10305_v38  ;;  %v10314_v49 = vld [vmem:[%s20707_s16 + $0x70] sm:$0xff]  ;;  %v10311_v38 = vld [vmem:[%s20707_s16 + $0x58] sm:$0xff] }
 0xa88   :  { %12012 = vmatpush3.bf16.msra.mxu1 %v12898_v10  ;;  %v12908_v10 = vld [vmem:[%s20706_s15 + $0x1d0] sm:$0xff]  }
 0xa89   :  { %12053 = vmatprep.subr.bf16.mxu1 %v12900_v18 }
 0xb0e   :  { %v11923_v16 = vpop.f32.mrb[164].mxu1 }
 0xb0f   :  { %v11924_v20 = vpop.f32.mrb[165].mxu1 }
 0xb10   :  { %v11925_v8 = vadd.f32 %v11924_v20, %v11923_v16  ;;  %v11926_v47 = vpop.f32.mrb[166].mxu1  ;;  %v11577_v20 = vcombine.high %v10308_v15, %v10312_v34 }
 0xb11   :  { %v11927_v55 = vpop.f32.mrb[167].mxu1 }
 0xb12   :  { %v11928_v14 = vadd.f32 %v11927_v55, %v11926_v47  ;;  %v10168_v37 = vadd.f32 %v11925_v8, %v11529_v26  ;;  %v11579_v8 = vcombine.high %v10309_v25, %v10313_v31 }
 0xb14   :  { %v10171_v29 = vadd.f32 %v11928_v14, %v11529_v26 }
 0xb1e   :  { %v11951_v0 = vpop.f32.mrb[8].mxu0 }
 0xb1f   :  { %v11952_v27 = vpop.f32.mrb[9].mxu0 }
 0xb20   :  { %v11953_v43 = vadd.f32 %v11952_v27, %v11951_v0  ;;  %v11954_v24 = vpop.f32.mrb[10].mxu0 }
 0xb21   :  { %v11955_v48 = vpop.f32.mrb[11].mxu0 }
 0xb22   :  { %v11956_v40 = vadd.f32 %v11955_v48, %v11954_v24  ;;  %v10217_v39 = vadd.f32 %v11953_v43, %v10168_v37  ;;  %v12901_v37 = vld [vmem:[%s20706_s15 + $0x100] sm:$0xff]  }
 0xb23   :  { %v12902_v43 = vld [vmem:[%s20706_s15 + $0x180] sm:$0xff]  }
 0xb24   :  { %v10220_v17 = vadd.f32 %v11956_v40, %v10171_v29  ;;  %v12903_v40 = vld [vmem:[%s20706_s15 + $0x148] sm:$0xff]  }
 0xb30   :  { %v11929_v46 = vpop.f32.mrb[168].mxu1 }
 0xb31   :  { %v11930_v30 = vpop.f32.mrb[169].mxu1 }
 0xb32   :  { %v11931_v1 = vadd.f32 %v11930_v30, %v11929_v46  ;;  %v11932_v60 = vpop.f32.mrb[170].mxu1  ;;  %v12906_v46 = vld [vmem:[%s20706_s15 + $0x188] sm:$0xff]   ;;  %v20549_v30 = vld [vmem:[%s20707_s16 + $0x10] sm:$0xff] }
 0xb33   :  { %v11933_v56 = vpop.f32.mrb[171].mxu1 }
 0xb34   :  { %v11934_v28 = vadd.f32 %v11933_v56, %v11932_v60  ;;  %v10176_v7 = vadd.f32 %v11931_v1, %v11529_v26  ;;  %v20554_v1 = vld [vmem:[%s20707_s16 + $0x30] sm:$0xff]  ;;  %v20559_v60 = vld [vmem:[%s20707_s16 + $0x18] sm:$0xff] }
 0xb35   :  { %v20564_v56 = vld [vmem:[%s20707_s16 + $0x38] sm:$0xff] }
 0xb36   :  { %v10179_v50 = vadd.f32 %v11934_v28, %v11529_v26  ;;  %v11576_v28 = vcombine.low %v10308_v15, %v10312_v34  ;;  %v10315_v15 = vld [vmem:[%s20707_s16 + $0x78] sm:$0xff] }
 0xb37   :  { %v12929_v34 = vld [vmem:[%s20706_s15 + $0x138] sm:$0xff]  }
 0xb3c   :  { %v11957_v5 = vpop.f32.mrb[12].mxu0 }
 0xb3d   :  { %v11958_v59 = vpop.f32.mrb[13].mxu0 }
 0xb3e   :  { %v11959_v2 = vadd.f32 %v11958_v59, %v11957_v5  ;;  %v11960_v11 = vpop.f32.mrb[14].mxu0  ;;  %v12394_v42 = vpop.f32.mrb[172].mxu1  ;;  %v11578_v5 = vcombine.low %v10309_v25, %v10313_v31  ;;  %v11573_v59 = vcombine.high %v20549_v30, %v20554_v1  ;;  %v12930_v25 = vld [vmem:[%s20706_s15 + $0x1b8] sm:$0xff]   ;;  %v11572_v31 = vcombine.low %v20549_v30, %v20554_v1 }
 0xb3f   :  { %v11961_v57 = vpop.f32.mrb[15].mxu0  ;;  %v10265_v3 = vpop.f32.mrb[173].mxu1 }
 0xb40   :  { %v10225_v21 = vadd.f32 %v11959_v2, %v10176_v7  ;;  %v11962_v53 = vadd.f32 %v11961_v57, %v11960_v11  ;;  %v10266_v22 = vadd.f32 %v10265_v3, %v10217_v39  ;;  %v12395_v61 = vpop.f32.mrb[174].mxu1  ;;  %v12904_v39 = vld [vmem:[%s20706_s15 + $0x1c8] sm:$0xff]   ;;  %v11575_v7 = vcombine.high %v20559_v60, %v20564_v56  ;;  %v12909_v2 = vld [vmem:[%s20706_s15 + $0x110] sm:$0xff]   ;;  %v12911_v57 = vld [vmem:[%s20706_s15 + $0x158] sm:$0xff]  }
 0xb41   :  { %v10268_v35 = vpop.f32.mrb[175].mxu1  ;;  %v12910_v11 = vld [vmem:[%s20706_s15 + $0x190] sm:$0xff]   ;;  %v12912_v3 = vld [vmem:[%s20706_s15 + $0x1d8] sm:$0xff]  }
 0xb42   :  { %v10274_v19 = vadd.f32 %v12394_v42, %v10225_v21  ;;  %v10228_v51 = vadd.f32 %v11962_v53, %v10179_v50  ;;  %v10269_v33 = vadd.f32 %v10268_v35, %v10220_v17  ;;  %v10280_v63 = vmax.f32 %v10266_v22, 0.0  ;;  %v12905_v17 = vld [vmem:[%s20706_s15 + $0x108] sm:$0xff]   ;;  %v12913_v21 = vld [vmem:[%s20706_s15 + $0x118] sm:$0xff]   ;;  %v12915_v22 = vld [vmem:[%s20706_s15 + $0x160] sm:$0xff]  }
 0xb43   :  { %v12914_v53 = vld [vmem:[%s20706_s15 + $0x198] sm:$0xff]   ;;  %v12917_v35 = vld [vmem:[%s20706_s15 + $0x120] sm:$0xff]  }
 0xb44   :  { %v10277_v58 = vadd.f32 %v12395_v61, %v10228_v51  ;;  %v10281_v36 = vmax.f32 %v10269_v33, 0.0  ;;  %v10282_v13 = vmax.f32 %v10274_v19, 0.0  ;;  %v12916_v61 = vld [vmem:[%s20706_s15 + $0x1e0] sm:$0xff]   ;;  %v12919_v51 = vld [vmem:[%s20706_s15 + $0x168] sm:$0xff]  }
 0xb45   :  { %v12918_v19 = vld [vmem:[%s20706_s15 + $0x1a0] sm:$0xff]   ;;  %v12920_v33 = vld [vmem:[%s20706_s15 + $0x1e8] sm:$0xff]  }
 0xb46   :  { %v10283_v12 = vmax.f32 %v10277_v58, 0.0  ;;  %v10284_v41 = vpack.c.bf16 %v10281_v36, %v10280_v63  ;;  %v12921_v63 = vld [vmem:[%s20706_s15 + $0x128] sm:$0xff]   ;;  %v12923_v36 = vld [vmem:[%s20706_s15 + $0x170] sm:$0xff]  }
 0xb47   :  { %v12922_v58 = vld [vmem:[%s20706_s15 + $0x1a8] sm:$0xff]  }
 0xb48   :  { %v10285_v52 = vpack.c.bf16 %v10283_v12, %v10282_v13  ;;  %10288 = vrot.lane.b32.xlu1 %v10284_v41, %s12999_s2  ;;  %v12924_v13 = vld [vmem:[%s20706_s15 + $0x1f0] sm:$0xff]  }
 0xb49   :  { %v12925_v12 = vld [vmem:[%s20706_s15 + $0x130] sm:$0xff]  }
 0xb4a   :  { %10290 = vrot.lane.b32.xlu0 %v10285_v52, %s12999_s2 }
 0xbba   :  { %v10289_v16 = vpop.permute.xlu1 %10288 }
 0xbbb   :  { %v20517_v47 = vsel %vm1894_vm10, %v10284_v41, %v10289_v16  ;;  %v12926_v41 = vld [vmem:[%s20706_s15 + $0x1b0] sm:$0xff]  }
 0xbbc   :  { %v10291_v55 = vpop.permute.xlu0 %10290  ;;  %v10396_v14 = vmul.bf16 %v11568_v32, %v20517_v47  ;;  %v10397_v26 = vmul.bf16 %v11569_v54, %v20517_v47  ;;  %v10399_v0 = vmul.bf16 %v11571_v9, %v20517_v47  ;;  %v10398_v27 = vmul.bf16 %v11570_v6, %v20517_v47 }
 0xbbd   :  { %v20530_v24 = vsel %vm1894_vm10, %v10285_v52, %v10291_v55  ;;  %v10401_v18 = vmul.bf16 %v11573_v59, %v20517_v47  ;;  %v10403_v50 = vmul.bf16 %v11575_v7, %v20517_v47  ;;  %v12927_v52 = vld [vmem:[%s20706_s15 + $0x178] sm:$0xff]   ;;  %v11574_v32 = vcombine.low %v20559_v60, %v20564_v56 }
 0xbbe   :  { %10956 = vmatprep.mubr.bf16.mxu0 %v10397_v26  ;;  %11005 = vmatprep.mubr.bf16.mxu1 %v10399_v0  ;;  %v10405_v48 = vmul.bf16 %v11577_v20, %v20530_v24  ;;  %v10407_v29 = vmul.bf16 %v11579_v8, %v20530_v24  ;;  %v10404_v42 = vmul.bf16 %v11576_v28, %v20530_v24  ;;  %v21750_v20 = vmov 0.0|0.0  }
 0xbbf   :  { %10957 = vmatmul.mubr.bf16.vlgmr.msra.gmra.mrb[16].mxu0 %v10396_v14  ;;  %11006 = vmatmul.mubr.bf16.vlgmr.msra.gmra.mrb[176].mxu1 %v10398_v27  ;;  %v10406_v44 = vmul.bf16 %v11578_v5, %v20530_v24  ;;  %v11581_v54 = vcombine.high %v10310_v23, %v10314_v49  ;;  %v11583_v6 = vcombine.high %v10311_v38, %v10315_v15 }
 0xbc0   :  { %12026 = vmatpush3.bf16.msra.mxu0 %v12901_v37  ;;  %12054 = vmatpush3.bf16.msra.mxu1 %v12902_v43  ;;  %v10400_v9 = vmul.bf16 %v11572_v31, %v20517_v47  ;;  %v10402_v16 = vmul.bf16 %v11574_v32, %v20517_v47  ;;  %v11580_v14 = vcombine.low %v10310_v23, %v10314_v49 }
 0xbc1   :  { %10964 = vmatprep.mubr.bf16.mxu0 %v10405_v48  ;;  %11013 = vmatprep.mubr.bf16.mxu1 %v10407_v29  ;;  %v10409_v8 = vmul.bf16 %v11581_v54, %v20530_v24  ;;  %v10411_v55 = vmul.bf16 %v11583_v6, %v20530_v24  ;;  %v11582_v26 = vcombine.low %v10311_v38, %v10315_v15 }
 0xbc2   :  { %12027 = vmatprep.subr.bf16.mxu0 %v12903_v40  ;;  %12055 = vmatprep.subr.bf16.mxu1 %v12904_v39  ;;  %v10408_v0 = vmul.bf16 %v11580_v14, %v20530_v24 }
 0xbc3   :  { %v10410_v27 = vmul.bf16 %v11582_v26, %v20530_v24 }
 0xbc4   :  { %12028 = vmatpush3.bf16.msra.mxu0 %v12905_v17  ;;  %12056 = vmatpush3.bf16.msra.mxu1 %v12906_v46 }
 0xbc5   :  { %12029 = vmatprep.subr.bf16.mxu0 %v12907_v4  ;;  %12057 = vmatprep.subr.bf16.mxu1 %v12908_v10 }
 0xbc7   :  { %10965 = vmatmul.mubr.bf16.gmra.mrb[20].mxu0 %v10404_v42  ;;  %11014 = vmatmul.mubr.bf16.gmra.mrb[180].mxu1 %v10406_v44 }
 0xbc8   :  { %12030 = vmatpush3.bf16.msra.mxu0 %v12909_v2  ;;  %12058 = vmatpush3.bf16.msra.mxu1 %v12910_v11 }
 0xbc9   :  { %11054 = vmatprep.mubr.bf16.mxu0 %v10401_v18  ;;  %11103 = vmatprep.mubr.bf16.mxu1 %v10403_v50 }
 0xbca   :  { %12031 = vmatprep.subr.bf16.mxu0 %v12911_v57  ;;  %12059 = vmatprep.subr.bf16.mxu1 %v12912_v3 }
 0xbcc   :  { %12032 = vmatpush3.bf16.msra.mxu0 %v12913_v21  ;;  %12060 = vmatpush3.bf16.msra.mxu1 %v12914_v53 }
 0xbcd   :  { %12033 = vmatprep.subr.bf16.mxu0 %v12915_v22  ;;  %12061 = vmatprep.subr.bf16.mxu1 %v12916_v61 }
 0xbd0   :  { %12034 = vmatpush3.bf16.msra.mxu0 %v12917_v35  ;;  %12062 = vmatpush3.bf16.msra.mxu1 %v12918_v19 }
 0xbd1   :  { %12035 = vmatprep.subr.bf16.mxu0 %v12919_v51  ;;  %12063 = vmatprep.subr.bf16.mxu1 %v12920_v33 }
 0xbd4   :  { %12036 = vmatpush3.bf16.msra.mxu0 %v12921_v63  ;;  %12064 = vmatpush3.bf16.msra.mxu1 %v12922_v58 }
 0xbd5   :  { %12037 = vmatprep.subr.bf16.mxu0 %v12923_v36  ;;  %12065 = vmatprep.subr.bf16.mxu1 %v12924_v13 }
 0xbd8   :  { %12038 = vmatpush3.bf16.msra.mxu0 %v12925_v12  ;;  %12066 = vmatpush3.bf16.msra.mxu1 %v12926_v41 }
 0xbd9   :  { %12039 = vmatprep.subr.bf16.mxu0 %v12927_v52  ;;  %12067 = vmatprep.subr.bf16.mxu1 %v12928_v45 }
 0xbdc   :  { %12040 = vmatpush3.bf16.msra.mxu0 %v12929_v34  ;;  %12068 = vmatpush3.bf16.msra.mxu1 %v12930_v25 }
 0xbdd   :  { %12407 = vmatprep.subr.bf16.mxu0 %v21750_v20 }
 0xbdf   :  { %11055 = vmatmul.mubr.bf16.vlgmr.msra.gmra.mrb[24].mxu0 %v10400_v9  ;;  %11104 = vmatmul.mubr.bf16.vlgmr.msra.gmra.mrb[184].mxu1 %v10402_v16 }
 0xbe0   :  { %11062 = vmatprep.mubr.bf16.mxu0 %v10409_v8  ;;  %11111 = vmatprep.mubr.bf16.mxu1 %v10411_v55 }
 0xbe7   :  { %11063 = vmatmul.mubr.bf16.gmra.mrb[28].mxu0 %v10408_v0  ;;  %11112 = vmatmul.mubr.bf16.gmra.mrb[188].mxu1 %v10410_v27  ;;  %v11120_v27 = vld [vmem:[%s20708_s17] sm:$0x3] }
 0xbe8   :  { %12404 = vmatprep.mubr.msk.f32.mxu0 %vm12995_vm2, %v21747_v62 }
 0xc92   :  { %v11985_v47 = vpop.f32.mrb[16].mxu0  ;;  %v12013_v37 = vpop.f32.mrb[176].mxu1 }
 0xc93   :  { %v11986_v43 = vpop.f32.mrb[17].mxu0  ;;  %v12014_v48 = vpop.f32.mrb[177].mxu1 }
 0xc94   :  { %v11987_v29 = vadd.f32 %v11986_v43, %v11985_v47  ;;  %v12015_v40 = vadd.f32 %v12014_v48, %v12013_v37  ;;  %v11988_v39 = vpop.f32.mrb[18].mxu0  ;;  %v12016_v17 = vpop.f32.mrb[178].mxu1  ;;  %v11648_v47 = vld [vmem:[%s20709_s18] ss:$0 sm:$0xff] }
 0xc95   :  { %v11989_v46 = vpop.f32.mrb[19].mxu0  ;;  %v12017_v30 = vpop.f32.mrb[179].mxu1 }
 0xc96   :  { %v11008_v1 = vadd.f32 %v12015_v40, %v11987_v29  ;;  %v11990_v60 = vadd.f32 %v11989_v46, %v11988_v39  ;;  %v12018_v56 = vadd.f32 %v12017_v30, %v12016_v17 }
 0xc98   :  { %v11011_v28 = vadd.f32 %v12018_v56, %v11990_v60 }
 0xc9a   :  { %v11991_v24 = vpop.f32.mrb[20].mxu0  ;;  %v12019_v4 = vpop.f32.mrb[180].mxu1 }
 0xc9b   :  { %v11992_v10 = vpop.f32.mrb[21].mxu0  ;;  %v12020_v5 = vpop.f32.mrb[181].mxu1 }
 0xc9c   :  { %v11993_v59 = vadd.f32 %v11992_v10, %v11991_v24  ;;  %v12021_v62 = vadd.f32 %v12020_v5, %v12019_v4  ;;  %v11994_v7 = vpop.f32.mrb[22].mxu0  ;;  %v12022_v2 = vpop.f32.mrb[182].mxu1 }
 0xc9d   :  { %v11995_v11 = vpop.f32.mrb[23].mxu0  ;;  %v12023_v42 = vpop.f32.mrb[183].mxu1 }
 0xc9e   :  { %v11016_v44 = vadd.f32 %v12021_v62, %v11993_v59  ;;  %v11996_v57 = vadd.f32 %v11995_v11, %v11994_v7  ;;  %v12024_v3 = vadd.f32 %v12023_v42, %v12022_v2 }
 0xca0   :  { %v11019_v18 = vadd.f32 %v12024_v3, %v11996_v57 }
 0xcb2   :  { %v12041_v50 = vpop.f32.mrb[24].mxu0  ;;  %v12069_v21 = vpop.f32.mrb[184].mxu1 }
 0xcb3   :  { %v12042_v53 = vpop.f32.mrb[25].mxu0  ;;  %v12070_v22 = vpop.f32.mrb[185].mxu1 }
 0xcb4   :  { %v12043_v61 = vadd.f32 %v12042_v53, %v12041_v50  ;;  %v12071_v35 = vadd.f32 %v12070_v22, %v12069_v21  ;;  %v12044_v19 = vpop.f32.mrb[26].mxu0  ;;  %v12072_v51 = vpop.f32.mrb[186].mxu1 }
 0xcb5   :  { %v12045_v33 = vpop.f32.mrb[27].mxu0  ;;  %v12073_v63 = vpop.f32.mrb[187].mxu1 }
 0xcb6   :  { %v11057_v58 = vadd.f32 %v12043_v61, %v11008_v1  ;;  %v12046_v36 = vadd.f32 %v12045_v33, %v12044_v19  ;;  %v12074_v13 = vadd.f32 %v12073_v63, %v12072_v51 }
 0xcb8   :  { %v11106_v12 = vadd.f32 %v12071_v35, %v11057_v58  ;;  %v11060_v41 = vadd.f32 %v12046_v36, %v11011_v28 }
 0xcba   :  { %v11109_v52 = vadd.f32 %v12074_v13, %v11060_v41  ;;  %v12047_v45 = vpop.f32.mrb[28].mxu0  ;;  %v12075_v23 = vpop.f32.mrb[188].mxu1 }
 0xcbb   :  { %v12048_v49 = vpop.f32.mrb[29].mxu0  ;;  %v12076_v38 = vpop.f32.mrb[189].mxu1 }
 0xcbc   :  { %v12408_v15 = vpack.c.bf16 %v11109_v52, %v11106_v12  ;;  %v12049_v34 = vadd.f32 %v12048_v49, %v12047_v45  ;;  %v12077_v25 = vadd.f32 %v12076_v38, %v12075_v23  ;;  %v12050_v31 = vpop.f32.mrb[30].mxu0  ;;  %v12078_v32 = vpop.f32.mrb[190].mxu1 }
 0xcbd   :  { %v12051_v54 = vpop.f32.mrb[31].mxu0  ;;  %v12079_v6 = vpop.f32.mrb[191].mxu1 }
 0xcbe   :  { %v11065_v9 = vadd.f32 %v12049_v34, %v11016_v44  ;;  %v12052_v16 = vadd.f32 %v12051_v54, %v12050_v31  ;;  %v12080_v8 = vadd.f32 %v12079_v6, %v12078_v32  ;;  %12409 = vmatpush3.bf16.msra.mxu0 %v12408_v15 }
 0xcbf   :  { %12410 = vmatprep.subr.bf16.mxu0 %v21750_v20 }
 0xcc0   :  { %v11114_v55 = vadd.f32 %v12077_v25, %v11065_v9  ;;  %v11068_v14 = vadd.f32 %v12052_v16, %v11019_v18 }
 0xcc2   :  { %v11117_v26 = vadd.f32 %v12080_v8, %v11068_v14 }
 0xcc4   :  { %v12411_v0 = vpack.c.bf16 %v11117_v26, %v11114_v55 }
 0xcc6   :  { %12412 = vmatpush3.bf16.msra.mxu0 %v12411_v0 }
 0xcc9   :  { %12405 = vmatmul.mubr.msk.f32.vlgmr.msra.gmra.mrb[32].mxu0 %vm1841_vm9, %v11120_v27 }
 0xd9c   :  { %v11197_v37 = vpop.f32.mrb[32].mxu0 }
 0xd9d   :  { %v11198_v43 = vadd.f32 %v11648_v47, %v11197_v37  ;;  %v12406_v20 = vpop.f32.mrb[33].mxu0 }
 0xd9f   :  { %11201 = vst [vmem:[#allocation2] sm:$0x3] %v11198_v43 }
 0xda0   :  { %12980 = shalt.err (!%p12977_p4)
}
 0xda1   :  { %s12981_s13 = scalar_lea.hbm %s20710_s19, 32 }
 0xda2   :  { %p12982_p5 = scmp.ne.s32.totalorder %s20710_s19, %s12981_s13  ;;  %p12985_p6 = scmp.lt.u32.totalorder %s12981_s13, %s20710_s19 }
 0xda4   :  { %p12987_p7 = pnand %p12985_p6, %p12982_p5 }
 0xda6   :  { %12990 = shalt.err (!%p12987_p7)
}
 0xda7   :  { %11211 = dma.vmem_to_hbm [thread:$0]  %s11209_s22, 32, %s20710_s19, [#allocation3]  }
 0xda8   :  { %12991 = dma.done.wait [#allocation3], 32  }
 0xda9   :  { %12992 = vsyncadd [#allocation3], 4294967264 }
 0xdaa   :  { %11215 = vsyncpa [#allocation3], 1 }

</bundles_post_ra>
